<compile_context>
chip_gen: v7x
topology: tpu7x:2x2x1
jax: 0.10.0
libtpu: 0.0.40
codegen_flags: <defaults>
</compile_context>

<pallas_src>
import functools

import jax
import jax.numpy as jnp
from jax import lax
from jax.experimental import pallas as pl
from jax.experimental.pallas import tpu as pltpu


def _resblock_kernel(xp_ref, w1_ref, w2_ref, s1_ref, b1_ref, s2_ref, b2_ref,
                     o_ref, *, valid_w):
    """One batch-block per grid step.

    xp_ref : (Nb, Hp, Wp, C) f32  spatially zero-padded input (NHWC)
    w*_ref : (3, 3C, C)      bf16 conv weights, (ky, kx*Cin+ci, co) layout
    s*_ref : (1, C)          f32  folded BN scale  (gamma / sqrt(var+eps))
    b*_ref : (1, C)          f32  folded BN shift  (beta - mean*scale)
    o_ref  : (Nb, Hp, Wp, C)      padded output block (halo rows written as 0)
    """
    Nb, Hp, Wp, C = xp_ref.shape
    H = Hp - 2
    M = Nb * Hp * Wp

    # Flat padded activation: row index = (b * Hp + p) * Wp + q.  Wp is a
    # multiple of 8, so this reshape is layout-preserving (no repacking).
    x_flat = xp_ref[...].reshape(M, C)                      # (M, C) f32

    # Interior mask (1.0 on the valid HxW window, 0.0 on halo/padding rows),
    # rebuilt in-kernel from 2D iotas -- no (M, 1) HBM stream.
    r2 = lax.broadcasted_iota(jnp.int32, (Hp, Wp), 0)
    c2 = lax.broadcasted_iota(jnp.int32, (Hp, Wp), 1)
    mask = ((r2 >= 1) & (r2 <= H) &
            (c2 >= 1) & (c2 <= valid_w)).astype(jnp.float32)
    mask4 = mask[None, :, :, None]                          # (1, Hp, Wp, 1)

    def apply_mask(a_flat):
        # Zero halo / padding rows (broadcast over batch block and channels).
        return (a_flat.reshape(Nb, Hp, Wp, C) * mask4).reshape(M, C)

    def conv3x3(act_f32, w_ref):
        # 3x3 "same" conv on the flat (M, C) view.  A flat-row shift of
        # s = dy*Wp + dx realizes the (dy, dx) spatial offset; circular wrap
        # only corrupts halo rows, which are masked downstream.
        a_m = pltpu.roll(act_f32, shift=1, axis=0)          # x[r-1]  (kx = -1)
        a_p = pltpu.roll(act_f32, shift=M - 1, axis=0)      # x[r+1]  (kx = +1)
        # Cast each shifted copy exactly once (hoisted out of the tap loop)
        # and fuse the kx taps along the contraction dim.
        xa = jnp.concatenate(
            [a_m.astype(jnp.bfloat16),
             act_f32.astype(jnp.bfloat16),
             a_p.astype(jnp.bfloat16)], axis=-1)            # (M, 3C) bf16
        p0 = jnp.dot(xa, w_ref[0], preferred_element_type=jnp.float32)
        p1 = jnp.dot(xa, w_ref[1], preferred_element_type=jnp.float32)
        p2 = jnp.dot(xa, w_ref[2], preferred_element_type=jnp.float32)
        # Align the per-kernel-row partials along the ky offset (f32 rolls,
        # sublane-aligned shifts of +/- Wp).
        return (pltpu.roll(p0, shift=Wp, axis=0) + p1 +
                pltpu.roll(p2, shift=M - Wp, axis=0))       # (M, C) f32

    # conv1 -> BN1 (f32 scale/shift) -> ReLU; mask so conv2 sees zero halos.
    h = conv3x3(x_flat, w1_ref)
    h = apply_mask(jnp.maximum(h * s1_ref[...] + b1_ref[...], 0.0))

    # conv2 -> BN2 -> residual add -> ReLU.
    y = conv3x3(h, w2_ref)
    y = jnp.maximum(y * s2_ref[...] + b2_ref[...] + x_flat, 0.0)

    # Mask the halo and store the full padded block: lane/sublane-dense,
    # unmasked vector stores; the slab is a valid zero-padded NHWC activation
    # directly reusable by the next ResBlock in a tower.
    y4 = y.reshape(Nb, Hp, Wp, C) * mask4
    o_ref[...] = y4.astype(o_ref.dtype)


def _vmem_footprint_bytes(nb, hp, wp, c):
    """Rough per-grid-step VMEM footprint for batch block `nb`."""
    m = nb * hp * wp
    act_blk = m * c * 4                        # one f32 activation block
    io = 2 * act_blk + 2 * act_blk             # double-buffered input + output
    wts = 2 * (2 * 3 * (3 * c) * c * 2)        # two bf16 weight sets, x2 buffers
    inter = (3 * m * c * 2                     # three bf16 shifted copies
             + m * 3 * c * 2                   # (M, 3C) concat operand
             + 3 * m * c * 4                   # f32 per-row partials
             + 2 * m * c * 4)                  # h / y f32 intermediates
    return io + wts + inter


def _tpu_budget_bytes():
    """(vmem budget bytes, tensorcores per chip) with conservative fallbacks."""
    vmem_cap = 64 * 1024 * 1024                # conservative floor (v7x)
    num_cores = 1                              # v5e / v6e have one TensorCore
    try:
        info = pltpu.get_tpu_info()
        vmem_cap = int(getattr(info, "vmem_capacity_bytes", vmem_cap))
        num_cores = int(getattr(info, "num_cores", num_cores))
    except Exception:
        pass
    return (3 * vmem_cap) // 4, num_cores      # ~75% of capacity as the budget


def _choose_batch_block(n, hp, wp, c, budget, num_cores):
    divisors = [d for d in range(n, 0, -1) if n % d == 0]
    feasible = [d for d in divisors
                if _vmem_footprint_bytes(d, hp, wp, c) <= budget]
    if not feasible:
        return 1
    if num_cores >= 2:
        # Only multi-TensorCore chips benefit from keeping the grid >= #cores.
        multi = [d for d in feasible if n // d >= num_cores]
        if multi:
            return max(multi)
    return max(feasible)


def resblock_forward_padded(xp, w1_oihw, w2_oihw,
                            g1, be1, m1, v1, g2, be2, m2, v2,
                            *, valid_w, eps=1e-5, block_n=None):
    """Padded-slab entry point: xp is (N, H+2, Wp, C) f32 zero-padded NHWC
    (Wp % 8 == 0, Wp >= valid_w + 2).  Returns the same padded layout with a
    zero halo, so a residual tower can chain blocks without pad/crop."""
    N, Hp, Wp, C = xp.shape
    W = valid_w

    # Eval-mode BN folding: y = scale*conv(x) + shift (scale/shift stay f32).
    s1 = (g1 * lax.rsqrt(v1 + eps)).astype(jnp.float32)
    s2 = (g2 * lax.rsqrt(v2 + eps)).astype(jnp.float32)
    b1 = (be1 - m1 * s1).reshape(1, C).astype(jnp.float32)
    b2 = (be2 - m2 * s2).reshape(1, C).astype(jnp.float32)
    s1 = s1.reshape(1, C)
    s2 = s2.reshape(1, C)

    def pack_w(w):
        # OIHW (Cout, Cin, kh, kw) -> (ky, kx*Cin + ci, co); kx-major rows
        # match the in-kernel [x[r-1], x[r], x[r+1]] lane concatenation.
        return (jnp.transpose(w, (2, 3, 1, 0))
                .reshape(3, 3 * C, C).astype(jnp.bfloat16))

    w1 = pack_w(w1_oihw)
    w2 = pack_w(w2_oihw)

    budget, num_cores = _tpu_budget_bytes()
    Nb = (_choose_batch_block(N, Hp, Wp, C, budget, num_cores)
          if block_n is None else block_n)
    assert N % Nb == 0, "batch must be divisible by the batch block"

    kernel = functools.partial(_resblock_kernel, valid_w=W)

    out = pl.pallas_call(
        kernel,
        out_shape=jax.ShapeDtypeStruct((N, Hp, Wp, C), jnp.float32),
        grid_spec=pltpu.PrefetchScalarGridSpec(
            num_scalar_prefetch=0,
            grid=(N // Nb,),
            in_specs=[
                pl.BlockSpec((Nb, Hp, Wp, C), lambda n: (n, 0, 0, 0)),
                pl.BlockSpec((3, 3 * C, C), lambda n: (0, 0, 0)),
                pl.BlockSpec((3, 3 * C, C), lambda n: (0, 0, 0)),
                pl.BlockSpec((1, C), lambda n: (0, 0)),
                pl.BlockSpec((1, C), lambda n: (0, 0)),
                pl.BlockSpec((1, C), lambda n: (0, 0)),
                pl.BlockSpec((1, C), lambda n: (0, 0)),
            ],
            out_specs=pl.BlockSpec((Nb, Hp, Wp, C), lambda n: (n, 0, 0, 0)),
        ),
        compiler_params=pltpu.CompilerParams(
            dimension_semantics=("parallel",),
            vmem_limit_bytes=budget,
        ),
    )(xp, w1, w2, s1, b1, s2, b2)
    return out


def resblock_forward_nhwc(x_nhwc, w1_oihw, w2_oihw,
                          g1, be1, m1, v1, g2, be2, m2, v2,
                          *, eps=1e-5, block_n=None):
    N, H, W, C = x_nhwc.shape
    Wp = ((W + 2 + 7) // 8) * 8            # pad width to a sublane multiple
    # Zero-pad spatially once (top/left halo = 1; right padded up to Wp).
    xp = jnp.pad(x_nhwc.astype(jnp.float32),
                 ((0, 0), (1, 1), (1, Wp - W - 1), (0, 0)))
    out_p = resblock_forward_padded(xp, w1_oihw, w2_oihw,
                                    g1, be1, m1, v1, g2, be2, m2, v2,
                                    valid_w=W, eps=eps, block_n=block_n)
    # Crop once in the wrapper (a tower should keep the padded slab instead).
    return out_p[:, 1:H + 1, 1:W + 1, :].astype(x_nhwc.dtype)


@functools.partial(jax.jit, static_argnames=("block_n",))
def resblock_forward(x_nchw, w1_oihw, w2_oihw,
                     g1, be1, m1, v1, g2, be2, m2, v2, block_n=None):
    # NCHW <-> NHWC only at the module boundary; a full residual tower should
    # stay (padded) NHWC and call resblock_forward_padded directly.
    x = jnp.transpose(x_nchw, (0, 2, 3, 1))
    out = resblock_forward_nhwc(x, w1_oihw, w2_oihw,
                                g1, be1, m1, v1, g2, be2, m2, v2,
                                block_n=block_n)
    return jnp.transpose(out, (0, 3, 1, 2))


def _reference(x_nchw, w1, w2, g1, be1, m1, v1, g2, be2, m2, v2):
    eps = 1e-5
    dn = ("NCHW", "OIHW", "NCHW")

    def bn(y, g, be, m, v):
        s = g / jnp.sqrt(v + eps)
        b = be - m * s
        return y * s[None, :, None, None] + b[None, :, None, None]

    out = lax.conv_general_dilated(x_nchw, w1, (1, 1), "SAME",
                                   dimension_numbers=dn)
    out = jax.nn.relu(bn(out, g1, be1, m1, v1))
    out = lax.conv_general_dilated(out, w2, (1, 1), "SAME",
                                   dimension_numbers=dn)
    out = bn(out, g2, be2, m2, v2)
    return jax.nn.relu(out + x_nchw)


if __name__ == "__main__":
    # Small but lane-dense shapes (C multiple of 128); module default is C=256.
    N, C, H, W = 4, 128, 8, 8

    key = jax.random.PRNGKey(0)
    ks = jax.random.split(key, 11)

    x = jax.random.normal(ks[0], (N, C, H, W), jnp.float32)          # NCHW
    w1 = jax.random.normal(ks[1], (C, C, 3, 3), jnp.float32) * 0.05  # OIHW
    w2 = jax.random.normal(ks[2], (C, C, 3, 3), jnp.float32) * 0.05  # OIHW

    g1 = 1.0 + 0.1 * jax.random.normal(ks[3], (C,), jnp.float32)
    be1 = 0.1 * jax.random.normal(ks[4], (C,), jnp.float32)
    m1 = 0.1 * jax.random.normal(ks[5], (C,), jnp.float32)
    v1 = 1.0 + 0.1 * jax.random.uniform(ks[6], (C,), jnp.float32)

    g2 = 1.0 + 0.1 * jax.random.normal(ks[7], (C,), jnp.float32)
    be2 = 0.1 * jax.random.normal(ks[8], (C,), jnp.float32)
    m2 = 0.1 * jax.random.normal(ks[9], (C,), jnp.float32)
    v2 = 1.0 + 0.1 * jax.random.uniform(ks[10], (C,), jnp.float32)

    out = resblock_forward(x, w1, w2, g1, be1, m1, v1, g2, be2, m2, v2)
    out = jax.block_until_ready(out)

    ref = _reference(x, w1, w2, g1, be1, m1, v1, g2, be2, m2, v2)
    assert out.shape == (N, C, H, W) and out.dtype == jnp.float32
    max_err = jnp.max(jnp.abs(out - ref))
    # bf16 MXU operands vs. a pure-f32 reference -> loosened tolerance.
    assert jnp.allclose(out, ref, atol=5e-2, rtol=5e-2), (
        f"mismatch vs reference, max |err| = {max_err}")

    print("KERNEL_OK")
</pallas_src>

<mosaic_0001>
module attributes {stable_mosaic.version = 11 : i64} {
  func.func @_resblock_kernel(%arg0: i32, %arg1: memref<4x10x16x128xf32, #tpu.memory_space<vmem>>, %arg2: memref<3x384x128xbf16, #tpu.memory_space<vmem>>, %arg3: memref<3x384x128xbf16, #tpu.memory_space<vmem>>, %arg4: memref<1x128xf32, #tpu.memory_space<vmem>>, %arg5: memref<1x128xf32, #tpu.memory_space<vmem>>, %arg6: memref<1x128xf32, #tpu.memory_space<vmem>>, %arg7: memref<1x128xf32, #tpu.memory_space<vmem>>, %arg8: memref<4x10x16x128xf32, #tpu.memory_space<vmem>>) attributes {dimension_semantics = [#tpu.dimension_semantics<parallel>], iteration_bounds = array<i64: 1>, scalar_prefetch = 0 : i64, scratch_operands = 0 : i64, tpu.core_type = #tpu.core_type<tc>, window_params = [{transform_indices = @transform_0, window_bounds = array<i64: 4, 10, 16, 128>}, {pipeline_mode = #tpu.pipeline_mode<synchronous>, transform_indices = @transform_1, window_bounds = array<i64: 3, 384, 128>}, {pipeline_mode = #tpu.pipeline_mode<synchronous>, transform_indices = @transform_2, window_bounds = array<i64: 3, 384, 128>}, {pipeline_mode = #tpu.pipeline_mode<synchronous>, transform_indices = @transform_3, window_bounds = array<i64: 1, 128>}, {pipeline_mode = #tpu.pipeline_mode<synchronous>, transform_indices = @transform_4, window_bounds = array<i64: 1, 128>}, {pipeline_mode = #tpu.pipeline_mode<synchronous>, transform_indices = @transform_5, window_bounds = array<i64: 1, 128>}, {pipeline_mode = #tpu.pipeline_mode<synchronous>, transform_indices = @transform_6, window_bounds = array<i64: 1, 128>}, {transform_indices = @transform_7, window_bounds = array<i64: 4, 10, 16, 128>}]} {
    %c0 = arith.constant 0 : index
    %c0_0 = arith.constant 0 : index
    %c0_1 = arith.constant 0 : index
    %c0_2 = arith.constant 0 : index
    %0 = vector.load %arg1[%c0, %c0_0, %c0_1, %c0_2] : memref<4x10x16x128xf32, #tpu.memory_space<vmem>>, vector<4x10x16x128xf32>
    %1 = vector.shape_cast %0 : vector<4x10x16x128xf32> to vector<640x128xf32>
    %2 = tpu.iota {dimensions = array<i32: 0>} : vector<10x16xi32>
    %3 = tpu.iota {dimensions = array<i32: 1>} : vector<10x16xi32>
    %c1_i32 = arith.constant 1 : i32
    %4 = vector.broadcast %c1_i32 : i32 to vector<10x16xi32>
    %5 = arith.cmpi sge, %2, %4 : vector<10x16xi32>
    %c8_i32 = arith.constant 8 : i32
    %6 = vector.broadcast %c8_i32 : i32 to vector<10x16xi32>
    %7 = arith.cmpi sle, %2, %6 : vector<10x16xi32>
    %8 = arith.andi %5, %7 : vector<10x16xi1>
    %c1_i32_3 = arith.constant 1 : i32
    %9 = vector.broadcast %c1_i32_3 : i32 to vector<10x16xi32>
    %10 = arith.cmpi sge, %3, %9 : vector<10x16xi32>
    %11 = arith.andi %8, %10 : vector<10x16xi1>
    %c8_i32_4 = arith.constant 8 : i32
    %12 = vector.broadcast %c8_i32_4 : i32 to vector<10x16xi32>
    %13 = arith.cmpi sle, %3, %12 : vector<10x16xi32>
    %14 = arith.andi %11, %13 : vector<10x16xi1>
    %15 = arith.extui %14 : vector<10x16xi1> to vector<10x16xi32>
    %16 = arith.sitofp %15 : vector<10x16xi32> to vector<10x16xf32>
    %17 = vector.shape_cast %16 : vector<10x16xf32> to vector<1x10x16x1xf32>
    %c1_i32_5 = arith.constant 1 : i32
    %18 = tpu.dynamic_rotate %1 by %c1_i32_5 dim 0 : vector<640x128xf32>, i32 -> vector<640x128xf32>
    %c639_i32 = arith.constant 639 : i32
    %19 = tpu.dynamic_rotate %1 by %c639_i32 dim 0 : vector<640x128xf32>, i32 -> vector<640x128xf32>
    %20 = arith.truncf %18 : vector<640x128xf32> to vector<640x128xbf16>
    %21 = arith.truncf %1 : vector<640x128xf32> to vector<640x128xbf16>
    %22 = arith.truncf %19 : vector<640x128xf32> to vector<640x128xbf16>
    %23 = tpu.concatenate %20, %21, %22 in 1 : vector<640x128xbf16>, vector<640x128xbf16>, vector<640x128xbf16> -> vector<640x384xbf16>
    %c0_6 = arith.constant 0 : index
    %c0_7 = arith.constant 0 : index
    %c0_8 = arith.constant 0 : index
    %24 = vector.load %arg2[%c0_6, %c0_7, %c0_8] : memref<3x384x128xbf16, #tpu.memory_space<vmem>>, vector<1x384x128xbf16>
    %25 = vector.shape_cast %24 : vector<1x384x128xbf16> to vector<384x128xbf16>
    %cst = arith.constant dense<0.000000e+00> : vector<640x128xf32>
    %26 = tpu.matmul %23, %25, %cst {dimension_numbers = #tpu.dot_dimension_numbers<[1], [0], [0], [1], [0, 0, 1, 1], [], []>} : vector<640x384xbf16>, vector<384x128xbf16>, vector<640x128xf32> -> vector<640x128xf32>
    %c1 = arith.constant 1 : index
    %c0_9 = arith.constant 0 : index
    %c0_10 = arith.constant 0 : index
    %27 = vector.load %arg2[%c1, %c0_9, %c0_10] : memref<3x384x128xbf16, #tpu.memory_space<vmem>>, vector<1x384x128xbf16>
    %28 = vector.shape_cast %27 : vector<1x384x128xbf16> to vector<384x128xbf16>
    %cst_11 = arith.constant dense<0.000000e+00> : vector<640x128xf32>
    %29 = tpu.matmul %23, %28, %cst_11 {dimension_numbers = #tpu.dot_dimension_numbers<[1], [0], [0], [1], [0, 0, 1, 1], [], []>} : vector<640x384xbf16>, vector<384x128xbf16>, vector<640x128xf32> -> vector<640x128xf32>
    %c2 = arith.constant 2 : index
    %c0_12 = arith.constant 0 : index
    %c0_13 = arith.constant 0 : index
    %30 = vector.load %arg2[%c2, %c0_12, %c0_13] : memref<3x384x128xbf16, #tpu.memory_space<vmem>>, vector<1x384x128xbf16>
    %31 = vector.shape_cast %30 : vector<1x384x128xbf16> to vector<384x128xbf16>
    %cst_14 = arith.constant dense<0.000000e+00> : vector<640x128xf32>
    %32 = tpu.matmul %23, %31, %cst_14 {dimension_numbers = #tpu.dot_dimension_numbers<[1], [0], [0], [1], [0, 0, 1, 1], [], []>} : vector<640x384xbf16>, vector<384x128xbf16>, vector<640x128xf32> -> vector<640x128xf32>
    %c16_i32 = arith.constant 16 : i32
    %33 = tpu.dynamic_rotate %26 by %c16_i32 dim 0 : vector<640x128xf32>, i32 -> vector<640x128xf32>
    %34 = arith.addf %33, %29 : vector<640x128xf32>
    %c624_i32 = arith.constant 624 : i32
    %35 = tpu.dynamic_rotate %32 by %c624_i32 dim 0 : vector<640x128xf32>, i32 -> vector<640x128xf32>
    %36 = arith.addf %34, %35 : vector<640x128xf32>
    %c0_15 = arith.constant 0 : index
    %c0_16 = arith.constant 0 : index
    %37 = vector.load %arg4[%c0_15, %c0_16] : memref<1x128xf32, #tpu.memory_space<vmem>>, vector<1x128xf32>
    %38 = vector.broadcast %37 : vector<1x128xf32> to vector<640x128xf32>
    %39 = arith.mulf %36, %38 : vector<640x128xf32>
    %c0_17 = arith.constant 0 : index
    %c0_18 = arith.constant 0 : index
    %40 = vector.load %arg5[%c0_17, %c0_18] : memref<1x128xf32, #tpu.memory_space<vmem>>, vector<1x128xf32>
    %41 = vector.broadcast %40 : vector<1x128xf32> to vector<640x128xf32>
    %42 = arith.addf %39, %41 : vector<640x128xf32>
    %cst_19 = arith.constant 0.000000e+00 : f32
    %43 = vector.broadcast %cst_19 : f32 to vector<640x128xf32>
    %44 = arith.maximumf %42, %43 : vector<640x128xf32>
    %45 = vector.shape_cast %44 : vector<640x128xf32> to vector<4x10x16x128xf32>
    %46 = vector.broadcast %17 : vector<1x10x16x1xf32> to vector<4x10x16x128xf32>
    %47 = arith.mulf %45, %46 : vector<4x10x16x128xf32>
    %48 = vector.shape_cast %47 : vector<4x10x16x128xf32> to vector<640x128xf32>
    %c1_i32_20 = arith.constant 1 : i32
    %49 = tpu.dynamic_rotate %48 by %c1_i32_20 dim 0 : vector<640x128xf32>, i32 -> vector<640x128xf32>
    %c639_i32_21 = arith.constant 639 : i32
    %50 = tpu.dynamic_rotate %48 by %c639_i32_21 dim 0 : vector<640x128xf32>, i32 -> vector<640x128xf32>
    %51 = arith.truncf %49 : vector<640x128xf32> to vector<640x128xbf16>
    %52 = arith.truncf %48 : vector<640x128xf32> to vector<640x128xbf16>
    %53 = arith.truncf %50 : vector<640x128xf32> to vector<640x128xbf16>
    %54 = tpu.concatenate %51, %52, %53 in 1 : vector<640x128xbf16>, vector<640x128xbf16>, vector<640x128xbf16> -> vector<640x384xbf16>
    %c0_22 = arith.constant 0 : index
    %c0_23 = arith.constant 0 : index
    %c0_24 = arith.constant 0 : index
    %55 = vector.load %arg3[%c0_22, %c0_23, %c0_24] : memref<3x384x128xbf16, #tpu.memory_space<vmem>>, vector<1x384x128xbf16>
    %56 = vector.shape_cast %55 : vector<1x384x128xbf16> to vector<384x128xbf16>
    %cst_25 = arith.constant dense<0.000000e+00> : vector<640x128xf32>
    %57 = tpu.matmul %54, %56, %cst_25 {dimension_numbers = #tpu.dot_dimension_numbers<[1], [0], [0], [1], [0, 0, 1, 1], [], []>} : vector<640x384xbf16>, vector<384x128xbf16>, vector<640x128xf32> -> vector<640x128xf32>
    %c1_26 = arith.constant 1 : index
    %c0_27 = arith.constant 0 : index
    %c0_28 = arith.constant 0 : index
    %58 = vector.load %arg3[%c1_26, %c0_27, %c0_28] : memref<3x384x128xbf16, #tpu.memory_space<vmem>>, vector<1x384x128xbf16>
    %59 = vector.shape_cast %58 : vector<1x384x128xbf16> to vector<384x128xbf16>
    %cst_29 = arith.constant dense<0.000000e+00> : vector<640x128xf32>
    %60 = tpu.matmul %54, %59, %cst_29 {dimension_numbers = #tpu.dot_dimension_numbers<[1], [0], [0], [1], [0, 0, 1, 1], [], []>} : vector<640x384xbf16>, vector<384x128xbf16>, vector<640x128xf32> -> vector<640x128xf32>
    %c2_30 = arith.constant 2 : index
    %c0_31 = arith.constant 0 : index
    %c0_32 = arith.constant 0 : index
    %61 = vector.load %arg3[%c2_30, %c0_31, %c0_32] : memref<3x384x128xbf16, #tpu.memory_space<vmem>>, vector<1x384x128xbf16>
    %62 = vector.shape_cast %61 : vector<1x384x128xbf16> to vector<384x128xbf16>
    %cst_33 = arith.constant dense<0.000000e+00> : vector<640x128xf32>
    %63 = tpu.matmul %54, %62, %cst_33 {dimension_numbers = #tpu.dot_dimension_numbers<[1], [0], [0], [1], [0, 0, 1, 1], [], []>} : vector<640x384xbf16>, vector<384x128xbf16>, vector<640x128xf32> -> vector<640x128xf32>
    %c16_i32_34 = arith.constant 16 : i32
    %64 = tpu.dynamic_rotate %57 by %c16_i32_34 dim 0 : vector<640x128xf32>, i32 -> vector<640x128xf32>
    %65 = arith.addf %64, %60 : vector<640x128xf32>
    %c624_i32_35 = arith.constant 624 : i32
    %66 = tpu.dynamic_rotate %63 by %c624_i32_35 dim 0 : vector<640x128xf32>, i32 -> vector<640x128xf32>
    %67 = arith.addf %65, %66 : vector<640x128xf32>
    %c0_36 = arith.constant 0 : index
    %c0_37 = arith.constant 0 : index
    %68 = vector.load %arg6[%c0_36, %c0_37] : memref<1x128xf32, #tpu.memory_space<vmem>>, vector<1x128xf32>
    %69 = vector.broadcast %68 : vector<1x128xf32> to vector<640x128xf32>
    %70 = arith.mulf %67, %69 : vector<640x128xf32>
    %c0_38 = arith.constant 0 : index
    %c0_39 = arith.constant 0 : index
    %71 = vector.load %arg7[%c0_38, %c0_39] : memref<1x128xf32, #tpu.memory_space<vmem>>, vector<1x128xf32>
    %72 = vector.broadcast %71 : vector<1x128xf32> to vector<640x128xf32>
    %73 = arith.addf %70, %72 : vector<640x128xf32>
    %74 = arith.addf %73, %1 : vector<640x128xf32>
    %cst_40 = arith.constant 0.000000e+00 : f32
    %75 = vector.broadcast %cst_40 : f32 to vector<640x128xf32>
    %76 = arith.maximumf %74, %75 : vector<640x128xf32>
    %77 = vector.shape_cast %76 : vector<640x128xf32> to vector<4x10x16x128xf32>
    %78 = vector.broadcast %17 : vector<1x10x16x1xf32> to vector<4x10x16x128xf32>
    %79 = arith.mulf %77, %78 : vector<4x10x16x128xf32>
    %c0_41 = arith.constant 0 : index
    %c0_42 = arith.constant 0 : index
    %c0_43 = arith.constant 0 : index
    %c0_44 = arith.constant 0 : index
    %80 = vector.load %arg8[%c0_41, %c0_42, %c0_43, %c0_44] : memref<4x10x16x128xf32, #tpu.memory_space<vmem>>, vector<4x10x16x128xf32>
    tpu.vector_store %arg8[%c0_41, %c0_42, %c0_43, %c0_44], %79 {strides = array<i32>} : memref<4x10x16x128xf32, #tpu.memory_space<vmem>>, vector<4x10x16x128xf32>,
    return
  }
  func.func @transform_0(%arg0: i32) -> (i32, i32, i32, i32) {
    %c0_i32 = arith.constant 0 : i32
    %c0_i32_0 = arith.constant 0 : i32
    %c0_i32_1 = arith.constant 0 : i32
    %c0_i32_2 = arith.constant 0 : i32
    return %arg0, %c0_i32, %c0_i32_0, %c0_i32_1 : i32, i32, i32, i32
  }
  func.func @transform_1(%arg0: i32) -> (i32, i32, i32) {
    %c0_i32 = arith.constant 0 : i32
    %c0_i32_0 = arith.constant 0 : i32
    %c0_i32_1 = arith.constant 0 : i32
    %c0_i32_2 = arith.constant 0 : i32
    return %c0_i32, %c0_i32_0, %c0_i32_1 : i32, i32, i32
  }
  func.func @transform_2(%arg0: i32) -> (i32, i32, i32) {
    %c0_i32 = arith.constant 0 : i32
    %c0_i32_0 = arith.constant 0 : i32
    %c0_i32_1 = arith.constant 0 : i32
    %c0_i32_2 = arith.constant 0 : i32
    return %c0_i32, %c0_i32_0, %c0_i32_1 : i32, i32, i32
  }
  func.func @transform_3(%arg0: i32) -> (i32, i32) {
    %c0_i32 = arith.constant 0 : i32
    %c0_i32_0 = arith.constant 0 : i32
    %c0_i32_1 = arith.constant 0 : i32
    return %c0_i32, %c0_i32_0 : i32, i32
  }
  func.func @transform_4(%arg0: i32) -> (i32, i32) {
    %c0_i32 = arith.constant 0 : i32
    %c0_i32_0 = arith.constant 0 : i32
    %c0_i32_1 = arith.constant 0 : i32
    return %c0_i32, %c0_i32_0 : i32, i32
  }
  func.func @transform_5(%arg0: i32) -> (i32, i32) {
    %c0_i32 = arith.constant 0 : i32
    %c0_i32_0 = arith.constant 0 : i32
    %c0_i32_1 = arith.constant 0 : i32
    return %c0_i32, %c0_i32_0 : i32, i32
  }
  func.func @transform_6(%arg0: i32) -> (i32, i32) {
    %c0_i32 = arith.constant 0 : i32
    %c0_i32_0 = arith.constant 0 : i32
    %c0_i32_1 = arith.constant 0 : i32
    return %c0_i32, %c0_i32_0 : i32, i32
  }
  func.func @transform_7(%arg0: i32) -> (i32, i32, i32, i32) {
    %c0_i32 = arith.constant 0 : i32
    %c0_i32_0 = arith.constant 0 : i32
    %c0_i32_1 = arith.constant 0 : i32
    %c0_i32_2 = arith.constant 0 : i32
    return %arg0, %c0_i32, %c0_i32_0, %c0_i32_1 : i32, i32, i32, i32
  }
}

</mosaic_0001>

<bundles_post_ra>
// kernel: resblock_forward.1
= control target key start
LH: loop header
LB: loop body
LE: loop exit
PB: predicated region body
PF: predicated region fallthrough
CT: control target
= control target key end

     0   :  { %v15484_v0 = vmov 0   ;;  %v15481_v7 = vlaneseq  ;;  %s15473_s1 = inlined_call_operand.vmem [shape: bf16[3,384,128], index: 1, kind: input, shape index: {}]   ;;  %s15474_s0 = inlined_call_operand.vmem [shape: f32[4,10,16,128], index: 0, kind: input, shape index: {}]   ;;  %s15475_s2 = inlined_call_operand.vmem [shape: bf16[3,384,128], index: 2, kind: input, shape index: {}]   ;;  %s15476_s3 = inlined_call_operand.vmem [shape: f32[1,128], index: 3, kind: input, shape index: {}]   ;;  %s15477_s4 = inlined_call_operand.vmem [shape: f32[1,128], index: 4, kind: input, shape index: {}]   ;;  %s15478_s5 = inlined_call_operand.vmem [shape: f32[1,128], index: 5, kind: input, shape index: {}]   ;;  %s15479_s6 = inlined_call_operand.vmem [shape: f32[1,128], index: 6, kind: input, shape index: {}]   ;;  %s15480_s7 = inlined_call_operand.vmem [shape: f32[4,10,16,128], index: 7, kind: output, shape index: {}]  }
   0x1   :  { %872 = vmatprep.subr.bf16.mxu0 %v15484_v0  ;;  %v8872_v1 = vld [vmem:[%s15473_s1] sm:$0xff]   ;;  %v8874_v3 = vld [vmem:[%s15473_s1 + $0x8] sm:$0xff]   ;;  %v8877_v5 = vld [vmem:[%s15473_s1 + $0x90] sm:$0xff]  }
   0x2   :  { %v8873_v2 = vld [vmem:[%s15473_s1 + $0x80] sm:$0xff]   ;;  %873 = vmatpush1.bf16.msra.mxu0 %v8872_v1  ;;  %v8875_v4 = vld [vmem:[%s15473_s1 + $0x88] sm:$0xff]   ;;  %v8876_v6 = vld [vmem:[%s15473_s1 + $0x10] sm:$0xff]   ;;  %v9174_v10 = vshrl.u32 %v15481_v7, 7 }
   0x3   :  { %8294 = vmatprep.subr.bf16.mxu1 %v8873_v2  ;;  %874 = vmatprep.subr.bf16.mxu0 %v15484_v0  ;;  %v8879_v8 = vld [vmem:[%s15473_s1 + $0x98] sm:$0xff]   ;;  %v8881_v11 = vld [vmem:[%s15473_s1 + $0xa0] sm:$0xff]   ;;  %v9191_v14 = vld [vmem:[%s15474_s0 + $0x8] sm:$0xff] }
   0x4   :  { %8295 = vmatpush3.bf16.msra.mxu1 %v8873_v2  ;;  %v8878_v9 = vld [vmem:[%s15473_s1 + $0x18] sm:$0xff]   ;;  %16017 = vst [vmem:[#allocation2_spill] sm:$0xff] %v9174_v10  ;;  %v8880_v12 = vld [vmem:[%s15473_s1 + $0x20] sm:$0xff]   ;;  %v9196_v15 = vld [vmem:[%s15474_s0 + $0x10] sm:$0xff]  ;;  %vm479_vm0 = vcmp.lt.s32.totalorder %v9174_v10, 7  ;;  %v400_v18 = vrot.slane %v9191_v14, 1 }
   0x5   :  { %8296 = vmatprep.subr.bf16.mxu1 %v8875_v4  ;;  %v9186_v13 = vld [vmem:[%s15474_s0] sm:$0xff]  ;;  %v8883_v16 = vld [vmem:[%s15473_s1 + $0xa8] sm:$0xff]   ;;  %v401_v19 = vrot.slane %v9196_v15, 1  ;;  %v8885_v24 = vld [vmem:[%s15473_s1 + $0xb0] sm:$0xff]   ;;  %vm318_vm1 = vcmp.lt.s32.totalorder %v9174_v10, 1  ;;  %vm112_vm7 = vcmp.ge.s32.totalorder %v9174_v10, 1 }
   0x6   :  { %875 = vmatpush1.bf16.msra.mxu0 %v8874_v3  ;;  %v15483_v17 = vrot.slane %v9186_v13, 1  ;;  %v9207_v20 = vpack.c.bf16 %v9191_v14, %v9186_v13  ;;  %v8882_v21 = vld [vmem:[%s15473_s1 + $0x28] sm:$0xff]   ;;  %v9228_v26 = vld [vmem:[%s15474_s0 + $0x18] sm:$0xff]  ;;  %v9233_v27 = vld [vmem:[%s15474_s0 + $0x20] sm:$0xff] }
   0x7   :  { %876 = vmatprep.subr.bf16.mxu0 %v15484_v0  ;;  %v557_v22 = vsel %vm479_vm0, %v400_v18, %v401_v19  ;;  %v8884_v28 = vld [vmem:[%s15473_s1 + $0x30] sm:$0xff]   ;;  %v9242_v29 = vld [vmem:[%s15474_s0 + $0x28] sm:$0xff]  ;;  %v8887_v31 = vld [vmem:[%s15473_s1 + $0xb8] sm:$0xff]   ;;  %v402_v32 = vrot.slane %v9228_v26, 1  ;;  %v403_v33 = vrot.slane %v9233_v27, 1 }
   0x8   :  { %8297 = vmatpush3.bf16.msra.mxu1 %v8875_v4  ;;  %16018 = vst [vmem:[#allocation3_spill] sm:$0xff] %v9207_v20  ;;  %v558_v23 = vsel %vm479_vm0, %v15483_v17, %v400_v18  ;;  %904 = vmatprep.mubr.bf16.mxu0 %v9207_v20  ;;  %v9247_v30 = vld [vmem:[%s15474_s0 + $0x30] sm:$0xff]  ;;  %v404_v34 = vrot.slane %v9242_v29, 1  ;;  %v8886_v36 = vld [vmem:[%s15473_s1 + $0x38] sm:$0xff]   ;;  %v9277_v42 = vld [vmem:[%s15474_s0 + $0x40] sm:$0xff] }
   0x9   :  { %8298 = vmatprep.subr.bf16.mxu1 %v8877_v5  ;;  %v9223_v25 = vpack.c.bf16 %v557_v22, %v558_v23  ;;  %v405_v35 = vrot.slane %v9247_v30, 1  ;;  %v555_v37 = vsel %vm479_vm0, %v402_v32, %v403_v33  ;;  %v556_v38 = vsel %vm479_vm0, %v401_v19, %v402_v32  ;;  %v9268_v39 = vld [vmem:[%s15474_s0 + $0x38] sm:$0xff]  ;;  %v8888_v43 = vld [vmem:[%s15473_s1 + $0x40] sm:$0xff]   ;;  %v9285_v44 = vld [vmem:[%s15474_s0 + $0x48] sm:$0xff] }
   0xa   :  { %877 = vmatpush1.bf16.msra.mxu0 %v8876_v6  ;;  %v554_v41 = vsel %vm479_vm0, %v403_v33, %v404_v34  ;;  %v9290_v45 = vld [vmem:[%s15474_s0 + $0x50] sm:$0xff]  ;;  %v9293_v46 = vpack.c.bf16 %v555_v37, %v556_v38  ;;  %v406_v47 = vrot.slane %v9268_v39, 1  ;;  %v407_v49 = vrot.slane %v9277_v42, 1  ;;  %v8895_v50 = vld [vmem:[%s15473_s1 + $0xc0] sm:$0xff]   ;;  %v8889_v53 = vld [vmem:[%s15473_s1 + $0x48] sm:$0xff]  }
   0xb   :  { %878 = vmatprep.subr.bf16.mxu0 %v15484_v0  ;;  %16019 = vst [vmem:[#allocation4_spill] sm:$0xff] %v9223_v25  ;;  %8310 = vmatprep.mubr.bf16.mxu1 %v9223_v25  ;;  %v553_v40 = vsel %vm479_vm0, %v404_v34, %v405_v35  ;;  %v408_v51 = vrot.slane %v9285_v44, 1  ;;  %v409_v52 = vrot.slane %v9290_v45, 1  ;;  %v8890_v54 = vld [vmem:[%s15473_s1 + $0x50] sm:$0xff]   ;;  %v9325_v59 = vld [vmem:[%s15474_s0 + $0x58] sm:$0xff]  ;;  %v9330_v60 = vld [vmem:[%s15474_s0 + $0x60] sm:$0xff] }
   0xc   :  { %8299 = vmatpush3.bf16.msra.mxu1 %v8877_v5  ;;  %16020 = vst [vmem:[#allocation5_spill] sm:$0xff] %v9293_v46  ;;  %v9296_v48 = vpack.c.bf16 %v553_v40, %v554_v41  ;;  %v551_v55 = vsel %vm479_vm0, %v406_v47, %v407_v49  ;;  %v552_v56 = vsel %vm479_vm0, %v405_v35, %v406_v47  ;;  %v8898_v61 = vld [vmem:[%s15473_s1 + $0xc8] sm:$0xff]   ;;  %v9344_v63 = vld [vmem:[%s15474_s0 + $0x70] sm:$0xff]  ;;  %v410_v3 = vrot.slane %v9325_v59, 1  ;;  %v8900_v18 = vld [vmem:[%s15473_s1 + $0xd8] sm:$0xff]  }
   0xd   :  { %8300 = vmatprep.subr.bf16.mxu1 %v8879_v8  ;;  %v549_v57 = vsel %vm479_vm0, %v408_v51, %v409_v52  ;;  %v550_v58 = vsel %vm479_vm0, %v407_v49, %v408_v51  ;;  %v9339_v62 = vld [vmem:[%s15474_s0 + $0x68] sm:$0xff]  ;;  %v9347_v1 = vpack.c.bf16 %v551_v55, %v552_v56  ;;  %v411_v4 = vrot.slane %v9330_v60, 1  ;;  %v8899_v5 = vld [vmem:[%s15473_s1 + $0xd0] sm:$0xff]   ;;  %v9384_v22 = vld [vmem:[%s15474_s0 + $0x80] sm:$0xff] }
   0xe   :  { %879 = vmatpush1.bf16.msra.mxu0 %v8878_v9  ;;  %16021 = vst [vmem:[#allocation6_spill] sm:$0xff] %v9296_v48  ;;  %v9349_v2 = vpack.c.bf16 %v549_v57, %v550_v58  ;;  %v412_v6 = vrot.slane %v9339_v62, 1  ;;  %v8891_v9 = vld [vmem:[%s15473_s1 + $0x58] sm:$0xff]   ;;  %v8892_v23 = vld [vmem:[%s15473_s1 + $0x60] sm:$0xff]   ;;  %v415_v34 = vrot.slane %v9384_v22, 1  ;;  %v8893_v38 = vld [vmem:[%s15473_s1 + $0x68] sm:$0xff]  }
   0xf   :  { %880 = vmatprep.subr.bf16.mxu0 %v15484_v0  ;;  %16022 = vst [vmem:[#allocation7_spill] sm:$0xff] %v9347_v1  ;;  %v8901_v35 = vld [vmem:[%s15473_s1 + $0xe0] sm:$0xff]   ;;  %v9421_v40 = vld [vmem:[%s15474_s0 + $0x278] sm:$0xff]  ;;  %v8903_v47 = vld [vmem:[%s15473_s1 + $0xe8] sm:$0xff]   ;;  %v239_v55 = vrot.slane %v9191_v14, 7 }
  0x10   :  { %8301 = vmatpush3.bf16.msra.mxu1 %v8879_v8  ;;  %16023 = vst [vmem:[#allocation8_spill] sm:$0xff] %v9349_v2  ;;  %v413_v8 = vrot.slane %v9344_v63, 1  ;;  %v9438_v51 = vld [vmem:[%s15474_s0 + $0x98] sm:$0xff]  ;;  %v15482_v56 = vrot.slane %v9421_v40, 7  ;;  %v9455_v57 = vld [vmem:[%s15474_s0 + $0xa8] sm:$0xff]  ;;  %v9460_v58 = vld [vmem:[%s15474_s0 + $0xb0] sm:$0xff] }
  0x11   :  { %8302 = vmatprep.subr.bf16.mxu1 %v8881_v11  ;;  %v418_v14 = vrot.slane %v9438_v51, 1  ;;  %v9824_v25 = vld [vmem:[%s15474_s0 + $0x170] sm:$0xff] }
  0x12   :  { %881 = vmatpush1.bf16.msra.mxu0 %v8880_v12  ;;  %v548_v12 = vsel %vm479_vm0, %v409_v52, %v410_v3  ;;  %v545_v19 = vsel %vm479_vm0, %v412_v6, %v413_v8  ;;  %v9443_v52 = vld [vmem:[%s15474_s0 + $0xa0] sm:$0xff]  ;;  %16050 = vst [vmem:[#allocation34_spill] sm:$0xff] %v9824_v25 }
  0x13   :  { %882 = vmatprep.subr.bf16.mxu0 %v15484_v0 }
  0x14   :  { %8303 = vmatpush3.bf16.msra.mxu1 %v8881_v11  ;;  %v547_v11 = vsel %vm479_vm0, %v410_v3, %v411_v4 }
  0x15   :  { %8304 = vmatprep.subr.bf16.mxu1 %v8883_v16 }
  0x16   :  { %883 = vmatpush1.bf16.msra.mxu0 %v8882_v21  ;;  %v546_v21 = vsel %vm479_vm0, %v411_v4, %v412_v6  ;;  %v419_v4 = vrot.slane %v9443_v52, 1  ;;  %v420_v6 = vrot.slane %v9455_v57, 1 }
  0x17   :  { %884 = vmatprep.subr.bf16.mxu0 %v15484_v0  ;;  %v9403_v32 = vpack.c.bf16 %v545_v19, %v546_v21 }
  0x18   :  { %8305 = vmatpush3.bf16.msra.mxu1 %v8883_v16  ;;  %v9372_v16 = vld [vmem:[%s15474_s0 + $0x78] sm:$0xff]  ;;  %v539_v19 = vsel %vm479_vm0, %v418_v14, %v419_v4 }
  0x19   :  { %8306 = vmatprep.subr.bf16.mxu1 %v8885_v24  ;;  %16025 = vst [vmem:[#allocation10_spill] sm:$0xff] %v9403_v32  ;;  %v414_v33 = vrot.slane %v9372_v16, 1 }
  0x1a   :  { %885 = vmatpush1.bf16.msra.mxu0 %v8884_v28  ;;  %v9398_v28 = vld [vmem:[%s15474_s0 + $0x90] sm:$0xff] }
  0x1b   :  { %886 = vmatprep.subr.bf16.mxu0 %v15484_v0  ;;  %v417_v37 = vrot.slane %v9398_v28, 1  ;;  %v543_v41 = vsel %vm479_vm0, %v414_v33, %v415_v34 }
  0x1c   :  { %8307 = vmatpush3.bf16.msra.mxu1 %v8885_v24  ;;  %v9393_v24 = vld [vmem:[%s15474_s0 + $0x88] sm:$0xff] }
  0x1d   :  { %8308 = vmatprep.subr.bf16.mxu1 %v8887_v31  ;;  %v540_v21 = vsel %vm479_vm0, %v417_v37, %v418_v14  ;;  %v8906_v14 = vld [vmem:[%s15473_s1 + $0x100] sm:$0xff]  }
  0x1e   :  { %887 = vmatpush1.bf16.msra.mxu0 %v8886_v36  ;;  %v416_v36 = vrot.slane %v9393_v24, 1 }
  0x1f   :  { %888 = vmatprep.subr.bf16.mxu0 %v15484_v0 }
  0x20   :  { %8309 = vmatpush3.bf16.msra.mxu1 %v8887_v31  ;;  %v9401_v31 = vpack.c.bf16 %v547_v11, %v548_v12  ;;  %v541_v49 = vsel %vm479_vm0, %v416_v36, %v417_v37  ;;  %v9512_v37 = vld [vmem:[%s15474_s0 + $0xc0] sm:$0xff] }
  0x21   :  { %1771 = vmatprep.subr.bf16.mxu1 %v15484_v0 }
  0x22   :  { %889 = vmatpush1.bf16.msra.mxu0 %v8888_v43  ;;  %16024 = vst [vmem:[#allocation9_spill] sm:$0xff] %v9401_v31  ;;  %v544_v43 = vsel %vm479_vm0, %v413_v8, %v414_v33  ;;  %v421_v8 = vrot.slane %v9460_v58, 1 }
  0x23   :  { %8311 = vmatmul.mubr.bf16.vlgmr.msra.gmra.mrb[0].mxu1 %v9293_v46  ;;  %890 = vmatprep.subr.bf16.mxu0 %v15484_v0  ;;  %v9819_v46 = vld [vmem:[%s15474_s0 + $0x168] sm:$0xff] }
  0x24   :  { %8314 = vmatprep.mubr.bf16.mxu1 %v9296_v48  ;;  %1772 = vmatpush1.bf16.msra.mxu1 %v8895_v50  ;;  %v542_v50 = vsel %vm479_vm0, %v415_v34, %v416_v36  ;;  %v537_v34 = vsel %vm479_vm0, %v420_v6, %v421_v8  ;;  %v9507_v36 = vld [vmem:[%s15474_s0 + $0xb8] sm:$0xff]  ;;  %v8917_v48 = vld [vmem:[%s15473_s1 + $0x160] sm:$0xff]  }
  0x25   :  { %1773 = vmatprep.subr.bf16.mxu1 %v15484_v0  ;;  %v9466_v3 = vpack.c.bf16 %v541_v49, %v542_v50  ;;  %v9529_v49 = vld [vmem:[%s15474_s0 + $0xd0] sm:$0xff]  ;;  %v9531_v50 = vpack.c.bf16 %v539_v19, %v540_v21  ;;  %v242_v19 = vrot.slane %v9233_v27, 7  ;;  %v8908_v21 = vld [vmem:[%s15473_s1 + $0x108] sm:$0xff]  }
  0x26   :  { %891 = vmatpush1.bf16.msra.mxu0 %v8889_v53  ;;  %v8894_v53 = vld [vmem:[%s15473_s1 + $0x70] sm:$0xff]  }
  0x27   :  { %892 = vmatprep.subr.bf16.mxu0 %v15484_v0  ;;  %16027 = vst [vmem:[#allocation12_spill] sm:$0xff] %v9466_v3  ;;  %16030 = vst [vmem:[#allocation15_spill] sm:$0xff] %v9531_v50 }
  0x28   :  { %1774 = vmatpush1.bf16.msra.mxu1 %v8898_v61  ;;  %v9463_v61 = vpack.c.bf16 %v543_v41, %v544_v43  ;;  %v240_v41 = vrot.slane %v9196_v15, 7  ;;  %v241_v43 = vrot.slane %v9228_v26, 7 }
  0x29   :  { %1775 = vmatprep.subr.bf16.mxu1 %v15484_v0 }
  0x2a   :  { %893 = vmatpush1.bf16.msra.mxu0 %v8890_v54  ;;  %v238_v54 = vrot.slane %v9186_v13, 7  ;;  %16026 = vst [vmem:[#allocation11_spill] sm:$0xff] %v9463_v61 }
  0x2b   :  { %8315 = vmatmul.mubr.bf16.gmra.mrb[4].mxu1 %v9347_v1  ;;  %894 = vmatprep.subr.bf16.mxu0 %v15484_v0 }
  0x2c   :  { %8318 = vmatprep.mubr.bf16.mxu1 %v9349_v2  ;;  %1776 = vmatpush1.bf16.msra.mxu1 %v8899_v5  ;;  %v8904_v5 = vld [vmem:[%s15473_s1 + $0xf0] sm:$0xff]   ;;  %v397_v11 = vsel %vm318_vm1, %v238_v54, %v239_v55  ;;  %v398_v12 = vsel %vm318_vm1, %v15482_v56, %v238_v54  ;;  %v423_v54 = vrot.slane %v9512_v37, 1  ;;  %v9764_v2 = vld [vmem:[%s15474_s0 + $0x148] sm:$0xff] }
  0x2d   :  { %1777 = vmatprep.subr.bf16.mxu1 %v15484_v0  ;;  %v9498_v33 = vpack.c.bf16 %v397_v11, %v398_v12  ;;  %v8907_v11 = vld [vmem:[%s15473_s1 + $0x150] sm:$0xff]  }
  0x2e   :  { %895 = vmatpush1.bf16.msra.mxu0 %v8891_v9  ;;  %v8896_v9 = vld [vmem:[%s15473_s1 + $0x78] sm:$0xff]  }
  0x2f   :  { %896 = vmatprep.subr.bf16.mxu0 %v15484_v0  ;;  %16028 = vst [vmem:[#allocation13_spill] sm:$0xff] %v9498_v33 }
  0x30   :  { %1778 = vmatpush1.bf16.msra.mxu1 %v8900_v18  ;;  %v8897_v18 = vld [vmem:[%s15473_s1 + $0x140] sm:$0xff]  }
  0x31   :  { %1779 = vmatprep.subr.bf16.mxu1 %v15484_v0 }
  0x32   :  { %897 = vmatpush1.bf16.msra.mxu0 %v8892_v23  ;;  %v8905_v23 = vld [vmem:[%s15473_s1 + $0xf8] sm:$0xff]  }
  0x33   :  { %8319 = vmatmul.mubr.bf16.gmra.mrb[8].mxu1 %v9401_v31  ;;  %898 = vmatprep.subr.bf16.mxu0 %v15484_v0 }
  0x34   :  { %8322 = vmatprep.mubr.bf16.mxu1 %v9403_v32  ;;  %1780 = vmatpush1.bf16.msra.mxu1 %v8901_v35  ;;  %v538_v35 = vsel %vm479_vm0, %v419_v4, %v420_v6  ;;  %v395_v6 = vsel %vm318_vm1, %v240_v41, %v241_v43  ;;  %v9711_v32 = vpack.c.bf16 %v9285_v44, %v9277_v42 }
  0x35   :  { %1781 = vmatprep.subr.bf16.mxu1 %v15484_v0 }
  0x36   :  { %899 = vmatpush1.bf16.msra.mxu0 %v8893_v38  ;;  %v9517_v38 = vpack.c.bf16 %v9228_v26, %v9196_v15  ;;  %v9536_v15 = vpack.c.bf16 %v537_v34, %v538_v35  ;;  %v422_v26 = vrot.slane %v9507_v36, 1  ;;  %v243_v34 = vrot.slane %v9242_v29, 7  ;;  %16042 = vst [vmem:[#allocation26_spill] sm:$0xff] %v9711_v32 }
  0x37   :  { %900 = vmatprep.subr.bf16.mxu0 %v15484_v0 }
  0x38   :  { %1782 = vmatpush1.bf16.msra.mxu1 %v8903_v47  ;;  %16029 = vst [vmem:[#allocation14_spill] sm:$0xff] %v9517_v38  ;;  %v9524_v47 = vld [vmem:[%s15474_s0 + $0xc8] sm:$0xff]  ;;  %16031 = vst [vmem:[#allocation16_spill] sm:$0xff] %v9536_v15  ;;  %v535_v12 = vsel %vm479_vm0, %v422_v26, %v423_v54 }
  0x39   :  { %1783 = vmatprep.subr.bf16.mxu1 %v15484_v0  ;;  %v424_v4 = vrot.slane %v9524_v47, 1 }
  0x3a   :  { %901 = vmatpush1.bf16.msra.mxu0 %v8894_v53  ;;  %v8902_v53 = vld [vmem:[%s15473_s1 + $0x148] sm:$0xff]  }
  0x3b   :  { %8323 = vmatmul.mubr.bf16.gmra.mrb[12].mxu1 %v9463_v61  ;;  %902 = vmatprep.subr.bf16.mxu0 %v15484_v0 }
  0x3c   :  { %8326 = vmatprep.mubr.bf16.mxu1 %v9466_v3  ;;  %1784 = vmatpush1.bf16.msra.mxu1 %v8904_v5  ;;  %v425_v5 = vrot.slane %v9529_v49, 1 }
  0x3d   :  { %1785 = vmatprep.subr.bf16.mxu1 %v15484_v0 }
  0x3e   :  { %903 = vmatpush1.bf16.msra.mxu0 %v8896_v9  ;;  %v396_v9 = vsel %vm318_vm1, %v239_v55, %v240_v41  ;;  %v9565_v55 = vld [vmem:[%s15474_s0 + $0xd8] sm:$0xff]  ;;  %v533_v35 = vsel %vm479_vm0, %v424_v4, %v425_v5  ;;  %v9580_v41 = vld [vmem:[%s15474_s0 + $0xe0] sm:$0xff] }
  0x3f   :  { %8390 = vmatprep.subr.bf16.mxu0 %v8897_v18  ;;  %v427_v7 = vrot.slane %v9580_v41, 1 }
  0x40   :  { %1786 = vmatpush1.bf16.msra.mxu1 %v8905_v23  ;;  %v9570_v23 = vpack.c.bf16 %v395_v6, %v396_v9  ;;  %v426_v9 = vrot.slane %v9565_v55, 1 }
  0x41   :  { %905 = vmatmul.mubr.bf16.vlgmr.msra.gmra.mrb[0].mxu0 %v9498_v33  ;;  %1787 = vmatprep.subr.bf16.mxu1 %v15484_v0 }
  0x42   :  { %8391 = vmatpush3.bf16.msra.mxu0 %v8897_v18  ;;  %912 = vmatprep.mubr.bf16.mxu0 %v9517_v38  ;;  %v536_v18 = vsel %vm479_vm0, %v421_v8, %v422_v26  ;;  %16032 = vst [vmem:[#allocation17_spill] sm:$0xff] %v9570_v23  ;;  %v534_v8 = vsel %vm479_vm0, %v423_v54, %v424_v4  ;;  %v9585_v26 = vld [vmem:[%s15474_s0 + $0xe8] sm:$0xff]  ;;  %v9595_v54 = vld [vmem:[%s15474_s0 + $0xf0] sm:$0xff] }
  0x43   :  { %8327 = vmatmul.mubr.bf16.gmra.mrb[16].mxu1 %v9531_v50  ;;  %8392 = vmatprep.subr.bf16.mxu0 %v8902_v53  ;;  %v9597_v4 = vpack.c.bf16 %v535_v12, %v536_v18  ;;  %v9599_v6 = vpack.c.bf16 %v533_v35, %v534_v8  ;;  %v428_v12 = vrot.slane %v9585_v26, 1  ;;  %v429_v18 = vrot.slane %v9595_v54, 1  ;;  %v8913_v35 = vld [vmem:[%s15473_s1 + $0x158] sm:$0xff]   ;;  %v9633_v8 = vld [vmem:[%s15474_s0 + $0x108] sm:$0xff] }
  0x44   :  { %8330 = vmatprep.mubr.bf16.mxu1 %v9536_v15  ;;  %1788 = vmatpush1.bf16.msra.mxu1 %v8906_v14  ;;  %v9590_v14 = vpack.c.bf16 %v9242_v29, %v9233_v27  ;;  %v8909_v27 = vld [vmem:[%s15473_s1 + $0x110] sm:$0xff]   ;;  %v393_v29 = vsel %vm318_vm1, %v242_v19, %v243_v34  ;;  %v531_v17 = vsel %vm479_vm0, %v426_v9, %v427_v7  ;;  %v16037_v50 = vmov 0  }
  0x45   :  { %1789 = vmatprep.subr.bf16.mxu1 %v15484_v0  ;;  %16034 = vst [vmem:[#allocation19_spill] sm:$0xff] %v9597_v4  ;;  %16035 = vst [vmem:[#allocation20_spill] sm:$0xff] %v9599_v6  ;;  %v529_v15 = vsel %vm479_vm0, %v428_v12, %v429_v18 }
  0x46   :  { %16033 = vst [vmem:[#allocation18_spill] sm:$0xff] %v9590_v14  ;;  %8393 = vmatpush3.bf16.msra.mxu0 %v8902_v53  ;;  %v394_v53 = vsel %vm318_vm1, %v241_v43, %v242_v19  ;;  %v9626_v43 = vld [vmem:[%s15474_s0 + $0x100] sm:$0xff]  ;;  %v244_v19 = vrot.slane %v9247_v30, 7 }
  0x47   :  { %8394 = vmatprep.subr.bf16.mxu0 %v8907_v11  ;;  %v9635_v56 = vpack.c.bf16 %v393_v29, %v394_v53  ;;  %v530_v29 = vsel %vm479_vm0, %v427_v7, %v428_v12 }
  0x48   :  { %1790 = vmatpush1.bf16.msra.mxu1 %v8908_v21  ;;  %v9616_v21 = vld [vmem:[%s15474_s0 + $0xf8] sm:$0xff]  ;;  %v9665_v12 = vpack.c.bf16 %v529_v15, %v530_v29  ;;  %v9687_v15 = vld [vmem:[%s15474_s0 + $0x120] sm:$0xff]  ;;  %v246_v29 = vrot.slane %v9277_v42, 7 }
  0x49   :  { %913 = vmatmul.mubr.bf16.gmra.mrb[4].mxu0 %v9570_v23  ;;  %1791 = vmatprep.subr.bf16.mxu1 %v15484_v0  ;;  %16036 = vst [vmem:[#allocation21_spill] sm:$0xff] %v9635_v56  ;;  %v532_v0 = vsel %vm479_vm0, %v425_v5, %v426_v9  ;;  %v430_v53 = vrot.slane %v9616_v21, 1  ;;  %v9655_v5 = vpack.c.bf16 %v9268_v39, %v9247_v30  ;;  %v9660_v9 = vld [vmem:[%s15474_s0 + $0x110] sm:$0xff]  ;;  %v8911_v30 = vld [vmem:[%s15473_s1 + $0x120] sm:$0xff]  }
  0x4a   :  { %920 = vmatprep.mubr.bf16.mxu0 %v9590_v14  ;;  %8395 = vmatpush3.bf16.msra.mxu0 %v8907_v11  ;;  %v245_v11 = vrot.slane %v9268_v39, 7  ;;  %v9663_v7 = vpack.c.bf16 %v531_v17, %v532_v0  ;;  %16040 = vst [vmem:[#allocation24_spill] sm:$0xff] %v9665_v12  ;;  %v433_v3 = vrot.slane %v9660_v9, 1  ;;  %v392_v0 = vsel %vm318_vm1, %v243_v34, %v244_v19  ;;  %v9681_v17 = vld [vmem:[%s15474_s0 + $0x118] sm:$0xff] }
  0x4b   :  { %8331 = vmatmul.mubr.bf16.gmra.mrb[20].mxu1 %v9597_v4  ;;  %v8910_v4 = vld [vmem:[%s15473_s1 + $0x118] sm:$0xff]   ;;  %8396 = vmatprep.subr.bf16.mxu0 %v8913_v35  ;;  %16038 = vst [vmem:[#allocation22_spill] sm:$0xff] %v9655_v5 }
  0x4c   :  { %8334 = vmatprep.mubr.bf16.mxu1 %v9599_v6  ;;  %1792 = vmatpush1.bf16.msra.mxu1 %v8909_v27  ;;  %v431_v6 = vrot.slane %v9626_v43, 1  ;;  %v432_v27 = vrot.slane %v9633_v8, 1  ;;  %16039 = vst [vmem:[#allocation23_spill] sm:$0xff] %v9663_v7  ;;  %v391_v39 = vsel %vm318_vm1, %v244_v19, %v245_v11 }
  0x4d   :  { %1793 = vmatprep.subr.bf16.mxu1 %v16037_v50  ;;  %v9699_v19 = vpack.c.bf16 %v391_v39, %v392_v0  ;;  %v8914_v0 = vld [vmem:[%s15473_s1 + $0x130] sm:$0xff]  }
  0x4e   :  { %8397 = vmatpush3.bf16.msra.mxu0 %v8913_v35  ;;  %v527_v34 = vsel %vm479_vm0, %v430_v53, %v431_v6  ;;  %v528_v35 = vsel %vm479_vm0, %v429_v18, %v430_v53  ;;  %v526_v61 = vsel %vm479_vm0, %v431_v6, %v432_v27  ;;  %v247_v18 = vrot.slane %v9285_v44, 7  ;;  %v9717_v53 = vld [vmem:[%s15474_s0 + $0x130] sm:$0xff] }
  0x4f   :  { %16041 = vst [vmem:[#allocation25_spill] sm:$0xff] %v9699_v19  ;;  %v9720_v39 = vpack.c.bf16 %v527_v34, %v528_v35  ;;  %v434_v6 = vrot.slane %v9681_v17, 1  ;;  %v437_v44 = vrot.slane %v9717_v53, 1  ;;  %8398 = vmatprep.subr.bf16.mxu0 %v8917_v48 }
  0x50   :  { %1794 = vmatpush1.bf16.msra.mxu1 %v8910_v4  ;;  %v9692_v4 = vld [vmem:[%s15474_s0 + $0x128] sm:$0xff]  ;;  %v389_v34 = vsel %vm318_vm1, %v246_v29, %v247_v18 }
  0x51   :  { %921 = vmatmul.mubr.bf16.gmra.mrb[8].mxu0 %v9635_v56  ;;  %1795 = vmatprep.subr.bf16.mxu1 %v16037_v50  ;;  %16043 = vst [vmem:[#allocation27_spill] sm:$0xff] %v9720_v39  ;;  %v436_v42 = vrot.slane %v9692_v4, 1  ;;  %v524_v35 = vsel %vm479_vm0, %v433_v3, %v434_v6 }
  0x52   :  { %928 = vmatprep.mubr.bf16.mxu0 %v9655_v5  ;;  %8399 = vmatpush3.bf16.msra.mxu0 %v8917_v48 }
  0x53   :  { %8335 = vmatmul.mubr.bf16.gmra.mrb[24].mxu1 %v9663_v7  ;;  %v525_v7 = vsel %vm479_vm0, %v432_v27, %v433_v3  ;;  %v521_v31 = vsel %vm479_vm0, %v436_v42, %v437_v44  ;;  %v8915_v3 = vld [vmem:[%s15473_s1 + $0x138] sm:$0xff]  }
  0x54   :  { %8338 = vmatprep.mubr.bf16.mxu1 %v9665_v12  ;;  %1796 = vmatpush1.bf16.msra.mxu1 %v8911_v30  ;;  %v8912_v12 = vld [vmem:[%s15473_s1 + $0x128] sm:$0xff]   ;;  %v9723_v27 = vpack.c.bf16 %v525_v7, %v526_v61  ;;  %v435_v30 = vrot.slane %v9687_v15, 1  ;;  %v390_v61 = vsel %vm318_vm1, %v245_v11, %v246_v29  ;;  %v9742_v7 = vld [vmem:[%s15474_s0 + $0x138] sm:$0xff]  ;;  %v9752_v11 = vld [vmem:[%s15474_s0 + $0x140] sm:$0xff] }
  0x55   :  { %1797 = vmatprep.subr.bf16.mxu1 %v16037_v50  ;;  %v9754_v29 = vpack.c.bf16 %v389_v34, %v390_v61  ;;  %v249_v34 = vrot.slane %v9325_v59, 7  ;;  %v438_v61 = vrot.slane %v9742_v7, 1  ;;  %v439_v1 = vrot.slane %v9752_v11, 1 }
  0x56   :  { %16044 = vst [vmem:[#allocation28_spill] sm:$0xff] %v9723_v27 }
  0x57   :  { %16045 = vst [vmem:[#allocation29_spill] sm:$0xff] %v9754_v29 }
  0x58   :  { %1798 = vmatpush1.bf16.msra.mxu1 %v8912_v12  ;;  %v523_v12 = vsel %vm479_vm0, %v434_v6, %v435_v30  ;;  %v9771_v6 = vpack.c.bf16 %v9325_v59, %v9290_v45 }
  0x59   :  { %929 = vmatmul.mubr.bf16.gmra.mrb[12].mxu0 %v9699_v19  ;;  %1799 = vmatprep.subr.bf16.mxu1 %v16037_v50 }
  0x5a   :  { %936 = vmatprep.mubr.bf16.mxu0 %v9711_v32  ;;  %16046 = vst [vmem:[#allocation30_spill] sm:$0xff] %v9771_v6 }
  0x5b   :  { %8339 = vmatmul.mubr.bf16.gmra.mrb[28].mxu1 %v9720_v39  ;;  %v248_v39 = vrot.slane %v9290_v45, 7  ;;  %v440_v45 = vrot.slane %v9764_v2, 1 }
  0x5c   :  { %8342 = vmatprep.mubr.bf16.mxu1 %v9723_v27  ;;  %v522_v27 = vsel %vm479_vm0, %v435_v30, %v436_v42  ;;  %1800 = vmatpush1.bf16.msra.mxu1 %v8914_v0  ;;  %v9777_v30 = vld [vmem:[%s15474_s0 + $0x150] sm:$0xff]  ;;  %v9780_v42 = vpack.c.bf16 %v523_v12, %v524_v35  ;;  %v250_v12 = vrot.slane %v9330_v60, 7  ;;  %v9803_v35 = vld [vmem:[%s15474_s0 + $0x158] sm:$0xff] }
  0x5d   :  { %16047 = vst [vmem:[#allocation31_spill] sm:$0xff] %v9777_v30  ;;  %1801 = vmatprep.subr.bf16.mxu1 %v16037_v50  ;;  %v9782_v0 = vpack.c.bf16 %v521_v31, %v522_v27  ;;  %v441_v59 = vrot.slane %v9777_v30, 1  ;;  %v387_v31 = vsel %vm318_vm1, %v248_v39, %v249_v34  ;;  %v388_v27 = vsel %vm318_vm1, %v247_v18, %v248_v39 }
  0x5e   :  { %16048 = vst [vmem:[#allocation32_spill] sm:$0xff] %v9780_v42  ;;  %v519_v18 = vsel %vm479_vm0, %v438_v61, %v439_v1  ;;  %v520_v39 = vsel %vm479_vm0, %v437_v44, %v438_v61  ;;  %v518_v44 = vsel %vm479_vm0, %v439_v1, %v440_v45  ;;  %v9834_v61 = vpack.c.bf16 %v9339_v62, %v9330_v60 }
  0x5f   :  { %16049 = vst [vmem:[#allocation33_spill] sm:$0xff] %v9782_v0  ;;  %v442_v32 = vrot.slane %v9803_v35, 1 }
  0x60   :  { %1802 = vmatpush1.bf16.msra.mxu1 %v8915_v3  ;;  %v9808_v3 = vld [vmem:[%s15474_s0 + $0x160] sm:$0xff]  ;;  %16052 = vst [vmem:[#allocation36_spill] sm:$0xff] %v9834_v61 }
  0x61   :  { %937 = vmatmul.mubr.bf16.gmra.mrb[16].mxu0 %v9754_v29  ;;  %2670 = vmatprep.subr.bf16.mxu1 %v16037_v50  ;;  %v9836_v29 = vpack.c.bf16 %v519_v18, %v520_v39  ;;  %v443_v48 = vrot.slane %v9808_v3, 1 }
  0x62   :  { %944 = vmatprep.mubr.bf16.mxu0 %v9771_v6  ;;  %v517_v6 = vsel %vm479_vm0, %v440_v45, %v441_v59 }
  0x63   :  { %8343 = vmatmul.mubr.bf16.gmra.mrb[32].mxu1 %v9780_v42  ;;  %v251_v42 = vrot.slane %v9339_v62, 7  ;;  %16053 = vst [vmem:[#allocation37_spill] sm:$0xff] %v9836_v29  ;;  %v9838_v30 = vpack.c.bf16 %v517_v6, %v518_v44  ;;  %v386_v62 = vsel %vm318_vm1, %v249_v34, %v250_v12  ;;  %v515_v1 = vsel %vm479_vm0, %v442_v32, %v443_v48  ;;  %v9865_v34 = vld [vmem:[%s15474_s0 + $0x178] sm:$0xff] }
  0x64   :  { %8346 = vmatprep.mubr.bf16.mxu1 %v9782_v0  ;;  %v9826_v0 = vpack.c.bf16 %v387_v31, %v388_v27  ;;  %v444_v31 = vrot.slane %v9819_v46, 1  ;;  %v445_v27 = vrot.slane %v9824_v25, 1  ;;  %v516_v6 = vsel %vm479_vm0, %v441_v59, %v442_v32 }
  0x65   :  { %16054 = vst [vmem:[#allocation38_spill] sm:$0xff] %v9838_v30  ;;  %v385_v60 = vsel %vm318_vm1, %v250_v12, %v251_v42  ;;  %v9870_v12 = vld [vmem:[%s15474_s0 + $0x180] sm:$0xff]  ;;  %v9874_v32 = vpack.c.bf16 %v9372_v16, %v9344_v63  ;;  %v252_v59 = vrot.slane %v9344_v63, 7  ;;  %v253_v44 = vrot.slane %v9372_v16, 7 }
  0x66   :  { %16051 = vst [vmem:[#allocation35_spill] sm:$0xff] %v9826_v0  ;;  %v9856_v45 = vpack.c.bf16 %v385_v60, %v386_v62  ;;  %v513_v18 = vsel %vm479_vm0, %v444_v31, %v445_v27  ;;  %v514_v39 = vsel %vm479_vm0, %v443_v48, %v444_v31  ;;  %16056 = vst [vmem:[#allocation40_spill] sm:$0xff] %v9870_v12  ;;  %v9881_v48 = vld [vmem:[%s15474_s0 + $0x188] sm:$0xff]  ;;  %v9886_v31 = vld [vmem:[%s15474_s0 + $0x190] sm:$0xff]  ;;  %v447_v63 = vrot.slane %v9870_v12, 1 }
  0x67   :  { %16057 = vst [vmem:[#allocation41_spill] sm:$0xff] %v9874_v32  ;;  %16058 = vst [vmem:[#allocation42_spill] sm:$0xff] %v9881_v48  ;;  %v9888_v60 = vpack.c.bf16 %v515_v1, %v516_v6  ;;  %v9890_v62 = vpack.c.bf16 %v513_v18, %v514_v39  ;;  %v448_v16 = vrot.slane %v9881_v48, 1  ;;  %v383_v25 = vsel %vm318_vm1, %v252_v59, %v253_v44 }
  0x68   :  { %16055 = vst [vmem:[#allocation39_spill] sm:$0xff] %v9856_v45  ;;  %16059 = vst [vmem:[#allocation43_spill] sm:$0xff] %v9886_v31  ;;  %v384_v1 = vsel %vm318_vm1, %v251_v42, %v252_v59  ;;  %v9917_v42 = vld [vmem:[%s15474_s0 + $0x198] sm:$0xff]  ;;  %v9922_v59 = vld [vmem:[%s15474_s0 + $0x1a0] sm:$0xff] }
  0x69   :  { %945 = vmatmul.mubr.bf16.gmra.mrb[20].mxu0 %v9826_v0  ;;  %16060 = vst [vmem:[#allocation44_spill] sm:$0xff] %v9888_v60  ;;  %16061 = vst [vmem:[#allocation45_spill] sm:$0xff] %v9890_v62  ;;  %v9908_v39 = vpack.c.bf16 %v383_v25, %v384_v1  ;;  %v510_v48 = vsel %vm479_vm0, %v447_v63, %v448_v16  ;;  %v9926_v25 = vpack.c.bf16 %v9393_v24, %v9384_v22 }
  0x6a   :  { %952 = vmatprep.mubr.bf16.mxu0 %v9834_v61  ;;  %16063 = vst [vmem:[#allocation47_spill] sm:$0xff] %v9917_v42  ;;  %16064 = vst [vmem:[#allocation48_spill] sm:$0xff] %v9922_v59 }
  0x6b   :  { %8347 = vmatmul.mubr.bf16.gmra.mrb[36].mxu1 %v9836_v29  ;;  %v449_v29 = vrot.slane %v9886_v31, 1  ;;  %16062 = vst [vmem:[#allocation46_spill] sm:$0xff] %v9908_v39  ;;  %16065 = vst [vmem:[#allocation49_spill] sm:$0xff] %v9926_v25 }
  0x6c   :  { %8350 = vmatprep.mubr.bf16.mxu1 %v9838_v30  ;;  %v446_v30 = vrot.slane %v9865_v34, 1 }
  0x6d   :  { %v509_v31 = vsel %vm479_vm0, %v448_v16, %v449_v29  ;;  %v9938_v16 = vld [vmem:[%s15474_s0 + $0x1b0] sm:$0xff] }
  0x6e   :  { %v511_v6 = vsel %vm479_vm0, %v446_v30, %v447_v63  ;;  %v512_v18 = vsel %vm479_vm0, %v445_v27, %v446_v30  ;;  %v254_v30 = vrot.slane %v9384_v22, 7  ;;  %v255_v27 = vrot.slane %v9393_v24, 7  ;;  %v9933_v63 = vld [vmem:[%s15474_s0 + $0x1a8] sm:$0xff]  ;;  %16067 = vst [vmem:[#allocation51_spill] sm:$0xff] %v9938_v16 }
  0x6f   :  { %16066 = vst [vmem:[#allocation50_spill] sm:$0xff] %v9933_v63  ;;  %v9940_v1 = vpack.c.bf16 %v511_v6, %v512_v18  ;;  %v451_v22 = vrot.slane %v9922_v59, 1  ;;  %v452_v24 = vrot.slane %v9933_v63, 1  ;;  %v453_v12 = vrot.slane %v9938_v16, 1 }
  0x70   :  { %v382_v6 = vsel %vm318_vm1, %v253_v44, %v254_v30  ;;  %v9969_v44 = vld [vmem:[%s15474_s0 + $0x1b8] sm:$0xff] }
  0x71   :  { %953 = vmatmul.mubr.bf16.gmra.mrb[24].mxu0 %v9856_v45  ;;  %16068 = vst [vmem:[#allocation52_spill] sm:$0xff] %v9940_v1  ;;  %v505_v16 = vsel %vm479_vm0, %v452_v24, %v453_v12  ;;  %v506_v63 = vsel %vm479_vm0, %v451_v22, %v452_v24  ;;  %16071 = vst [vmem:[#allocation55_spill] sm:$0xff] %v9969_v44  ;;  %v9990_v24 = vld [vmem:[%s15474_s0 + $0x1d0] sm:$0xff] }
  0x72   :  { %960 = vmatprep.mubr.bf16.mxu0 %v9874_v32  ;;  %v381_v32 = vsel %vm318_vm1, %v254_v30, %v255_v27  ;;  %v9974_v30 = vld [vmem:[%s15474_s0 + $0x1c0] sm:$0xff]  ;;  %16075 = vst [vmem:[#allocation59_spill] sm:$0xff] %v9990_v24  ;;  %v457_v59 = vrot.slane %v9990_v24, 1 }
  0x73   :  { %8351 = vmatmul.mubr.bf16.gmra.mrb[40].mxu1 %v9888_v60  ;;  %v450_v60 = vrot.slane %v9917_v42, 1  ;;  %v9960_v18 = vpack.c.bf16 %v381_v32, %v382_v6  ;;  %16072 = vst [vmem:[#allocation56_spill] sm:$0xff] %v9974_v30  ;;  %v256_v32 = vrot.slane %v9398_v28, 7 }
  0x74   :  { %8354 = vmatprep.mubr.bf16.mxu1 %v9890_v62  ;;  %v9942_v62 = vpack.c.bf16 %v509_v31, %v510_v48 }
  0x75   :  { %v507_v48 = vsel %vm479_vm0, %v450_v60, %v451_v22  ;;  %v508_v31 = vsel %vm479_vm0, %v449_v29, %v450_v60  ;;  %16070 = vst [vmem:[#allocation54_spill] sm:$0xff] %v9960_v18  ;;  %v9978_v29 = vpack.c.bf16 %v9438_v51, %v9398_v28  ;;  %v257_v60 = vrot.slane %v9438_v51, 7  ;;  %v9985_v22 = vld [vmem:[%s15474_s0 + $0x1c8] sm:$0xff] }
  0x76   :  { %16069 = vst [vmem:[#allocation53_spill] sm:$0xff] %v9942_v62  ;;  %16074 = vst [vmem:[#allocation58_spill] sm:$0xff] %v9985_v22  ;;  %v9992_v6 = vpack.c.bf16 %v507_v48, %v508_v31  ;;  %v455_v28 = vrot.slane %v9974_v30, 1  ;;  %v456_v51 = vrot.slane %v9985_v22, 1  ;;  %v380_v48 = vsel %vm318_vm1, %v255_v27, %v256_v32  ;;  %v10021_v27 = vld [vmem:[%s15474_s0 + $0x1d8] sm:$0xff] }
  0x77   :  { %16073 = vst [vmem:[#allocation57_spill] sm:$0xff] %v9978_v29  ;;  %v379_v42 = vsel %vm318_vm1, %v256_v32, %v257_v60  ;;  %16079 = vst [vmem:[#allocation63_spill] sm:$0xff] %v10021_v27  ;;  %v10026_v32 = vld [vmem:[%s15474_s0 + $0x1e0] sm:$0xff] }
  0x78   :  { %16076 = vst [vmem:[#allocation60_spill] sm:$0xff] %v9992_v6  ;;  %v10012_v31 = vpack.c.bf16 %v379_v42, %v380_v48  ;;  %v501_v24 = vsel %vm479_vm0, %v456_v51, %v457_v59  ;;  %v502_v22 = vsel %vm479_vm0, %v455_v28, %v456_v51  ;;  %16080 = vst [vmem:[#allocation64_spill] sm:$0xff] %v10026_v32  ;;  %v258_v42 = vrot.slane %v9443_v52, 7  ;;  %v10042_v51 = vld [vmem:[%s15474_s0 + $0x1f0] sm:$0xff] }
  0x79   :  { %961 = vmatmul.mubr.bf16.gmra.mrb[28].mxu0 %v9908_v39  ;;  %16083 = vst [vmem:[#allocation67_spill] sm:$0xff] %v10042_v51  ;;  %v461_v30 = vrot.slane %v10042_v51, 1 }
  0x7a   :  { %968 = vmatprep.mubr.bf16.mxu0 %v9926_v25  ;;  %16078 = vst [vmem:[#allocation62_spill] sm:$0xff] %v10012_v31 }
  0x7b   :  { %8355 = vmatmul.mubr.bf16.gmra.mrb[44].mxu1 %v9940_v1  ;;  %v454_v1 = vrot.slane %v9969_v44, 1  ;;  %v8920_v44 = vld [vmem:[%s15473_s1 + $0x168] sm:$0xff]  }
  0x7c   :  { %8358 = vmatprep.mubr.bf16.mxu1 %v9942_v62  ;;  %v9994_v62 = vpack.c.bf16 %v505_v16, %v506_v63  ;;  %8400 = vmatprep.subr.bf16.mxu0 %v8920_v44 }
  0x7d   :  { %v503_v63 = vsel %vm479_vm0, %v454_v1, %v455_v28  ;;  %v504_v16 = vsel %vm479_vm0, %v453_v12, %v454_v1  ;;  %v10030_v12 = vpack.c.bf16 %v9455_v57, %v9443_v52  ;;  %v259_v1 = vrot.slane %v9455_v57, 7  ;;  %v10037_v28 = vld [vmem:[%s15474_s0 + $0x1e8] sm:$0xff]  ;;  %8401 = vmatpush3.bf16.msra.mxu0 %v8920_v44 }
  0x7e   :  { %16077 = vst [vmem:[#allocation61_spill] sm:$0xff] %v9994_v62  ;;  %16082 = vst [vmem:[#allocation66_spill] sm:$0xff] %v10037_v28  ;;  %v10044_v48 = vpack.c.bf16 %v503_v63, %v504_v16  ;;  %v459_v52 = vrot.slane %v10026_v32, 1  ;;  %v460_v57 = vrot.slane %v10037_v28, 1  ;;  %v260_v44 = vrot.slane %v9460_v58, 7 }
  0x7f   :  { %16081 = vst [vmem:[#allocation65_spill] sm:$0xff] %v10030_v12 }
  0x80   :  { %16084 = vst [vmem:[#allocation68_spill] sm:$0xff] %v10044_v48  ;;  %v497_v28 = vsel %vm479_vm0, %v460_v57, %v461_v30 }
  0x81   :  { %969 = vmatmul.mubr.bf16.gmra.mrb[32].mxu0 %v9960_v18 }
  0x82   :  { %976 = vmatprep.mubr.bf16.mxu0 %v9978_v29 }
  0x83   :  { %8359 = vmatmul.mubr.bf16.gmra.mrb[48].mxu1 %v9992_v6  ;;  %v458_v6 = vrot.slane %v10021_v27, 1 }
  0x84   :  { %8362 = vmatprep.mubr.bf16.mxu1 %v9994_v62  ;;  %v10046_v62 = vpack.c.bf16 %v501_v24, %v502_v22  ;;  %v377_v22 = vsel %vm318_vm1, %v258_v42, %v259_v1  ;;  %v378_v24 = vsel %vm318_vm1, %v257_v60, %v258_v42  ;;  %v498_v60 = vsel %vm479_vm0, %v459_v52, %v460_v57  ;;  %v10076_v42 = vld [vmem:[%s15474_s0 + $0x1f8] sm:$0xff]  ;;  %v10097_v57 = vld [vmem:[%s15474_s0 + $0x210] sm:$0xff] }
  0x85   :  { %v499_v63 = vsel %vm479_vm0, %v458_v6, %v459_v52  ;;  %v500_v16 = vsel %vm479_vm0, %v457_v59, %v458_v6  ;;  %v10067_v51 = vpack.c.bf16 %v377_v22, %v378_v24  ;;  %16087 = vst [vmem:[#allocation71_spill] sm:$0xff] %v10076_v42  ;;  %v10085_v59 = vpack.c.bf16 %v9507_v36, %v9460_v58  ;;  %v10092_v52 = vld [vmem:[%s15474_s0 + $0x208] sm:$0xff] }
  0x86   :  { %16085 = vst [vmem:[#allocation69_spill] sm:$0xff] %v10046_v62  ;;  %v261_v6 = vrot.slane %v9507_v36, 7  ;;  %16090 = vst [vmem:[#allocation74_spill] sm:$0xff] %v10092_v52  ;;  %v10099_v22 = vpack.c.bf16 %v499_v63, %v500_v16  ;;  %v10101_v24 = vpack.c.bf16 %v497_v28, %v498_v60  ;;  %v464_v36 = vrot.slane %v10092_v52, 1 }
  0x87   :  { %16086 = vst [vmem:[#allocation70_spill] sm:$0xff] %v10067_v51  ;;  %16089 = vst [vmem:[#allocation73_spill] sm:$0xff] %v10085_v59  ;;  %v465_v32 = vrot.slane %v10097_v57, 1  ;;  %v376_v63 = vsel %vm318_vm1, %v259_v1, %v260_v44  ;;  %v10128_v1 = vld [vmem:[%s15474_s0 + $0x218] sm:$0xff] }
  0x88   :  { %16091 = vst [vmem:[#allocation75_spill] sm:$0xff] %v10097_v57  ;;  %16092 = vst [vmem:[#allocation76_spill] sm:$0xff] %v10099_v22  ;;  %v375_v27 = vsel %vm318_vm1, %v260_v44, %v261_v6  ;;  %v10133_v44 = vld [vmem:[%s15474_s0 + $0x220] sm:$0xff] }
  0x89   :  { %977 = vmatmul.mubr.bf16.gmra.mrb[36].mxu0 %v10012_v31  ;;  %16093 = vst [vmem:[#allocation77_spill] sm:$0xff] %v10101_v24  ;;  %v10119_v60 = vpack.c.bf16 %v375_v27, %v376_v63  ;;  %v493_v57 = vsel %vm479_vm0, %v464_v36, %v465_v32  ;;  %16095 = vst [vmem:[#allocation79_spill] sm:$0xff] %v10128_v1  ;;  %v262_v27 = vrot.slane %v9512_v37, 7 }
  0x8a   :  { %984 = vmatprep.mubr.bf16.mxu0 %v10030_v12  ;;  %16096 = vst [vmem:[#allocation80_spill] sm:$0xff] %v10133_v44 }
  0x8b   :  { %8363 = vmatmul.mubr.bf16.gmra.mrb[52].mxu1 %v10044_v48  ;;  %v462_v48 = vrot.slane %v10076_v42, 1  ;;  %16094 = vst [vmem:[#allocation78_spill] sm:$0xff] %v10119_v60 }
  0x8c   :  { %8366 = vmatprep.mubr.bf16.mxu1 %v10046_v62  ;;  %v10081_v62 = vld [vmem:[%s15474_s0 + $0x200] sm:$0xff] }
  0x8d   :  { %16088 = vst [vmem:[#allocation72_spill] sm:$0xff] %v10081_v62  ;;  %v463_v58 = vrot.slane %v10081_v62, 1  ;;  %v496_v16 = vsel %vm479_vm0, %v461_v30, %v462_v48  ;;  %v10137_v30 = vpack.c.bf16 %v9524_v47, %v9512_v37  ;;  %v467_v37 = vrot.slane %v10133_v44, 1 }
  0x8f   :  { %v495_v28 = vsel %vm479_vm0, %v462_v48, %v463_v58  ;;  %v494_v52 = vsel %vm479_vm0, %v463_v58, %v464_v36  ;;  %16097 = vst [vmem:[#allocation81_spill] sm:$0xff] %v10137_v30  ;;  %v263_v48 = vrot.slane %v9524_v47, 7  ;;  %v10144_v58 = vld [vmem:[%s15474_s0 + $0x228] sm:$0xff]  ;;  %v10149_v36 = vld [vmem:[%s15474_s0 + $0x230] sm:$0xff] }
  0x90   :  { %16098 = vst [vmem:[#allocation82_spill] sm:$0xff] %v10144_v58  ;;  %16099 = vst [vmem:[#allocation83_spill] sm:$0xff] %v10149_v36  ;;  %v10151_v63 = vpack.c.bf16 %v495_v28, %v496_v16  ;;  %v468_v47 = vrot.slane %v10144_v58, 1  ;;  %v469_v62 = vrot.slane %v10149_v36, 1  ;;  %v374_v28 = vsel %vm318_vm1, %v261_v6, %v262_v27  ;;  %v10180_v6 = vld [vmem:[%s15474_s0 + $0x238] sm:$0xff] }
  0x91   :  { %985 = vmatmul.mubr.bf16.gmra.mrb[40].mxu0 %v10067_v51  ;;  %v373_v42 = vsel %vm318_vm1, %v262_v27, %v263_v48  ;;  %16103 = vst [vmem:[#allocation87_spill] sm:$0xff] %v10180_v6  ;;  %v10185_v27 = vld [vmem:[%s15474_s0 + $0x240] sm:$0xff] }
  0x92   :  { %992 = vmatprep.mubr.bf16.mxu0 %v10085_v59  ;;  %16100 = vst [vmem:[#allocation84_spill] sm:$0xff] %v10151_v63  ;;  %v10171_v16 = vpack.c.bf16 %v373_v42, %v374_v28  ;;  %v489_v36 = vsel %vm479_vm0, %v468_v47, %v469_v62  ;;  %v490_v58 = vsel %vm479_vm0, %v467_v37, %v468_v47  ;;  %16104 = vst [vmem:[#allocation88_spill] sm:$0xff] %v10185_v27  ;;  %v10201_v47 = vld [vmem:[%s15474_s0 + $0x250] sm:$0xff] }
  0x93   :  { %8367 = vmatmul.mubr.bf16.gmra.mrb[56].mxu1 %v10099_v22  ;;  %v466_v22 = vrot.slane %v10128_v1, 1  ;;  %v264_v42 = vrot.slane %v9529_v49, 7  ;;  %16107 = vst [vmem:[#allocation91_spill] sm:$0xff] %v10201_v47  ;;  %v473_v44 = vrot.slane %v10201_v47, 1 }
  0x94   :  { %8370 = vmatprep.mubr.bf16.mxu1 %v10101_v24  ;;  %v10153_v24 = vpack.c.bf16 %v493_v57, %v494_v52  ;;  %16102 = vst [vmem:[#allocation86_spill] sm:$0xff] %v10171_v16 }
  0x95   :  { %v491_v52 = vsel %vm479_vm0, %v466_v22, %v467_v37  ;;  %v492_v57 = vsel %vm479_vm0, %v465_v32, %v466_v22  ;;  %v10189_v32 = vpack.c.bf16 %v9565_v55, %v9529_v49  ;;  %v265_v22 = vrot.slane %v9565_v55, 7  ;;  %v10196_v37 = vld [vmem:[%s15474_s0 + $0x248] sm:$0xff] }
  0x96   :  { %16101 = vst [vmem:[#allocation85_spill] sm:$0xff] %v10153_v24  ;;  %16106 = vst [vmem:[#allocation90_spill] sm:$0xff] %v10196_v37  ;;  %v10203_v28 = vpack.c.bf16 %v491_v52, %v492_v57  ;;  %v471_v49 = vrot.slane %v10185_v27, 1  ;;  %v472_v55 = vrot.slane %v10196_v37, 1  ;;  %v372_v52 = vsel %vm318_vm1, %v263_v48, %v264_v42  ;;  %v10232_v48 = vld [vmem:[%s15474_s0 + $0x258] sm:$0xff] }
  0x97   :  { %16105 = vst [vmem:[#allocation89_spill] sm:$0xff] %v10189_v32  ;;  %v371_v1 = vsel %vm318_vm1, %v264_v42, %v265_v22  ;;  %v10237_v42 = vld [vmem:[%s15474_s0 + $0x260] sm:$0xff] }
  0x98   :  { %16108 = vst [vmem:[#allocation92_spill] sm:$0xff] %v10203_v28  ;;  %v10223_v57 = vpack.c.bf16 %v371_v1, %v372_v52  ;;  %v485_v47 = vsel %vm479_vm0, %v472_v55, %v473_v44  ;;  %v486_v37 = vsel %vm479_vm0, %v471_v49, %v472_v55  ;;  %16111 = vst [vmem:[#allocation95_spill] sm:$0xff] %v10237_v42  ;;  %v266_v1 = vrot.slane %v9580_v41, 7  ;;  %v10253_v55 = vld [vmem:[%s15474_s0 + $0x270] sm:$0xff] }
  0x99   :  { %993 = vmatmul.mubr.bf16.gmra.mrb[44].mxu0 %v10119_v60  ;;  %16114 = vst [vmem:[#allocation98_spill] sm:$0xff] %v10253_v55  ;;  %v477_v27 = vrot.slane %v10253_v55, 1 }
  0x9a   :  { %1000 = vmatprep.mubr.bf16.mxu0 %v10137_v30  ;;  %16110 = vst [vmem:[#allocation94_spill] sm:$0xff] %v10223_v57 }
  0x9b   :  { %8371 = vmatmul.mubr.bf16.gmra.mrb[60].mxu1 %v10151_v63  ;;  %v470_v63 = vrot.slane %v10180_v6, 1 }
  0x9c   :  { %8374 = vmatprep.mubr.bf16.mxu1 %v10153_v24  ;;  %v10205_v24 = vpack.c.bf16 %v489_v36, %v490_v58 }
  0x9d   :  { %v487_v58 = vsel %vm479_vm0, %v470_v63, %v471_v49  ;;  %v488_v36 = vsel %vm479_vm0, %v469_v62, %v470_v63  ;;  %v10241_v62 = vpack.c.bf16 %v9585_v26, %v9580_v41  ;;  %v267_v63 = vrot.slane %v9585_v26, 7  ;;  %v10248_v49 = vld [vmem:[%s15474_s0 + $0x268] sm:$0xff] }
  0x9e   :  { %16109 = vst [vmem:[#allocation93_spill] sm:$0xff] %v10205_v24  ;;  %16113 = vst [vmem:[#allocation97_spill] sm:$0xff] %v10248_v49  ;;  %v10255_v52 = vpack.c.bf16 %v487_v58, %v488_v36  ;;  %v475_v41 = vrot.slane %v10237_v42, 1  ;;  %v476_v26 = vrot.slane %v10248_v49, 1  ;;  %v370_v58 = vsel %vm318_vm1, %v265_v22, %v266_v1 }
  0x9f   :  { %16112 = vst [vmem:[#allocation96_spill] sm:$0xff] %v10241_v62  ;;  %v369_v6 = vsel %vm318_vm1, %v266_v1, %v267_v63  ;;  %v10283_v22 = vpack.c.bf16 %v9616_v21, %v9595_v54  ;;  %v268_v1 = vrot.slane %v9595_v54, 7 }
  0xa0   :  { %16115 = vst [vmem:[#allocation99_spill] sm:$0xff] %v10255_v52  ;;  %v10275_v36 = vpack.c.bf16 %v369_v6, %v370_v58  ;;  %v481_v55 = vsel %vm479_vm0, %v476_v26, %v477_v27  ;;  %v482_v49 = vsel %vm479_vm0, %v475_v41, %v476_v26  ;;  %v8923_v6 = vld [vmem:[%s15473_s1 + $0x170] sm:$0xff]   ;;  %v10313_v26 = vpack.c.bf16 %v9633_v8, %v9626_v43 }
  0xa1   :  { %1001 = vmatmul.mubr.bf16.gmra.mrb[48].mxu0 %v10171_v16  ;;  %16118 = vst [vmem:[#allocation102_spill] sm:$0xff] %v10283_v22  ;;  %v10289_v42 = vpack.c.bf16 %v481_v55, %v482_v49  ;;  %v368_v54 = vsel %vm318_vm1, %v267_v63, %v268_v1  ;;  %8402 = vmatprep.subr.bf16.mxu0 %v8923_v6  ;;  %v16121_v49 = vrot.slane %v9186_v13, 1  ;;  %v270_v63 = vrot.slane %v9626_v43, 7 }
  0xa2   :  { %1008 = vmatprep.mubr.bf16.mxu0 %v10189_v32  ;;  %16117 = vst [vmem:[#allocation101_spill] sm:$0xff] %v10275_v36  ;;  %8403 = vmatpush3.bf16.msra.mxu0 %v8923_v6  ;;  %16123 = vst [vmem:[#allocation106_spill] sm:$0xff] %v10313_v26  ;;  %v271_v58 = vrot.slane %v9633_v8, 7  ;;  %v10331_v43 = vpack.c.bf16 %v9681_v17, %v9660_v9  ;;  %v272_v8 = vrot.slane %v9660_v9, 7  ;;  %v8918_v9 = vld [vmem:[%s15473_s1 + $0x188] sm:$0xff]  }
  0xa3   :  { %8375 = vmatmul.mubr.bf16.gmra.mrb[64].mxu1 %v10203_v28  ;;  %v474_v28 = vrot.slane %v10232_v48, 1  ;;  %16120 = vst [vmem:[#allocation104_spill] sm:$0xff] %v10289_v42 }
  0xa4   :  { %8378 = vmatprep.mubr.bf16.mxu1 %v10205_v24  ;;  %v10257_v24 = vpack.c.bf16 %v485_v47, %v486_v37  ;;  %v365_v13 = vsel %vm318_vm1, %v270_v63, %v271_v58  ;;  %16126 = vst [vmem:[#allocation109_spill] sm:$0xff] %v10331_v43  ;;  %v364_v6 = vsel %vm318_vm1, %v271_v58, %v272_v8 }
  0xa5   :  { %v483_v37 = vsel %vm479_vm0, %v474_v28, %v475_v41  ;;  %v484_v47 = vsel %vm479_vm0, %v473_v44, %v474_v28  ;;  %v478_v44 = vrot.slane %v9421_v40, 1  ;;  %v10378_v58 = vpack.c.bf16 %v9742_v7, %v9717_v53 }
  0xa6   :  { %16116 = vst [vmem:[#allocation100_spill] sm:$0xff] %v10257_v24 }
  0xa7   :  { %v559_v55 = vsel %vm479_vm0, %v478_v44, %v16121_v49  ;;  %v8919_v49 = vld [vmem:[%s15473_s1 + $0x190] sm:$0xff]   ;;  %16130 = vst [vmem:[#allocation113_spill] sm:$0xff] %v10378_v58 }
  0xa9   :  { %1009 = vmatmul.mubr.bf16.gmra.mrb[52].mxu0 %v10223_v57 }
  0xaa   :  { %1016 = vmatprep.mubr.bf16.mxu0 %v10241_v62 }
  0xab   :  { %8379 = vmatmul.mubr.bf16.gmra.mrb[68].mxu1 %v10255_v52  ;;  %v10287_v52 = vpack.c.bf16 %v483_v37, %v484_v47 }
  0xac   :  { %8382 = vmatprep.mubr.bf16.mxu1 %v10257_v24  ;;  %v269_v24 = vrot.slane %v9616_v21, 7  ;;  %v480_v21 = vsel %vm479_vm0, %v477_v27, %v478_v44  ;;  %v8916_v44 = vld [vmem:[%s15473_s1 + $0x180] sm:$0xff]  }
  0xad   :  { %16119 = vst [vmem:[#allocation103_spill] sm:$0xff] %v10287_v52  ;;  %v10317_v37 = vpack.c.bf16 %v559_v55, %v480_v21  ;;  %v275_v21 = vrot.slane %v9692_v4, 7 }
  0xae   :  { %v367_v28 = vsel %vm318_vm1, %v268_v1, %v269_v24  ;;  %v366_v27 = vsel %vm318_vm1, %v269_v24, %v270_v63  ;;  %v273_v1 = vrot.slane %v9681_v17, 7 }
  0xaf   :  { %v10309_v41 = vpack.c.bf16 %v367_v28, %v368_v54  ;;  %16124 = vst [vmem:[#allocation107_spill] sm:$0xff] %v10317_v37  ;;  %v10327_v47 = vpack.c.bf16 %v365_v13, %v366_v27  ;;  %v10354_v28 = vpack.c.bf16 %v9692_v4, %v9687_v15  ;;  %v274_v54 = vrot.slane %v9687_v15, 7  ;;  %v8921_v15 = vld [vmem:[%s15473_s1 + $0x198] sm:$0xff]  }
  0xb0   :  { %v363_v24 = vsel %vm318_vm1, %v272_v8, %v273_v1  ;;  %v276_v13 = vrot.slane %v9717_v53, 7  ;;  %v277_v27 = vrot.slane %v9742_v7, 7  ;;  %v8922_v8 = vld [vmem:[%s15473_s1 + $0x1a0] sm:$0xff]   ;;  %v8924_v53 = vld [vmem:[%s15473_s1 + $0x1a8] sm:$0xff]  }
  0xb1   :  { %1017 = vmatmul.mubr.bf16.gmra.mrb[56].mxu0 %v10275_v36  ;;  %16122 = vst [vmem:[#allocation105_spill] sm:$0xff] %v10309_v41  ;;  %16125 = vst [vmem:[#allocation108_spill] sm:$0xff] %v10327_v47  ;;  %v10349_v17 = vpack.c.bf16 %v363_v24, %v364_v6  ;;  %v361_v55 = vsel %vm318_vm1, %v274_v54, %v275_v21  ;;  %v362_v63 = vsel %vm318_vm1, %v273_v1, %v274_v54  ;;  %v8925_v54 = vld [vmem:[%s15473_s1 + $0x1b0] sm:$0xff]  }
  0xb2   :  { %1024 = vmatprep.mubr.bf16.mxu0 %v10283_v22  ;;  %16128 = vst [vmem:[#allocation111_spill] sm:$0xff] %v10354_v28  ;;  %v10373_v4 = vpack.c.bf16 %v361_v55, %v362_v63  ;;  %v359_v1 = vsel %vm318_vm1, %v276_v13, %v277_v27  ;;  %v10402_v24 = vpack.c.bf16 %v9764_v2, %v9752_v11  ;;  %v278_v6 = vrot.slane %v9752_v11, 7  ;;  %v16135_v63 = vld [vmem:[#allocation31_spill] sm:$0xff] }
  0xb3   :  { %8383 = vmatmul.mubr.bf16.gmra.mrb[72].mxu1 %v10287_v52  ;;  %16127 = vst [vmem:[#allocation110_spill] sm:$0xff] %v10349_v17 }
  0xb4   :  { %8386 = vmatprep.mubr.bf16.mxu1 %v10289_v42  ;;  %16129 = vst [vmem:[#allocation112_spill] sm:$0xff] %v10373_v4  ;;  %16132 = vst [vmem:[#allocation115_spill] sm:$0xff] %v10402_v24 }
  0xb9   :  { %1025 = vmatmul.mubr.bf16.gmra.mrb[60].mxu0 %v10309_v41 }
  0xba   :  { %1032 = vmatprep.mubr.bf16.mxu0 %v10313_v26 }
  0xbb   :  { %8387 = vmatmul.mubr.bf16.gmra.mrb[76].mxu1 %v10317_v37  ;;  %v16155_v37 = vld [vmem:[#allocation50_spill] sm:$0xff] }
  0xbc   :  { %1803 = vmatprep.mubr.bf16.mxu1 %v9207_v20  ;;  %v291_v42 = vrot.slane %v16155_v37, 7 }
  0xc1   :  { %1033 = vmatmul.mubr.bf16.gmra.mrb[64].mxu0 %v10327_v47 }
  0xc2   :  { %1040 = vmatprep.mubr.bf16.mxu0 %v10331_v43 }
  0xc3   :  { %1804 = vmatmul.mubr.bf16.vlgmr.msra.gmra.mrb[80].mxu1 %v9498_v33 }
  0xc4   :  { %1811 = vmatprep.mubr.bf16.mxu1 %v9517_v38  ;;  %2671 = vmatpush1.bf16.msra.mxu1 %v8916_v44  ;;  %v360_v44 = vsel %vm318_vm1, %v275_v21, %v276_v13  ;;  %v8926_v21 = vld [vmem:[%s15473_s1 + $0x178] sm:$0xff]   ;;  %v280_v13 = vrot.slane %v16135_v63, 7 }
  0xc5   :  { %2672 = vmatprep.subr.bf16.mxu1 %v16037_v50  ;;  %v10397_v7 = vpack.c.bf16 %v359_v1, %v360_v44  ;;  %8404 = vmatprep.subr.bf16.mxu0 %v8926_v21  ;;  %v16137_v44 = vld [vmem:[#allocation29_spill] sm:$0xff] }
  0xc6   :  { %8405 = vmatpush3.bf16.msra.mxu0 %v8926_v21  ;;  %v283_v21 = vrot.slane %v9819_v46, 7 }
  0xc7   :  { %16131 = vst [vmem:[#allocation114_spill] sm:$0xff] %v10397_v7 }
  0xc8   :  { %2673 = vmatpush1.bf16.msra.mxu1 %v8918_v9  ;;  %v279_v9 = vrot.slane %v9764_v2, 7  ;;  %v358_v2 = vsel %vm318_vm1, %v277_v27, %v278_v6 }
  0xc9   :  { %1041 = vmatmul.mubr.bf16.gmra.mrb[68].mxu0 %v10349_v17  ;;  %2674 = vmatprep.subr.bf16.mxu1 %v16037_v50 }
  0xca   :  { %1048 = vmatprep.mubr.bf16.mxu0 %v10354_v28  ;;  %v357_v11 = vsel %vm318_vm1, %v278_v6, %v279_v9  ;;  %v356_v1 = vsel %vm318_vm1, %v279_v9, %v280_v13 }
  0xcb   :  { %1812 = vmatmul.mubr.bf16.gmra.mrb[84].mxu1 %v9570_v23  ;;  %v10421_v55 = vpack.c.bf16 %v357_v11, %v358_v2  ;;  %v8927_v11 = vld [vmem:[%s15473_s1 + $0x1b8] sm:$0xff]  }
  0xcc   :  { %1819 = vmatprep.mubr.bf16.mxu1 %v9590_v14  ;;  %2675 = vmatpush1.bf16.msra.mxu1 %v8919_v49  ;;  %v16133_v49 = vld [vmem:[#allocation26_spill] sm:$0xff] }
  0xcd   :  { %2676 = vmatprep.subr.bf16.mxu1 %v16037_v50  ;;  %16134 = vst [vmem:[#allocation116_spill] sm:$0xff] %v10421_v55 }
  0xd0   :  { %2677 = vmatpush1.bf16.msra.mxu1 %v8921_v15  ;;  %v10426_v15 = vpack.c.bf16 %v9803_v35, %v16135_v63 }
  0xd1   :  { %1049 = vmatmul.mubr.bf16.gmra.mrb[72].mxu0 %v10373_v4  ;;  %2678 = vmatprep.subr.bf16.mxu1 %v16037_v50 }
  0xd2   :  { %1056 = vmatprep.mubr.bf16.mxu0 %v10378_v58  ;;  %16136 = vst [vmem:[#allocation31_spill] sm:$0xff] %v10426_v15 }
  0xd3   :  { %1820 = vmatmul.mubr.bf16.gmra.mrb[88].mxu1 %v9635_v56 }
  0xd4   :  { %1827 = vmatprep.mubr.bf16.mxu1 %v9655_v5  ;;  %2679 = vmatpush1.bf16.msra.mxu1 %v8922_v8  ;;  %v281_v8 = vrot.slane %v9803_v35, 7  ;;  %v282_v35 = vrot.slane %v9808_v3, 7 }
  0xd5   :  { %2680 = vmatprep.subr.bf16.mxu1 %v16037_v50 }
  0xd6   :  { %v355_v27 = vsel %vm318_vm1, %v280_v13, %v281_v8  ;;  %v353_v9 = vsel %vm318_vm1, %v282_v35, %v283_v21  ;;  %v354_v2 = vsel %vm318_vm1, %v281_v8, %v282_v35  ;;  %v16144_v35 = vld [vmem:[#allocation41_spill] sm:$0xff] }
  0xd7   :  { %v10438_v6 = vpack.c.bf16 %v355_v27, %v356_v1  ;;  %v285_v27 = vrot.slane %v9865_v34, 7 }
  0xd8   :  { %2681 = vmatpush1.bf16.msra.mxu1 %v8924_v53  ;;  %v16138_v53 = vld [vmem:[#allocation30_spill] sm:$0xff] }
  0xd9   :  { %1057 = vmatmul.mubr.bf16.gmra.mrb[76].mxu0 %v10397_v7  ;;  %2682 = vmatprep.subr.bf16.mxu1 %v16037_v50  ;;  %16139 = vst [vmem:[#allocation117_spill] sm:$0xff] %v10438_v6 }
  0xda   :  { %1064 = vmatprep.mubr.bf16.mxu0 %v10402_v24 }
  0xdb   :  { %1828 = vmatmul.mubr.bf16.gmra.mrb[92].mxu1 %v9699_v19 }
  0xdc   :  { %1835 = vmatprep.mubr.bf16.mxu1 %v16133_v49  ;;  %2683 = vmatpush1.bf16.msra.mxu1 %v8925_v54  ;;  %v10442_v54 = vpack.c.bf16 %v9819_v46, %v9808_v3  ;;  %v10458_v46 = vpack.c.bf16 %v353_v9, %v354_v2  ;;  %v16142_v3 = vld [vmem:[#allocation34_spill] sm:$0xff]  ;;  %v16146_v9 = vld [vmem:[#allocation40_spill] sm:$0xff] }
  0xdd   :  { %2684 = vmatprep.subr.bf16.mxu1 %v16037_v50  ;;  %v10462_v63 = vpack.c.bf16 %v9865_v34, %v16142_v3  ;;  %v284_v13 = vrot.slane %v16142_v3, 7  ;;  %v16147_v2 = vld [vmem:[#allocation42_spill] sm:$0xff]  ;;  %v286_v34 = vrot.slane %v16146_v9, 7 }
  0xde   :  { %16140 = vst [vmem:[#allocation118_spill] sm:$0xff] %v10442_v54  ;;  %16141 = vst [vmem:[#allocation119_spill] sm:$0xff] %v10458_v46  ;;  %v10478_v3 = vpack.c.bf16 %v16147_v2, %v16146_v9 }
  0xdf   :  { %16143 = vst [vmem:[#allocation34_spill] sm:$0xff] %v10462_v63  ;;  %v351_v8 = vsel %vm318_vm1, %v284_v13, %v285_v27  ;;  %v352_v1 = vsel %vm318_vm1, %v283_v21, %v284_v13 }
  0xe0   :  { %2685 = vmatpush1.bf16.msra.mxu1 %v8927_v11  ;;  %v10474_v11 = vpack.c.bf16 %v351_v8, %v352_v1  ;;  %16148 = vst [vmem:[#allocation40_spill] sm:$0xff] %v10478_v3  ;;  %v350_v8 = vsel %vm318_vm1, %v285_v27, %v286_v34  ;;  %v8928_v1 = vld [vmem:[%s15473_s1 + $0x1c0] sm:$0xff]  }
  0xe1   :  { %1065 = vmatmul.mubr.bf16.gmra.mrb[80].mxu0 %v10421_v55  ;;  %2686 = vmatprep.subr.bf16.mxu1 %v16037_v50 }
  0xe2   :  { %1072 = vmatprep.mubr.bf16.mxu0 %v10426_v15  ;;  %16145 = vst [vmem:[#allocation120_spill] sm:$0xff] %v10474_v11 }
  0xe3   :  { %1836 = vmatmul.mubr.bf16.gmra.mrb[96].mxu1 %v16137_v44 }
  0xe4   :  { %1843 = vmatprep.mubr.bf16.mxu1 %v16138_v53  ;;  %2687 = vmatpush1.bf16.msra.mxu1 %v8928_v1 }
  0xe5   :  { %2688 = vmatprep.subr.bf16.mxu1 %v16037_v50 }
  0xe9   :  { %1073 = vmatmul.mubr.bf16.gmra.mrb[84].mxu0 %v10438_v6 }
  0xea   :  { %1080 = vmatprep.mubr.bf16.mxu0 %v10442_v54 }
  0xeb   :  { %1844 = vmatmul.mubr.bf16.gmra.mrb[100].mxu1 %v9826_v0 }
  0xec   :  { %1851 = vmatprep.mubr.bf16.mxu1 %v9834_v61  ;;  %v287_v61 = vrot.slane %v16147_v2, 7  ;;  %v16150_v2 = vld [vmem:[#allocation43_spill] sm:$0xff] }
  0xed   :  { %v288_v49 = vrot.slane %v16150_v2, 7 }
  0xee   :  { %v349_v13 = vsel %vm318_vm1, %v286_v34, %v287_v61 }
  0xef   :  { %v10499_v9 = vpack.c.bf16 %v349_v13, %v350_v8  ;;  %v10520_v8 = vld [vmem:[%s15473_s1 + $0x200] sm:$0xff]   ;;  %v348_v1 = vsel %vm318_vm1, %v287_v61, %v288_v49 }
  0xf0   :  { %8486 = vmatprep.subr.bf16.mxu0 %v10520_v8 }
  0xf1   :  { %1081 = vmatmul.mubr.bf16.gmra.mrb[88].mxu0 %v10458_v46  ;;  %16149 = vst [vmem:[#allocation42_spill] sm:$0xff] %v10499_v9 }
  0xf2   :  { %1088 = vmatprep.mubr.bf16.mxu0 %v10462_v63 }
  0xf3   :  { %1852 = vmatmul.mubr.bf16.gmra.mrb[104].mxu1 %v9856_v45 }
  0xf4   :  { %1859 = vmatprep.mubr.bf16.mxu1 %v16144_v35  ;;  %v16151_v35 = vld [vmem:[#allocation47_spill] sm:$0xff] }
  0xf5   :  { %v10503_v45 = vpack.c.bf16 %v16151_v35, %v16150_v2  ;;  %v289_v19 = vrot.slane %v16151_v35, 7 }
  0xf6   :  { %v10482_v0 = vpop.f32.mrb[0].mxu1 }
  0xf7   :  { %v1259_v53 = vpop.f32.mrb[1].mxu1  ;;  %16152 = vst [vmem:[#allocation43_spill] sm:$0xff] %v10503_v45  ;;  %v347_v35 = vsel %vm318_vm1, %v288_v49, %v289_v19 }
  0xf8   :  { %v10484_v44 = vpop.f32.mrb[2].mxu1  ;;  %v10530_v2 = vpack.c.bf16 %v347_v35, %v348_v1  ;;  %v16158_v1 = vld [vmem:[#allocation51_spill] sm:$0xff] }
  0xf9   :  { %1089 = vmatmul.mubr.bf16.gmra.mrb[92].mxu0 %v10474_v11  ;;  %v10487_v21 = vpop.f32.mrb[3].mxu1  ;;  %v292_v23 = vrot.slane %v16158_v1, 7 }
  0xfa   :  { %1096 = vmatprep.mubr.bf16.mxu0 %v10478_v3  ;;  %16153 = vst [vmem:[#allocation47_spill] sm:$0xff] %v10530_v2 }
  0xfb   :  { %1860 = vmatmul.mubr.bf16.gmra.mrb[108].mxu1 %v9908_v39 }
  0xfc   :  { %1867 = vmatprep.mubr.bf16.mxu1 %v9926_v25  ;;  %v16154_v25 = vld [vmem:[#allocation48_spill] sm:$0xff] }
  0xfd   :  { %v10534_v5 = vpack.c.bf16 %v16155_v37, %v16154_v25  ;;  %v290_v56 = vrot.slane %v16154_v25, 7 }
  0xfe   :  { %v10507_v27 = vpop.f32.mrb[4].mxu1 }
  0xff   :  { %v10510_v34 = vpop.f32.mrb[5].mxu1  ;;  %16156 = vst [vmem:[#allocation48_spill] sm:$0xff] %v10534_v5  ;;  %v345_v35 = vsel %vm318_vm1, %v290_v56, %v291_v42  ;;  %v346_v25 = vsel %vm318_vm1, %v289_v19, %v290_v56  ;;  %v8930_v56 = vld [vmem:[%s15473_s1 + $0x1c8] sm:$0xff]  }
 0x100   :  { %v10512_v39 = vpop.f32.mrb[6].mxu1  ;;  %v10554_v37 = vpack.c.bf16 %v345_v35, %v346_v25  ;;  %2689 = vmatpush1.bf16.msra.mxu1 %v8930_v56  ;;  %v344_v25 = vsel %vm318_vm1, %v291_v42, %v292_v23 }
 0x101   :  { %1097 = vmatmul.mubr.bf16.gmra.mrb[96].mxu0 %v10499_v9  ;;  %v10515_v13 = vpop.f32.mrb[7].mxu1  ;;  %2690 = vmatprep.subr.bf16.mxu1 %v16037_v50 }
 0x102   :  { %1104 = vmatprep.mubr.bf16.mxu0 %v10503_v45  ;;  %16157 = vst [vmem:[#allocation50_spill] sm:$0xff] %v10554_v37 }
 0x103   :  { %1868 = vmatmul.mubr.bf16.gmra.mrb[112].mxu1 %v9960_v18 }
 0x104   :  { %1875 = vmatprep.mubr.bf16.mxu1 %v9978_v29  ;;  %v16159_v29 = vld [vmem:[#allocation55_spill] sm:$0xff] }
 0x105   :  { %v10558_v18 = vpack.c.bf16 %v16159_v29, %v16158_v1  ;;  %v293_v38 = vrot.slane %v16159_v29, 7 }
 0x106   :  { %v10538_v52 = vpop.f32.mrb[8].mxu1 }
 0x107   :  { %v10540_v14 = vpop.f32.mrb[9].mxu1  ;;  %16160 = vst [vmem:[#allocation51_spill] sm:$0xff] %v10558_v18  ;;  %v343_v29 = vsel %vm318_vm1, %v292_v23, %v293_v38 }
 0x108   :  { %v10542_v61 = vpop.f32.mrb[10].mxu1 }
 0x109   :  { %1105 = vmatmul.mubr.bf16.gmra.mrb[100].mxu0 %v10530_v2  ;;  %v10545_v49 = vpop.f32.mrb[11].mxu1 }
 0x10a   :  { %1112 = vmatprep.mubr.bf16.mxu0 %v10534_v5  ;;  %v16164_v5 = vld [vmem:[#allocation58_spill] sm:$0xff] }
 0x10b   :  { %1876 = vmatmul.mubr.bf16.gmra.mrb[116].mxu1 %v10012_v31  ;;  %v295_v23 = vrot.slane %v16164_v5, 7 }
 0x10c   :  { %1883 = vmatprep.mubr.bf16.mxu1 %v10030_v12 }
 0x10e   :  { %v10562_v33 = vpop.f32.mrb[12].mxu1 }
 0x10f   :  { %v10564_v20 = vpop.f32.mrb[13].mxu1 }
 0x110   :  { %v10569_v19 = vpop.f32.mrb[14].mxu1 }
 0x111   :  { %1113 = vmatmul.mubr.bf16.gmra.mrb[104].mxu0 %v10554_v37  ;;  %v10572_v35 = vpop.f32.mrb[15].mxu1  ;;  %v10584_v37 = vpack.c.bf16 %v343_v29, %v344_v25 }
 0x112   :  { %1120 = vmatprep.mubr.bf16.mxu0 %v10558_v18  ;;  %v16163_v18 = vld [vmem:[#allocation56_spill] sm:$0xff] }
 0x113   :  { %1884 = vmatmul.mubr.bf16.gmra.mrb[120].mxu1 %v10067_v51  ;;  %16162 = vst [vmem:[#allocation121_spill] sm:$0xff] %v10584_v37  ;;  %v10588_v2 = vpack.c.bf16 %v16164_v5, %v16163_v18  ;;  %v294_v45 = vrot.slane %v16163_v18, 7 }
 0x114   :  { %v906_v1 = vpop.f32.mrb[0].mxu0  ;;  %1891 = vmatprep.mubr.bf16.mxu1 %v10085_v59 }
 0x115   :  { %v10582_v12 = vadd.f32 %v1259_v53, %v906_v1  ;;  %v908_v31 = vpop.f32.mrb[1].mxu0  ;;  %16165 = vst [vmem:[#allocation56_spill] sm:$0xff] %v10588_v2  ;;  %v341_v18 = vsel %vm318_vm1, %v294_v45, %v295_v23  ;;  %v342_v5 = vsel %vm318_vm1, %v293_v38, %v294_v45 }
 0x116   :  { %v909_v56 = vpop.f32.mrb[2].mxu0  ;;  %v10592_v42 = vpop.f32.mrb[16].mxu1  ;;  %v10614_v1 = vpack.c.bf16 %v341_v18, %v342_v5 }
 0x117   :  { %16161 = vst [vmem:[#allocation55_spill] sm:$0xff] %v10582_v12  ;;  %v10595_v51 = vadd.f32 %v10487_v21, %v909_v56  ;;  %v911_v59 = vpop.f32.mrb[3].mxu0  ;;  %v10597_v53 = vpop.f32.mrb[17].mxu1  ;;  %v16170_v12 = vld [vmem:[#allocation63_spill] sm:$0xff] }
 0x118   :  { %v10599_v31 = vpop.f32.mrb[18].mxu1  ;;  %16168 = vst [vmem:[#allocation123_spill] sm:$0xff] %v10614_v1  ;;  %v297_v38 = vrot.slane %v16170_v12, 7 }
 0x119   :  { %16166 = vst [vmem:[#allocation58_spill] sm:$0xff] %v10595_v51  ;;  %1121 = vmatmul.mubr.bf16.gmra.mrb[108].mxu0 %v10584_v37  ;;  %v10602_v29 = vpop.f32.mrb[19].mxu1  ;;  %v16169_v51 = vld [vmem:[#allocation59_spill] sm:$0xff] }
 0x11a   :  { %1128 = vmatprep.mubr.bf16.mxu0 %v10588_v2  ;;  %v10618_v2 = vpack.c.bf16 %v16170_v12, %v16169_v51  ;;  %v296_v37 = vrot.slane %v16169_v51, 7 }
 0x11b   :  { %1892 = vmatmul.mubr.bf16.gmra.mrb[124].mxu1 %v10119_v60 }
 0x11c   :  { %v914_v21 = vpop.f32.mrb[4].mxu0  ;;  %1899 = vmatprep.mubr.bf16.mxu1 %v10137_v30  ;;  %16171 = vst [vmem:[#allocation59_spill] sm:$0xff] %v10618_v2  ;;  %v339_v51 = vsel %vm318_vm1, %v296_v37, %v297_v38  ;;  %v340_v12 = vsel %vm318_vm1, %v295_v23, %v296_v37 }
 0x11d   :  { %v10612_v59 = vadd.f32 %v10482_v0, %v914_v21  ;;  %v916_v25 = vpop.f32.mrb[5].mxu0 }
 0x11e   :  { %v917_v56 = vpop.f32.mrb[6].mxu0  ;;  %v10622_v45 = vpop.f32.mrb[20].mxu1 }
 0x11f   :  { %16167 = vst [vmem:[#allocation122_spill] sm:$0xff] %v10612_v59  ;;  %v10625_v60 = vadd.f32 %v10484_v44, %v917_v56  ;;  %v919_v30 = vpop.f32.mrb[7].mxu0  ;;  %v10627_v0 = vpop.f32.mrb[21].mxu1  ;;  %v10647_v56 = vpack.c.bf16 %v339_v51, %v340_v12  ;;  %v16175_v59 = vld [vmem:[#allocation64_spill] sm:$0xff] }
 0x120   :  { %v10629_v21 = vpop.f32.mrb[22].mxu1  ;;  %v8932_v30 = vld [vmem:[%s15473_s1 + $0x1d0] sm:$0xff]   ;;  %v298_v23 = vrot.slane %v16175_v59, 7 }
 0x121   :  { %16172 = vst [vmem:[#allocation63_spill] sm:$0xff] %v10625_v60  ;;  %1129 = vmatmul.mubr.bf16.gmra.mrb[112].mxu0 %v10614_v1  ;;  %v10632_v18 = vpop.f32.mrb[23].mxu1  ;;  %16174 = vst [vmem:[#allocation125_spill] sm:$0xff] %v10647_v56  ;;  %2691 = vmatpush1.bf16.msra.mxu1 %v8932_v30 }
 0x122   :  { %1136 = vmatprep.mubr.bf16.mxu0 %v10618_v2  ;;  %v16176_v2 = vld [vmem:[#allocation66_spill] sm:$0xff]  ;;  %2692 = vmatprep.subr.bf16.mxu1 %v16037_v50 }
 0x123   :  { %1900 = vmatmul.mubr.bf16.gmra.mrb[128].mxu1 %v10171_v16  ;;  %v10651_v37 = vpack.c.bf16 %v16176_v2, %v16175_v59  ;;  %v299_v16 = vrot.slane %v16176_v2, 7  ;;  %v338_v59 = vsel %vm318_vm1, %v297_v38, %v298_v23 }
 0x124   :  { %v922_v44 = vpop.f32.mrb[8].mxu0  ;;  %1907 = vmatprep.mubr.bf16.mxu1 %v10189_v32 }
 0x125   :  { %v10645_v5 = vadd.f32 %v10510_v34, %v922_v44  ;;  %v924_v25 = vpop.f32.mrb[9].mxu0  ;;  %16177 = vst [vmem:[#allocation64_spill] sm:$0xff] %v10651_v37  ;;  %v337_v2 = vsel %vm318_vm1, %v298_v23, %v299_v16 }
 0x126   :  { %v925_v60 = vpop.f32.mrb[10].mxu0  ;;  %v10655_v1 = vpop.f32.mrb[24].mxu1 }
 0x127   :  { %16173 = vst [vmem:[#allocation124_spill] sm:$0xff] %v10645_v5  ;;  %v10659_v34 = vadd.f32 %v10515_v13, %v925_v60  ;;  %v927_v44 = vpop.f32.mrb[11].mxu0  ;;  %v10661_v51 = vpop.f32.mrb[25].mxu1  ;;  %v16182_v5 = vld [vmem:[#allocation71_spill] sm:$0xff] }
 0x128   :  { %v10663_v12 = vpop.f32.mrb[26].mxu1  ;;  %v10678_v44 = vpack.c.bf16 %v337_v2, %v338_v59  ;;  %v301_v38 = vrot.slane %v16182_v5, 7 }
 0x129   :  { %16178 = vst [vmem:[#allocation66_spill] sm:$0xff] %v10659_v34  ;;  %1137 = vmatmul.mubr.bf16.gmra.mrb[116].mxu0 %v10647_v56  ;;  %v10666_v30 = vpop.f32.mrb[27].mxu1  ;;  %v16181_v34 = vld [vmem:[#allocation67_spill] sm:$0xff] }
 0x12a   :  { %1144 = vmatprep.mubr.bf16.mxu0 %v10651_v37  ;;  %16180 = vst [vmem:[#allocation127_spill] sm:$0xff] %v10678_v44  ;;  %v10682_v37 = vpack.c.bf16 %v16182_v5, %v16181_v34  ;;  %v300_v56 = vrot.slane %v16181_v34, 7 }
 0x12b   :  { %1908 = vmatmul.mubr.bf16.gmra.mrb[132].mxu1 %v10223_v57 }
 0x12c   :  { %v930_v60 = vpop.f32.mrb[12].mxu0  ;;  %1915 = vmatprep.mubr.bf16.mxu1 %v10241_v62  ;;  %16183 = vst [vmem:[#allocation67_spill] sm:$0xff] %v10682_v37  ;;  %v335_v34 = vsel %vm318_vm1, %v300_v56, %v301_v38  ;;  %v336_v5 = vsel %vm318_vm1, %v299_v16, %v300_v56 }
 0x12d   :  { %v10676_v13 = vadd.f32 %v10507_v27, %v930_v60  ;;  %v932_v25 = vpop.f32.mrb[13].mxu0  ;;  %v10708_v59 = vpack.c.bf16 %v335_v34, %v336_v5  ;;  %v8934_v34 = vld [vmem:[%s15473_s1 + $0x1d8] sm:$0xff]  }
 0x12e   :  { %v933_v32 = vpop.f32.mrb[14].mxu0  ;;  %v10686_v23 = vpop.f32.mrb[28].mxu1  ;;  %2693 = vmatpush1.bf16.msra.mxu1 %v8934_v34 }
 0x12f   :  { %16179 = vst [vmem:[#allocation126_spill] sm:$0xff] %v10676_v13  ;;  %v10689_v57 = vadd.f32 %v10512_v39, %v933_v32  ;;  %v935_v62 = vpop.f32.mrb[15].mxu0  ;;  %v10691_v27 = vpop.f32.mrb[29].mxu1  ;;  %16186 = vst [vmem:[#allocation129_spill] sm:$0xff] %v10708_v59  ;;  %v16188_v13 = vld [vmem:[#allocation74_spill] sm:$0xff]  ;;  %2694 = vmatprep.subr.bf16.mxu1 %v16037_v50 }
 0x130   :  { %v10693_v60 = vpop.f32.mrb[30].mxu1  ;;  %v303_v16 = vrot.slane %v16188_v13, 7 }
 0x131   :  { %16184 = vst [vmem:[#allocation71_spill] sm:$0xff] %v10689_v57  ;;  %1145 = vmatmul.mubr.bf16.gmra.mrb[120].mxu0 %v10678_v44  ;;  %v10696_v2 = vpop.f32.mrb[31].mxu1  ;;  %v16187_v57 = vld [vmem:[#allocation72_spill] sm:$0xff] }
 0x132   :  { %1152 = vmatprep.mubr.bf16.mxu0 %v10682_v37  ;;  %v10712_v37 = vpack.c.bf16 %v16188_v13, %v16187_v57  ;;  %v302_v44 = vrot.slane %v16187_v57, 7 }
 0x133   :  { %1916 = vmatmul.mubr.bf16.gmra.mrb[136].mxu1 %v10275_v36 }
 0x134   :  { %v938_v39 = vpop.f32.mrb[16].mxu0  ;;  %1923 = vmatprep.mubr.bf16.mxu1 %v10283_v22  ;;  %16189 = vst [vmem:[#allocation72_spill] sm:$0xff] %v10712_v37  ;;  %v333_v57 = vsel %vm318_vm1, %v302_v44, %v303_v16 }
 0x135   :  { %v10706_v32 = vadd.f32 %v10540_v14, %v938_v39  ;;  %v940_v62 = vpop.f32.mrb[17].mxu0 }
 0x136   :  { %v941_v25 = vpop.f32.mrb[18].mxu0  ;;  %v10716_v56 = vpop.f32.mrb[32].mxu1 }
 0x137   :  { %16185 = vst [vmem:[#allocation128_spill] sm:$0xff] %v10706_v32  ;;  %v10719_v36 = vadd.f32 %v10545_v49, %v941_v25  ;;  %v943_v22 = vpop.f32.mrb[19].mxu0  ;;  %v10721_v14 = vpop.f32.mrb[33].mxu1  ;;  %v16194_v32 = vld [vmem:[#allocation79_spill] sm:$0xff] }
 0x138   :  { %v10726_v5 = vpop.f32.mrb[34].mxu1  ;;  %v334_v22 = vsel %vm318_vm1, %v301_v38, %v302_v44  ;;  %v305_v38 = vrot.slane %v16194_v32, 7 }
 0x139   :  { %16190 = vst [vmem:[#allocation74_spill] sm:$0xff] %v10719_v36  ;;  %1153 = vmatmul.mubr.bf16.gmra.mrb[124].mxu0 %v10708_v59  ;;  %v10729_v39 = vpop.f32.mrb[35].mxu1  ;;  %v10742_v25 = vpack.c.bf16 %v333_v57, %v334_v22  ;;  %v16193_v36 = vld [vmem:[#allocation75_spill] sm:$0xff] }
 0x13a   :  { %1160 = vmatprep.mubr.bf16.mxu0 %v10712_v37  ;;  %v10746_v37 = vpack.c.bf16 %v16194_v32, %v16193_v36  ;;  %v304_v44 = vrot.slane %v16193_v36, 7 }
 0x13b   :  { %1924 = vmatmul.mubr.bf16.gmra.mrb[140].mxu1 %v10309_v41  ;;  %16192 = vst [vmem:[#allocation131_spill] sm:$0xff] %v10742_v25 }
 0x13c   :  { %v946_v49 = vpop.f32.mrb[20].mxu0  ;;  %1931 = vmatprep.mubr.bf16.mxu1 %v10313_v26  ;;  %16195 = vst [vmem:[#allocation75_spill] sm:$0xff] %v10746_v37  ;;  %v331_v36 = vsel %vm318_vm1, %v304_v44, %v305_v38  ;;  %v332_v32 = vsel %vm318_vm1, %v303_v16, %v304_v44 }
 0x13d   :  { %v10740_v13 = vadd.f32 %v10538_v52, %v946_v49  ;;  %v948_v62 = vpop.f32.mrb[21].mxu0 }
 0x13e   :  { %v949_v34 = vpop.f32.mrb[22].mxu0  ;;  %v10750_v59 = vpop.f32.mrb[36].mxu1  ;;  %v10772_v62 = vpack.c.bf16 %v331_v36, %v332_v32 }
 0x13f   :  { %16191 = vst [vmem:[#allocation130_spill] sm:$0xff] %v10740_v13  ;;  %v10753_v41 = vadd.f32 %v10542_v61, %v949_v34  ;;  %v951_v26 = vpop.f32.mrb[23].mxu0  ;;  %v10755_v52 = vpop.f32.mrb[37].mxu1  ;;  %v16200_v13 = vld [vmem:[#allocation82_spill] sm:$0xff] }
 0x140   :  { %v10757_v49 = vpop.f32.mrb[38].mxu1  ;;  %16198 = vst [vmem:[#allocation133_spill] sm:$0xff] %v10772_v62  ;;  %v307_v16 = vrot.slane %v16200_v13, 7 }
 0x141   :  { %16196 = vst [vmem:[#allocation79_spill] sm:$0xff] %v10753_v41  ;;  %1161 = vmatmul.mubr.bf16.gmra.mrb[128].mxu0 %v10742_v25  ;;  %v10760_v57 = vpop.f32.mrb[39].mxu1  ;;  %v16199_v41 = vld [vmem:[#allocation80_spill] sm:$0xff] }
 0x142   :  { %1168 = vmatprep.mubr.bf16.mxu0 %v10746_v37  ;;  %v10776_v37 = vpack.c.bf16 %v16200_v13, %v16199_v41  ;;  %v306_v25 = vrot.slane %v16199_v41, 7 }
 0x143   :  { %1932 = vmatmul.mubr.bf16.gmra.mrb[144].mxu1 %v10327_v47 }
 0x144   :  { %v954_v61 = vpop.f32.mrb[24].mxu0  ;;  %1939 = vmatprep.mubr.bf16.mxu1 %v10331_v43  ;;  %16201 = vst [vmem:[#allocation80_spill] sm:$0xff] %v10776_v37  ;;  %v329_v41 = vsel %vm318_vm1, %v306_v25, %v307_v16  ;;  %v330_v13 = vsel %vm318_vm1, %v305_v38, %v306_v25 }
 0x145   :  { %v10770_v26 = vadd.f32 %v10564_v20, %v954_v61  ;;  %v956_v22 = vpop.f32.mrb[25].mxu0 }
 0x146   :  { %v957_v34 = vpop.f32.mrb[26].mxu0  ;;  %v10780_v44 = vpop.f32.mrb[40].mxu1 }
 0x147   :  { %16197 = vst [vmem:[#allocation132_spill] sm:$0xff] %v10770_v26  ;;  %v10783_v47 = vadd.f32 %v10572_v35, %v957_v34  ;;  %v959_v43 = vpop.f32.mrb[27].mxu0  ;;  %v10785_v20 = vpop.f32.mrb[41].mxu1  ;;  %v10805_v34 = vpack.c.bf16 %v329_v41, %v330_v13  ;;  %v16205_v26 = vld [vmem:[#allocation83_spill] sm:$0xff] }
 0x148   :  { %v10787_v61 = vpop.f32.mrb[42].mxu1  ;;  %v8936_v43 = vld [vmem:[%s15473_s1 + $0x1e0] sm:$0xff]   ;;  %v308_v38 = vrot.slane %v16205_v26, 7 }
 0x149   :  { %16202 = vst [vmem:[#allocation82_spill] sm:$0xff] %v10783_v47  ;;  %1169 = vmatmul.mubr.bf16.gmra.mrb[132].mxu0 %v10772_v62  ;;  %v10790_v36 = vpop.f32.mrb[43].mxu1  ;;  %16204 = vst [vmem:[#allocation135_spill] sm:$0xff] %v10805_v34  ;;  %2695 = vmatpush1.bf16.msra.mxu1 %v8936_v43 }
 0x14a   :  { %1176 = vmatprep.mubr.bf16.mxu0 %v10776_v37  ;;  %v16206_v37 = vld [vmem:[#allocation87_spill] sm:$0xff]  ;;  %2696 = vmatprep.subr.bf16.mxu1 %v16037_v50 }
 0x14b   :  { %1940 = vmatmul.mubr.bf16.gmra.mrb[148].mxu1 %v10349_v17  ;;  %v10809_v25 = vpack.c.bf16 %v16206_v37, %v16205_v26  ;;  %v309_v17 = vrot.slane %v16206_v37, 7  ;;  %v328_v26 = vsel %vm318_vm1, %v307_v16, %v308_v38 }
 0x14c   :  { %v962_v35 = vpop.f32.mrb[28].mxu0  ;;  %1947 = vmatprep.mubr.bf16.mxu1 %v10354_v28 }
 0x14d   :  { %v10803_v32 = vadd.f32 %v10562_v33, %v962_v35  ;;  %v964_v22 = vpop.f32.mrb[29].mxu0  ;;  %16207 = vst [vmem:[#allocation83_spill] sm:$0xff] %v10809_v25  ;;  %v327_v37 = vsel %vm318_vm1, %v308_v38, %v309_v17 }
 0x14e   :  { %v965_v47 = vpop.f32.mrb[30].mxu0  ;;  %v10813_v62 = vpop.f32.mrb[44].mxu1 }
 0x14f   :  { %16203 = vst [vmem:[#allocation134_spill] sm:$0xff] %v10803_v32  ;;  %v10817_v33 = vadd.f32 %v10569_v19, %v965_v47  ;;  %v967_v35 = vpop.f32.mrb[31].mxu0  ;;  %v10819_v41 = vpop.f32.mrb[45].mxu1  ;;  %v16212_v32 = vld [vmem:[#allocation90_spill] sm:$0xff] }
 0x150   :  { %v10821_v13 = vpop.f32.mrb[46].mxu1  ;;  %v10836_v35 = vpack.c.bf16 %v327_v37, %v328_v26  ;;  %v311_v16 = vrot.slane %v16212_v32, 7 }
 0x151   :  { %16208 = vst [vmem:[#allocation87_spill] sm:$0xff] %v10817_v33  ;;  %1177 = vmatmul.mubr.bf16.gmra.mrb[136].mxu0 %v10805_v34  ;;  %v10824_v43 = vpop.f32.mrb[47].mxu1  ;;  %v16211_v33 = vld [vmem:[#allocation88_spill] sm:$0xff] }
 0x152   :  { %1184 = vmatprep.mubr.bf16.mxu0 %v10809_v25  ;;  %16210 = vst [vmem:[#allocation137_spill] sm:$0xff] %v10836_v35  ;;  %v10840_v25 = vpack.c.bf16 %v16212_v32, %v16211_v33  ;;  %v310_v34 = vrot.slane %v16211_v33, 7 }
 0x153   :  { %1948 = vmatmul.mubr.bf16.gmra.mrb[152].mxu1 %v10373_v4 }
 0x154   :  { %v970_v47 = vpop.f32.mrb[32].mxu0  ;;  %1955 = vmatprep.mubr.bf16.mxu1 %v10378_v58  ;;  %16213 = vst [vmem:[#allocation88_spill] sm:$0xff] %v10840_v25  ;;  %v325_v33 = vsel %vm318_vm1, %v310_v34, %v311_v16  ;;  %v326_v32 = vsel %vm318_vm1, %v309_v17, %v310_v34  ;;  %v313_v17 = vrot.slane %v10232_v48, 7 }
 0x155   :  { %v10834_v19 = vadd.f32 %v10597_v53, %v970_v47  ;;  %v972_v22 = vpop.f32.mrb[33].mxu0  ;;  %v10866_v26 = vpack.c.bf16 %v325_v33, %v326_v32  ;;  %v8938_v33 = vld [vmem:[%s15473_s1 + $0x1e8] sm:$0xff]  }
 0x156   :  { %v973_v28 = vpop.f32.mrb[34].mxu0  ;;  %v10844_v38 = vpop.f32.mrb[48].mxu1  ;;  %2697 = vmatpush1.bf16.msra.mxu1 %v8938_v33 }
 0x157   :  { %16209 = vst [vmem:[#allocation136_spill] sm:$0xff] %v10834_v19  ;;  %v10847_v4 = vadd.f32 %v10602_v29, %v973_v28  ;;  %v975_v58 = vpop.f32.mrb[35].mxu0  ;;  %v10849_v53 = vpop.f32.mrb[49].mxu1  ;;  %16217 = vst [vmem:[#allocation140_spill] sm:$0xff] %v10866_v26  ;;  %2698 = vmatprep.subr.bf16.mxu1 %v16037_v50 }
 0x158   :  { %v10851_v47 = vpop.f32.mrb[50].mxu1 }
 0x159   :  { %16214 = vst [vmem:[#allocation90_spill] sm:$0xff] %v10847_v4  ;;  %16215 = vst [vmem:[#allocation138_spill] sm:$0xff] %v10851_v47  ;;  %1185 = vmatmul.mubr.bf16.gmra.mrb[140].mxu0 %v10836_v35  ;;  %v10854_v37 = vpop.f32.mrb[51].mxu1  ;;  %v16218_v4 = vld [vmem:[#allocation91_spill] sm:$0xff] }
 0x15a   :  { %1192 = vmatprep.mubr.bf16.mxu0 %v10840_v25  ;;  %v10870_v19 = vpack.c.bf16 %v10232_v48, %v16218_v4  ;;  %v312_v47 = vrot.slane %v16218_v4, 7 }
 0x15b   :  { %1956 = vmatmul.mubr.bf16.gmra.mrb[156].mxu1 %v10397_v7 }
 0x15c   :  { %v978_v28 = vpop.f32.mrb[36].mxu0  ;;  %1963 = vmatprep.mubr.bf16.mxu1 %v10402_v24  ;;  %16219 = vst [vmem:[#allocation91_spill] sm:$0xff] %v10870_v19  ;;  %v323_v48 = vsel %vm318_vm1, %v312_v47, %v313_v17  ;;  %v324_v4 = vsel %vm318_vm1, %v311_v16, %v312_v47 }
 0x15d   :  { %v10864_v58 = vadd.f32 %v10592_v42, %v978_v28  ;;  %v980_v29 = vpop.f32.mrb[37].mxu0 }
 0x15e   :  { %v981_v22 = vpop.f32.mrb[38].mxu0  ;;  %v10874_v34 = vpop.f32.mrb[52].mxu1 }
 0x15f   :  { %16216 = vst [vmem:[#allocation139_spill] sm:$0xff] %v10864_v58  ;;  %16220 = vst [vmem:[#allocation141_spill] sm:$0xff] %v10874_v34  ;;  %v10877_v7 = vadd.f32 %v10599_v31, %v981_v22  ;;  %v983_v24 = vpop.f32.mrb[39].mxu0  ;;  %v10879_v42 = vpop.f32.mrb[53].mxu1  ;;  %v10900_v22 = vpack.c.bf16 %v323_v48, %v324_v4  ;;  %v16226_v58 = vld [vmem:[#allocation97_spill] sm:$0xff] }
 0x160   :  { %v10884_v32 = vpop.f32.mrb[54].mxu1  ;;  %v315_v47 = vrot.slane %v16226_v58, 7 }
 0x161   :  { %16221 = vst [vmem:[#allocation142_spill] sm:$0xff] %v10877_v7  ;;  %16222 = vst [vmem:[#allocation143_spill] sm:$0xff] %v10884_v32  ;;  %1193 = vmatmul.mubr.bf16.gmra.mrb[144].mxu0 %v10866_v26  ;;  %v10887_v28 = vpop.f32.mrb[55].mxu1  ;;  %v16225_v7 = vld [vmem:[#allocation95_spill] sm:$0xff] }
 0x162   :  { %1200 = vmatprep.mubr.bf16.mxu0 %v10870_v19  ;;  %16224 = vst [vmem:[#allocation145_spill] sm:$0xff] %v10900_v22  ;;  %v10904_v32 = vpack.c.bf16 %v16226_v58, %v16225_v7  ;;  %v314_v16 = vrot.slane %v16225_v7, 7 }
 0x163   :  { %1964 = vmatmul.mubr.bf16.gmra.mrb[160].mxu1 %v10421_v55 }
 0x164   :  { %v986_v24 = vpop.f32.mrb[40].mxu0  ;;  %1971 = vmatprep.mubr.bf16.mxu1 %v10426_v15  ;;  %16227 = vst [vmem:[#allocation95_spill] sm:$0xff] %v10904_v32  ;;  %v321_v7 = vsel %vm318_vm1, %v314_v16, %v315_v47  ;;  %v322_v58 = vsel %vm318_vm1, %v313_v17, %v314_v16 }
 0x165   :  { %v10898_v31 = vadd.f32 %v10627_v0, %v986_v24  ;;  %v988_v29 = vpop.f32.mrb[41].mxu0 }
 0x166   :  { %v989_v33 = vpop.f32.mrb[42].mxu0  ;;  %v10908_v34 = vpop.f32.mrb[56].mxu1  ;;  %v10930_v29 = vpack.c.bf16 %v321_v7, %v322_v58 }
 0x167   :  { %16223 = vst [vmem:[#allocation144_spill] sm:$0xff] %v10898_v31  ;;  %v10911_v55 = vadd.f32 %v10632_v18, %v989_v33  ;;  %v991_v15 = vpop.f32.mrb[43].mxu0  ;;  %v10913_v0 = vpop.f32.mrb[57].mxu1  ;;  %v16232_v31 = vld [vmem:[#allocation98_spill] sm:$0xff] }
 0x168   :  { %v10915_v24 = vpop.f32.mrb[58].mxu1  ;;  %16231 = vst [vmem:[#allocation148_spill] sm:$0xff] %v10930_v29  ;;  %v316_v17 = vrot.slane %v16232_v31, 7 }
 0x169   :  { %16228 = vst [vmem:[#allocation97_spill] sm:$0xff] %v10911_v55  ;;  %16229 = vst [vmem:[#allocation146_spill] sm:$0xff] %v10915_v24  ;;  %1201 = vmatmul.mubr.bf16.gmra.mrb[148].mxu0 %v10900_v22  ;;  %v10918_v48 = vpop.f32.mrb[59].mxu1  ;;  %v9016_v55 = vld [vmem:[%s15474_s0 + $0x278] sm:$0xff] }
 0x16a   :  { %1208 = vmatprep.mubr.bf16.mxu0 %v10904_v32  ;;  %v10936_v24 = vpack.c.bf16 %v9016_v55, %v16232_v31  ;;  %v16235_v55 = vrot.slane %v9421_v40, 7 }
 0x16b   :  { %1972 = vmatmul.mubr.bf16.gmra.mrb[164].mxu1 %v10438_v6 }
 0x16c   :  { %v994_v18 = vpop.f32.mrb[44].mxu0  ;;  %1979 = vmatprep.mubr.bf16.mxu1 %v10442_v54  ;;  %16233 = vst [vmem:[#allocation98_spill] sm:$0xff] %v10936_v24  ;;  %v319_v31 = vsel %vm318_vm1, %v316_v17, %v16235_v55 }
 0x16d   :  { %v10928_v15 = vadd.f32 %v10622_v45, %v994_v18  ;;  %v996_v4 = vpop.f32.mrb[45].mxu0 }
 0x16e   :  { %v997_v33 = vpop.f32.mrb[46].mxu0  ;;  %v10939_v16 = vpop.f32.mrb[60].mxu1  ;;  %v8940_v4 = vld [vmem:[%s15473_s1 + $0x1f0] sm:$0xff]  }
 0x16f   :  { %16230 = vst [vmem:[#allocation147_spill] sm:$0xff] %v10928_v15  ;;  %v10942_v54 = vadd.f32 %v10629_v21, %v997_v33  ;;  %v999_v45 = vpop.f32.mrb[47].mxu0  ;;  %v10944_v18 = vpop.f32.mrb[61].mxu1  ;;  %v320_v21 = vsel %vm318_vm1, %v315_v47, %v316_v17  ;;  %2699 = vmatpush1.bf16.msra.mxu1 %v8940_v4 }
 0x170   :  { %v10946_v7 = vpop.f32.mrb[62].mxu1  ;;  %v10966_v40 = vpack.c.bf16 %v319_v31, %v320_v21  ;;  %2700 = vmatprep.subr.bf16.mxu1 %v16037_v50 }
 0x171   :  { %16234 = vst [vmem:[#allocation149_spill] sm:$0xff] %v10942_v54  ;;  %1209 = vmatmul.mubr.bf16.gmra.mrb[152].mxu0 %v10930_v29  ;;  %v10949_v58 = vpop.f32.mrb[63].mxu1 }
 0x172   :  { %1216 = vmatprep.mubr.bf16.mxu0 %v10936_v24  ;;  %16237 = vst [vmem:[#allocation151_spill] sm:$0xff] %v10966_v40 }
 0x173   :  { %1980 = vmatmul.mubr.bf16.gmra.mrb[168].mxu1 %v10458_v46 }
 0x174   :  { %v1002_v33 = vpop.f32.mrb[48].mxu0  ;;  %1987 = vmatprep.mubr.bf16.mxu1 %v10462_v63 }
 0x175   :  { %v10964_v45 = vadd.f32 %v10661_v51, %v1002_v33  ;;  %v1004_v6 = vpop.f32.mrb[49].mxu0 }
 0x176   :  { %v1005_v55 = vpop.f32.mrb[50].mxu0  ;;  %v10968_v54 = vpop.f32.mrb[64].mxu1  ;;  %v16239_v6 = vld [vmem:[#allocation4_spill] sm:$0xff] }
 0x177   :  { %16236 = vst [vmem:[#allocation150_spill] sm:$0xff] %v10964_v45  ;;  %v10972_v47 = vadd.f32 %v10666_v30, %v1005_v55  ;;  %v1007_v17 = vpop.f32.mrb[51].mxu0  ;;  %v10974_v46 = vpop.f32.mrb[65].mxu1  ;;  %v8942_v55 = vld [vmem:[%s15473_s1 + $0x1f8] sm:$0xff]  }
 0x178   :  { %v10976_v15 = vpop.f32.mrb[66].mxu1  ;;  %2701 = vmatpush1.bf16.msra.mxu1 %v8942_v55 }
 0x179   :  { %16238 = vst [vmem:[#allocation152_spill] sm:$0xff] %v10972_v47  ;;  %1217 = vmatmul.mubr.bf16.gmra.mrb[156].mxu0 %v10966_v40  ;;  %v10979_v51 = vpop.f32.mrb[67].mxu1 }
 0x17a   :  { %8406 = vmatprep.mubr.bf16.mxu0 %v16239_v6 }
 0x17b   :  { %1988 = vmatmul.mubr.bf16.gmra.mrb[172].mxu1 %v10474_v11  ;;  %v16245_v11 = vld [vmem:[#allocation6_spill] sm:$0xff] }
 0x17c   :  { %v1010_v31 = vpop.f32.mrb[52].mxu0  ;;  %1995 = vmatprep.mubr.bf16.mxu1 %v10478_v3  ;;  %v8931_v3 = vld [vmem:[%s15473_s1 + $0x208] sm:$0xff]  }
 0x17d   :  { %v10985_v21 = vadd.f32 %v10655_v1, %v1010_v31  ;;  %v1012_v30 = vpop.f32.mrb[53].mxu0  ;;  %v16244_v31 = vld [vmem:[#allocation5_spill] sm:$0xff] }
 0x17e   :  { %v1013_v4 = vpop.f32.mrb[54].mxu0  ;;  %v10987_v33 = vpop.f32.mrb[68].mxu1 }
 0x17f   :  { %16240 = vst [vmem:[#allocation4_spill] sm:$0xff] %v10985_v21  ;;  %16241 = vst [vmem:[#allocation153_spill] sm:$0xff] %v10987_v33  ;;  %v10993_v17 = vadd.f32 %v10663_v12, %v1013_v4  ;;  %v1015_v63 = vpop.f32.mrb[55].mxu0  ;;  %v10995_v47 = vpop.f32.mrb[69].mxu1  ;;  %v16246_v4 = vld [vmem:[#allocation43_spill] sm:$0xff]  ;;  %v8935_v33 = vld [vmem:[%s15473_s1 + $0x218] sm:$0xff]  }
 0x180   :  { %v11000_v1 = vpop.f32.mrb[70].mxu1  ;;  %v8933_v63 = vld [vmem:[%s15473_s1 + $0x210] sm:$0xff]  }
 0x181   :  { %16242 = vst [vmem:[#allocation154_spill] sm:$0xff] %v10993_v17  ;;  %16243 = vst [vmem:[#allocation155_spill] sm:$0xff] %v11000_v1  ;;  %8407 = vmatmul.mubr.bf16.vlgmr.msra.gmra.mrb[160].mxu0 %v16244_v31  ;;  %v11003_v30 = vpop.f32.mrb[71].mxu1 }
 0x182   :  { %8487 = vmatpush3.bf16.msra.mxu0 %v10520_v8  ;;  %8410 = vmatprep.mubr.bf16.mxu0 %v16245_v11 }
 0x183   :  { %1996 = vmatmul.mubr.bf16.gmra.mrb[176].mxu1 %v10499_v9  ;;  %8488 = vmatprep.subr.bf16.mxu0 %v8931_v3 }
 0x184   :  { %v1018_v12 = vpop.f32.mrb[56].mxu0  ;;  %2003 = vmatprep.mubr.bf16.mxu1 %v16246_v4 }
 0x185   :  { %v11013_v55 = vadd.f32 %v10691_v27, %v1018_v12  ;;  %v1020_v17 = vpop.f32.mrb[57].mxu0  ;;  %v16252_v27 = vld [vmem:[#allocation7_spill] sm:$0xff] }
 0x186   :  { %v1021_v21 = vpop.f32.mrb[58].mxu0  ;;  %8489 = vmatpush3.bf16.msra.mxu0 %v8931_v3  ;;  %v11015_v45 = vpop.f32.mrb[72].mxu1  ;;  %v16254_v3 = vld [vmem:[#allocation8_spill] sm:$0xff]  ;;  %v16255_v12 = vld [vmem:[#allocation47_spill] sm:$0xff] }
 0x187   :  { %16247 = vst [vmem:[#allocation5_spill] sm:$0xff] %v11013_v55  ;;  %16248 = vst [vmem:[#allocation6_spill] sm:$0xff] %v11015_v45  ;;  %v11018_v8 = vadd.f32 %v10696_v2, %v1021_v21  ;;  %v1023_v9 = vpop.f32.mrb[59].mxu0  ;;  %v11020_v1 = vpop.f32.mrb[73].mxu1  ;;  %8490 = vmatprep.subr.bf16.mxu0 %v8933_v63  ;;  %v16256_v21 = vld [vmem:[#allocation48_spill] sm:$0xff] }
 0x188   :  { %16250 = vst [vmem:[#allocation157_spill] sm:$0xff] %v11020_v1  ;;  %v11025_v4 = vpop.f32.mrb[74].mxu1  ;;  %v8937_v9 = vld [vmem:[%s15473_s1 + $0x220] sm:$0xff]   ;;  %v8939_v1 = vld [vmem:[%s15473_s1 + $0x228] sm:$0xff]  }
 0x189   :  { %16249 = vst [vmem:[#allocation156_spill] sm:$0xff] %v11018_v8  ;;  %16251 = vst [vmem:[#allocation158_spill] sm:$0xff] %v11025_v4  ;;  %8411 = vmatmul.mubr.bf16.gmra.mrb[164].mxu0 %v16252_v27  ;;  %v11028_v17 = vpop.f32.mrb[75].mxu1 }
 0x18a   :  { %16253 = vst [vmem:[#allocation7_spill] sm:$0xff] %v11028_v17  ;;  %8414 = vmatprep.mubr.bf16.mxu0 %v16254_v3  ;;  %8491 = vmatpush3.bf16.msra.mxu0 %v8933_v63 }
 0x18b   :  { %2004 = vmatmul.mubr.bf16.gmra.mrb[180].mxu1 %v16255_v12  ;;  %8492 = vmatprep.subr.bf16.mxu0 %v8935_v33 }
 0x18c   :  { %v1026_v2 = vpop.f32.mrb[60].mxu0  ;;  %2011 = vmatprep.mubr.bf16.mxu1 %v16256_v21 }
 0x18d   :  { %v11037_v8 = vadd.f32 %v10686_v23, %v1026_v2  ;;  %v1028_v55 = vpop.f32.mrb[61].mxu0  ;;  %v16262_v23 = vld [vmem:[#allocation9_spill] sm:$0xff]  ;;  %v16264_v2 = vld [vmem:[#allocation10_spill] sm:$0xff] }
 0x18e   :  { %v1029_v4 = vpop.f32.mrb[62].mxu0  ;;  %v11039_v45 = vpop.f32.mrb[76].mxu1  ;;  %8493 = vmatpush3.bf16.msra.mxu0 %v8935_v33  ;;  %v16265_v33 = vld [vmem:[#allocation50_spill] sm:$0xff] }
 0x18f   :  { %16257 = vst [vmem:[#allocation8_spill] sm:$0xff] %v11037_v8  ;;  %16258 = vst [vmem:[#allocation159_spill] sm:$0xff] %v11039_v45  ;;  %v11042_v63 = vadd.f32 %v10693_v60, %v1029_v4  ;;  %v1031_v12 = vpop.f32.mrb[63].mxu0  ;;  %v11044_v17 = vpop.f32.mrb[77].mxu1  ;;  %8494 = vmatprep.subr.bf16.mxu0 %v8937_v9  ;;  %v8941_v60 = vld [vmem:[%s15473_s1 + $0x230] sm:$0xff]  }
 0x190   :  { %16260 = vst [vmem:[#allocation161_spill] sm:$0xff] %v11044_v17  ;;  %v11049_v21 = vpop.f32.mrb[78].mxu1  ;;  %v16266_v12 = vld [vmem:[#allocation51_spill] sm:$0xff]  ;;  %v8943_v17 = vld [vmem:[%s15473_s1 + $0x238] sm:$0xff]  }
 0x191   :  { %16259 = vst [vmem:[#allocation160_spill] sm:$0xff] %v11042_v63  ;;  %16261 = vst [vmem:[#allocation162_spill] sm:$0xff] %v11049_v21  ;;  %8415 = vmatmul.mubr.bf16.gmra.mrb[168].mxu0 %v16262_v23  ;;  %v11052_v55 = vpop.f32.mrb[79].mxu1 }
 0x192   :  { %16263 = vst [vmem:[#allocation9_spill] sm:$0xff] %v11052_v55  ;;  %8418 = vmatprep.mubr.bf16.mxu0 %v16264_v2  ;;  %8495 = vmatpush3.bf16.msra.mxu0 %v8937_v9 }
 0x193   :  { %2012 = vmatmul.mubr.bf16.gmra.mrb[184].mxu1 %v16265_v33  ;;  %8496 = vmatprep.subr.bf16.mxu0 %v8939_v1 }
 0x194   :  { %v1034_v4 = vpop.f32.mrb[64].mxu0  ;;  %2019 = vmatprep.mubr.bf16.mxu1 %v16266_v12  ;;  %v16271_v12 = vld [vmem:[#allocation11_spill] sm:$0xff] }
 0x195   :  { %v11061_v63 = vadd.f32 %v10721_v14, %v1034_v4  ;;  %v1036_v8 = vpop.f32.mrb[65].mxu0  ;;  %v16273_v4 = vld [vmem:[#allocation121_spill] sm:$0xff] }
 0x196   :  { %v1037_v21 = vpop.f32.mrb[66].mxu0  ;;  %v11063_v45 = vpop.f32.mrb[80].mxu1  ;;  %8497 = vmatpush3.bf16.msra.mxu0 %v8939_v1  ;;  %v16272_v8 = vld [vmem:[#allocation12_spill] sm:$0xff] }
 0x197   :  { %16267 = vst [vmem:[#allocation163_spill] sm:$0xff] %v11061_v63  ;;  %16268 = vst [vmem:[#allocation164_spill] sm:$0xff] %v11063_v45  ;;  %v11066_v9 = vadd.f32 %v10729_v39, %v1037_v21  ;;  %v1039_v33 = vpop.f32.mrb[67].mxu0  ;;  %v1807_v55 = vpop.f32.mrb[81].mxu1  ;;  %8498 = vmatprep.subr.bf16.mxu0 %v8941_v60  ;;  %v16274_v1 = vld [vmem:[#allocation56_spill] sm:$0xff] }
 0x198   :  { %v11071_v2 = vpop.f32.mrb[82].mxu1  ;;  %v16280_v45 = vld [vmem:[#allocation16_spill] sm:$0xff] }
 0x199   :  { %16269 = vst [vmem:[#allocation165_spill] sm:$0xff] %v11066_v9  ;;  %16270 = vst [vmem:[#allocation166_spill] sm:$0xff] %v11071_v2  ;;  %8419 = vmatmul.mubr.bf16.gmra.mrb[172].mxu0 %v16271_v12  ;;  %v1810_v14 = vpop.f32.mrb[83].mxu1 }
 0x19a   :  { %8422 = vmatprep.mubr.bf16.mxu0 %v16272_v8  ;;  %8499 = vmatpush3.bf16.msra.mxu0 %v8941_v60 }
 0x19b   :  { %2020 = vmatmul.mubr.bf16.gmra.mrb[188].mxu1 %v16273_v4  ;;  %8500 = vmatprep.subr.bf16.mxu0 %v8943_v17  ;;  %v16279_v4 = vld [vmem:[#allocation15_spill] sm:$0xff] }
 0x19c   :  { %v1042_v39 = vpop.f32.mrb[68].mxu0  ;;  %2027 = vmatprep.mubr.bf16.mxu1 %v16274_v1 }
 0x19d   :  { %v11078_v21 = vadd.f32 %v10716_v56, %v1042_v39  ;;  %v1044_v55 = vpop.f32.mrb[69].mxu0  ;;  %v16281_v56 = vld [vmem:[#allocation123_spill] sm:$0xff] }
 0x19e   :  { %v1045_v33 = vpop.f32.mrb[70].mxu0  ;;  %v11080_v9 = vpop.f32.mrb[84].mxu1  ;;  %8501 = vmatpush3.bf16.msra.mxu0 %v8943_v17  ;;  %v16282_v55 = vld [vmem:[#allocation59_spill] sm:$0xff] }
 0x19f   :  { %16275 = vst [vmem:[#allocation11_spill] sm:$0xff] %v11078_v21  ;;  %16276 = vst [vmem:[#allocation12_spill] sm:$0xff] %v11080_v9  ;;  %v11083_v63 = vadd.f32 %v10726_v5, %v1045_v33  ;;  %v1047_v14 = vpop.f32.mrb[71].mxu0  ;;  %v1815_v2 = vpop.f32.mrb[85].mxu1  ;;  %4502 = vmatprep.subr.bf16.mxu0 %v16037_v50  ;;  %v16288_v9 = vld [vmem:[#allocation20_spill] sm:$0xff] }
 0x1a0   :  { %v11086_v60 = vpop.f32.mrb[86].mxu1 }
 0x1a1   :  { %16277 = vst [vmem:[#allocation167_spill] sm:$0xff] %v11083_v63  ;;  %16278 = vst [vmem:[#allocation168_spill] sm:$0xff] %v11086_v60  ;;  %8423 = vmatmul.mubr.bf16.gmra.mrb[176].mxu0 %v16279_v4  ;;  %v1818_v1 = vpop.f32.mrb[87].mxu1  ;;  %v16287_v60 = vld [vmem:[#allocation19_spill] sm:$0xff] }
 0x1a2   :  { %8426 = vmatprep.mubr.bf16.mxu0 %v16280_v45 }
 0x1a3   :  { %2028 = vmatmul.mubr.bf16.gmra.mrb[192].mxu1 %v16281_v56 }
 0x1a4   :  { %v1050_v39 = vpop.f32.mrb[72].mxu0  ;;  %2035 = vmatprep.mubr.bf16.mxu1 %v16282_v55  ;;  %v16289_v55 = vld [vmem:[#allocation125_spill] sm:$0xff] }
 0x1a5   :  { %v11093_v17 = vadd.f32 %v10755_v52, %v1050_v39  ;;  %v1052_v5 = vpop.f32.mrb[73].mxu0  ;;  %v16290_v39 = vld [vmem:[#allocation64_spill] sm:$0xff] }
 0x1a6   :  { %v1053_v33 = vpop.f32.mrb[74].mxu0  ;;  %v11095_v2 = vpop.f32.mrb[88].mxu1 }
 0x1a7   :  { %16283 = vst [vmem:[#allocation15_spill] sm:$0xff] %v11093_v17  ;;  %16284 = vst [vmem:[#allocation16_spill] sm:$0xff] %v11095_v2  ;;  %v11098_v14 = vadd.f32 %v10760_v57, %v1053_v33  ;;  %v1055_v63 = vpop.f32.mrb[75].mxu0  ;;  %v1823_v21 = vpop.f32.mrb[89].mxu1  ;;  %v16296_v2 = vld [vmem:[#allocation24_spill] sm:$0xff] }
 0x1a8   :  { %v11100_v1 = vpop.f32.mrb[90].mxu1 }
 0x1a9   :  { %16285 = vst [vmem:[#allocation169_spill] sm:$0xff] %v11098_v14  ;;  %16286 = vst [vmem:[#allocation170_spill] sm:$0xff] %v11100_v1  ;;  %8427 = vmatmul.mubr.bf16.gmra.mrb[180].mxu0 %v16287_v60  ;;  %v1826_v56 = vpop.f32.mrb[91].mxu1  ;;  %v16295_v1 = vld [vmem:[#allocation23_spill] sm:$0xff] }
 0x1aa   :  { %8430 = vmatprep.mubr.bf16.mxu0 %v16288_v9 }
 0x1ab   :  { %2036 = vmatmul.mubr.bf16.gmra.mrb[196].mxu1 %v16289_v55 }
 0x1ac   :  { %v1058_v52 = vpop.f32.mrb[76].mxu0  ;;  %2043 = vmatprep.mubr.bf16.mxu1 %v16290_v39  ;;  %v16297_v39 = vld [vmem:[#allocation127_spill] sm:$0xff] }
 0x1ad   :  { %v11107_v5 = vadd.f32 %v10750_v59, %v1058_v52  ;;  %v1060_v17 = vpop.f32.mrb[77].mxu0  ;;  %v16298_v52 = vld [vmem:[#allocation67_spill] sm:$0xff] }
 0x1ae   :  { %v1061_v57 = vpop.f32.mrb[78].mxu0  ;;  %v11109_v33 = vpop.f32.mrb[92].mxu1 }
 0x1af   :  { %16291 = vst [vmem:[#allocation19_spill] sm:$0xff] %v11107_v5  ;;  %16292 = vst [vmem:[#allocation20_spill] sm:$0xff] %v11109_v33  ;;  %v11112_v63 = vadd.f32 %v10757_v49, %v1061_v57  ;;  %v1063_v21 = vpop.f32.mrb[79].mxu0  ;;  %v1831_v14 = vpop.f32.mrb[93].mxu1  ;;  %v16304_v33 = vld [vmem:[#allocation28_spill] sm:$0xff] }
 0x1b0   :  { %v11114_v56 = vpop.f32.mrb[94].mxu1 }
 0x1b1   :  { %16293 = vst [vmem:[#allocation171_spill] sm:$0xff] %v11112_v63  ;;  %16294 = vst [vmem:[#allocation172_spill] sm:$0xff] %v11114_v56  ;;  %8431 = vmatmul.mubr.bf16.gmra.mrb[184].mxu0 %v16295_v1  ;;  %v1834_v55 = vpop.f32.mrb[95].mxu1  ;;  %v16303_v56 = vld [vmem:[#allocation27_spill] sm:$0xff] }
 0x1b2   :  { %8434 = vmatprep.mubr.bf16.mxu0 %v16296_v2 }
 0x1b3   :  { %2044 = vmatmul.mubr.bf16.gmra.mrb[200].mxu1 %v16297_v39 }
 0x1b4   :  { %v1066_v59 = vpop.f32.mrb[80].mxu0  ;;  %2051 = vmatprep.mubr.bf16.mxu1 %v16298_v52  ;;  %v16305_v52 = vld [vmem:[#allocation129_spill] sm:$0xff] }
 0x1b5   :  { %v11121_v17 = vadd.f32 %v10785_v20, %v1066_v59  ;;  %v1068_v5 = vpop.f32.mrb[81].mxu0  ;;  %v16306_v59 = vld [vmem:[#allocation72_spill] sm:$0xff] }
 0x1b6   :  { %v1069_v49 = vpop.f32.mrb[82].mxu0  ;;  %v11123_v57 = vpop.f32.mrb[96].mxu1 }
 0x1b7   :  { %16299 = vst [vmem:[#allocation23_spill] sm:$0xff] %v11121_v17  ;;  %16300 = vst [vmem:[#allocation24_spill] sm:$0xff] %v11123_v57  ;;  %v11126_v14 = vadd.f32 %v10790_v36, %v1069_v49  ;;  %v1071_v21 = vpop.f32.mrb[83].mxu0  ;;  %v1839_v63 = vpop.f32.mrb[97].mxu1  ;;  %v16312_v57 = vld [vmem:[#allocation33_spill] sm:$0xff] }
 0x1b8   :  { %v11128_v55 = vpop.f32.mrb[98].mxu1 }
 0x1b9   :  { %16301 = vst [vmem:[#allocation173_spill] sm:$0xff] %v11126_v14  ;;  %16302 = vst [vmem:[#allocation174_spill] sm:$0xff] %v11128_v55  ;;  %8435 = vmatmul.mubr.bf16.gmra.mrb[188].mxu0 %v16303_v56  ;;  %v1842_v39 = vpop.f32.mrb[99].mxu1  ;;  %v16311_v55 = vld [vmem:[#allocation32_spill] sm:$0xff] }
 0x1ba   :  { %8438 = vmatprep.mubr.bf16.mxu0 %v16304_v33 }
 0x1bb   :  { %2052 = vmatmul.mubr.bf16.gmra.mrb[204].mxu1 %v16305_v52 }
 0x1bc   :  { %v1074_v20 = vpop.f32.mrb[84].mxu0  ;;  %2059 = vmatprep.mubr.bf16.mxu1 %v16306_v59  ;;  %v16313_v59 = vld [vmem:[#allocation131_spill] sm:$0xff] }
 0x1bd   :  { %v11135_v5 = vadd.f32 %v10780_v44, %v1074_v20  ;;  %v1076_v17 = vpop.f32.mrb[85].mxu0  ;;  %v16314_v20 = vld [vmem:[#allocation75_spill] sm:$0xff] }
 0x1be   :  { %v1077_v36 = vpop.f32.mrb[86].mxu0  ;;  %v11137_v49 = vpop.f32.mrb[100].mxu1 }
 0x1bf   :  { %16307 = vst [vmem:[#allocation27_spill] sm:$0xff] %v11135_v5  ;;  %16308 = vst [vmem:[#allocation28_spill] sm:$0xff] %v11137_v49  ;;  %v11140_v63 = vadd.f32 %v10787_v61, %v1077_v36  ;;  %v1079_v21 = vpop.f32.mrb[87].mxu0  ;;  %v1847_v14 = vpop.f32.mrb[101].mxu1  ;;  %v16320_v49 = vld [vmem:[#allocation38_spill] sm:$0xff] }
 0x1c0   :  { %v11142_v39 = vpop.f32.mrb[102].mxu1 }
 0x1c1   :  { %16309 = vst [vmem:[#allocation175_spill] sm:$0xff] %v11140_v63  ;;  %16310 = vst [vmem:[#allocation176_spill] sm:$0xff] %v11142_v39  ;;  %8439 = vmatmul.mubr.bf16.gmra.mrb[192].mxu0 %v16311_v55  ;;  %v1850_v52 = vpop.f32.mrb[103].mxu1  ;;  %v16319_v39 = vld [vmem:[#allocation37_spill] sm:$0xff] }
 0x1c2   :  { %8442 = vmatprep.mubr.bf16.mxu0 %v16312_v57 }
 0x1c3   :  { %2060 = vmatmul.mubr.bf16.gmra.mrb[208].mxu1 %v16313_v59 }
 0x1c4   :  { %v1082_v44 = vpop.f32.mrb[88].mxu0  ;;  %2067 = vmatprep.mubr.bf16.mxu1 %v16314_v20  ;;  %v16321_v20 = vld [vmem:[#allocation133_spill] sm:$0xff] }
 0x1c5   :  { %v11149_v17 = vadd.f32 %v10819_v41, %v1082_v44  ;;  %v1084_v5 = vpop.f32.mrb[89].mxu0  ;;  %v16322_v44 = vld [vmem:[#allocation80_spill] sm:$0xff] }
 0x1c6   :  { %v1085_v61 = vpop.f32.mrb[90].mxu0  ;;  %v11151_v36 = vpop.f32.mrb[104].mxu1 }
 0x1c7   :  { %16315 = vst [vmem:[#allocation32_spill] sm:$0xff] %v11149_v17  ;;  %16316 = vst [vmem:[#allocation33_spill] sm:$0xff] %v11151_v36  ;;  %v11154_v14 = vadd.f32 %v10824_v43, %v1085_v61  ;;  %v1087_v21 = vpop.f32.mrb[91].mxu0  ;;  %v1855_v63 = vpop.f32.mrb[105].mxu1  ;;  %v16326_v36 = vld [vmem:[#allocation45_spill] sm:$0xff] }
 0x1c8   :  { %v11156_v52 = vpop.f32.mrb[106].mxu1 }
 0x1c9   :  { %16317 = vst [vmem:[#allocation177_spill] sm:$0xff] %v11154_v14  ;;  %16318 = vst [vmem:[#allocation178_spill] sm:$0xff] %v11156_v52  ;;  %8443 = vmatmul.mubr.bf16.gmra.mrb[196].mxu0 %v16319_v39  ;;  %v1858_v59 = vpop.f32.mrb[107].mxu1  ;;  %v16325_v52 = vld [vmem:[#allocation44_spill] sm:$0xff] }
 0x1ca   :  { %8446 = vmatprep.mubr.bf16.mxu0 %v16320_v49 }
 0x1cb   :  { %2068 = vmatmul.mubr.bf16.gmra.mrb[212].mxu1 %v16321_v20 }
 0x1cc   :  { %v1090_v41 = vpop.f32.mrb[92].mxu0  ;;  %2075 = vmatprep.mubr.bf16.mxu1 %v16322_v44  ;;  %v16327_v44 = vld [vmem:[#allocation135_spill] sm:$0xff] }
 0x1cd   :  { %v11163_v5 = vadd.f32 %v10813_v62, %v1090_v41  ;;  %v1092_v17 = vpop.f32.mrb[93].mxu0  ;;  %v16328_v41 = vld [vmem:[#allocation83_spill] sm:$0xff] }
 0x1ce   :  { %v1093_v43 = vpop.f32.mrb[94].mxu0  ;;  %v11165_v61 = vpop.f32.mrb[108].mxu1 }
 0x1cf   :  { %16323 = vst [vmem:[#allocation37_spill] sm:$0xff] %v11163_v5  ;;  %v11168_v63 = vadd.f32 %v10821_v13, %v1093_v43  ;;  %v1095_v21 = vpop.f32.mrb[95].mxu0  ;;  %v1863_v14 = vpop.f32.mrb[109].mxu1 }
 0x1d0   :  { %v11170_v59 = vpop.f32.mrb[110].mxu1 }
 0x1d1   :  { %16324 = vst [vmem:[#allocation38_spill] sm:$0xff] %v11168_v63  ;;  %8447 = vmatmul.mubr.bf16.gmra.mrb[200].mxu0 %v16325_v52  ;;  %v1866_v20 = vpop.f32.mrb[111].mxu1  ;;  %v16332_v52 = vld [vmem:[#allocation53_spill] sm:$0xff] }
 0x1d2   :  { %8450 = vmatprep.mubr.bf16.mxu0 %v16326_v36  ;;  %v16331_v36 = vld [vmem:[#allocation52_spill] sm:$0xff] }
 0x1d3   :  { %2076 = vmatmul.mubr.bf16.gmra.mrb[216].mxu1 %v16327_v44 }
 0x1d4   :  { %v1098_v62 = vpop.f32.mrb[96].mxu0  ;;  %2083 = vmatprep.mubr.bf16.mxu1 %v16328_v41 }
 0x1d5   :  { %v11177_v17 = vadd.f32 %v10849_v53, %v1098_v62  ;;  %v1100_v5 = vpop.f32.mrb[97].mxu0 }
 0x1d6   :  { %v1101_v13 = vpop.f32.mrb[98].mxu0  ;;  %v11179_v43 = vpop.f32.mrb[112].mxu1 }
 0x1d7   :  { %16329 = vst [vmem:[#allocation179_spill] sm:$0xff] %v11177_v17  ;;  %v11182_v14 = vadd.f32 %v10854_v37, %v1101_v13  ;;  %v1103_v21 = vpop.f32.mrb[99].mxu0  ;;  %v1871_v63 = vpop.f32.mrb[113].mxu1  ;;  %v16336_v17 = vld [vmem:[#allocation60_spill] sm:$0xff] }
 0x1d8   :  { %v11184_v20 = vpop.f32.mrb[114].mxu1  ;;  %v16334_v63 = vld [vmem:[#allocation138_spill] sm:$0xff] }
 0x1d9   :  { %16330 = vst [vmem:[#allocation180_spill] sm:$0xff] %v11182_v14  ;;  %8451 = vmatmul.mubr.bf16.gmra.mrb[204].mxu0 %v16331_v36  ;;  %v1874_v44 = vpop.f32.mrb[115].mxu1 }
 0x1da   :  { %8454 = vmatprep.mubr.bf16.mxu0 %v16332_v52  ;;  %v16337_v52 = vld [vmem:[#allocation61_spill] sm:$0xff] }
 0x1db   :  { %2084 = vmatmul.mubr.bf16.gmra.mrb[220].mxu1 %v10836_v35 }
 0x1dc   :  { %v1106_v53 = vpop.f32.mrb[100].mxu0  ;;  %2091 = vmatprep.mubr.bf16.mxu1 %v10840_v25  ;;  %v109_v25 = vadd.s32 8, %v9174_v10 }
 0x1dd   :  { %v11191_v5 = vadd.f32 %v10844_v38, %v1106_v53  ;;  %v1108_v62 = vpop.f32.mrb[101].mxu0  ;;  %v16338_v38 = vlaneseq }
 0x1de   :  { %v1109_v37 = vpop.f32.mrb[102].mxu0  ;;  %v11193_v13 = vpop.f32.mrb[116].mxu1  ;;  %vm115_vm2 = vcmp.le.s32.totalorder %v109_v25, 8 }
 0x1df   :  { %16333 = vst [vmem:[#allocation52_spill] sm:$0xff] %v11191_v5  ;;  %v11196_v21 = vadd.f32 %v16334_v63, %v1109_v37  ;;  %v1111_v41 = vpop.f32.mrb[103].mxu0  ;;  %v1879_v14 = vpop.f32.mrb[117].mxu1  ;;  %v111_v53 = vand.u32 127, %v16338_v38  ;;  %v141_v63 = vsub.s32 1, %v9174_v10 }
 0x1e0   :  { %v11198_v44 = vpop.f32.mrb[118].mxu1 }
 0x1e1   :  { %16335 = vst [vmem:[#allocation138_spill] sm:$0xff] %v11196_v21  ;;  %8455 = vmatmul.mubr.bf16.gmra.mrb[208].mxu0 %v16336_v17  ;;  %v1882_v35 = vpop.f32.mrb[119].mxu1  ;;  %vm118_vm3 = vcmp.ge.s32.totalorder %v111_v53, 1  ;;  %vm121_vm5 = vcmp.le.s32.totalorder %v111_v53, 8 }
 0x1e2   :  { %8458 = vmatprep.mubr.bf16.mxu0 %v16337_v52  ;;  %vm120_vm4 = vmand %vm115_vm2, %vm118_vm3 }
 0x1e3   :  { %2092 = vmatmul.mubr.bf16.gmra.mrb[224].mxu1 %v10866_v26  ;;  %vm123_vm6 = vmand %vm120_vm4, %vm121_vm5  ;;  %v9104_v26 = vmov 0.0  }
 0x1e4   :  { %v1114_v62 = vpop.f32.mrb[104].mxu0  ;;  %2099 = vmatprep.mubr.bf16.mxu1 %v10870_v19  ;;  %v11217_v21 = vsel %vm123_vm6, 1.0, %v9104_v26  ;;  %vm119_vm8 = vmand %vm112_vm7, %vm118_vm3 }
 0x1e5   :  { %v11207_v41 = vadd.f32 %v10879_v42, %v1114_v62  ;;  %v1116_v14 = vpop.f32.mrb[105].mxu0  ;;  %v11223_v62 = vrot.slane %v11217_v21, %v141_v63  ;;  %vm122_vm9 = vmand %vm119_vm8, %vm121_vm5 }
 0x1e6   :  { %v1117_v35 = vpop.f32.mrb[106].mxu0  ;;  %v11210_v37 = vpop.f32.mrb[120].mxu1  ;;  %v16342_v14 = vld [vmem:[#allocation68_spill] sm:$0xff] }
 0x1e7   :  { %16339 = vst [vmem:[#allocation181_spill] sm:$0xff] %v11207_v41  ;;  %v11215_v38 = vadd.f32 %v10887_v28, %v1117_v35  ;;  %v1119_v19 = vpop.f32.mrb[107].mxu0  ;;  %v1887_v25 = vpop.f32.mrb[121].mxu1  ;;  %v16343_v41 = vld [vmem:[#allocation69_spill] sm:$0xff]  ;;  %236 = vbcast.lane.b32.xlu1 %v11223_v62, 264  ;;  %v11236_v28 = vsel %vm122_vm9, 1.0, %v9104_v26 }
 0x1e8   :  { %v11219_v42 = vpop.f32.mrb[122].mxu1  ;;  %v11234_v19 = vld [vmem:[%s15475_s2 + $0x80] sm:$0xff]   ;;  %v16344_v25 = vld [vmem:[#allocation141_spill] sm:$0xff]  ;;  %v152_v26 = vsub.s32 2, %v9174_v10 }
 0x1e9   :  { %16340 = vst [vmem:[#allocation182_spill] sm:$0xff] %v11215_v38  ;;  %16341 = vst [vmem:[#allocation183_spill] sm:$0xff] %v11219_v42  ;;  %8459 = vmatmul.mubr.bf16.gmra.mrb[212].mxu0 %v16342_v14  ;;  %v1890_v5 = vpop.f32.mrb[123].mxu1  ;;  %8582 = vmatprep.subr.bf16.mxu1 %v11234_v19  ;;  %v16346_v14 = vld [vmem:[#allocation143_spill] sm:$0xff]  ;;  %v163_v42 = vsub.s32 3, %v9174_v10 }
 0x1ea   :  { %8462 = vmatprep.mubr.bf16.mxu0 %v16343_v41  ;;  %v11240_v5 = vrot.slane %v11236_v28, %v141_v63 }
 0x1eb   :  { %2100 = vmatmul.mubr.bf16.gmra.mrb[228].mxu1 %v10900_v22 }
 0x1ec   :  { %v1122_v35 = vpop.f32.mrb[108].mxu0  ;;  %2107 = vmatprep.mubr.bf16.mxu1 %v10904_v32  ;;  %144 = vbcast.lane.b32.xlu1 %v11240_v5, 256 }
 0x1ed   :  { %v11243_v53 = vadd.f32 %v16344_v25, %v1122_v35  ;;  %v1124_v38 = vpop.f32.mrb[109].mxu0  ;;  %v11256_v35 = vrot.slane %v11236_v28, %v152_v26 }
 0x1ee   :  { %v1125_v22 = vpop.f32.mrb[110].mxu0  ;;  %v11246_v41 = vpop.f32.mrb[124].mxu1  ;;  %v16348_v38 = vld [vmem:[#allocation76_spill] sm:$0xff] }
 0x1ef   :  { %16345 = vst [vmem:[#allocation141_spill] sm:$0xff] %v11243_v53  ;;  %v11251_v52 = vadd.f32 %v16346_v14, %v1125_v22  ;;  %v1127_v32 = vpop.f32.mrb[111].mxu0  ;;  %v1895_v17 = vpop.f32.mrb[125].mxu1  ;;  %v16349_v53 = vld [vmem:[#allocation77_spill] sm:$0xff] }
 0x1f0   :  { %v11253_v63 = vpop.f32.mrb[126].mxu1  ;;  %155 = vbcast.lane.b32.xlu1 %v11256_v35, 256  ;;  %v11265_v32 = vrot.slane %v11236_v28, %v163_v42 }
 0x1f1   :  { %16347 = vst [vmem:[#allocation143_spill] sm:$0xff] %v11251_v52  ;;  %8463 = vmatmul.mubr.bf16.gmra.mrb[216].mxu0 %v16348_v38  ;;  %v1898_v25 = vpop.f32.mrb[127].mxu1  ;;  %v174_v52 = vsub.s32 4, %v9174_v10 }
 0x1f2   :  { %8466 = vmatprep.mubr.bf16.mxu0 %v16349_v53 }
 0x1f3   :  { %2108 = vmatmul.mubr.bf16.gmra.mrb[232].mxu1 %v10930_v29  ;;  %v11280_v42 = vrot.slane %v11236_v28, %v174_v52 }
 0x1f4   :  { %v1130_v22 = vpop.f32.mrb[112].mxu0  ;;  %2115 = vmatprep.mubr.bf16.mxu1 %v10936_v24  ;;  %166 = vbcast.lane.b32.xlu1 %v11265_v32, 256 }
 0x1f5   :  { %v11268_v17 = vadd.f32 %v10913_v0, %v1130_v22  ;;  %v1132_v14 = vpop.f32.mrb[113].mxu0  ;;  %v16354_v0 = vld [vmem:[#allocation84_spill] sm:$0xff] }
 0x1f6   :  { %v1133_v26 = vpop.f32.mrb[114].mxu0  ;;  %v11270_v25 = vpop.f32.mrb[128].mxu1  ;;  %v16355_v14 = vld [vmem:[#allocation85_spill] sm:$0xff] }
 0x1f7   :  { %16350 = vst [vmem:[#allocation184_spill] sm:$0xff] %v11268_v17  ;;  %16351 = vst [vmem:[#allocation185_spill] sm:$0xff] %v11270_v25  ;;  %v11275_v53 = vadd.f32 %v10918_v48, %v1133_v26  ;;  %v1135_v29 = vpop.f32.mrb[115].mxu0  ;;  %v1903_v38 = vpop.f32.mrb[129].mxu1  ;;  %v185_v17 = vsub.s32 5, %v9174_v10  ;;  %v16356_v26 = vld [vmem:[#allocation3_spill] sm:$0xff] }
 0x1f8   :  { %v11277_v24 = vpop.f32.mrb[130].mxu1  ;;  %177 = vbcast.lane.b32.xlu1 %v11280_v42, 256 }
 0x1f9   :  { %16352 = vst [vmem:[#allocation186_spill] sm:$0xff] %v11275_v53  ;;  %16353 = vst [vmem:[#allocation187_spill] sm:$0xff] %v11277_v24  ;;  %8467 = vmatmul.mubr.bf16.gmra.mrb[220].mxu0 %v16354_v0  ;;  %v1906_v22 = vpop.f32.mrb[131].mxu1  ;;  %v11289_v29 = vrot.slane %v11236_v28, %v185_v17  ;;  %v16359_v0 = vld [vmem:[#allocation146_spill] sm:$0xff] }
 0x1fa   :  { %8470 = vmatprep.mubr.bf16.mxu0 %v16355_v14  ;;  %v196_v14 = vsub.s32 6, %v9174_v10 }
 0x1fb   :  { %2116 = vmatmul.mubr.bf16.gmra.mrb[236].mxu1 %v10966_v40 }
 0x1fc   :  { %v1138_v48 = vpop.f32.mrb[116].mxu0  ;;  %2702 = vmatprep.mubr.bf16.mxu1 %v16356_v26  ;;  %188 = vbcast.lane.b32.xlu1 %v11289_v29, 256  ;;  %v11304_v17 = vrot.slane %v11236_v28, %v196_v14 }
 0x1fd   :  { %v11292_v52 = vadd.f32 %v10908_v34, %v1138_v48  ;;  %v1140_v38 = vpop.f32.mrb[117].mxu0  ;;  %v16361_v34 = vld [vmem:[#allocation92_spill] sm:$0xff] }
 0x1fe   :  { %v1141_v53 = vpop.f32.mrb[118].mxu0  ;;  %v11294_v22 = vpop.f32.mrb[132].mxu1  ;;  %v16362_v38 = vld [vmem:[#allocation93_spill] sm:$0xff] }
 0x1ff   :  { %16357 = vst [vmem:[#allocation3_spill] sm:$0xff] %v11292_v52  ;;  %16358 = vst [vmem:[#allocation188_spill] sm:$0xff] %v11294_v22  ;;  %v11299_v24 = vadd.f32 %v16359_v0, %v1141_v53  ;;  %v1143_v40 = vpop.f32.mrb[119].mxu0  ;;  %v1911_v25 = vpop.f32.mrb[133].mxu1  ;;  %v207_v52 = vsub.s32 7, %v9174_v10  ;;  %v16363_v22 = vld [vmem:[#allocation13_spill] sm:$0xff] }
 0x200   :  { %v11301_v26 = vpop.f32.mrb[134].mxu1  ;;  %199 = vbcast.lane.b32.xlu1 %v11304_v17, 256  ;;  %v16364_v0 = vld [vmem:[#allocation14_spill] sm:$0xff] }
 0x201   :  { %16360 = vst [vmem:[#allocation146_spill] sm:$0xff] %v11299_v24  ;;  %8471 = vmatmul.mubr.bf16.gmra.mrb[224].mxu0 %v16361_v34  ;;  %v1914_v48 = vpop.f32.mrb[135].mxu1  ;;  %v11314_v40 = vrot.slane %v11236_v28, %v207_v52 }
 0x202   :  { %8474 = vmatprep.mubr.bf16.mxu0 %v16362_v38  ;;  %v130_v38 = vsub.s32 0, %v9174_v10  ;;  %v16369_v10 = vld [vmem:[#allocation17_spill] sm:$0xff] }
 0x203   :  { %2703 = vmatmul.mubr.bf16.vlgmr.msra.gmra.mrb[240].mxu1 %v16363_v22 }
 0x204   :  { %v1146_v53 = vpop.f32.mrb[120].mxu0  ;;  %2710 = vmatprep.mubr.bf16.mxu1 %v16364_v0  ;;  %8583 = vmatpush3.bf16.msra.mxu1 %v11234_v19  ;;  %v11329_v52 = vrot.slane %v11217_v21, %v130_v38 }
 0x205   :  { %v11317_v25 = vadd.f32 %v10944_v18, %v1146_v53  ;;  %v1148_v14 = vpop.f32.mrb[121].mxu0  ;;  %210 = vbcast.lane.b32.xlu1 %v11314_v40, 256  ;;  %v16367_v18 = vld [vmem:[#allocation99_spill] sm:$0xff] }
 0x206   :  { %v1149_v48 = vpop.f32.mrb[122].mxu0  ;;  %v11319_v24 = vpop.f32.mrb[136].mxu1  ;;  %v131_v14 = vrot.slane %v11236_v28, %v130_v38 }
 0x207   :  { %16365 = vst [vmem:[#allocation13_spill] sm:$0xff] %v11317_v25  ;;  %v11324_v22 = vadd.f32 %v10949_v58, %v1149_v48  ;;  %v1151_v0 = vpop.f32.mrb[123].mxu0  ;;  %v1919_v34 = vpop.f32.mrb[137].mxu1  ;;  %v16368_v25 = vld [vmem:[#allocation100_spill] sm:$0xff]  ;;  %v16370_v48 = vld [vmem:[#allocation18_spill] sm:$0xff] }
 0x208   :  { %v11326_v19 = vpop.f32.mrb[138].mxu1  ;;  %133 = vbcast.lane.b32.xlu0 %v131_v14, 256 }
 0x209   :  { %16366 = vst [vmem:[#allocation14_spill] sm:$0xff] %v11324_v22  ;;  %8475 = vmatmul.mubr.bf16.gmra.mrb[228].mxu0 %v16367_v18  ;;  %v1922_v53 = vpop.f32.mrb[139].mxu1  ;;  %221 = vbcast.lane.b32.xlu1 %v11329_v52, 256  ;;  %v16373_v18 = vld [vmem:[#allocation104_spill] sm:$0xff] }
 0x20a   :  { %8478 = vmatprep.mubr.bf16.mxu0 %v16368_v25  ;;  %v16372_v25 = vld [vmem:[#allocation103_spill] sm:$0xff] }
 0x20b   :  { %2711 = vmatmul.mubr.bf16.gmra.mrb[244].mxu1 %v16369_v10 }
 0x20c   :  { %v1154_v58 = vpop.f32.mrb[124].mxu0  ;;  %2718 = vmatprep.mubr.bf16.mxu1 %v16370_v48  ;;  %137 = vbcast.lane.b32.xlu0 %v131_v14, 264 }
 0x20d   :  { %v11338_v34 = vadd.f32 %v10939_v16, %v1154_v58  ;;  %v1156_v21 = vpop.f32.mrb[125].mxu0  ;;  %232 = vbcast.lane.b32.xlu1 %v11223_v62, 256  ;;  %v8949_v16 = vld [vmem:[%s15475_s2 + $0x88] sm:$0xff]   ;;  %v16374_v58 = vld [vmem:[#allocation21_spill] sm:$0xff]  ;;  %v16375_v62 = vld [vmem:[#allocation22_spill] sm:$0xff] }
 0x20e   :  { %v1157_v0 = vpop.f32.mrb[126].mxu0  ;;  %v11340_v22 = vpop.f32.mrb[140].mxu1  ;;  %8584 = vmatprep.subr.bf16.mxu1 %v8949_v16 }
 0x20f   :  { %v11344_v28 = vadd.f32 %v10946_v7, %v1157_v0  ;;  %v1159_v38 = vpop.f32.mrb[127].mxu0  ;;  %v1927_v53 = vpop.f32.mrb[141].mxu1  ;;  %8585 = vmatpush3.bf16.msra.mxu1 %v8949_v16 }
 0x210   :  { %v11346_v10 = vpop.f32.mrb[142].mxu1  ;;  %148 = vbcast.lane.b32.xlu0 %v11240_v5, 264 }
 0x211   :  { %16371 = vst [vmem:[#allocation17_spill] sm:$0xff] %v11344_v28  ;;  %8479 = vmatmul.mubr.bf16.gmra.mrb[232].mxu0 %v16372_v25  ;;  %v1930_v48 = vpop.f32.mrb[143].mxu1 }
 0x212   :  { %8482 = vmatprep.mubr.bf16.mxu0 %v16373_v18 }
 0x213   :  { %2719 = vmatmul.mubr.bf16.gmra.mrb[248].mxu1 %v16374_v58  ;;  %v16376_v58 = vld [vmem:[#allocation107_spill] sm:$0xff] }
 0x214   :  { %v1162_v7 = vpop.f32.mrb[128].mxu0  ;;  %2726 = vmatprep.mubr.bf16.mxu1 %v16375_v62  ;;  %159 = vbcast.lane.b32.xlu0 %v11256_v35, 264  ;;  %v8945_v35 = vld [vmem:[%s15475_s2] sm:$0xff]  }
 0x215   :  { %v11357_v14 = vadd.f32 %v10974_v46, %v1162_v7  ;;  %v1164_v21 = vpop.f32.mrb[129].mxu0  ;;  %v16377_v46 = vld [vmem:[#allocation25_spill] sm:$0xff]  ;;  %v16378_v7 = vld [vmem:[#allocation26_spill] sm:$0xff] }
 0x216   :  { %v1165_v0 = vpop.f32.mrb[130].mxu0  ;;  %v11359_v38 = vpop.f32.mrb[144].mxu1 }
 0x217   :  { %v11362_v53 = vadd.f32 %v10979_v51, %v1165_v0  ;;  %v1167_v48 = vpop.f32.mrb[131].mxu0  ;;  %v1935_v28 = vpop.f32.mrb[145].mxu1 }
 0x218   :  { %v11365_v5 = vpop.f32.mrb[146].mxu1  ;;  %170 = vbcast.lane.b32.xlu0 %v11265_v32, 264 }
 0x219   :  { %8483 = vmatmul.mubr.bf16.gmra.mrb[236].mxu0 %v16376_v58  ;;  %v1938_v62 = vpop.f32.mrb[147].mxu1 }
 0x21a   :  { %8502 = vmatprep.mubr.bf16.mxu0 %v16239_v6 }
 0x21b   :  { %2727 = vmatmul.mubr.bf16.gmra.mrb[252].mxu1 %v16377_v46  ;;  %v8946_v46 = vld [vmem:[%s15475_s2 + $0x8] sm:$0xff]  }
 0x21c   :  { %v1170_v16 = vpop.f32.mrb[132].mxu0  ;;  %2734 = vmatprep.mubr.bf16.mxu1 %v16378_v7  ;;  %181 = vbcast.lane.b32.xlu0 %v11280_v42, 264  ;;  %v16382_v7 = vld [vmem:[#allocation30_spill] sm:$0xff] }
 0x21d   :  { %v11373_v51 = vadd.f32 %v10968_v54, %v1170_v16  ;;  %v1172_v28 = vpop.f32.mrb[133].mxu0  ;;  %v16381_v16 = vld [vmem:[#allocation29_spill] sm:$0xff] }
 0x21e   :  { %v1173_v21 = vpop.f32.mrb[134].mxu0  ;;  %v11378_v0 = vpop.f32.mrb[148].mxu1  ;;  %v8947_v28 = vld [vmem:[%s15475_s2 + $0x10] sm:$0xff]  }
 0x21f   :  { %16379 = vst [vmem:[#allocation18_spill] sm:$0xff] %v11373_v51  ;;  %v11381_v6 = vadd.f32 %v10976_v15, %v1173_v21  ;;  %v1175_v48 = vpop.f32.mrb[135].mxu0  ;;  %v1943_v62 = vpop.f32.mrb[149].mxu1 }
 0x220   :  { %v11384_v32 = vpop.f32.mrb[150].mxu1  ;;  %192 = vbcast.lane.b32.xlu0 %v11289_v29, 264 }
 0x221   :  { %16380 = vst [vmem:[#allocation103_spill] sm:$0xff] %v11381_v6  ;;  %8503 = vmatmul.mubr.bf16.vlgmr.msra.gmra.mrb[240].mxu0 %v16244_v31  ;;  %v1946_v54 = vpop.f32.mrb[151].mxu1 }
 0x222   :  { %8506 = vmatprep.mubr.bf16.mxu0 %v16245_v11  ;;  %4503 = vmatpush1.bf16.msra.mxu0 %v8945_v35  ;;  %v8948_v54 = vld [vmem:[%s15475_s2 + $0x18] sm:$0xff]  }
 0x223   :  { %2735 = vmatmul.mubr.bf16.gmra.mrb[0].mxu1 %v16381_v16  ;;  %4504 = vmatprep.subr.bf16.mxu0 %v16037_v50  ;;  %v16386_v16 = vld [vmem:[#allocation36_spill] sm:$0xff] }
 0x224   :  { %v1178_v15 = vpop.f32.mrb[136].mxu0  ;;  %2742 = vmatprep.mubr.bf16.mxu1 %v16382_v7  ;;  %203 = vbcast.lane.b32.xlu0 %v11304_v17, 264  ;;  %v16387_v17 = vld [vmem:[#allocation153_spill] sm:$0xff]  ;;  %v8950_v7 = vld [vmem:[%s15475_s2 + $0x20] sm:$0xff]  }
 0x225   :  { %v11396_v42 = vadd.f32 %v10995_v47, %v1178_v15  ;;  %v1180_v31 = vpop.f32.mrb[137].mxu0 }
 0x226   :  { %v1181_v21 = vpop.f32.mrb[138].mxu0  ;;  %v11401_v11 = vpop.f32.mrb[152].mxu1  ;;  %4505 = vmatpush1.bf16.msra.mxu0 %v8946_v46 }
 0x227   :  { %16383 = vst [vmem:[#allocation104_spill] sm:$0xff] %v11396_v42  ;;  %v11404_v35 = vadd.f32 %v11003_v30, %v1181_v21  ;;  %v1183_v48 = vpop.f32.mrb[139].mxu0  ;;  %v1951_v62 = vpop.f32.mrb[153].mxu1  ;;  %4506 = vmatprep.subr.bf16.mxu0 %v16037_v50  ;;  %v16385_v30 = vld [vmem:[#allocation35_spill] sm:$0xff] }
 0x228   :  { %v11407_v29 = vpop.f32.mrb[154].mxu1  ;;  %214 = vbcast.lane.b32.xlu0 %v11314_v40, 264 }
 0x229   :  { %16384 = vst [vmem:[#allocation21_spill] sm:$0xff] %v11404_v35  ;;  %8507 = vmatmul.mubr.bf16.gmra.mrb[244].mxu0 %v16252_v27  ;;  %v1954_v47 = vpop.f32.mrb[155].mxu1 }
 0x22a   :  { %8510 = vmatprep.mubr.bf16.mxu0 %v16254_v3  ;;  %4507 = vmatpush1.bf16.msra.mxu0 %v8947_v28  ;;  %v16389_v28 = vld [vmem:[#allocation155_spill] sm:$0xff] }
 0x22b   :  { %2743 = vmatmul.mubr.bf16.gmra.mrb[4].mxu1 %v16385_v30  ;;  %4508 = vmatprep.subr.bf16.mxu0 %v16037_v50  ;;  %v16391_v30 = vld [vmem:[#allocation10_spill] sm:$0xff] }
 0x22c   :  { %v1186_v46 = vpop.f32.mrb[140].mxu0  ;;  %2750 = vmatprep.mubr.bf16.mxu1 %v16386_v16  ;;  %225 = vbcast.lane.b32.xlu0 %v11329_v52, 264 }
 0x22d   :  { %v11420_v15 = vadd.f32 %v16387_v17, %v1186_v46  ;;  %v1188_v27 = vpop.f32.mrb[141].mxu0  ;;  %v16392_v46 = vld [vmem:[#allocation39_spill] sm:$0xff]  ;;  %v16393_v17 = vld [vmem:[#allocation41_spill] sm:$0xff] }
 0x22e   :  { %v1189_v31 = vpop.f32.mrb[142].mxu0  ;;  %v11425_v3 = vpop.f32.mrb[156].mxu1  ;;  %4509 = vmatpush1.bf16.msra.mxu0 %v8948_v54  ;;  %v8951_v54 = vld [vmem:[%s15475_s2 + $0x28] sm:$0xff]   ;;  %v16394_v27 = vld [vmem:[#allocation157_spill] sm:$0xff] }
 0x22f   :  { %16388 = vst [vmem:[#allocation22_spill] sm:$0xff] %v11420_v15  ;;  %v11428_v21 = vadd.f32 %v16389_v28, %v1189_v31  ;;  %v1191_v48 = vpop.f32.mrb[143].mxu0  ;;  %v1959_v62 = vpop.f32.mrb[157].mxu1  ;;  %4510 = vmatprep.subr.bf16.mxu0 %v16037_v50 }
 0x230   :  { %v11431_v40 = vpop.f32.mrb[158].mxu1  ;;  %v16396_v48 = vld [vmem:[#allocation7_spill] sm:$0xff] }
 0x231   :  { %16390 = vst [vmem:[#allocation107_spill] sm:$0xff] %v11428_v21  ;;  %8511 = vmatmul.mubr.bf16.gmra.mrb[248].mxu0 %v16262_v23  ;;  %v1962_v47 = vpop.f32.mrb[159].mxu1 }
 0x232   :  { %8514 = vmatprep.mubr.bf16.mxu0 %v16391_v30  ;;  %4511 = vmatpush1.bf16.msra.mxu0 %v8950_v7  ;;  %v8952_v7 = vld [vmem:[%s15475_s2 + $0x30] sm:$0xff]  }
 0x233   :  { %2751 = vmatmul.mubr.bf16.gmra.mrb[8].mxu1 %v16392_v46  ;;  %4512 = vmatprep.subr.bf16.mxu0 %v16037_v50 }
 0x234   :  { %v1194_v16 = vpop.f32.mrb[144].mxu0  ;;  %2758 = vmatprep.mubr.bf16.mxu1 %v16393_v17  ;;  %v8954_v17 = vld [vmem:[%s15475_s2 + $0x90] sm:$0xff]  }
 0x235   :  { %v11443_v31 = vadd.f32 %v16394_v27, %v1194_v16  ;;  %v1196_v52 = vpop.f32.mrb[145].mxu0  ;;  %v16398_v27 = vld [vmem:[#allocation46_spill] sm:$0xff]  ;;  %8586 = vmatprep.subr.bf16.mxu1 %v8954_v17 }
 0x236   :  { %v1197_v23 = vpop.f32.mrb[146].mxu0  ;;  %v11445_v28 = vpop.f32.mrb[160].mxu1  ;;  %4513 = vmatpush1.bf16.msra.mxu0 %v8951_v54  ;;  %v8953_v54 = vld [vmem:[%s15475_s2 + $0x38] sm:$0xff]   ;;  %8587 = vmatpush3.bf16.msra.mxu1 %v8954_v17 }
 0x237   :  { %16395 = vst [vmem:[#allocation25_spill] sm:$0xff] %v11443_v31  ;;  %v11451_v62 = vadd.f32 %v16396_v48, %v1197_v23  ;;  %v1199_v47 = vpop.f32.mrb[147].mxu0  ;;  %v1967_v30 = vpop.f32.mrb[161].mxu1  ;;  %4514 = vmatprep.subr.bf16.mxu0 %v16037_v50  ;;  %v16399_v23 = vld [vmem:[#allocation49_spill] sm:$0xff] }
 0x238   :  { %v11454_v46 = vpop.f32.mrb[162].mxu1  ;;  %v8955_v30 = vld [vmem:[%s15475_s2 + $0x40] sm:$0xff]  }
 0x239   :  { %16397 = vst [vmem:[#allocation26_spill] sm:$0xff] %v11451_v62  ;;  %8515 = vmatmul.mubr.bf16.gmra.mrb[252].mxu0 %v16271_v12  ;;  %v1970_v16 = vpop.f32.mrb[163].mxu1  ;;  %v16400_v12 = vld [vmem:[#allocation6_spill] sm:$0xff] }
 0x23a   :  { %8518 = vmatprep.mubr.bf16.mxu0 %v16272_v8  ;;  %4515 = vmatpush1.bf16.msra.mxu0 %v8952_v7  ;;  %v16402_v16 = vld [vmem:[#allocation158_spill] sm:$0xff] }
 0x23b   :  { %2759 = vmatmul.mubr.bf16.gmra.mrb[12].mxu1 %v16398_v27  ;;  %4516 = vmatprep.subr.bf16.mxu0 %v16037_v50 }
 0x23c   :  { %v1202_v52 = vpop.f32.mrb[148].mxu0  ;;  %2766 = vmatprep.mubr.bf16.mxu1 %v16399_v23 }
 0x23d   :  { %v11468_v48 = vadd.f32 %v16400_v12, %v1202_v52  ;;  %v1204_v8 = vpop.f32.mrb[149].mxu0  ;;  %v16405_v12 = vld [vmem:[#allocation57_spill] sm:$0xff] }
 0x23e   :  { %v1205_v7 = vpop.f32.mrb[150].mxu0  ;;  %v11470_v47 = vpop.f32.mrb[164].mxu1  ;;  %4517 = vmatpush1.bf16.msra.mxu0 %v8953_v54  ;;  %v16404_v54 = vld [vmem:[#allocation54_spill] sm:$0xff]  ;;  %v16406_v8 = vld [vmem:[#allocation161_spill] sm:$0xff] }
 0x23f   :  { %16401 = vst [vmem:[#allocation29_spill] sm:$0xff] %v11468_v48  ;;  %v11476_v27 = vadd.f32 %v16402_v16, %v1205_v7  ;;  %v1207_v21 = vpop.f32.mrb[151].mxu0  ;;  %v1975_v62 = vpop.f32.mrb[165].mxu1  ;;  %4518 = vmatprep.subr.bf16.mxu0 %v16037_v50  ;;  %v16413_v48 = vld [vmem:[#allocation162_spill] sm:$0xff] }
 0x240   :  { %v11479_v23 = vpop.f32.mrb[166].mxu1 }
 0x241   :  { %16403 = vst [vmem:[#allocation30_spill] sm:$0xff] %v11476_v27  ;;  %8519 = vmatmul.mubr.bf16.gmra.mrb[0].mxu0 %v16279_v4  ;;  %v1978_v17 = vpop.f32.mrb[167].mxu1  ;;  %v16408_v27 = vld [vmem:[#allocation9_spill] sm:$0xff] }
 0x242   :  { %8522 = vmatprep.mubr.bf16.mxu0 %v16280_v45  ;;  %4519 = vmatpush1.bf16.msra.mxu0 %v8955_v30  ;;  %v8956_v30 = vld [vmem:[%s15475_s2 + $0x48] sm:$0xff]  }
 0x243   :  { %2767 = vmatmul.mubr.bf16.gmra.mrb[16].mxu1 %v16404_v54  ;;  %4520 = vmatprep.subr.bf16.mxu0 %v16037_v50 }
 0x244   :  { %v1210_v52 = vpop.f32.mrb[152].mxu0  ;;  %2774 = vmatprep.mubr.bf16.mxu1 %v16405_v12 }
 0x245   :  { %v11487_v21 = vadd.f32 %v16406_v8, %v1210_v52  ;;  %v1212_v62 = vpop.f32.mrb[153].mxu0  ;;  %v16410_v52 = vld [vmem:[#allocation62_spill] sm:$0xff]  ;;  %v16411_v8 = vld [vmem:[#allocation65_spill] sm:$0xff] }
 0x246   :  { %v1213_v7 = vpop.f32.mrb[154].mxu0  ;;  %v11489_v16 = vpop.f32.mrb[168].mxu1  ;;  %4521 = vmatpush1.bf16.msra.mxu0 %v8956_v30  ;;  %v16412_v62 = vld [vmem:[#allocation159_spill] sm:$0xff]  ;;  %v8957_v30 = vld [vmem:[%s15475_s2 + $0x50] sm:$0xff]  }
 0x247   :  { %16407 = vst [vmem:[#allocation35_spill] sm:$0xff] %v11487_v21  ;;  %v11492_v4 = vadd.f32 %v16408_v27, %v1213_v7  ;;  %v1215_v17 = vpop.f32.mrb[155].mxu0  ;;  %v1983_v45 = vpop.f32.mrb[169].mxu1  ;;  %4522 = vmatprep.subr.bf16.mxu0 %v16037_v50 }
 0x248   :  { %v11497_v54 = vpop.f32.mrb[170].mxu1 }
 0x249   :  { %16409 = vst [vmem:[#allocation36_spill] sm:$0xff] %v11492_v4  ;;  %8523 = vmatmul.mubr.bf16.gmra.mrb[4].mxu0 %v16287_v60  ;;  %v1986_v12 = vpop.f32.mrb[171].mxu1 }
 0x24a   :  { %8526 = vmatprep.mubr.bf16.mxu0 %v16288_v9  ;;  %4523 = vmatpush1.bf16.msra.mxu0 %v8957_v30 }
 0x24b   :  { %2775 = vmatmul.mubr.bf16.gmra.mrb[20].mxu1 %v16410_v52  ;;  %v16414_v52 = vld [vmem:[#allocation70_spill] sm:$0xff]  ;;  %4524 = vmatprep.subr.bf16.mxu0 %v16037_v50 }
 0x24c   :  { %v1218_v27 = vpop.f32.mrb[156].mxu0  ;;  %2782 = vmatprep.mubr.bf16.mxu1 %v16411_v8  ;;  %v16415_v8 = vld [vmem:[#allocation73_spill] sm:$0xff] }
 0x24d   :  { %v1572_v7 = vadd.f32 %v16412_v62, %v1218_v27  ;;  %v1220_v17 = vpop.f32.mrb[157].mxu0 }
 0x24e   :  { %v1221_v45 = vpop.f32.mrb[158].mxu0  ;;  %v11505_v4 = vpop.f32.mrb[172].mxu1 }
 0x24f   :  { %v1575_v21 = vadd.f32 %v16413_v48, %v1221_v45  ;;  %v1223_v60 = vpop.f32.mrb[159].mxu0  ;;  %v1991_v12 = vpop.f32.mrb[173].mxu1  ;;  %v16416_v48 = vld [vmem:[#allocation12_spill] sm:$0xff] }
 0x250   :  { %v11508_v15 = vpop.f32.mrb[174].mxu1  ;;  %v16417_v45 = vld [vmem:[#allocation164_spill] sm:$0xff] }
 0x251   :  { %8527 = vmatmul.mubr.bf16.gmra.mrb[8].mxu0 %v16295_v1  ;;  %v1994_v9 = vpop.f32.mrb[175].mxu1 }
 0x252   :  { %8530 = vmatprep.mubr.bf16.mxu0 %v16296_v2  ;;  %v16418_v9 = vld [vmem:[#allocation55_spill] sm:$0xff]  ;;  %v16420_v2 = vld [vmem:[#allocation168_spill] sm:$0xff] }
 0x253   :  { %2783 = vmatmul.mubr.bf16.gmra.mrb[24].mxu1 %v16414_v52 }
 0x254   :  { %v8408_v27 = vpop.f32.mrb[160].mxu0  ;;  %2790 = vmatprep.mubr.bf16.mxu1 %v16415_v8  ;;  %v16421_v8 = vld [vmem:[#allocation166_spill] sm:$0xff] }
 0x255   :  { %v2167_v62 = vadd.f32 %v8408_v27, %v16416_v48  ;;  %v2158_v17 = vpop.f32.mrb[161].mxu0  ;;  %v16422_v27 = vld [vmem:[#allocation58_spill] sm:$0xff] }
 0x256   :  { %v2159_v1 = vadd.f32 %v2158_v17, %v16417_v45  ;;  %v8409_v60 = vpop.f32.mrb[162].mxu0  ;;  %v11520_v12 = vpop.f32.mrb[176].mxu1 }
 0x257   :  { %v11523_v31 = vadd.f32 %v2167_v62, %v16418_v9  ;;  %v2170_v6 = vadd.f32 %v8409_v60, %v16420_v2  ;;  %v2161_v52 = vpop.f32.mrb[163].mxu0  ;;  %v1999_v30 = vpop.f32.mrb[177].mxu1  ;;  %v8958_v62 = vld [vmem:[%s15475_s2 + $0x58] sm:$0xff]   ;;  %v16427_v9 = vld [vmem:[#allocation20_spill] sm:$0xff] }
 0x258   :  { %v11526_v35 = vadd.f32 %v2159_v1, %v1572_v7  ;;  %v2162_v51 = vadd.f32 %v2161_v52, %v16421_v8  ;;  %v11529_v42 = vpop.f32.mrb[178].mxu1  ;;  %v16425_v7 = vld [vmem:[#allocation78_spill] sm:$0xff]  ;;  %v16426_v60 = vld [vmem:[#allocation81_spill] sm:$0xff]  ;;  %4525 = vmatpush1.bf16.msra.mxu0 %v8958_v62  ;;  %v16431_v8 = vld [vmem:[#allocation172_spill] sm:$0xff] }
 0x259   :  { %16419 = vst [vmem:[#allocation153_spill] sm:$0xff] %v11523_v31  ;;  %v11532_v48 = vadd.f32 %v2170_v6, %v16422_v27  ;;  %v2002_v17 = vpop.f32.mrb[179].mxu1  ;;  %8531 = vmatmul.mubr.bf16.gmra.mrb[12].mxu0 %v16303_v56  ;;  %4526 = vmatprep.subr.bf16.mxu0 %v16037_v50  ;;  %v16428_v56 = vld [vmem:[#allocation16_spill] sm:$0xff]  ;;  %v16434_v62 = vld [vmem:[#allocation170_spill] sm:$0xff] }
 0x25a   :  { %v11535_v45 = vadd.f32 %v2162_v51, %v1575_v21  ;;  %8534 = vmatprep.mubr.bf16.mxu0 %v16304_v33  ;;  %v16429_v33 = vld [vmem:[#allocation124_spill] sm:$0xff]  ;;  %v16435_v31 = vld [vmem:[#allocation66_spill] sm:$0xff] }
 0x25b   :  { %16423 = vst [vmem:[#allocation155_spill] sm:$0xff] %v11532_v48  ;;  %2791 = vmatmul.mubr.bf16.gmra.mrb[28].mxu1 %v16425_v7  ;;  %v16432_v48 = vld [vmem:[#allocation122_spill] sm:$0xff] }
 0x25c   :  { %16424 = vst [vmem:[#allocation10_spill] sm:$0xff] %v11535_v45  ;;  %v8412_v1 = vpop.f32.mrb[164].mxu0  ;;  %2798 = vmatprep.mubr.bf16.mxu1 %v16426_v60 }
 0x25d   :  { %v2183_v6 = vadd.f32 %v8412_v1, %v16427_v9  ;;  %v2174_v2 = vpop.f32.mrb[165].mxu0 }
 0x25e   :  { %v2175_v51 = vadd.f32 %v2174_v2, %v16428_v56  ;;  %v8413_v21 = vpop.f32.mrb[166].mxu0  ;;  %v11546_v52 = vpop.f32.mrb[180].mxu1  ;;  %v16437_v56 = vld [vmem:[#allocation63_spill] sm:$0xff] }
 0x25f   :  { %v11549_v30 = vadd.f32 %v2183_v6, %v16429_v33  ;;  %v2186_v27 = vadd.f32 %v8413_v21, %v16431_v8  ;;  %v2177_v17 = vpop.f32.mrb[167].mxu0  ;;  %v2007_v7 = vpop.f32.mrb[181].mxu1  ;;  %v8960_v21 = vld [vmem:[%s15475_s2 + $0x60] sm:$0xff]   ;;  %v16440_v33 = vld [vmem:[#allocation89_spill] sm:$0xff] }
 0x260   :  { %v11553_v60 = vadd.f32 %v2175_v51, %v16432_v48  ;;  %v2178_v1 = vadd.f32 %v2177_v17, %v16434_v62  ;;  %v11556_v9 = vpop.f32.mrb[182].mxu1  ;;  %v8959_v48 = vld [vmem:[%s15475_s2 + $0x98] sm:$0xff]   ;;  %v16439_v51 = vld [vmem:[#allocation86_spill] sm:$0xff]  ;;  %4527 = vmatpush1.bf16.msra.mxu0 %v8960_v21 }
 0x261   :  { %16430 = vst [vmem:[#allocation39_spill] sm:$0xff] %v11549_v30  ;;  %v11559_v45 = vadd.f32 %v2186_v27, %v16435_v31  ;;  %v2010_v2 = vpop.f32.mrb[183].mxu1  ;;  %8535 = vmatmul.mubr.bf16.gmra.mrb[16].mxu0 %v16311_v55  ;;  %8588 = vmatprep.subr.bf16.mxu1 %v8959_v48  ;;  %v16441_v55 = vld [vmem:[#allocation28_spill] sm:$0xff]  ;;  %v16445_v30 = vld [vmem:[#allocation126_spill] sm:$0xff] }
 0x262   :  { %16433 = vst [vmem:[#allocation41_spill] sm:$0xff] %v11553_v60  ;;  %v11563_v6 = vadd.f32 %v2178_v1, %v16437_v56  ;;  %8538 = vmatprep.mubr.bf16.mxu0 %v16312_v57  ;;  %8589 = vmatpush3.bf16.msra.mxu1 %v8959_v48  ;;  %v16442_v57 = vld [vmem:[#allocation24_spill] sm:$0xff]  ;;  %v16449_v60 = vld [vmem:[#allocation71_spill] sm:$0xff] }
 0x263   :  { %16436 = vst [vmem:[#allocation157_spill] sm:$0xff] %v11559_v45  ;;  %2799 = vmatmul.mubr.bf16.gmra.mrb[32].mxu1 %v16439_v51  ;;  %4528 = vmatprep.subr.bf16.mxu0 %v16037_v50  ;;  %v16443_v1 = vld [vmem:[#allocation128_spill] sm:$0xff] }
 0x264   :  { %16438 = vst [vmem:[#allocation7_spill] sm:$0xff] %v11563_v6  ;;  %v8416_v31 = vpop.f32.mrb[168].mxu0  ;;  %2806 = vmatprep.mubr.bf16.mxu1 %v16440_v33  ;;  %v16444_v56 = vld [vmem:[#allocation176_spill] sm:$0xff] }
 0x265   :  { %v2199_v8 = vadd.f32 %v8416_v31, %v16441_v55  ;;  %v2190_v27 = vpop.f32.mrb[169].mxu0  ;;  %v16446_v31 = vld [vmem:[#allocation174_spill] sm:$0xff] }
 0x266   :  { %v2191_v17 = vadd.f32 %v2190_v27, %v16442_v57  ;;  %v8417_v7 = vpop.f32.mrb[170].mxu0  ;;  %v11576_v62 = vpop.f32.mrb[184].mxu1  ;;  %v16447_v55 = vld [vmem:[#allocation74_spill] sm:$0xff] }
 0x267   :  { %v11580_v2 = vadd.f32 %v2199_v8, %v16443_v1  ;;  %v2202_v51 = vadd.f32 %v8417_v7, %v16444_v56  ;;  %v2193_v45 = vpop.f32.mrb[171].mxu0  ;;  %v2015_v33 = vpop.f32.mrb[185].mxu1  ;;  %v16450_v7 = vld [vmem:[#allocation94_spill] sm:$0xff]  ;;  %v16452_v56 = vld [vmem:[#allocation33_spill] sm:$0xff] }
 0x268   :  { %v11584_v6 = vadd.f32 %v2191_v17, %v16445_v30  ;;  %v2194_v48 = vadd.f32 %v2193_v45, %v16446_v31  ;;  %v11587_v21 = vpop.f32.mrb[186].mxu1  ;;  %v16451_v30 = vld [vmem:[#allocation96_spill] sm:$0xff] }
 0x269   :  { %v11590_v27 = vadd.f32 %v2202_v51, %v16447_v55  ;;  %v2018_v57 = vpop.f32.mrb[187].mxu1  ;;  %8539 = vmatmul.mubr.bf16.gmra.mrb[20].mxu0 %v16319_v39  ;;  %v16453_v55 = vld [vmem:[#allocation132_spill] sm:$0xff] }
 0x26a   :  { %v11594_v8 = vadd.f32 %v2194_v48, %v16449_v60  ;;  %8542 = vmatprep.mubr.bf16.mxu0 %v16320_v49  ;;  %v8961_v57 = vld [vmem:[%s15475_s2 + $0x68] sm:$0xff]  }
 0x26b   :  { %16448 = vst [vmem:[#allocation46_spill] sm:$0xff] %v11590_v27  ;;  %2807 = vmatmul.mubr.bf16.gmra.mrb[36].mxu1 %v16450_v7  ;;  %v16455_v7 = vld [vmem:[#allocation130_spill] sm:$0xff]  ;;  %4529 = vmatpush1.bf16.msra.mxu0 %v8961_v57 }
 0x26c   :  { %v8420_v1 = vpop.f32.mrb[172].mxu0  ;;  %2814 = vmatprep.mubr.bf16.mxu1 %v16451_v30  ;;  %4530 = vmatprep.subr.bf16.mxu0 %v16037_v50 }
 0x26d   :  { %v2215_v45 = vadd.f32 %v8420_v1, %v11165_v61  ;;  %v2206_v17 = vpop.f32.mrb[173].mxu0  ;;  %v16456_v61 = vld [vmem:[#allocation178_spill] sm:$0xff] }
 0x26e   :  { %v2207_v33 = vadd.f32 %v2206_v17, %v16452_v56  ;;  %v8421_v51 = vpop.f32.mrb[174].mxu0  ;;  %v11601_v31 = vpop.f32.mrb[188].mxu1  ;;  %v16457_v56 = vld [vmem:[#allocation82_spill] sm:$0xff] }
 0x26f   :  { %v11604_v39 = vadd.f32 %v2215_v45, %v16453_v55  ;;  %v2218_v60 = vadd.f32 %v8421_v51, %v11170_v59  ;;  %v2209_v48 = vpop.f32.mrb[175].mxu0  ;;  %v2023_v49 = vpop.f32.mrb[189].mxu1  ;;  %v16459_v55 = vld [vmem:[#allocation44_spill] sm:$0xff]  ;;  %v16460_v59 = vld [vmem:[#allocation79_spill] sm:$0xff] }
 0x270   :  { %v11611_v30 = vadd.f32 %v2207_v33, %v16455_v7  ;;  %v2210_v1 = vadd.f32 %v2209_v48, %v16456_v61  ;;  %v11614_v17 = vpop.f32.mrb[190].mxu1  ;;  %v16462_v49 = vld [vmem:[#allocation45_spill] sm:$0xff]  ;;  %v16464_v48 = vld [vmem:[#allocation102_spill] sm:$0xff] }
 0x271   :  { %16454 = vst [vmem:[#allocation49_spill] sm:$0xff] %v11604_v39  ;;  %v11617_v27 = vadd.f32 %v2218_v60, %v16457_v56  ;;  %v2026_v45 = vpop.f32.mrb[191].mxu1  ;;  %8543 = vmatmul.mubr.bf16.gmra.mrb[24].mxu0 %v16459_v55  ;;  %v16463_v39 = vld [vmem:[#allocation101_spill] sm:$0xff] }
 0x272   :  { %v11621_v51 = vadd.f32 %v2210_v1, %v16460_v59  ;;  %8546 = vmatprep.mubr.bf16.mxu0 %v16462_v49  ;;  %v16465_v1 = vld [vmem:[#allocation136_spill] sm:$0xff]  ;;  %v16467_v49 = vld [vmem:[#allocation134_spill] sm:$0xff] }
 0x273   :  { %16458 = vst [vmem:[#allocation6_spill] sm:$0xff] %v11617_v27  ;;  %2815 = vmatmul.mubr.bf16.gmra.mrb[40].mxu1 %v16463_v39 }
 0x274   :  { %16461 = vst [vmem:[#allocation158_spill] sm:$0xff] %v11621_v51  ;;  %v8424_v33 = vpop.f32.mrb[176].mxu0  ;;  %2822 = vmatprep.mubr.bf16.mxu1 %v16464_v48 }
 0x275   :  { %v2231_v7 = vadd.f32 %v8424_v33, %v11193_v13  ;;  %v2222_v60 = vpop.f32.mrb[177].mxu0  ;;  %v16469_v13 = vld [vmem:[#allocation90_spill] sm:$0xff] }
 0x276   :  { %v2223_v61 = vadd.f32 %v2222_v60, %v11179_v43  ;;  %v8425_v56 = vpop.f32.mrb[178].mxu0  ;;  %v11629_v45 = vpop.f32.mrb[192].mxu1  ;;  %v16471_v60 = vld [vmem:[#allocation87_spill] sm:$0xff] }
 0x277   :  { %v11632_v55 = vadd.f32 %v2231_v7, %v16465_v1  ;;  %v2234_v57 = vadd.f32 %v8425_v56, %v11198_v44  ;;  %v2225_v59 = vpop.f32.mrb[179].mxu0  ;;  %v2031_v39 = vpop.f32.mrb[193].mxu1  ;;  %v16473_v1 = vld [vmem:[#allocation53_spill] sm:$0xff] }
 0x278   :  { %v11636_v27 = vadd.f32 %v2223_v61, %v16467_v49  ;;  %v2226_v48 = vadd.f32 %v2225_v59, %v11184_v20  ;;  %v11639_v51 = vpop.f32.mrb[194].mxu1  ;;  %v16474_v44 = vld [vmem:[#allocation105_spill] sm:$0xff]  ;;  %v16475_v61 = vld [vmem:[#allocation106_spill] sm:$0xff] }
 0x279   :  { %16466 = vst [vmem:[#allocation54_spill] sm:$0xff] %v11632_v55  ;;  %v11642_v33 = vadd.f32 %v2234_v57, %v16469_v13  ;;  %v2034_v43 = vpop.f32.mrb[195].mxu1  ;;  %8547 = vmatmul.mubr.bf16.gmra.mrb[28].mxu0 %v16331_v36  ;;  %v16476_v13 = vld [vmem:[#allocation144_spill] sm:$0xff] }
 0x27a   :  { %16468 = vst [vmem:[#allocation57_spill] sm:$0xff] %v11636_v27  ;;  %v11646_v7 = vadd.f32 %v2226_v48, %v16471_v60  ;;  %8550 = vmatprep.mubr.bf16.mxu0 %v16473_v1  ;;  %v8962_v1 = vld [vmem:[%s15475_s2 + $0x70] sm:$0xff]  }
 0x27b   :  { %16470 = vst [vmem:[#allocation161_spill] sm:$0xff] %v11642_v33  ;;  %2823 = vmatmul.mubr.bf16.gmra.mrb[44].mxu1 %v16474_v44  ;;  %v16478_v44 = vld [vmem:[#allocation139_spill] sm:$0xff]  ;;  %4531 = vmatpush1.bf16.msra.mxu0 %v8962_v1  ;;  %v16491_v1 = vld [vmem:[#allocation150_spill] sm:$0xff]  ;;  %v16496_v27 = vld [vmem:[#allocation68_spill] sm:$0xff] }
 0x27c   :  { %16472 = vst [vmem:[#allocation9_spill] sm:$0xff] %v11646_v7  ;;  %v8428_v56 = vpop.f32.mrb[180].mxu0  ;;  %2830 = vmatprep.mubr.bf16.mxu1 %v16475_v61  ;;  %4532 = vmatprep.subr.bf16.mxu0 %v16037_v50  ;;  %v16494_v7 = vld [vmem:[#allocation152_spill] sm:$0xff] }
 0x27d   :  { %v2247_v20 = vadd.f32 %v8428_v56, %v11246_v41  ;;  %v2238_v59 = vpop.f32.mrb[181].mxu0  ;;  %v16480_v41 = vld [vmem:[#allocation183_spill] sm:$0xff] }
 0x27e   :  { %v2239_v39 = vadd.f32 %v2238_v59, %v11210_v37  ;;  %v8429_v57 = vpop.f32.mrb[182].mxu0  ;;  %v11653_v49 = vpop.f32.mrb[196].mxu1  ;;  %v16481_v59 = vld [vmem:[#allocation97_spill] sm:$0xff] }
 0x27f   :  { %v11656_v36 = vadd.f32 %v2247_v20, %v16476_v13  ;;  %v2250_v48 = vadd.f32 %v8429_v57, %v11253_v63  ;;  %v2241_v43 = vpop.f32.mrb[183].mxu0  ;;  %v2039_v60 = vpop.f32.mrb[197].mxu1  ;;  %v16483_v13 = vld [vmem:[#allocation60_spill] sm:$0xff]  ;;  %v16484_v63 = vld [vmem:[#allocation142_spill] sm:$0xff] }
 0x280   :  { %v11663_v61 = vadd.f32 %v2239_v39, %v16478_v44  ;;  %v2242_v56 = vadd.f32 %v2241_v43, %v16480_v41  ;;  %v11666_v37 = vpop.f32.mrb[198].mxu1  ;;  %v16486_v60 = vld [vmem:[#allocation61_spill] sm:$0xff]  ;;  %v16489_v44 = vld [vmem:[#allocation188_spill] sm:$0xff] }
 0x281   :  { %16477 = vst [vmem:[#allocation62_spill] sm:$0xff] %v11656_v36  ;;  %v11669_v33 = vadd.f32 %v2250_v48, %v16481_v59  ;;  %v2042_v20 = vpop.f32.mrb[199].mxu1  ;;  %8551 = vmatmul.mubr.bf16.gmra.mrb[32].mxu0 %v16483_v13  ;;  %v16487_v36 = vld [vmem:[#allocation108_spill] sm:$0xff]  ;;  %v16488_v43 = vld [vmem:[#allocation109_spill] sm:$0xff] }
 0x282   :  { %16479 = vst [vmem:[#allocation65_spill] sm:$0xff] %v11663_v61  ;;  %v11673_v57 = vadd.f32 %v2242_v56, %v16484_v63  ;;  %8554 = vmatprep.mubr.bf16.mxu0 %v16486_v60  ;;  %v8963_v59 = vld [vmem:[%s15475_s2 + $0x78] sm:$0xff]  }
 0x283   :  { %16482 = vst [vmem:[#allocation159_spill] sm:$0xff] %v11669_v33  ;;  %2831 = vmatmul.mubr.bf16.gmra.mrb[48].mxu1 %v16487_v36  ;;  %v16490_v20 = vld [vmem:[#allocation185_spill] sm:$0xff]  ;;  %4533 = vmatpush1.bf16.msra.mxu0 %v8963_v59 }
 0x284   :  { %16485 = vst [vmem:[#allocation162_spill] sm:$0xff] %v11673_v57  ;;  %v8432_v39 = vpop.f32.mrb[184].mxu0  ;;  %2838 = vmatprep.mubr.bf16.mxu1 %v16488_v43  ;;  %v16492_v43 = vld [vmem:[#allocation147_spill] sm:$0xff] }
 0x285   :  { %v2263_v41 = vadd.f32 %v8432_v39, %v16489_v44  ;;  %v2254_v48 = vpop.f32.mrb[185].mxu0  ;;  %v16493_v44 = vld [vmem:[#allocation187_spill] sm:$0xff] }
 0x286   :  { %v2255_v56 = vadd.f32 %v2254_v48, %v16490_v20  ;;  %v8433_v13 = vpop.f32.mrb[186].mxu0  ;;  %v11684_v63 = vpop.f32.mrb[200].mxu1 }
 0x287   :  { %v11687_v60 = vadd.f32 %v2263_v41, %v16491_v1  ;;  %v2266_v36 = vadd.f32 %v8433_v13, %v11301_v26  ;;  %v2257_v33 = vpop.f32.mrb[187].mxu0  ;;  %v2047_v57 = vpop.f32.mrb[201].mxu1  ;;  %v16497_v41 = vld [vmem:[#allocation149_spill] sm:$0xff] }
 0x288   :  { %v11691_v39 = vadd.f32 %v2255_v56, %v16492_v43  ;;  %v2258_v61 = vadd.f32 %v2257_v33, %v16493_v44  ;;  %v11694_v55 = vpop.f32.mrb[202].mxu1  ;;  %v16498_v26 = vld [vmem:[#allocation69_spill] sm:$0xff]  ;;  %v16499_v57 = vld [vmem:[#allocation110_spill] sm:$0xff]  ;;  %v16500_v56 = vld [vmem:[#allocation111_spill] sm:$0xff] }
 0x289   :  { %v11697_v48 = vadd.f32 %v2266_v36, %v16494_v7  ;;  %v2050_v20 = vpop.f32.mrb[203].mxu1  ;;  %8555 = vmatmul.mubr.bf16.gmra.mrb[36].mxu0 %v16496_v27  ;;  %v16501_v44 = vld [vmem:[#allocation5_spill] sm:$0xff] }
 0x28a   :  { %v11701_v1 = vadd.f32 %v2258_v61, %v16497_v41  ;;  %8558 = vmatprep.mubr.bf16.mxu0 %v16498_v26  ;;  %v16503_v26 = vld [vmem:[#allocation4_spill] sm:$0xff] }
 0x28b   :  { %16495 = vst [vmem:[#allocation70_spill] sm:$0xff] %v11697_v48  ;;  %2839 = vmatmul.mubr.bf16.gmra.mrb[52].mxu1 %v16499_v57 }
 0x28c   :  { %v8436_v59 = vpop.f32.mrb[188].mxu0  ;;  %2846 = vmatprep.mubr.bf16.mxu1 %v16500_v56 }
 0x28d   :  { %v2279_v33 = vadd.f32 %v8436_v59, %v11340_v22  ;;  %v2270_v13 = vpop.f32.mrb[189].mxu0  ;;  %v11726_v22 = vld [vmem:[%s15475_s2 + $0x140] sm:$0xff]   ;;  %v16505_v59 = vld [vmem:[#allocation156_spill] sm:$0xff] }
 0x28e   :  { %v2271_v43 = vadd.f32 %v2270_v13, %v11319_v24  ;;  %v8437_v7 = vpop.f32.mrb[190].mxu0  ;;  %v11708_v36 = vpop.f32.mrb[204].mxu1  ;;  %v8964_v24 = vld [vmem:[%s15475_s2 + $0xa0] sm:$0xff]   ;;  %v16507_v13 = vld [vmem:[#allocation76_spill] sm:$0xff]  ;;  %8678 = vmatprep.subr.bf16.mxu0 %v11726_v22 }
 0x28f   :  { %v11711_v27 = vadd.f32 %v2279_v33, %v16501_v44  ;;  %v2282_v61 = vadd.f32 %v8437_v7, %v11346_v10  ;;  %v2273_v20 = vpop.f32.mrb[191].mxu0  ;;  %v2055_v41 = vpop.f32.mrb[205].mxu1  ;;  %8590 = vmatprep.subr.bf16.mxu1 %v8964_v24  ;;  %v16511_v44 = vld [vmem:[#allocation112_spill] sm:$0xff] }
 0x290   :  { %v11715_v57 = vadd.f32 %v2271_v43, %v16503_v26  ;;  %v2274_v56 = vadd.f32 %v2273_v20, %v11326_v19  ;;  %v11718_v48 = vpop.f32.mrb[206].mxu1  ;;  %v16508_v43 = vld [vmem:[#allocation154_spill] sm:$0xff]  ;;  %v16510_v19 = vld [vmem:[#allocation77_spill] sm:$0xff]  ;;  %8591 = vmatpush3.bf16.msra.mxu1 %v8964_v24 }
 0x291   :  { %16502 = vst [vmem:[#allocation73_spill] sm:$0xff] %v11711_v27  ;;  %v11729_v10 = vadd.f32 %v2282_v61, %v16505_v59  ;;  %v2058_v33 = vpop.f32.mrb[207].mxu1  ;;  %8559 = vmatmul.mubr.bf16.gmra.mrb[40].mxu0 %v16507_v13  ;;  %v16512_v41 = vld [vmem:[#allocation113_spill] sm:$0xff]  ;;  %v16515_v27 = vld [vmem:[#allocation8_spill] sm:$0xff] }
 0x292   :  { %16504 = vst [vmem:[#allocation12_spill] sm:$0xff] %v11715_v57  ;;  %v11733_v7 = vadd.f32 %v2274_v56, %v16508_v43  ;;  %8562 = vmatprep.mubr.bf16.mxu0 %v16510_v19  ;;  %v16513_v56 = vld [vmem:[#allocation163_spill] sm:$0xff]  ;;  %v16520_v57 = vld [vmem:[#allocation160_spill] sm:$0xff] }
 0x293   :  { %16506 = vst [vmem:[#allocation164_spill] sm:$0xff] %v11729_v10  ;;  %2847 = vmatmul.mubr.bf16.gmra.mrb[56].mxu1 %v16511_v44 }
 0x294   :  { %16509 = vst [vmem:[#allocation55_spill] sm:$0xff] %v11733_v7  ;;  %v8440_v20 = vpop.f32.mrb[192].mxu0  ;;  %2854 = vmatprep.mubr.bf16.mxu1 %v16512_v41 }
 0x295   :  { %v2295_v61 = vadd.f32 %v8440_v20, %v11378_v0  ;;  %v2286_v26 = vpop.f32.mrb[193].mxu0  ;;  %v16517_v0 = vld [vmem:[#allocation165_spill] sm:$0xff] }
 0x296   :  { %v2287_v59 = vadd.f32 %v2286_v26, %v11359_v38  ;;  %v8441_v33 = vpop.f32.mrb[194].mxu0  ;;  %v11741_v13 = vpop.f32.mrb[208].mxu1  ;;  %v16519_v26 = vld [vmem:[#allocation84_spill] sm:$0xff] }
 0x297   :  { %v11744_v43 = vadd.f32 %v2295_v61, %v16513_v56  ;;  %v2298_v19 = vadd.f32 %v8441_v33, %v11384_v32  ;;  %v2289_v44 = vpop.f32.mrb[195].mxu0  ;;  %v2063_v10 = vpop.f32.mrb[209].mxu1  ;;  %v16522_v56 = vld [vmem:[#allocation85_spill] sm:$0xff]  ;;  %v16523_v32 = vld [vmem:[#allocation114_spill] sm:$0xff] }
 0x298   :  { %v11748_v7 = vadd.f32 %v2287_v59, %v16515_v27  ;;  %v2290_v24 = vadd.f32 %v2289_v44, %v11365_v5  ;;  %v11751_v41 = vpop.f32.mrb[210].mxu1  ;;  %v16524_v27 = vld [vmem:[#allocation115_spill] sm:$0xff] }
 0x299   :  { %16514 = vst [vmem:[#allocation168_spill] sm:$0xff] %v11744_v43  ;;  %v11754_v20 = vadd.f32 %v2298_v19, %v16517_v0  ;;  %v2066_v38 = vpop.f32.mrb[211].mxu1  ;;  %8563 = vmatmul.mubr.bf16.gmra.mrb[44].mxu0 %v16519_v26  ;;  %v16525_v0 = vld [vmem:[#allocation15_spill] sm:$0xff] }
 0x29a   :  { %16516 = vst [vmem:[#allocation166_spill] sm:$0xff] %v11748_v7  ;;  %v11758_v61 = vadd.f32 %v2290_v24, %v16520_v57  ;;  %8566 = vmatprep.mubr.bf16.mxu0 %v16522_v56  ;;  %v16527_v56 = vld [vmem:[#allocation11_spill] sm:$0xff] }
 0x29b   :  { %16518 = vst [vmem:[#allocation58_spill] sm:$0xff] %v11754_v20  ;;  %2855 = vmatmul.mubr.bf16.gmra.mrb[60].mxu1 %v16523_v32  ;;  %v16532_v43 = vld [vmem:[#allocation167_spill] sm:$0xff] }
 0x29c   :  { %16521 = vst [vmem:[#allocation78_spill] sm:$0xff] %v11758_v61  ;;  %v8444_v10 = vpop.f32.mrb[196].mxu0  ;;  %2862 = vmatprep.mubr.bf16.mxu1 %v16524_v27  ;;  %v16681_v61 = vld [vmem:[#allocation49_spill] sm:$0xff] }
 0x29d   :  { %v2311_v5 = vadd.f32 %v8444_v10, %v11425_v3  ;;  %v2302_v59 = vpop.f32.mrb[197].mxu0  ;;  %v16529_v3 = vld [vmem:[#allocation169_spill] sm:$0xff] }
 0x29e   :  { %v2303_v33 = vadd.f32 %v2302_v59, %v11401_v11  ;;  %v8445_v19 = vpop.f32.mrb[198].mxu0  ;;  %v11765_v44 = vpop.f32.mrb[212].mxu1  ;;  %v16531_v59 = vld [vmem:[#allocation92_spill] sm:$0xff] }
 0x29f   :  { %v11768_v38 = vadd.f32 %v2311_v5, %v16525_v0  ;;  %v2314_v57 = vadd.f32 %v8445_v19, %v11431_v40  ;;  %v2305_v24 = vpop.f32.mrb[199].mxu0  ;;  %v2071_v26 = vpop.f32.mrb[213].mxu1  ;;  %v16534_v0 = vld [vmem:[#allocation93_spill] sm:$0xff]  ;;  %v16535_v40 = vld [vmem:[#allocation116_spill] sm:$0xff] }
 0x2a0   :  { %v11772_v32 = vadd.f32 %v2303_v33, %v16527_v56  ;;  %v2306_v27 = vadd.f32 %v2305_v24, %v11407_v29  ;;  %v11775_v20 = vpop.f32.mrb[214].mxu1  ;;  %v16536_v33 = vld [vmem:[#allocation31_spill] sm:$0xff] }
 0x2a1   :  { %16526 = vst [vmem:[#allocation81_spill] sm:$0xff] %v11768_v38  ;;  %v11778_v10 = vadd.f32 %v2314_v57, %v16529_v3  ;;  %v2074_v11 = vpop.f32.mrb[215].mxu1  ;;  %8567 = vmatmul.mubr.bf16.gmra.mrb[48].mxu0 %v16531_v59  ;;  %v16537_v3 = vld [vmem:[#allocation23_spill] sm:$0xff] }
 0x2a2   :  { %16528 = vst [vmem:[#allocation20_spill] sm:$0xff] %v11772_v32  ;;  %v11782_v5 = vadd.f32 %v2306_v27, %v16532_v43  ;;  %8570 = vmatprep.mubr.bf16.mxu0 %v16534_v0  ;;  %v16539_v0 = vld [vmem:[#allocation19_spill] sm:$0xff] }
 0x2a3   :  { %16530 = vst [vmem:[#allocation16_spill] sm:$0xff] %v11778_v10  ;;  %2863 = vmatmul.mubr.bf16.gmra.mrb[64].mxu1 %v16535_v40  ;;  %v16544_v38 = vld [vmem:[#allocation171_spill] sm:$0xff] }
 0x2a4   :  { %16533 = vst [vmem:[#allocation124_spill] sm:$0xff] %v11782_v5  ;;  %v8448_v19 = vpop.f32.mrb[200].mxu0  ;;  %2870 = vmatprep.mubr.bf16.mxu1 %v16536_v33 }
 0x2a5   :  { %v2327_v29 = vadd.f32 %v8448_v19, %v11470_v47  ;;  %v2318_v24 = vpop.f32.mrb[201].mxu0  ;;  %v16541_v47 = vld [vmem:[#allocation173_spill] sm:$0xff] }
 0x2a6   :  { %v2319_v26 = vadd.f32 %v2318_v24, %v11445_v28  ;;  %v8449_v57 = vpop.f32.mrb[202].mxu0  ;;  %v11789_v56 = vpop.f32.mrb[216].mxu1  ;;  %v16543_v24 = vld [vmem:[#allocation99_spill] sm:$0xff] }
 0x2a7   :  { %v11792_v11 = vadd.f32 %v2327_v29, %v16537_v3  ;;  %v2330_v43 = vadd.f32 %v8449_v57, %v11479_v23  ;;  %v2321_v27 = vpop.f32.mrb[203].mxu0  ;;  %v2079_v59 = vpop.f32.mrb[217].mxu1  ;;  %v16546_v3 = vld [vmem:[#allocation100_spill] sm:$0xff]  ;;  %v16547_v23 = vld [vmem:[#allocation117_spill] sm:$0xff] }
 0x2a8   :  { %v11796_v40 = vadd.f32 %v2319_v26, %v16539_v0  ;;  %v2322_v33 = vadd.f32 %v2321_v27, %v11454_v46  ;;  %v11799_v10 = vpop.f32.mrb[218].mxu1  ;;  %v16548_v26 = vld [vmem:[#allocation118_spill] sm:$0xff] }
 0x2a9   :  { %16538 = vst [vmem:[#allocation172_spill] sm:$0xff] %v11792_v11  ;;  %v11802_v19 = vadd.f32 %v2330_v43, %v16541_v47  ;;  %v2082_v28 = vpop.f32.mrb[219].mxu1  ;;  %8571 = vmatmul.mubr.bf16.gmra.mrb[52].mxu0 %v16543_v24  ;;  %v16549_v47 = vld [vmem:[#allocation32_spill] sm:$0xff] }
 0x2aa   :  { %16540 = vst [vmem:[#allocation122_spill] sm:$0xff] %v11796_v40  ;;  %v11806_v29 = vadd.f32 %v2322_v33, %v16544_v38  ;;  %8574 = vmatprep.mubr.bf16.mxu0 %v16546_v3  ;;  %v16551_v3 = vld [vmem:[#allocation27_spill] sm:$0xff] }
 0x2ab   :  { %16542 = vst [vmem:[#allocation170_spill] sm:$0xff] %v11802_v19  ;;  %2871 = vmatmul.mubr.bf16.gmra.mrb[68].mxu1 %v16547_v23 }
 0x2ac   :  { %16545 = vst [vmem:[#allocation66_spill] sm:$0xff] %v11806_v29  ;;  %v8452_v57 = vpop.f32.mrb[204].mxu0  ;;  %2878 = vmatprep.mubr.bf16.mxu1 %v16548_v26 }
 0x2ad   :  { %v2343_v46 = vadd.f32 %v8452_v57, %v11505_v4  ;;  %v2334_v27 = vpop.f32.mrb[205].mxu0  ;;  %v16553_v4 = vld [vmem:[#allocation177_spill] sm:$0xff] }
 0x2ae   :  { %v2335_v59 = vadd.f32 %v2334_v27, %v11489_v16  ;;  %v8453_v43 = vpop.f32.mrb[206].mxu0  ;;  %v11813_v0 = vpop.f32.mrb[220].mxu1  ;;  %v16555_v27 = vld [vmem:[#allocation175_spill] sm:$0xff] }
 0x2af   :  { %v11816_v28 = vadd.f32 %v2343_v46, %v16549_v47  ;;  %v2346_v38 = vadd.f32 %v8453_v43, %v11508_v15  ;;  %v2337_v33 = vpop.f32.mrb[207].mxu0  ;;  %v2087_v24 = vpop.f32.mrb[221].mxu1  ;;  %v16557_v15 = vld [vmem:[#allocation119_spill] sm:$0xff] }
 0x2b0   :  { %v11820_v23 = vadd.f32 %v2335_v59, %v16551_v3  ;;  %v2338_v26 = vadd.f32 %v2337_v33, %v11497_v54  ;;  %v11823_v19 = vpop.f32.mrb[222].mxu1  ;;  %v16558_v59 = vld [vmem:[#allocation34_spill] sm:$0xff]  ;;  %v11836_v33 = vpop.permute.xlu1 %236 }
 0x2b1   :  { %16550 = vst [vmem:[#allocation63_spill] sm:$0xff] %v11816_v28  ;;  %v11826_v57 = vadd.f32 %v2346_v38, %v16553_v4  ;;  %v2090_v16 = vpop.f32.mrb[223].mxu1  ;;  %8575 = vmatmul.mubr.bf16.gmra.mrb[56].mxu0 %v16372_v25  ;;  %16559 = vst [vmem:[#allocation24_spill] sm:$0xff] %v11836_v33  ;;  %v16560_v25 = vld [vmem:[#allocation179_spill] sm:$0xff] }
 0x2b2   :  { %16552 = vst [vmem:[#allocation86_spill] sm:$0xff] %v11820_v23  ;;  %v11830_v46 = vadd.f32 %v2338_v26, %v16555_v27  ;;  %8578 = vmatprep.mubr.bf16.mxu0 %v16373_v18  ;;  %v16562_v27 = vld [vmem:[#allocation37_spill] sm:$0xff] }
 0x2b3   :  { %16554 = vst [vmem:[#allocation89_spill] sm:$0xff] %v11826_v57  ;;  %2879 = vmatmul.mubr.bf16.gmra.mrb[72].mxu1 %v16557_v15 }
 0x2b4   :  { %16556 = vst [vmem:[#allocation28_spill] sm:$0xff] %v11830_v46  ;;  %v8456_v43 = vpop.f32.mrb[208].mxu0  ;;  %2886 = vmatprep.mubr.bf16.mxu1 %v16558_v59  ;;  %v16564_v59 = vld [vmem:[#allocation180_spill] sm:$0xff] }
 0x2b5   :  { %v2359_v54 = vadd.f32 %v8456_v43, %v11546_v52  ;;  %v2350_v47 = vpop.f32.mrb[209].mxu0 }
 0x2b6   :  { %v2351_v38 = vadd.f32 %v2350_v47, %v11520_v12  ;;  %v8457_v24 = vpop.f32.mrb[210].mxu0  ;;  %v11839_v3 = vpop.f32.mrb[224].mxu1 }
 0x2b7   :  { %v11842_v26 = vadd.f32 %v2359_v54, %v16560_v25  ;;  %v2362_v18 = vadd.f32 %v8457_v24, %v11556_v9  ;;  %v2353_v4 = vpop.f32.mrb[211].mxu0  ;;  %v2095_v16 = vpop.f32.mrb[225].mxu1  ;;  %v8966_v54 = vld [vmem:[%s15475_s2 + $0xa8] sm:$0xff]   ;;  %v16566_v9 = vld [vmem:[#allocation38_spill] sm:$0xff]  ;;  %v16568_v24 = vld [vmem:[#allocation120_spill] sm:$0xff] }
 0x2b8   :  { %v11846_v15 = vadd.f32 %v2351_v38, %v16562_v27  ;;  %v2354_v52 = vadd.f32 %v2353_v4, %v11529_v42  ;;  %v11849_v43 = vpop.f32.mrb[226].mxu1  ;;  %8592 = vmatprep.subr.bf16.mxu1 %v8966_v54  ;;  %v16569_v42 = vld [vmem:[#allocation40_spill] sm:$0xff]  ;;  %v11864_v4 = vpop.permute.xlu1 %144 }
 0x2b9   :  { %16561 = vst [vmem:[#allocation128_spill] sm:$0xff] %v11842_v26  ;;  %v11852_v57 = vadd.f32 %v2362_v18, %v16564_v59  ;;  %v2098_v12 = vpop.f32.mrb[227].mxu1  ;;  %8579 = vmatmul.mubr.bf16.gmra.mrb[60].mxu0 %v16376_v58  ;;  %8593 = vmatpush3.bf16.msra.mxu1 %v8966_v54  ;;  %16570 = vst [vmem:[#allocation74_spill] sm:$0xff] %v11864_v4  ;;  %v16571_v59 = vld [vmem:[#allocation181_spill] sm:$0xff] }
 0x2ba   :  { %16563 = vst [vmem:[#allocation176_spill] sm:$0xff] %v11846_v15  ;;  %v11859_v47 = vadd.f32 %v2354_v52, %v16566_v9 }
 0x2bb   :  { %16565 = vst [vmem:[#allocation126_spill] sm:$0xff] %v11852_v57  ;;  %2887 = vmatmul.mubr.bf16.gmra.mrb[76].mxu1 %v16568_v24  ;;  %v16573_v57 = vld [vmem:[#allocation52_spill] sm:$0xff] }
 0x2bc   :  { %16567 = vst [vmem:[#allocation174_spill] sm:$0xff] %v11859_v47  ;;  %v8460_v38 = vpop.f32.mrb[212].mxu0  ;;  %2894 = vmatprep.mubr.bf16.mxu1 %v16569_v42 }
 0x2bd   :  { %v2375_v25 = vadd.f32 %v8460_v38, %v11601_v31  ;;  %v2366_v18 = vpop.f32.mrb[213].mxu0  ;;  %v16575_v38 = vld [vmem:[#allocation182_spill] sm:$0xff] }
 0x2be   :  { %v2367_v58 = vadd.f32 %v2366_v18, %v11576_v62  ;;  %v8461_v16 = vpop.f32.mrb[214].mxu0  ;;  %v11867_v27 = vpop.f32.mrb[228].mxu1  ;;  %v8968_v62 = vld [vmem:[%s15475_s2 + $0xb0] sm:$0xff]  }
 0x2bf   :  { %v11870_v52 = vadd.f32 %v2375_v25, %v16571_v59  ;;  %v2378_v12 = vadd.f32 %v8461_v16, %v11614_v17  ;;  %v2369_v9 = vpop.f32.mrb[215].mxu0  ;;  %v2103_v24 = vpop.f32.mrb[229].mxu1  ;;  %v16577_v59 = vld [vmem:[#allocation138_spill] sm:$0xff]  ;;  %8594 = vmatprep.subr.bf16.mxu1 %v8968_v62 }
 0x2c0   :  { %v11874_v42 = vadd.f32 %v2367_v58, %v16573_v57  ;;  %v2370_v31 = vadd.f32 %v2369_v9, %v11587_v21  ;;  %v11877_v54 = vpop.f32.mrb[230].mxu1  ;;  %v16579_v17 = vld [vmem:[#allocation42_spill] sm:$0xff]  ;;  %v16580_v58 = vld [vmem:[#allocation43_spill] sm:$0xff]  ;;  %8595 = vmatpush3.bf16.msra.mxu1 %v8968_v62  ;;  %v11891_v9 = vpop.permute.xlu1 %155  ;;  %v8969_v62 = vld [vmem:[%s15475_s2 + $0xb8] sm:$0xff]  }
 0x2c1   :  { %16572 = vst [vmem:[#allocation71_spill] sm:$0xff] %v11870_v52  ;;  %v11883_v18 = vadd.f32 %v2378_v12, %v16575_v38  ;;  %v2106_v25 = vpop.f32.mrb[231].mxu1  ;;  %16581 = vst [vmem:[#allocation132_spill] sm:$0xff] %v11891_v9  ;;  %8596 = vmatprep.subr.bf16.mxu1 %v8969_v62 }
 0x2c2   :  { %16574 = vst [vmem:[#allocation94_spill] sm:$0xff] %v11874_v42  ;;  %v11886_v52 = vadd.f32 %v2370_v31, %v16577_v59  ;;  %v16582_v25 = vld [vmem:[#allocation184_spill] sm:$0xff] }
 0x2c3   :  { %16576 = vst [vmem:[#allocation96_spill] sm:$0xff] %v11883_v18  ;;  %2895 = vmatmul.mubr.bf16.gmra.mrb[80].mxu1 %v16579_v17 }
 0x2c4   :  { %16578 = vst [vmem:[#allocation33_spill] sm:$0xff] %v11886_v52  ;;  %v8464_v57 = vpop.f32.mrb[216].mxu0  ;;  %2902 = vmatprep.mubr.bf16.mxu1 %v16580_v58  ;;  %8597 = vmatpush3.bf16.msra.mxu1 %v8969_v62 }
 0x2c5   :  { %v2391_v21 = vadd.f32 %v8464_v57, %v11653_v49  ;;  %v2382_v16 = vpop.f32.mrb[217].mxu0  ;;  %v16584_v49 = vld [vmem:[#allocation141_spill] sm:$0xff]  ;;  %5401 = vmatprep.subr.bf16.mxu1 %v16037_v50 }
 0x2c6   :  { %v2383_v24 = vadd.f32 %v2382_v16, %v11629_v45  ;;  %v8465_v12 = vpop.f32.mrb[218].mxu0  ;;  %v11894_v38 = vpop.f32.mrb[232].mxu1  ;;  %v16586_v16 = vld [vmem:[#allocation186_spill] sm:$0xff] }
 0x2c7   :  { %v11897_v31 = vadd.f32 %v2391_v21, %v16582_v25  ;;  %v2394_v59 = vadd.f32 %v8465_v12, %v11666_v37  ;;  %v2385_v17 = vpop.f32.mrb[219].mxu0  ;;  %v2111_v18 = vpop.f32.mrb[233].mxu1  ;;  %v16588_v25 = vld [vmem:[#allocation143_spill] sm:$0xff] }
 0x2c8   :  { %v11904_v57 = vadd.f32 %v2383_v24, %v16584_v49  ;;  %v2386_v58 = vadd.f32 %v2385_v17, %v11639_v51  ;;  %v11907_v45 = vpop.f32.mrb[234].mxu1  ;;  %v16590_v18 = vld [vmem:[#allocation47_spill] sm:$0xff]  ;;  %v16591_v24 = vld [vmem:[#allocation48_spill] sm:$0xff]  ;;  %v11919_v49 = vpop.permute.xlu1 %166 }
 0x2c9   :  { %16583 = vst [vmem:[#allocation130_spill] sm:$0xff] %v11897_v31  ;;  %v11910_v52 = vadd.f32 %v2394_v59, %v16586_v16  ;;  %v2114_v21 = vpop.f32.mrb[235].mxu1  ;;  %16592 = vst [vmem:[#allocation79_spill] sm:$0xff] %v11919_v49  ;;  %v16595_v31 = vld [vmem:[#allocation3_spill] sm:$0xff] }
 0x2ca   :  { %16585 = vst [vmem:[#allocation178_spill] sm:$0xff] %v11904_v57  ;;  %v11913_v37 = vadd.f32 %v2386_v58, %v16588_v25  ;;  %v16593_v58 = vld [vmem:[#allocation13_spill] sm:$0xff] }
 0x2cb   :  { %16587 = vst [vmem:[#allocation82_spill] sm:$0xff] %v11910_v52  ;;  %2903 = vmatmul.mubr.bf16.gmra.mrb[84].mxu1 %v16590_v18 }
 0x2cc   :  { %16589 = vst [vmem:[#allocation44_spill] sm:$0xff] %v11913_v37  ;;  %v8468_v12 = vpop.f32.mrb[220].mxu0  ;;  %2910 = vmatprep.mubr.bf16.mxu1 %v16591_v24  ;;  %v16597_v24 = vld [vmem:[#allocation14_spill] sm:$0xff] }
 0x2cd   :  { %v2407_v51 = vadd.f32 %v8468_v12, %v11708_v36  ;;  %v2398_v17 = vpop.f32.mrb[221].mxu0 }
 0x2ce   :  { %v2399_v59 = vadd.f32 %v2398_v17, %v11684_v63  ;;  %v8469_v16 = vpop.f32.mrb[222].mxu0  ;;  %v11922_v21 = vpop.f32.mrb[236].mxu1  ;;  %v16599_v17 = vld [vmem:[#allocation146_spill] sm:$0xff] }
 0x2cf   :  { %v11925_v25 = vadd.f32 %v2407_v51, %v16593_v58  ;;  %v2410_v62 = vadd.f32 %v8469_v16, %v11718_v48  ;;  %v2401_v18 = vpop.f32.mrb[223].mxu0  ;;  %v2119_v52 = vpop.f32.mrb[237].mxu1  ;;  %v16601_v51 = vld [vmem:[#allocation50_spill] sm:$0xff]  ;;  %v16602_v48 = vld [vmem:[#allocation51_spill] sm:$0xff] }
 0x2d0   :  { %v11929_v37 = vadd.f32 %v2399_v59, %v16595_v31  ;;  %v2402_v36 = vadd.f32 %v2401_v18, %v11694_v55  ;;  %v11932_v12 = vpop.f32.mrb[238].mxu1  ;;  %v11943_v59 = vpop.permute.xlu1 %177 }
 0x2d1   :  { %16594 = vst [vmem:[#allocation45_spill] sm:$0xff] %v11925_v25  ;;  %v11935_v57 = vadd.f32 %v2410_v62, %v16597_v24  ;;  %v2122_v63 = vpop.f32.mrb[239].mxu1  ;;  %16603 = vst [vmem:[#allocation134_spill] sm:$0xff] %v11943_v59 }
 0x2d2   :  { %16596 = vst [vmem:[#allocation101_spill] sm:$0xff] %v11929_v37  ;;  %v11938_v42 = vadd.f32 %v2402_v36, %v16599_v17 }
 0x2d3   :  { %16598 = vst [vmem:[#allocation102_spill] sm:$0xff] %v11935_v57  ;;  %2911 = vmatmul.mubr.bf16.gmra.mrb[88].mxu1 %v16601_v51 }
 0x2d4   :  { %16600 = vst [vmem:[#allocation136_spill] sm:$0xff] %v11938_v42  ;;  %v8472_v58 = vpop.f32.mrb[224].mxu0  ;;  %2918 = vmatprep.mubr.bf16.mxu1 %v16602_v48  ;;  %v16607_v48 = vld [vmem:[#allocation17_spill] sm:$0xff] }
 0x2d5   :  { %v2423_v52 = vadd.f32 %v8472_v58, %v11765_v44  ;;  %v2414_v31 = vpop.f32.mrb[225].mxu0 }
 0x2d6   :  { %v2415_v55 = vadd.f32 %v2414_v31, %v11741_v13  ;;  %v8473_v16 = vpop.f32.mrb[226].mxu0  ;;  %v11946_v18 = vpop.f32.mrb[240].mxu1 }
 0x2d7   :  { %v11949_v62 = vadd.f32 %v2423_v52, %v11357_v14  ;;  %v2426_v36 = vadd.f32 %v8473_v16, %v11775_v20  ;;  %v2417_v24 = vpop.f32.mrb[227].mxu0  ;;  %v2706_v63 = vpop.f32.mrb[241].mxu1  ;;  %v16609_v14 = vld [vmem:[#allocation121_spill] sm:$0xff]  ;;  %v16610_v20 = vld [vmem:[#allocation56_spill] sm:$0xff] }
 0x2d8   :  { %v11953_v17 = vadd.f32 %v2415_v55, %v11338_v34  ;;  %v2418_v44 = vadd.f32 %v2417_v24, %v11751_v41  ;;  %v11956_v51 = vpop.f32.mrb[242].mxu1  ;;  %v11967_v55 = vpop.permute.xlu1 %188 }
 0x2d9   :  { %16604 = vst [vmem:[#allocation90_spill] sm:$0xff] %v11949_v62  ;;  %v11959_v58 = vadd.f32 %v2426_v36, %v11362_v53  ;;  %v2709_v13 = vpop.f32.mrb[243].mxu1  ;;  %16611 = vst [vmem:[#allocation106_spill] sm:$0xff] %v11967_v55  ;;  %v16612_v53 = vld [vmem:[#allocation104_spill] sm:$0xff] }
 0x2da   :  { %16605 = vst [vmem:[#allocation87_spill] sm:$0xff] %v11953_v17  ;;  %v11962_v31 = vadd.f32 %v2418_v44, %v16607_v48  ;;  %v16620_v17 = vld [vmem:[#allocation123_spill] sm:$0xff] }
 0x2db   :  { %16606 = vst [vmem:[#allocation53_spill] sm:$0xff] %v11959_v58  ;;  %2919 = vmatmul.mubr.bf16.gmra.mrb[92].mxu1 %v16609_v14  ;;  %v16614_v14 = vld [vmem:[#allocation18_spill] sm:$0xff] }
 0x2dc   :  { %16608 = vst [vmem:[#allocation105_spill] sm:$0xff] %v11962_v31  ;;  %v8476_v52 = vpop.f32.mrb[228].mxu0  ;;  %2926 = vmatprep.mubr.bf16.mxu1 %v16610_v20 }
 0x2dd   :  { %v2439_v16 = vadd.f32 %v8476_v52, %v11813_v0  ;;  %v2430_v34 = vpop.f32.mrb[229].mxu0  ;;  %v16616_v52 = vld [vmem:[#allocation21_spill] sm:$0xff] }
 0x2de   :  { %v2431_v41 = vadd.f32 %v2430_v34, %v11789_v56  ;;  %v8477_v24 = vpop.f32.mrb[230].mxu0  ;;  %v2712_v63 = vpop.f32.mrb[244].mxu1  ;;  %v16618_v56 = vld [vmem:[#allocation103_spill] sm:$0xff] }
 0x2df   :  { %v11971_v36 = vadd.f32 %v2439_v16, %v16612_v53  ;;  %v2442_v44 = vadd.f32 %v8477_v24, %v11823_v19  ;;  %v2433_v13 = vpop.f32.mrb[231].mxu0  ;;  %v2714_v48 = vpop.f32.mrb[245].mxu1  ;;  %v16621_v53 = vld [vmem:[#allocation59_spill] sm:$0xff] }
 0x2e0   :  { %v11975_v58 = vadd.f32 %v2431_v41, %v16614_v14  ;;  %v2434_v20 = vadd.f32 %v2433_v13, %v11799_v10  ;;  %v2715_v0 = vpop.f32.mrb[246].mxu1  ;;  %v11986_v19 = vpop.permute.xlu1 %199 }
 0x2e1   :  { %16613 = vst [vmem:[#allocation144_spill] sm:$0xff] %v11971_v36  ;;  %v11979_v62 = vadd.f32 %v2442_v44, %v16616_v52  ;;  %v2717_v31 = vpop.f32.mrb[247].mxu1  ;;  %16622 = vst [vmem:[#allocation60_spill] sm:$0xff] %v11986_v19  ;;  %v11989_v48 = vpop.permute.xlu0 %133 }
 0x2e2   :  { %16615 = vst [vmem:[#allocation139_spill] sm:$0xff] %v11975_v58  ;;  %v11982_v34 = vadd.f32 %v2434_v20, %v16618_v56  ;;  %16623 = vst [vmem:[#allocation142_spill] sm:$0xff] %v11989_v48  ;;  %v16624_v31 = vld [vmem:[#allocation25_spill] sm:$0xff]  ;;  %v16626_v56 = vld [vmem:[#allocation22_spill] sm:$0xff] }
 0x2e3   :  { %16617 = vst [vmem:[#allocation183_spill] sm:$0xff] %v11979_v62  ;;  %2927 = vmatmul.mubr.bf16.gmra.mrb[96].mxu1 %v16620_v17  ;;  %v16628_v62 = vld [vmem:[#allocation26_spill] sm:$0xff] }
 0x2e4   :  { %16619 = vst [vmem:[#allocation97_spill] sm:$0xff] %v11982_v34  ;;  %v8480_v16 = vpop.f32.mrb[232].mxu0  ;;  %2934 = vmatprep.mubr.bf16.mxu1 %v16621_v53  ;;  %v16640_v58 = vld [vmem:[#allocation30_spill] sm:$0xff] }
 0x2e5   :  { %v2455_v41 = vadd.f32 %v8480_v16, %v11867_v27  ;;  %v2446_v24 = vpop.f32.mrb[233].mxu0 }
 0x2e6   :  { %v2447_v10 = vadd.f32 %v2446_v24, %v11839_v3  ;;  %v8481_v44 = vpop.f32.mrb[234].mxu0  ;;  %v11992_v13 = vpop.f32.mrb[248].mxu1  ;;  %v16630_v24 = vld [vmem:[#allocation107_spill] sm:$0xff] }
 0x2e7   :  { %v11995_v14 = vadd.f32 %v2455_v41, %v16624_v31  ;;  %v2458_v17 = vadd.f32 %v8481_v44, %v11877_v54  ;;  %v2449_v20 = vpop.f32.mrb[235].mxu0  ;;  %v2722_v52 = vpop.f32.mrb[249].mxu1  ;;  %v16632_v41 = vld [vmem:[#allocation125_spill] sm:$0xff]  ;;  %v16633_v54 = vld [vmem:[#allocation64_spill] sm:$0xff] }
 0x2e8   :  { %v11999_v53 = vadd.f32 %v2447_v10, %v16626_v56  ;;  %v2450_v27 = vadd.f32 %v2449_v20, %v11849_v43  ;;  %v12002_v16 = vpop.f32.mrb[250].mxu1  ;;  %v12012_v44 = vpop.permute.xlu1 %210  ;;  %v16636_v56 = vld [vmem:[#allocation35_spill] sm:$0xff] }
 0x2e9   :  { %16625 = vst [vmem:[#allocation61_spill] sm:$0xff] %v11995_v14  ;;  %v12005_v36 = vadd.f32 %v2458_v17, %v16628_v62  ;;  %v2725_v3 = vpop.f32.mrb[251].mxu1  ;;  %16634 = vst [vmem:[#allocation185_spill] sm:$0xff] %v12012_v44  ;;  %v12015_v43 = vpop.permute.xlu0 %137 }
 0x2ea   :  { %16627 = vst [vmem:[#allocation108_spill] sm:$0xff] %v11999_v53  ;;  %v12008_v34 = vadd.f32 %v2450_v27, %v16630_v24  ;;  %16635 = vst [vmem:[#allocation150_spill] sm:$0xff] %v12015_v43 }
 0x2eb   :  { %16629 = vst [vmem:[#allocation109_spill] sm:$0xff] %v12005_v36  ;;  %2935 = vmatmul.mubr.bf16.gmra.mrb[100].mxu1 %v16632_v41  ;;  %v16637_v36 = vld [vmem:[#allocation29_spill] sm:$0xff] }
 0x2ec   :  { %16631 = vst [vmem:[#allocation188_spill] sm:$0xff] %v12008_v34  ;;  %v8484_v31 = vpop.f32.mrb[236].mxu0  ;;  %2942 = vmatprep.mubr.bf16.mxu1 %v16633_v54 }
 0x2ed   :  { %v2471_v10 = vadd.f32 %v8484_v31, %v11922_v21  ;;  %v2462_v52 = vpop.f32.mrb[237].mxu0  ;;  %v16639_v21 = vld [vmem:[#allocation36_spill] sm:$0xff] }
 0x2ee   :  { %v2463_v20 = vadd.f32 %v2462_v52, %v11894_v38  ;;  %v8485_v62 = vpop.f32.mrb[238].mxu0  ;;  %v2728_v17 = vpop.f32.mrb[252].mxu1  ;;  %v16642_v38 = vld [vmem:[#allocation127_spill] sm:$0xff] }
 0x2ef   :  { %v3454_v3 = vadd.f32 %v2471_v10, %v16636_v56  ;;  %v2474_v27 = vadd.f32 %v8485_v62, %v11932_v12  ;;  %v2465_v24 = vpop.f32.mrb[239].mxu0  ;;  %v2730_v41 = vpop.f32.mrb[253].mxu1  ;;  %v16643_v10 = vld [vmem:[#allocation67_spill] sm:$0xff] }
 0x2f0   :  { %v12021_v14 = vadd.f32 %v2463_v20, %v16637_v36  ;;  %v2466_v54 = vadd.f32 %v2465_v24, %v11907_v45  ;;  %v2731_v34 = vpop.f32.mrb[254].mxu1  ;;  %v12030_v12 = vpop.permute.xlu1 %221  ;;  %v12037_v45 = vld [vmem:[%s15476_s3] ss:$0 sm:$0xff] }
 0x2f1   :  { %v3455_v31 = vadd.f32 %v2474_v27, %v16639_v21  ;;  %v2733_v53 = vpop.f32.mrb[255].mxu1  ;;  %16644 = vst [vmem:[#allocation152_spill] sm:$0xff] %v12030_v12  ;;  %v12032_v36 = vpop.permute.xlu0 %148 }
 0x2f2   :  { %16638 = vst [vmem:[#allocation147_spill] sm:$0xff] %v12021_v14  ;;  %v12026_v57 = vadd.f32 %v2466_v54, %v16640_v58  ;;  %16645 = vst [vmem:[#allocation68_spill] sm:$0xff] %v12032_v36  ;;  %v16651_v14 = vld [vmem:[#allocation41_spill] sm:$0xff] }
 0x2f3   :  { %2943 = vmatmul.mubr.bf16.gmra.mrb[104].mxu1 %v16642_v38 }
 0x2f4   :  { %16641 = vst [vmem:[#allocation187_spill] sm:$0xff] %v12026_v57  ;;  %v8504_v52 = vpop.f32.mrb[240].mxu0  ;;  %2950 = vmatprep.mubr.bf16.mxu1 %v16643_v10  ;;  %v16646_v10 = vld [vmem:[#allocation10_spill] sm:$0xff] }
 0x2f5   :  { %v3066_v62 = vadd.f32 %v8504_v52, %v2712_v63  ;;  %v3057_v56 = vpop.f32.mrb[241].mxu0  ;;  %v12046_v63 = vld [vmem:[%s15477_s4] ss:$0 sm:$0xff] }
 0x2f6   :  { %v3058_v53 = vadd.f32 %v3057_v56, %v11946_v18  ;;  %v8505_v58 = vpop.f32.mrb[242].mxu0  ;;  %v12040_v20 = vpop.f32.mrb[0].mxu1 }
 0x2f7   :  { %v3456_v27 = vadd.f32 %v11526_v35, %v3066_v62  ;;  %v3069_v24 = vadd.f32 %v8505_v58, %v2715_v0  ;;  %v3060_v41 = vpop.f32.mrb[243].mxu0  ;;  %v2738_v54 = vpop.f32.mrb[1].mxu1 }
 0x2f8   :  { %v3534_v21 = vadd.f32 %v3454_v3, %v3058_v53  ;;  %v3061_v38 = vadd.f32 %v3060_v41, %v11956_v51  ;;  %v12049_v52 = vpop.f32.mrb[2].mxu1  ;;  %v16647_v54 = vld [vmem:[#allocation129_spill] sm:$0xff]  ;;  %v12059_v41 = vpop.permute.xlu1 %232 }
 0x2f9   :  { %v3543_v18 = vmul.f32 %v12037_v45, %v3456_v27  ;;  %v3457_v56 = vadd.f32 %v16646_v10, %v3069_v24  ;;  %v2741_v57 = vpop.f32.mrb[3].mxu1  ;;  %16648 = vst [vmem:[#allocation149_spill] sm:$0xff] %v12059_v41  ;;  %v16649_v27 = vld [vmem:[#allocation72_spill] sm:$0xff] }
 0x2fa   :  { %v3621_v35 = vmul.f32 %v12037_v45, %v3534_v21  ;;  %v3535_v0 = vadd.f32 %v3455_v31, %v3061_v38  ;;  %v12063_v38 = vpop.permute.xlu0 %159 }
 0x2fb   :  { %v3630_v62 = vadd.f32 %v12046_v63, %v3543_v18  ;;  %v3544_v58 = vmul.f32 %v12037_v45, %v3457_v56  ;;  %2951 = vmatmul.mubr.bf16.gmra.mrb[108].mxu1 %v16647_v54  ;;  %16650 = vst [vmem:[#allocation69_spill] sm:$0xff] %v12063_v38 }
 0x2fc   :  { %v3708_v3 = vadd.f32 %v12046_v63, %v3621_v35  ;;  %v3622_v51 = vmul.f32 %v12037_v45, %v3535_v0  ;;  %v8508_v53 = vpop.f32.mrb[244].mxu0  ;;  %2958 = vmatprep.mubr.bf16.mxu1 %v16649_v27 }
 0x2fd   :  { %v3710_v24 = vmax.f32 %v3630_v62, 0.0  ;;  %v3631_v57 = vadd.f32 %v12046_v63, %v3544_v58  ;;  %v3082_v21 = vadd.f32 %v8508_v53, %v2728_v17  ;;  %v3073_v31 = vpop.f32.mrb[245].mxu0  ;;  %v16652_v58 = vld [vmem:[#allocation153_spill] sm:$0xff] }
 0x2fe   :  { %v3788_v18 = vmax.f32 %v3708_v3, 0.0  ;;  %v3709_v10 = vadd.f32 %v12046_v63, %v3622_v51  ;;  %v3074_v56 = vadd.f32 %v3073_v31, %v11992_v13  ;;  %v8509_v35 = vpop.f32.mrb[246].mxu0  ;;  %v2744_v54 = vpop.f32.mrb[4].mxu1 }
 0x2ff   :  { %v3711_v0 = vmax.f32 %v3631_v57, 0.0  ;;  %v3460_v25 = vadd.f32 %v16651_v14, %v3082_v21  ;;  %v3085_v42 = vadd.f32 %v8509_v35, %v2731_v34  ;;  %v3076_v37 = vpop.f32.mrb[247].mxu0  ;;  %v2746_v27 = vpop.f32.mrb[5].mxu1  ;;  %v12069_v62 = vmul.f32 %v3710_v24, %v11989_v48  ;;  %v16654_v57 = vld [vmem:[#allocation7_spill] sm:$0xff] }
 0x300   :  { %v3789_v17 = vmax.f32 %v3709_v10, 0.0  ;;  %v3458_v53 = vadd.f32 %v16652_v58, %v3074_v56  ;;  %v3077_v3 = vadd.f32 %v3076_v37, %v12002_v16  ;;  %v2747_v26 = vpop.f32.mrb[6].mxu1  ;;  %v12074_v51 = vmul.f32 %v3788_v18, %v12059_v41  ;;  %v16655_v37 = vld [vmem:[#allocation155_spill] sm:$0xff]  ;;  %v12105_v27 = vpop.permute.xlu0 %170 }
 0x301   :  { %v3547_v13 = vmul.f32 %v12037_v45, %v3460_v25  ;;  %v3461_v31 = vadd.f32 %v16654_v57, %v3085_v42  ;;  %v12079_v34 = vmul.f32 %v3711_v0, %v12015_v43  ;;  %v3870_v14 = vrot.slane %v12069_v62, 7  ;;  %v2749_v24 = vpop.f32.mrb[7].mxu1  ;;  %v16656_v42 = vld [vmem:[#allocation131_spill] sm:$0xff]  ;;  %16660 = vst [vmem:[#allocation5_spill] sm:$0xff] %v12105_v27 }
 0x302   :  { %16653 = vst [vmem:[#allocation110_spill] sm:$0xff] %v12074_v51  ;;  %v12083_v21 = vmul.f32 %v3789_v17, %v11836_v33  ;;  %v3545_v10 = vmul.f32 %v12037_v45, %v3458_v53  ;;  %v3459_v16 = vadd.f32 %v16655_v37, %v3077_v3 }
 0x303   :  { %v3634_v56 = vadd.f32 %v12046_v63, %v3547_v13  ;;  %v3548_v25 = vmul.f32 %v12037_v45, %v3461_v31  ;;  %2959 = vmatmul.mubr.bf16.gmra.mrb[112].mxu1 %v16656_v42  ;;  %v3871_v35 = vrot.slane %v12079_v34, 7  ;;  %v12094_v0 = vpack.c.bf16 %v12079_v34, %v12069_v62  ;;  %v16658_v13 = vld [vmem:[#allocation75_spill] sm:$0xff] }
 0x304   :  { %v3632_v58 = vadd.f32 %v12046_v63, %v3545_v10  ;;  %v3546_v53 = vmul.f32 %v12037_v45, %v3459_v16  ;;  %v8512_v3 = vpop.f32.mrb[248].mxu0  ;;  %2966 = vmatprep.mubr.bf16.mxu1 %v16658_v13  ;;  %v16661_v47 = vrot.slane %v12083_v21, 7 }
 0x305   :  { %16657 = vst [vmem:[#allocation111_spill] sm:$0xff] %v12094_v0  ;;  %v3714_v57 = vmax.f32 %v3634_v56, 0.0  ;;  %v3635_v31 = vadd.f32 %v12046_v63, %v3548_v25  ;;  %v3098_v24 = vadd.f32 %v8512_v3, %v2744_v54  ;;  %v3089_v37 = vpop.f32.mrb[249].mxu0  ;;  %v4028_v18 = vsel %vm318_vm1, %v3870_v14, %v3871_v35  ;;  %4534 = vmatprep.mubr.bf16.mxu0 %v12094_v0 }
 0x306   :  { %v3712_v17 = vmax.f32 %v3632_v58, 0.0  ;;  %v3633_v10 = vadd.f32 %v12046_v63, %v3546_v53  ;;  %v3090_v16 = vadd.f32 %v3089_v37, %v12040_v20  ;;  %v4029_v56 = vsel %vm318_vm1, %v16661_v47, %v3870_v14  ;;  %v8513_v25 = vpop.f32.mrb[250].mxu0  ;;  %v2752_v54 = vpop.f32.mrb[8].mxu1  ;;  %v8967_v58 = vld [vmem:[%s15475_s2 + $0x148] sm:$0xff]  }
 0x307   :  { %v3715_v3 = vmax.f32 %v3635_v31, 0.0  ;;  %v3464_v13 = vadd.f32 %v11584_v6, %v3098_v24  ;;  %v12114_v15 = vpack.c.bf16 %v4028_v18, %v4029_v56  ;;  %v3101_v0 = vadd.f32 %v8513_v25, %v2747_v26  ;;  %v3092_v28 = vpop.f32.mrb[251].mxu0  ;;  %v2754_v46 = vpop.f32.mrb[9].mxu1  ;;  %v16663_v53 = vld [vmem:[#allocation39_spill] sm:$0xff] }
 0x308   :  { %v3713_v20 = vmax.f32 %v3633_v10, 0.0  ;;  %v3462_v37 = vadd.f32 %v16663_v53, %v3090_v16  ;;  %v3093_v23 = vadd.f32 %v3092_v28, %v12049_v52  ;;  %v2755_v47 = vpop.f32.mrb[10].mxu1  ;;  %v12122_v14 = vmul.f32 %v3712_v17, %v11864_v4  ;;  %v16664_v28 = vld [vmem:[#allocation157_spill] sm:$0xff]  ;;  %v16666_v53 = vld [vmem:[#allocation80_spill] sm:$0xff] }
 0x309   :  { %16662 = vst [vmem:[#allocation4_spill] sm:$0xff] %v12114_v15  ;;  %v3551_v6 = vmul.f32 %v12037_v45, %v3464_v13  ;;  %v3465_v18 = vadd.f32 %v11594_v8, %v3101_v0  ;;  %4535 = vmatmul.mubr.bf16.vlgmr.msra.gmra.mrb[64].mxu0 %v12114_v15  ;;  %v2757_v46 = vpop.f32.mrb[11].mxu1  ;;  %v12128_v26 = vmul.f32 %v3714_v57, %v11891_v9  ;;  %v16665_v57 = vld [vmem:[#allocation133_spill] sm:$0xff] }
 0x30a   :  { %v12131_v31 = vmul.f32 %v3715_v3, %v12063_v38  ;;  %v3549_v24 = vmul.f32 %v12037_v45, %v3462_v37  ;;  %v3463_v52 = vadd.f32 %v16664_v28, %v3093_v23  ;;  %8679 = vmatpush3.bf16.msra.mxu0 %v11726_v22  ;;  %v12137_v17 = vmul.f32 %v3713_v20, %v12032_v36  ;;  %v8970_v22 = vld [vmem:[%s15475_s2 + $0x150] sm:$0xff]  }
 0x30b   :  { %v3872_v8 = vrot.slane %v12122_v14, 7  ;;  %v3638_v0 = vadd.f32 %v12046_v63, %v3551_v6  ;;  %v3552_v10 = vmul.f32 %v12037_v45, %v3465_v18  ;;  %2967 = vmatmul.mubr.bf16.gmra.mrb[116].mxu1 %v16665_v57  ;;  %v3874_v16 = vrot.slane %v12128_v26, 7  ;;  %8680 = vmatprep.subr.bf16.mxu0 %v8967_v58 }
 0x30c   :  { %v3636_v23 = vadd.f32 %v12046_v63, %v3549_v24  ;;  %v3550_v25 = vmul.f32 %v12037_v45, %v3463_v52  ;;  %v8516_v3 = vpop.f32.mrb[252].mxu0  ;;  %v3873_v13 = vrot.slane %v12137_v17, 7  ;;  %2974 = vmatprep.mubr.bf16.mxu1 %v16666_v53  ;;  %v12158_v28 = vpack.c.bf16 %v12137_v17, %v12122_v14  ;;  %v12160_v24 = vpop.permute.xlu0 %181 }
 0x30d   :  { %v4027_v20 = vsel %vm318_vm1, %v3871_v35, %v3872_v8  ;;  %v3718_v37 = vmax.f32 %v3638_v0, 0.0  ;;  %v3639_v6 = vadd.f32 %v12046_v63, %v3552_v10  ;;  %v3105_v18 = vpop.f32.mrb[253].mxu0  ;;  %16668 = vst [vmem:[#allocation76_spill] sm:$0xff] %v12160_v24  ;;  %v16670_v40 = vrot.slane %v12131_v31, 7 }
 0x30e   :  { %16667 = vst [vmem:[#allocation156_spill] sm:$0xff] %v12158_v28  ;;  %v3716_v52 = vmax.f32 %v3636_v23, 0.0  ;;  %v3637_v57 = vadd.f32 %v12046_v63, %v3550_v25  ;;  %v2760_v56 = vpop.f32.mrb[12].mxu1  ;;  %v3106_v15 = vadd.f32 %v3105_v18, %v2752_v54  ;;  %v8517_v35 = vpop.f32.mrb[254].mxu0  ;;  %v4026_v0 = vsel %vm318_vm1, %v3872_v8, %v3873_v13  ;;  %8681 = vmatpush3.bf16.msra.mxu0 %v8967_v58 }
 0x30f   :  { %v3719_v10 = vmax.f32 %v3639_v6, 0.0  ;;  %v3114_v53 = vadd.f32 %v8516_v3, %v2760_v56  ;;  %v2762_v11 = vpop.f32.mrb[13].mxu1  ;;  %v12165_v46 = vpack.c.bf16 %v4026_v0, %v4027_v20  ;;  %4542 = vmatprep.mubr.bf16.mxu0 %v12158_v28  ;;  %v3108_v29 = vpop.f32.mrb[255].mxu0  ;;  %v4024_v23 = vsel %vm318_vm1, %v3874_v16, %v16670_v40  ;;  %8682 = vmatprep.subr.bf16.mxu0 %v8970_v22  ;;  %v8971_v40 = vld [vmem:[%s15475_s2 + $0x158] sm:$0xff]  }
 0x310   :  { %v3717_v54 = vmax.f32 %v3637_v57, 0.0  ;;  %v3466_v25 = vadd.f32 %v11580_v2, %v3106_v15  ;;  %v2763_v18 = vpop.f32.mrb[14].mxu1  ;;  %v3109_v8 = vadd.f32 %v3108_v29, %v2755_v47  ;;  %v4025_v58 = vsel %vm318_vm1, %v3873_v13, %v3874_v16  ;;  %v16672_v29 = vld [vmem:[#allocation46_spill] sm:$0xff]  ;;  %v12195_v0 = vpop.permute.xlu0 %192 }
 0x311   :  { %16669 = vst [vmem:[#allocation154_spill] sm:$0xff] %v12165_v46  ;;  %v3468_v11 = vadd.f32 %v11611_v30, %v3114_v53  ;;  %v3117_v56 = vadd.f32 %v8517_v35, %v2763_v18  ;;  %4543 = vmatmul.mubr.bf16.gmra.mrb[68].mxu0 %v12165_v46  ;;  %v12178_v20 = vpack.c.bf16 %v4024_v23, %v4025_v58  ;;  %v2765_v6 = vpop.f32.mrb[15].mxu1  ;;  %v16674_v13 = vld [vmem:[#allocation158_spill] sm:$0xff]  ;;  %v16675_v35 = vld [vmem:[#allocation135_spill] sm:$0xff]  ;;  %16676 = vst [vmem:[#allocation113_spill] sm:$0xff] %v12195_v0 }
 0x312   :  { %v3553_v2 = vmul.f32 %v12037_v45, %v3466_v25  ;;  %v3467_v15 = vadd.f32 %v16672_v29, %v3109_v8  ;;  %v12187_v47 = vpack.c.bf16 %v12131_v31, %v12128_v26  ;;  %v12190_v30 = vmul.f32 %v3716_v52, %v11919_v49  ;;  %8683 = vmatpush3.bf16.msra.mxu0 %v8970_v22  ;;  %v16677_v18 = vld [vmem:[#allocation83_spill] sm:$0xff] }
 0x313   :  { %16671 = vst [vmem:[#allocation77_spill] sm:$0xff] %v12178_v20  ;;  %v3555_v16 = vmul.f32 %v12037_v45, %v3468_v11  ;;  %v3469_v57 = vadd.f32 %v16674_v13, %v3117_v56  ;;  %2975 = vmatmul.mubr.bf16.gmra.mrb[120].mxu1 %v16675_v35  ;;  %v12198_v53 = vmul.f32 %v3717_v54, %v12105_v27  ;;  %v16678_v35 = vrot.slane %v12131_v31, 7 }
 0x314   :  { %16673 = vst [vmem:[#allocation112_spill] sm:$0xff] %v12187_v47  ;;  %v12201_v23 = vmul.f32 %v3718_v37, %v11943_v59  ;;  %v3640_v25 = vadd.f32 %v12046_v63, %v3553_v2  ;;  %v3554_v52 = vmul.f32 %v12037_v45, %v3467_v15  ;;  %4550 = vmatprep.mubr.bf16.mxu0 %v12187_v47  ;;  %v12206_v22 = vpop.f32.mrb[0].mxu0  ;;  %v3876_v8 = vrot.slane %v12190_v30, 7  ;;  %v12236_v7 = vpop.permute.xlu0 %203 }
 0x315   :  { %2982 = vmatprep.mubr.bf16.mxu1 %v16677_v18  ;;  %v12211_v58 = vmul.f32 %v3719_v10, %v12160_v24  ;;  %v3642_v54 = vadd.f32 %v12046_v63, %v3555_v16  ;;  %v3556_v37 = vmul.f32 %v12037_v45, %v3469_v57  ;;  %v3121_v11 = vpop.f32.mrb[1].mxu0  ;;  %v3877_v56 = vrot.slane %v12198_v53, 7  ;;  %8684 = vmatprep.subr.bf16.mxu0 %v8971_v40 }
 0x316   :  { %v3720_v2 = vmax.f32 %v3640_v25, 0.0  ;;  %v3641_v29 = vadd.f32 %v12046_v63, %v3554_v52  ;;  %v2768_v15 = vpop.f32.mrb[16].mxu1  ;;  %v12218_v13 = vpop.f32.mrb[2].mxu0  ;;  %v4023_v10 = vsel %vm318_vm1, %v16678_v35, %v3876_v8  ;;  %v12226_v16 = vpack.c.bf16 %v12198_v53, %v12190_v30  ;;  %8685 = vmatpush3.bf16.msra.mxu0 %v8971_v40  ;;  %16682 = vst [vmem:[#allocation165_spill] sm:$0xff] %v12236_v7 }
 0x317   :  { %v3722_v57 = vmax.f32 %v3642_v54, 0.0  ;;  %v3643_v18 = vadd.f32 %v12046_v63, %v3556_v37  ;;  %v3122_v6 = vadd.f32 %v3121_v11, %v2768_v15  ;;  %v2770_v25 = vpop.f32.mrb[17].mxu1  ;;  %v3124_v3 = vpop.f32.mrb[3].mxu0  ;;  %v4022_v52 = vsel %vm318_vm1, %v3876_v8, %v3877_v56 }
 0x318   :  { %16679 = vst [vmem:[#allocation163_spill] sm:$0xff] %v12226_v16  ;;  %v3721_v47 = vmax.f32 %v3641_v29, 0.0  ;;  %v2771_v46 = vpop.f32.mrb[18].mxu1  ;;  %v12231_v28 = vpack.c.bf16 %v4022_v52, %v4023_v10  ;;  %v3878_v35 = vrot.slane %v12201_v23, 7  ;;  %v3879_v5 = vrot.slane %v12211_v58, 7  ;;  %v16685_v10 = vld [vmem:[#allocation137_spill] sm:$0xff] }
 0x319   :  { %v3723_v32 = vmax.f32 %v3643_v18, 0.0  ;;  %v3470_v40 = vadd.f32 %v16681_v61, %v3122_v6  ;;  %v3125_v54 = vadd.f32 %v3124_v3, %v2771_v46  ;;  %4551 = vmatmul.mubr.bf16.gmra.mrb[72].mxu0 %v12178_v20  ;;  %v2773_v37 = vpop.f32.mrb[19].mxu1  ;;  %v12247_v15 = vpack.c.bf16 %v12211_v58, %v12201_v23  ;;  %v16684_v3 = vld [vmem:[#allocation6_spill] sm:$0xff]  ;;  %v16687_v52 = vld [vmem:[#allocation88_spill] sm:$0xff] }
 0x31a   :  { %16680 = vst [vmem:[#allocation8_spill] sm:$0xff] %v12231_v28  ;;  %4558 = vmatprep.mubr.bf16.mxu0 %v12226_v16  ;;  %v4020_v8 = vsel %vm318_vm1, %v3878_v35, %v3879_v5  ;;  %v4021_v29 = vsel %vm318_vm1, %v3877_v56, %v3878_v35  ;;  %v12250_v61 = vmul.f32 %v3720_v2, %v11967_v55 }
 0x31b   :  { %16683 = vst [vmem:[#allocation84_spill] sm:$0xff] %v12247_v15  ;;  %v3557_v46 = vmul.f32 %v12037_v45, %v3470_v40  ;;  %v3471_v6 = vadd.f32 %v16684_v3, %v3125_v54  ;;  %2983 = vmatmul.mubr.bf16.gmra.mrb[124].mxu1 %v16685_v10  ;;  %v12255_v18 = vpack.c.bf16 %v4020_v8, %v4021_v29  ;;  %v4031_v54 = vrot.slane %v12079_v34, 1 }
 0x31c   :  { %v12258_v25 = vmul.f32 %v3721_v47, %v12195_v0  ;;  %2990 = vmatprep.mubr.bf16.mxu1 %v16687_v52  ;;  %v12261_v56 = vpop.f32.mrb[4].mxu0  ;;  %v3880_v35 = vrot.slane %v12250_v61, 7  ;;  %v12265_v2 = vmul.f32 %v3722_v57, %v11986_v19  ;;  %v12268_v40 = vmul.f32 %v3723_v32, %v12236_v7 }
 0x31d   :  { %16686 = vst [vmem:[#allocation160_spill] sm:$0xff] %v12255_v18  ;;  %v3644_v37 = vadd.f32 %v12046_v63, %v3557_v46  ;;  %v3558_v8 = vmul.f32 %v12037_v45, %v3471_v6  ;;  %v3137_v47 = vpop.f32.mrb[5].mxu0 }
 0x31e   :  { %v3881_v29 = vrot.slane %v12258_v25, 7  ;;  %v2776_v10 = vpop.f32.mrb[20].mxu1  ;;  %v12275_v52 = vpop.f32.mrb[6].mxu0  ;;  %v4019_v57 = vsel %vm318_vm1, %v3879_v5, %v3880_v35  ;;  %v12281_v32 = vpack.c.bf16 %v12258_v25, %v12250_v61  ;;  %v3882_v34 = vrot.slane %v12265_v2, 7 }
 0x31f   :  { %v3883_v46 = vrot.slane %v12268_v40, 7  ;;  %v3724_v6 = vmax.f32 %v3644_v37, 0.0  ;;  %v3645_v11 = vadd.f32 %v12046_v63, %v3558_v8  ;;  %v3130_v16 = vadd.f32 %v12206_v22, %v2776_v10  ;;  %v2778_v3 = vpop.f32.mrb[21].mxu1  ;;  %v3140_v20 = vpop.f32.mrb[7].mxu0  ;;  %v16691_v22 = vld [vmem:[#allocation57_spill] sm:$0xff] }
 0x320   :  { %16688 = vst [vmem:[#allocation85_spill] sm:$0xff] %v12281_v32  ;;  %v4018_v7 = vsel %vm318_vm1, %v3880_v35, %v3881_v29  ;;  %v2779_v19 = vpop.f32.mrb[22].mxu1  ;;  %v12289_v5 = vpop.permute.xlu0 %214  ;;  %v4017_v37 = vsel %vm318_vm1, %v3881_v29, %v3882_v34 }
 0x321   :  { %16689 = vst [vmem:[#allocation114_spill] sm:$0xff] %v12289_v5  ;;  %v12291_v0 = vpack.c.bf16 %v4018_v7, %v4019_v57  ;;  %v4016_v55 = vsel %vm318_vm1, %v3882_v34, %v3883_v46  ;;  %v3725_v24 = vmax.f32 %v3645_v11, 0.0  ;;  %v3472_v3 = vadd.f32 %v16691_v22, %v3130_v16  ;;  %4559 = vmatmul.mubr.bf16.gmra.mrb[76].mxu0 %v12231_v28  ;;  %v2781_v35 = vpop.f32.mrb[23].mxu1  ;;  %v16696_v57 = vld [vmem:[#allocation9_spill] sm:$0xff] }
 0x322   :  { %v3133_v10 = vadd.f32 %v12218_v13, %v2779_v19  ;;  %v12301_v59 = vpack.c.bf16 %v4016_v55, %v4017_v37  ;;  %4566 = vmatprep.mubr.bf16.mxu0 %v12247_v15  ;;  %v12306_v7 = vpack.c.bf16 %v12268_v40, %v12265_v2  ;;  %v12309_v29 = vmul.f32 %v3724_v6, %v12012_v44  ;;  %v16697_v37 = vld [vmem:[#allocation140_spill] sm:$0xff]  ;;  %v16699_v35 = vld [vmem:[#allocation91_spill] sm:$0xff] }
 0x323   :  { %16690 = vst [vmem:[#allocation115_spill] sm:$0xff] %v12291_v0  ;;  %v4032_v11 = vrot.slane %v12122_v14, 1  ;;  %v16694_v16 = vrot.slane %v12128_v26, 1  ;;  %v16695_v19 = vrot.slane %v12137_v17, 1  ;;  %v3559_v55 = vmul.f32 %v12037_v45, %v3472_v3  ;;  %2991 = vmatmul.mubr.bf16.gmra.mrb[128].mxu1 %v16697_v37 }
 0x324   :  { %16692 = vst [vmem:[#allocation15_spill] sm:$0xff] %v12301_v59  ;;  %16693 = vst [vmem:[#allocation11_spill] sm:$0xff] %v12306_v7  ;;  %v3473_v34 = vadd.f32 %v16696_v57, %v3133_v10  ;;  %v12322_v22 = vmul.f32 %v3725_v24, %v12289_v5  ;;  %v16698_v6 = vrot.slane %v12069_v62, 1  ;;  %2998 = vmatprep.mubr.bf16.mxu1 %v16699_v35  ;;  %v12329_v8 = vpop.f32.mrb[8].mxu0  ;;  %v16702_v57 = vrot.slane %v12083_v21, 1 }
 0x325   :  { %v4185_v13 = vsel %vm479_vm0, %v16695_v19, %v16694_v16  ;;  %v3884_v16 = vrot.slane %v12309_v29, 7  ;;  %v16700_v3 = vmov %v16695_v19  ;;  %v4187_v24 = vsel %vm479_vm0, %v4031_v54, %v4032_v11  ;;  %v12348_v15 = vpop.f32.mrb[9].mxu0 }
 0x326   :  { %v4188_v14 = vsel %vm479_vm0, %v16698_v6, %v4031_v54  ;;  %v4186_v10 = vsel %vm479_vm0, %v4032_v11, %v16700_v3  ;;  %v16701_v19 = vmov %v16698_v6  ;;  %v3646_v6 = vadd.f32 %v12046_v63, %v3559_v55  ;;  %v2784_v28 = vpop.f32.mrb[24].mxu1  ;;  %v12352_v54 = vpop.f32.mrb[10].mxu0 }
 0x327   :  { %v12344_v37 = vsel %vm479_vm0, %v16702_v57, %v16701_v19  ;;  %v3560_v35 = vmul.f32 %v12037_v45, %v3473_v34  ;;  %v3885_v17 = vrot.slane %v12322_v22, 7  ;;  %v4015_v62 = vsel %vm318_vm1, %v3883_v46, %v3884_v16  ;;  %v2786_v44 = vpop.f32.mrb[25].mxu1  ;;  %v12365_v3 = vpop.f32.mrb[11].mxu0 }
 0x328   :  { %v12358_v11 = vpack.c.bf16 %v12322_v22, %v12309_v29  ;;  %v12360_v19 = vpack.c.bf16 %v4187_v24, %v4188_v14  ;;  %v12362_v55 = vpack.c.bf16 %v4185_v13, %v4186_v10  ;;  %v3726_v34 = vmax.f32 %v3646_v6, 0.0  ;;  %v2787_v49 = vpop.f32.mrb[26].mxu1  ;;  %v12369_v46 = vpop.permute.xlu0 %225 }
 0x329   :  { %v3647_v57 = vadd.f32 %v12046_v63, %v3560_v35  ;;  %v3138_v5 = vadd.f32 %v3137_v47, %v2784_v28  ;;  %v4014_v27 = vsel %vm318_vm1, %v3884_v16, %v3885_v17  ;;  %16706 = vst [vmem:[#allocation93_spill] sm:$0xff] %v12369_v46  ;;  %v4035_v14 = vrot.slane %v12131_v31, 1  ;;  %v16710_v47 = vld [vmem:[#allocation54_spill] sm:$0xff]  ;;  %4567 = vmatmul.mubr.bf16.gmra.mrb[80].mxu0 %v12255_v18  ;;  %v2789_v35 = vpop.f32.mrb[27].mxu1 }
 0x32a   :  { %16703 = vst [vmem:[#allocation169_spill] sm:$0xff] %v12358_v11  ;;  %16704 = vst [vmem:[#allocation92_spill] sm:$0xff] %v12360_v19  ;;  %v12371_v38 = vpack.c.bf16 %v4014_v27, %v4015_v62  ;;  %v4036_v13 = vrot.slane %v12190_v30, 1  ;;  %v16708_v10 = vrot.slane %v12201_v23, 1  ;;  %v16709_v24 = vrot.slane %v12198_v53, 1  ;;  %4574 = vmatprep.mubr.bf16.mxu0 %v12281_v32  ;;  %v16715_v35 = vld [vmem:[#allocation95_spill] sm:$0xff] }
 0x32b   :  { %16705 = vst [vmem:[#allocation167_spill] sm:$0xff] %v12362_v55  ;;  %v3727_v28 = vmax.f32 %v3647_v57, 0.0  ;;  %v3474_v6 = vadd.f32 %v16710_v47, %v3138_v5  ;;  %v3141_v16 = vadd.f32 %v3140_v20, %v2787_v49  ;;  %v12384_v27 = vmul.f32 %v3726_v34, %v12030_v12  ;;  %v16713_v34 = vld [vmem:[#allocation161_spill] sm:$0xff] }
 0x32c   :  { %16707 = vst [vmem:[#allocation116_spill] sm:$0xff] %v12371_v38  ;;  %v4181_v44 = vsel %vm479_vm0, %v16709_v24, %v16708_v10  ;;  %v16711_v31 = vmov %v16709_v24  ;;  %v4183_v62 = vsel %vm479_vm0, %v4035_v14, %v4036_v13  ;;  %v16712_v57 = vrot.slane %v12128_v26, 1  ;;  %v16714_v24 = vld [vmem:[#allocation145_spill] sm:$0xff] }
 0x32d   :  { %v4182_v30 = vsel %vm479_vm0, %v4036_v13, %v16711_v31  ;;  %v4039_v20 = vrot.slane %v12211_v58, 1  ;;  %v3561_v5 = vmul.f32 %v12037_v45, %v3474_v6  ;;  %v3475_v10 = vadd.f32 %v16713_v34, %v3141_v16  ;;  %2999 = vmatmul.mubr.bf16.gmra.mrb[132].mxu1 %v16714_v24  ;;  %v12411_v58 = vpop.f32.mrb[12].mxu0 }
 0x32e   :  { %v4184_v49 = vsel %vm479_vm0, %v16712_v57, %v4035_v14  ;;  %v12402_v53 = vmul.f32 %v3727_v28, %v12369_v46  ;;  %v3886_v47 = vrot.slane %v12384_v27, 7  ;;  %3006 = vmatprep.mubr.bf16.mxu1 %v16715_v35  ;;  %v12409_v14 = vpack.c.bf16 %v4181_v44, %v4182_v30  ;;  %v12419_v34 = vpop.f32.mrb[13].mxu0  ;;  %v2792_v24 = vpop.f32.mrb[28].mxu1 }
 0x32f   :  { %v12407_v13 = vpack.c.bf16 %v4183_v62, %v4184_v49  ;;  %v4040_v6 = vrot.slane %v12250_v61, 1  ;;  %v3648_v16 = vadd.f32 %v12046_v63, %v3561_v5  ;;  %v3562_v31 = vmul.f32 %v12037_v45, %v3475_v10  ;;  %v12425_v30 = vpop.f32.mrb[14].mxu0  ;;  %v2794_v18 = vpop.f32.mrb[29].mxu1 }
 0x330   :  { %16717 = vst [vmem:[#allocation23_spill] sm:$0xff] %v12409_v14  ;;  %v3887_v28 = vrot.slane %v12402_v53, 7  ;;  %v4013_v57 = vsel %vm318_vm1, %v3885_v17, %v3886_v47  ;;  %v12423_v44 = vpack.c.bf16 %v12402_v53, %v12384_v27  ;;  %v16719_v61 = vrot.slane %v12265_v2, 1  ;;  %v12443_v12 = vpop.f32.mrb[15].mxu0 }
 0x331   :  { %16716 = vst [vmem:[#allocation31_spill] sm:$0xff] %v12407_v13  ;;  %v16720_v62 = vrot.slane %v12258_v25, 1  ;;  %v4179_v10 = vsel %vm479_vm0, %v4039_v20, %v4040_v6  ;;  %v3728_v35 = vmax.f32 %v3648_v16, 0.0  ;;  %v3649_v26 = vadd.f32 %v12046_v63, %v3562_v31  ;;  %4575 = vmatmul.mubr.bf16.gmra.mrb[84].mxu0 %v12291_v0 }
 0x332   :  { %16718 = vst [vmem:[#allocation19_spill] sm:$0xff] %v12423_v44  ;;  %v3146_v32 = vadd.f32 %v12261_v56, %v2792_v24  ;;  %v4012_v46 = vsel %vm318_vm1, %v3886_v47, %v3887_v28  ;;  %v16723_v25 = vrot.slane %v12201_v23, 1  ;;  %v4043_v16 = vrot.slane %v12268_v40, 1  ;;  %v16725_v56 = vld [vmem:[#allocation65_spill] sm:$0xff]  ;;  %4582 = vmatprep.mubr.bf16.mxu0 %v12306_v7 }
 0x333   :  { %v4177_v49 = vsel %vm479_vm0, %v16720_v62, %v16719_v61  ;;  %v16721_v5 = vmov %v16720_v62  ;;  %v2795_v61 = vpop.f32.mrb[30].mxu1  ;;  %v12445_v62 = vpack.c.bf16 %v4012_v46, %v4013_v57  ;;  %v3729_v31 = vmax.f32 %v3649_v26, 0.0 }
 0x334   :  { %v4178_v17 = vsel %vm479_vm0, %v4040_v6, %v16721_v5  ;;  %v4180_v5 = vsel %vm479_vm0, %v16723_v25, %v4039_v20  ;;  %v3476_v18 = vadd.f32 %v16725_v56, %v3146_v32  ;;  %v3149_v24 = vadd.f32 %v12275_v52, %v2795_v61  ;;  %v2797_v47 = vpop.f32.mrb[31].mxu1  ;;  %v16732_v25 = vld [vmem:[#allocation98_spill] sm:$0xff] }
 0x335   :  { %16722 = vst [vmem:[#allocation173_spill] sm:$0xff] %v12445_v62  ;;  %v12451_v6 = vpack.c.bf16 %v4177_v49, %v4178_v17  ;;  %v3808_v46 = vmul.f32 %v3728_v35, %v12059_v41  ;;  %v12459_v23 = vpack.c.bf16 %v4179_v10, %v4180_v5  ;;  %v4044_v20 = vrot.slane %v12309_v29, 1  ;;  %v16730_v17 = vld [vmem:[#allocation162_spill] sm:$0xff]  ;;  %v16731_v10 = vld [vmem:[#allocation148_spill] sm:$0xff]  ;;  %v12485_v47 = vpop.f32.mrb[16].mxu0 }
 0x336   :  { %v16727_v57 = vrot.slane %v12384_v27, 1  ;;  %v16728_v40 = vrot.slane %v12322_v22, 1  ;;  %v16729_v52 = vrot.slane %v12265_v2, 1  ;;  %v3563_v49 = vmul.f32 %v12037_v45, %v3476_v18  ;;  %3007 = vmatmul.mubr.bf16.gmra.mrb[136].mxu1 %v16731_v10 }
 0x337   :  { %16724 = vst [vmem:[#allocation99_spill] sm:$0xff] %v12451_v6  ;;  %16726 = vst [vmem:[#allocation171_spill] sm:$0xff] %v12459_v23  ;;  %v3477_v35 = vadd.f32 %v16730_v17, %v3149_v24  ;;  %v12476_v29 = vmul.f32 %v3729_v31, %v11836_v33  ;;  %v3888_v61 = vrot.slane %v3808_v46, 7  ;;  %3014 = vmatprep.mubr.bf16.mxu1 %v16732_v25  ;;  %v4047_v18 = vrot.slane %v12402_v53, 1  ;;  %v2800_v17 = vpop.f32.mrb[32].mxu1 }
 0x338   :  { %v4173_v32 = vsel %vm479_vm0, %v16728_v40, %v16727_v57  ;;  %v4176_v26 = vsel %vm479_vm0, %v16729_v52, %v4043_v16  ;;  %v16733_v5 = vmov %v16728_v40  ;;  %v4175_v56 = vsel %vm479_vm0, %v4043_v16, %v4044_v20  ;;  %v12493_v52 = vpop.f32.mrb[17].mxu0 }
 0x339   :  { %v4174_v2 = vsel %vm479_vm0, %v4044_v20, %v16733_v5  ;;  %v4048_v24 = vrot.slane %v3808_v46, 1  ;;  %v3650_v57 = vadd.f32 %v12046_v63, %v3563_v49  ;;  %v3564_v31 = vmul.f32 %v12037_v45, %v3477_v35  ;;  %v12503_v49 = vpop.f32.mrb[18].mxu0  ;;  %4583 = vmatmul.mubr.bf16.gmra.mrb[88].mxu0 %v12301_v59 }
 0x33a   :  { %v3889_v40 = vrot.slane %v12476_v29, 7  ;;  %v4011_v22 = vsel %vm318_vm1, %v3887_v28, %v3888_v61  ;;  %v4049_v10 = vrot.slane %v12476_v29, 1  ;;  %v12497_v16 = vpack.c.bf16 %v12476_v29, %v3808_v46  ;;  %v2802_v28 = vpop.f32.mrb[33].mxu1  ;;  %v12509_v0 = vpop.f32.mrb[19].mxu0  ;;  %4590 = vmatprep.mubr.bf16.mxu0 %v12358_v11 }
 0x33b   :  { %v12499_v20 = vpack.c.bf16 %v4175_v56, %v4176_v26  ;;  %v12501_v53 = vpack.c.bf16 %v4173_v32, %v4174_v2  ;;  %v3730_v35 = vmax.f32 %v3650_v57, 0.0  ;;  %v3651_v25 = vadd.f32 %v12046_v63, %v3564_v31  ;;  %v2803_v33 = vpop.f32.mrb[34].mxu1  ;;  %v16739_v56 = vld [vmem:[#allocation62_spill] sm:$0xff] }
 0x33c   :  { %16734 = vst [vmem:[#allocation100_spill] sm:$0xff] %v12497_v16  ;;  %v3154_v5 = vadd.f32 %v12348_v15, %v2800_v17  ;;  %v4010_v7 = vsel %vm318_vm1, %v3888_v61, %v3889_v40  ;;  %v4170_v32 = vsel %vm479_vm0, %v4048_v24, %v4049_v10  ;;  %v4171_v26 = vsel %vm479_vm0, %v4047_v18, %v4048_v24  ;;  %v16742_v17 = vld [vmem:[#allocation159_spill] sm:$0xff] }
 0x33d   :  { %16735 = vst [vmem:[#allocation117_spill] sm:$0xff] %v12499_v20  ;;  %16736 = vst [vmem:[#allocation118_spill] sm:$0xff] %v12501_v53  ;;  %v12511_v46 = vpack.c.bf16 %v4010_v7, %v4011_v22  ;;  %v16738_v29 = vrot.slane %v12384_v27, 1  ;;  %v3731_v2 = vmax.f32 %v3651_v25, 0.0  ;;  %v3157_v61 = vadd.f32 %v12365_v3, %v2803_v33  ;;  %v2805_v7 = vpop.f32.mrb[35].mxu1  ;;  %v8973_v22 = vld [vmem:[%s15475_s2 + $0x160] sm:$0xff]  }
 0x33e   :  { %v3478_v57 = vadd.f32 %v16739_v56, %v3154_v5  ;;  %v3810_v31 = vmul.f32 %v3730_v35, %v11989_v48  ;;  %v15796_v24 = vrot.slane %v12074_v51, 1  ;;  %v12535_v33 = vpack.c.bf16 %v12083_v21, %v12074_v51  ;;  %v16743_v25 = vld [vmem:[#allocation151_spill] sm:$0xff]  ;;  %8686 = vmatprep.subr.bf16.mxu0 %v8973_v22  ;;  %v2808_v11 = vpop.f32.mrb[36].mxu1 }
 0x33f   :  { %16737 = vst [vmem:[#allocation32_spill] sm:$0xff] %v12511_v46  ;;  %v4172_v15 = vsel %vm479_vm0, %v16738_v29, %v4047_v18  ;;  %v15793_v18 = vrot.slane %v12074_v51, 7  ;;  %v3479_v35 = vadd.f32 %v16742_v17, %v3157_v61  ;;  %3015 = vmatmul.mubr.bf16.gmra.mrb[140].mxu1 %v16743_v25  ;;  %v3811_v5 = vmul.f32 %v3731_v2, %v12015_v43  ;;  %v12542_v29 = vpop.f32.mrb[20].mxu0 }
 0x340   :  { %v12529_v27 = vpack.c.bf16 %v4171_v26, %v4172_v15  ;;  %16741 = vst [vmem:[#allocation177_spill] sm:$0xff] %v12535_v33  ;;  %v3565_v3 = vmul.f32 %v12037_v45, %v3478_v57  ;;  %v3890_v28 = vrot.slane %v3810_v31, 7  ;;  %8598 = vmatprep.mubr.bf16.mxu1 %v12360_v19  ;;  %v4050_v26 = vrot.slane %v3810_v31, 1  ;;  %8687 = vmatpush3.bf16.msra.mxu0 %v8973_v22  ;;  %v12562_v25 = vpop.f32.mrb[21].mxu0 }
 0x341   :  { %v16744_v15 = vrot.slane %v12083_v21, 7  ;;  %v16746_v57 = vrot.slane %v12083_v21, 1  ;;  %v3566_v7 = vmul.f32 %v12037_v45, %v3479_v35  ;;  %v3891_v22 = vrot.slane %v3811_v5, 7  ;;  %v12568_v59 = vpop.f32.mrb[22].mxu0  ;;  %4591 = vmatmul.mubr.bf16.gmra.mrb[92].mxu0 %v12371_v38 }
 0x342   :  { %16740 = vst [vmem:[#allocation27_spill] sm:$0xff] %v12529_v27  ;;  %v3652_v61 = vadd.f32 %v12046_v63, %v3565_v3  ;;  %v4009_v17 = vsel %vm318_vm1, %v3889_v40, %v3890_v28  ;;  %v4169_v21 = vsel %vm479_vm0, %v4049_v10, %v4050_v26  ;;  %v2810_v40 = vpop.f32.mrb[37].mxu1  ;;  %4598 = vmatprep.mubr.bf16.mxu0 %v12423_v44 }
 0x343   :  { %v12550_v56 = vsel %vm318_vm1, %v15793_v18, %v16744_v15  ;;  %v4110_v2 = vsel %vm479_vm0, %v15796_v24, %v16746_v57  ;;  %v12564_v15 = vpack.c.bf16 %v3811_v5, %v3810_v31  ;;  %v4051_v18 = vrot.slane %v3811_v5, 1  ;;  %v12577_v31 = vpop.f32.mrb[23].mxu0  ;;  %v2811_v33 = vpop.f32.mrb[38].mxu1  ;;  %v8972_v5 = vld [vmem:[%s15475_s2 + $0xc0] sm:$0xff]  }
 0x344   :  { %16745 = vst [vmem:[#allocation175_spill] sm:$0xff] %v12550_v56  ;;  %v12571_v57 = vpack.c.bf16 %v12344_v37, %v4110_v2  ;;  %v3732_v3 = vmax.f32 %v3652_v61, 0.0  ;;  %v3653_v35 = vadd.f32 %v12046_v63, %v3566_v7  ;;  %v3162_v24 = vadd.f32 %v12329_v8, %v2808_v11 }
 0x345   :  { %16747 = vst [vmem:[#allocation119_spill] sm:$0xff] %v12564_v15  ;;  %v4008_v19 = vsel %vm318_vm1, %v3890_v28, %v3891_v22  ;;  %v12581_v10 = vpack.c.bf16 %v4169_v21, %v4170_v32  ;;  %v4168_v37 = vsel %vm479_vm0, %v4050_v26, %v4051_v18  ;;  %v3165_v11 = vadd.f32 %v12352_v54, %v2811_v33  ;;  %v2813_v28 = vpop.f32.mrb[39].mxu1  ;;  %v12598_v54 = vpop.f32.mrb[24].mxu0 }
 0x346   :  { %16748 = vst [vmem:[#allocation34_spill] sm:$0xff] %v12571_v57  ;;  %v12579_v56 = vpack.c.bf16 %v4008_v19, %v4009_v17  ;;  %v3733_v2 = vmax.f32 %v3653_v35, 0.0  ;;  %v3480_v8 = vadd.f32 %v11691_v39, %v3162_v24  ;;  %v3812_v19 = vmul.f32 %v3732_v3, %v11864_v4  ;;  %v8974_v24 = vld [vmem:[%s15475_s2 + $0xc8] sm:$0xff]   ;;  %v12607_v3 = vpop.f32.mrb[25].mxu0  ;;  %v2816_v35 = vpop.f32.mrb[40].mxu1 }
 0x347   :  { %16750 = vst [vmem:[#allocation37_spill] sm:$0xff] %v12581_v10  ;;  %v3481_v26 = vadd.f32 %v11701_v1, %v3165_v11  ;;  %8599 = vmatmul.mubr.bf16.vlgmr.msra.gmra.mrb[144].mxu1 %v12362_v55 }
 0x348   :  { %16749 = vst [vmem:[#allocation179_spill] sm:$0xff] %v12579_v56  ;;  %v3567_v32 = vmul.f32 %v12037_v45, %v3480_v8  ;;  %v3813_v61 = vmul.f32 %v3733_v2, %v12032_v36  ;;  %v3892_v7 = vrot.slane %v3812_v19, 7  ;;  %8602 = vmatprep.mubr.bf16.mxu1 %v12407_v13  ;;  %v4052_v39 = vrot.slane %v3812_v19, 1  ;;  %5402 = vmatpush1.bf16.msra.mxu1 %v8972_v5  ;;  %v12614_v8 = vpop.f32.mrb[26].mxu0 }
 0x349   :  { %v3568_v17 = vmul.f32 %v12037_v45, %v3481_v26  ;;  %5403 = vmatprep.subr.bf16.mxu1 %v16037_v50  ;;  %v2818_v26 = vpop.f32.mrb[41].mxu1  ;;  %v12620_v44 = vpop.f32.mrb[27].mxu0  ;;  %4599 = vmatmul.mubr.bf16.gmra.mrb[96].mxu0 %v12445_v62 }
 0x34a   :  { %v3654_v33 = vadd.f32 %v12046_v63, %v3567_v32  ;;  %v3893_v1 = vrot.slane %v3813_v61, 7  ;;  %v4007_v21 = vsel %vm318_vm1, %v3891_v22, %v3892_v7  ;;  %v4053_v40 = vrot.slane %v3813_v61, 1  ;;  %v2819_v38 = vpop.f32.mrb[42].mxu1  ;;  %4606 = vmatprep.mubr.bf16.mxu0 %v12497_v16 }
 0x34b   :  { %v12610_v2 = vpack.c.bf16 %v3813_v61, %v3812_v19  ;;  %v4167_v5 = vsel %vm479_vm0, %v4051_v18, %v4052_v39  ;;  %v3655_v28 = vadd.f32 %v12046_v63, %v3568_v17  ;;  %v3170_v32 = vadd.f32 %v12419_v34, %v2816_v35  ;;  %v2821_v17 = vpop.f32.mrb[43].mxu1 }
 0x34c   :  { %v3734_v11 = vmax.f32 %v3654_v33, 0.0  ;;  %v4006_v22 = vsel %vm318_vm1, %v3892_v7, %v3893_v1  ;;  %v4166_v19 = vsel %vm479_vm0, %v4052_v39, %v4053_v40  ;;  %v12626_v18 = vpack.c.bf16 %v4167_v5, %v4168_v37  ;;  %5404 = vmatpush1.bf16.msra.mxu1 %v8974_v24  ;;  %v16754_v39 = vld [vmem:[#allocation70_spill] sm:$0xff]  ;;  %v16755_v24 = vld [vmem:[#allocation69_spill] sm:$0xff] }
 0x34d   :  { %16751 = vst [vmem:[#allocation180_spill] sm:$0xff] %v12610_v2  ;;  %v12622_v13 = vpack.c.bf16 %v4006_v22, %v4007_v21  ;;  %v3735_v61 = vmax.f32 %v3655_v28, 0.0  ;;  %v3482_v33 = vadd.f32 %v11687_v60, %v3170_v32  ;;  %v3173_v34 = vadd.f32 %v12443_v12, %v2819_v38  ;;  %5405 = vmatprep.subr.bf16.mxu1 %v16037_v50  ;;  %v12639_v38 = vpop.f32.mrb[28].mxu0  ;;  %v8975_v22 = vld [vmem:[%s15475_s2 + $0xd0] sm:$0xff]  }
 0x34e   :  { %16753 = vst [vmem:[#allocation120_spill] sm:$0xff] %v12626_v18  ;;  %v3814_v7 = vmul.f32 %v3734_v11, %v11891_v9  ;;  %v12645_v26 = vpop.f32.mrb[29].mxu0 }
 0x34f   :  { %16752 = vst [vmem:[#allocation38_spill] sm:$0xff] %v12622_v13  ;;  %v3569_v21 = vmul.f32 %v12037_v45, %v3482_v33  ;;  %v3483_v37 = vadd.f32 %v16754_v39, %v3173_v34  ;;  %8603 = vmatmul.mubr.bf16.gmra.mrb[148].mxu1 %v12409_v14  ;;  %v3815_v35 = vmul.f32 %v3735_v61, %v16755_v24  ;;  %v2824_v61 = vpop.f32.mrb[44].mxu1 }
 0x350   :  { %v3894_v60 = vrot.slane %v3814_v7, 7  ;;  %8606 = vmatprep.mubr.bf16.mxu1 %v12459_v23  ;;  %v4054_v12 = vrot.slane %v3814_v7, 1  ;;  %v2826_v16 = vpop.f32.mrb[45].mxu1  ;;  %5406 = vmatpush1.bf16.msra.mxu1 %v8975_v22 }
 0x351   :  { %v3656_v5 = vadd.f32 %v12046_v63, %v3569_v21  ;;  %v3570_v11 = vmul.f32 %v12037_v45, %v3483_v37  ;;  %v3895_v28 = vrot.slane %v3815_v35, 7  ;;  %v12650_v33 = vpack.c.bf16 %v3815_v35, %v3814_v7  ;;  %v12654_v21 = vpop.f32.mrb[30].mxu0  ;;  %v2827_v7 = vpop.f32.mrb[46].mxu1  ;;  %5407 = vmatprep.subr.bf16.mxu1 %v16037_v50  ;;  %4607 = vmatmul.mubr.bf16.gmra.mrb[100].mxu0 %v12511_v46 }
 0x352   :  { %v4005_v32 = vsel %vm318_vm1, %v3893_v1, %v3894_v60  ;;  %v4165_v34 = vsel %vm479_vm0, %v4053_v40, %v4054_v12  ;;  %v4055_v17 = vrot.slane %v3815_v35, 1  ;;  %v3178_v1 = vadd.f32 %v12411_v58, %v2824_v61  ;;  %v12660_v23 = vpop.f32.mrb[31].mxu0  ;;  %4614 = vmatprep.mubr.bf16.mxu0 %v12564_v15 }
 0x353   :  { %16756 = vst [vmem:[#allocation40_spill] sm:$0xff] %v12650_v33  ;;  %v3736_v39 = vmax.f32 %v3656_v5, 0.0  ;;  %v3657_v37 = vadd.f32 %v12046_v63, %v3570_v11  ;;  %v4004_v62 = vsel %vm318_vm1, %v3894_v60, %v3895_v28  ;;  %v12664_v55 = vpack.c.bf16 %v4165_v34, %v4166_v19  ;;  %v16759_v5 = vld [vmem:[#allocation12_spill] sm:$0xff]  ;;  %v2829_v60 = vpop.f32.mrb[47].mxu1  ;;  %v16760_v11 = vld [vmem:[#allocation79_spill] sm:$0xff] }
 0x354   :  { %v12662_v14 = vpack.c.bf16 %v4004_v62, %v4005_v32  ;;  %v4164_v40 = vsel %vm479_vm0, %v4054_v12, %v4055_v17  ;;  %v3484_v58 = vadd.f32 %v16759_v5, %v3178_v1  ;;  %v3181_v16 = vadd.f32 %v12425_v30, %v2827_v7  ;;  %v16761_v19 = vld [vmem:[#allocation55_spill] sm:$0xff]  ;;  %v16762_v12 = vld [vmem:[#allocation5_spill] sm:$0xff]  ;;  %v12679_v30 = vpop.f32.mrb[32].mxu0 }
 0x355   :  { %16758 = vst [vmem:[#allocation52_spill] sm:$0xff] %v12664_v55  ;;  %v3737_v35 = vmax.f32 %v3657_v37, 0.0  ;;  %v3816_v22 = vmul.f32 %v3736_v39, %v16760_v11 }
 0x356   :  { %16757 = vst [vmem:[#allocation181_spill] sm:$0xff] %v12662_v14  ;;  %v3571_v62 = vmul.f32 %v12037_v45, %v3484_v58  ;;  %v3485_v32 = vadd.f32 %v16761_v19, %v3181_v16  ;;  %v12685_v58 = vpop.f32.mrb[33].mxu0  ;;  %v2832_v16 = vpop.f32.mrb[48].mxu1 }
 0x357   :  { %8607 = vmatmul.mubr.bf16.gmra.mrb[152].mxu1 %v12451_v6  ;;  %v3817_v61 = vmul.f32 %v3737_v35, %v16762_v12  ;;  %v3896_v34 = vrot.slane %v3816_v22, 7  ;;  %v4056_v37 = vrot.slane %v3816_v22, 1  ;;  %v12691_v15 = vpop.f32.mrb[34].mxu0 }
 0x358   :  { %8610 = vmatprep.mubr.bf16.mxu1 %v12499_v20  ;;  %v3658_v1 = vadd.f32 %v12046_v63, %v3571_v62  ;;  %v3572_v39 = vmul.f32 %v12037_v45, %v3485_v32  ;;  %v3186_v45 = vadd.f32 %v12493_v52, %v2832_v16  ;;  %v2834_v32 = vpop.f32.mrb[49].mxu1  ;;  %v12697_v20 = vpop.f32.mrb[35].mxu0  ;;  %v16768_v16 = vld [vmem:[#allocation164_spill] sm:$0xff] }
 0x359   :  { %v3897_v7 = vrot.slane %v3817_v61, 7  ;;  %v4003_v5 = vsel %vm318_vm1, %v3895_v28, %v3896_v34  ;;  %v4057_v60 = vrot.slane %v3817_v61, 1  ;;  %v12687_v19 = vpack.c.bf16 %v3817_v61, %v3816_v22  ;;  %v2835_v6 = vpop.f32.mrb[50].mxu1  ;;  %4615 = vmatmul.mubr.bf16.gmra.mrb[104].mxu0 %v12579_v56  ;;  %v12728_v32 = vld [vmem:[%s15477_s4] ss:$0 sm:$0xff] }
 0x35a   :  { %v4163_v35 = vsel %vm479_vm0, %v4055_v17, %v4056_v37  ;;  %v3738_v46 = vmax.f32 %v3658_v1, 0.0  ;;  %v3659_v62 = vadd.f32 %v12046_v63, %v3572_v39  ;;  %v16766_v1 = vld [vmem:[#allocation73_spill] sm:$0xff]  ;;  %v3189_v63 = vadd.f32 %v12509_v0, %v2835_v6  ;;  %v2837_v52 = vpop.f32.mrb[51].mxu1  ;;  %v16767_v39 = vld [vmem:[#allocation134_spill] sm:$0xff]  ;;  %4622 = vmatprep.mubr.bf16.mxu0 %v12610_v2  ;;  %v16769_v6 = vld [vmem:[#allocation76_spill] sm:$0xff] }
 0x35b   :  { %16763 = vst [vmem:[#allocation182_spill] sm:$0xff] %v12687_v19  ;;  %v4002_v28 = vsel %vm318_vm1, %v3896_v34, %v3897_v7  ;;  %v4162_v22 = vsel %vm479_vm0, %v4056_v37, %v4057_v60  ;;  %v12703_v17 = vpack.c.bf16 %v4163_v35, %v4164_v40  ;;  %v3486_v51 = vadd.f32 %v16766_v1, %v3186_v45  ;;  %v12716_v40 = vld [vmem:[%s15476_s3] ss:$0 sm:$0xff] }
 0x35c   :  { %v12699_v57 = vpack.c.bf16 %v4002_v28, %v4003_v5  ;;  %v3739_v61 = vmax.f32 %v3659_v62, 0.0  ;;  %v3818_v34 = vmul.f32 %v3738_v46, %v16767_v39  ;;  %v8976_v5 = vld [vmem:[%s15475_s2 + $0xd8] sm:$0xff]   ;;  %v3487_v0 = vadd.f32 %v16768_v16, %v3189_v63  ;;  %v12723_v45 = vpop.f32.mrb[36].mxu0 }
 0x35d   :  { %16765 = vst [vmem:[#allocation42_spill] sm:$0xff] %v12703_v17  ;;  %v3573_v37 = vmul.f32 %v12716_v40, %v3486_v51  ;;  %16770 = vst [vmem:[#allocation43_spill] sm:$0xff] %v12723_v45  ;;  %5408 = vmatpush1.bf16.msra.mxu1 %v8976_v5  ;;  %v12734_v63 = vpop.f32.mrb[37].mxu0 }
 0x35e   :  { %16764 = vst [vmem:[#allocation138_spill] sm:$0xff] %v12699_v57  ;;  %v3819_v35 = vmul.f32 %v3739_v61, %v16769_v6  ;;  %v3898_v46 = vrot.slane %v3818_v34, 7  ;;  %v4058_v62 = vrot.slane %v3818_v34, 1  ;;  %v3574_v28 = vmul.f32 %v12716_v40, %v3487_v0  ;;  %5409 = vmatprep.subr.bf16.mxu1 %v16037_v50  ;;  %v2840_v52 = vpop.f32.mrb[52].mxu1  ;;  %v12741_v56 = vpop.f32.mrb[38].mxu0 }
 0x35f   :  { %8611 = vmatmul.mubr.bf16.gmra.mrb[156].mxu1 %v12501_v53  ;;  %v3660_v51 = vadd.f32 %v12728_v32, %v3573_v37  ;;  %16772 = vst [vmem:[#allocation141_spill] sm:$0xff] %v12741_v56  ;;  %v2842_v53 = vpop.f32.mrb[53].mxu1  ;;  %v12747_v45 = vpop.f32.mrb[39].mxu0 }
 0x360   :  { %8614 = vmatprep.mubr.bf16.mxu1 %v12529_v27  ;;  %v3899_v1 = vrot.slane %v3819_v35, 7  ;;  %v4001_v61 = vsel %vm318_vm1, %v3897_v7, %v3898_v46  ;;  %v4161_v5 = vsel %vm479_vm0, %v4057_v60, %v4058_v62  ;;  %v12739_v16 = vpack.c.bf16 %v3819_v35, %v3818_v34  ;;  %16773 = vst [vmem:[#allocation186_spill] sm:$0xff] %v12747_v45  ;;  %v2843_v6 = vpop.f32.mrb[54].mxu1  ;;  %v16776_v53 = vld [vmem:[#allocation106_spill] sm:$0xff] }
 0x361   :  { %v4059_v2 = vrot.slane %v3819_v35, 1  ;;  %v3740_v37 = vmax.f32 %v3660_v51, 0.0  ;;  %v3661_v0 = vadd.f32 %v12728_v32, %v3574_v28  ;;  %v3194_v27 = vadd.f32 %v12485_v47, %v2840_v52  ;;  %v8977_v35 = vld [vmem:[%s15475_s2 + $0xe0] sm:$0xff]   ;;  %v8978_v47 = vld [vmem:[%s15475_s2 + $0x168] sm:$0xff]   ;;  %4623 = vmatmul.mubr.bf16.gmra.mrb[108].mxu0 %v12622_v13 }
 0x362   :  { %16771 = vst [vmem:[#allocation184_spill] sm:$0xff] %v12739_v16  ;;  %v4000_v7 = vsel %vm318_vm1, %v3898_v46, %v3899_v1  ;;  %v12751_v60 = vpack.c.bf16 %v4161_v5, %v4162_v22  ;;  %v16777_v28 = vld [vmem:[#allocation166_spill] sm:$0xff]  ;;  %v2845_v22 = vpop.f32.mrb[55].mxu1  ;;  %4630 = vmatprep.mubr.bf16.mxu0 %v12650_v33  ;;  %5410 = vmatpush1.bf16.msra.mxu1 %v8977_v35 }
 0x363   :  { %v12749_v39 = vpack.c.bf16 %v4000_v7, %v4001_v61  ;;  %v4160_v34 = vsel %vm479_vm0, %v4058_v62, %v4059_v2  ;;  %v3820_v46 = vmul.f32 %v3740_v37, %v16776_v53  ;;  %v3741_v51 = vmax.f32 %v3661_v0, 0.0  ;;  %v16778_v7 = vld [vmem:[#allocation78_spill] sm:$0xff]  ;;  %8688 = vmatprep.subr.bf16.mxu0 %v8978_v47  ;;  %5411 = vmatprep.subr.bf16.mxu1 %v16037_v50 }
 0x364   :  { %16775 = vst [vmem:[#allocation47_spill] sm:$0xff] %v12751_v60  ;;  %v3488_v52 = vadd.f32 %v16777_v28, %v3194_v27  ;;  %v3197_v61 = vadd.f32 %v12503_v49, %v2843_v6  ;;  %v16779_v27 = vld [vmem:[#allocation113_spill] sm:$0xff]  ;;  %v12771_v49 = vpop.f32.mrb[40].mxu0  ;;  %8689 = vmatpush3.bf16.msra.mxu0 %v8978_v47 }
 0x365   :  { %16774 = vst [vmem:[#allocation143_spill] sm:$0xff] %v12749_v39  ;;  %v3900_v62 = vrot.slane %v3820_v46, 7  ;;  %v4060_v45 = vrot.slane %v3820_v46, 1  ;;  %v3821_v37 = vmul.f32 %v3741_v51, %v16779_v27  ;;  %16780 = vst [vmem:[#allocation48_spill] sm:$0xff] %v12771_v49  ;;  %v16785_v49 = vld [vmem:[#allocation168_spill] sm:$0xff] }
 0x366   :  { %v3575_v5 = vmul.f32 %v12716_v40, %v3488_v52  ;;  %v3489_v56 = vadd.f32 %v16778_v7, %v3197_v61  ;;  %v12779_v52 = vpop.f32.mrb[41].mxu0  ;;  %v2848_v61 = vpop.f32.mrb[56].mxu1 }
 0x367   :  { %8615 = vmatmul.mubr.bf16.gmra.mrb[160].mxu1 %v12581_v10  ;;  %v3999_v35 = vsel %vm318_vm1, %v3899_v1, %v3900_v62  ;;  %v4159_v28 = vsel %vm479_vm0, %v4059_v2, %v4060_v45  ;;  %v3901_v51 = vrot.slane %v3821_v37, 7  ;;  %v4061_v7 = vrot.slane %v3821_v37, 1  ;;  %v2850_v13 = vpop.f32.mrb[57].mxu1 }
 0x368   :  { %8618 = vmatprep.mubr.bf16.mxu1 %v12626_v18  ;;  %v3662_v6 = vadd.f32 %v12728_v32, %v3575_v5  ;;  %v3576_v0 = vmul.f32 %v12716_v40, %v3489_v56  ;;  %v12782_v22 = vpack.c.bf16 %v4159_v28, %v4160_v34  ;;  %v12784_v47 = vpack.c.bf16 %v3821_v37, %v3820_v46  ;;  %v12786_v5 = vpop.f32.mrb[42].mxu0  ;;  %v2851_v18 = vpop.f32.mrb[58].mxu1  ;;  %v16784_v28 = vld [vmem:[#allocation60_spill] sm:$0xff]  ;;  %v8979_v13 = vld [vmem:[%s15475_s2 + $0xe8] sm:$0xff]  }
 0x369   :  { %16783 = vst [vmem:[#allocation14_spill] sm:$0xff] %v12786_v5  ;;  %v3202_v1 = vadd.f32 %v12562_v25, %v2848_v61  ;;  %v12790_v2 = vpop.f32.mrb[43].mxu0  ;;  %v3998_v10 = vsel %vm318_vm1, %v3900_v62, %v3901_v51  ;;  %v4158_v34 = vsel %vm479_vm0, %v4060_v45, %v4061_v7  ;;  %4631 = vmatmul.mubr.bf16.gmra.mrb[112].mxu0 %v12662_v14  ;;  %v2853_v25 = vpop.f32.mrb[59].mxu1  ;;  %v16787_v61 = vld [vmem:[#allocation165_spill] sm:$0xff] }
 0x36a   :  { %16781 = vst [vmem:[#allocation13_spill] sm:$0xff] %v12782_v22  ;;  %16782 = vst [vmem:[#allocation3_spill] sm:$0xff] %v12784_v47  ;;  %v3742_v56 = vmax.f32 %v3662_v6, 0.0  ;;  %v3663_v33 = vadd.f32 %v12728_v32, %v3576_v0  ;;  %v3205_v6 = vadd.f32 %v12577_v31, %v2851_v18  ;;  %4638 = vmatprep.mubr.bf16.mxu0 %v12687_v19  ;;  %v16788_v31 = vld [vmem:[#allocation58_spill] sm:$0xff]  ;;  %5412 = vmatpush1.bf16.msra.mxu1 %v8979_v13 }
 0x36b   :  { %v3490_v5 = vadd.f32 %v16785_v49, %v3202_v1  ;;  %v12804_v62 = vpack.c.bf16 %v3998_v10, %v3999_v35  ;;  %5413 = vmatprep.subr.bf16.mxu1 %v16037_v50 }
 0x36c   :  { %v3822_v46 = vmul.f32 %v3742_v56, %v16784_v28  ;;  %v3743_v37 = vmax.f32 %v3663_v33, 0.0  ;;  %v3491_v18 = vadd.f32 %v16788_v31, %v3205_v6  ;;  %v12811_v49 = vpop.f32.mrb[44].mxu0 }
 0x36d   :  { %16786 = vst [vmem:[#allocation146_spill] sm:$0xff] %v12804_v62  ;;  %v3577_v33 = vmul.f32 %v12716_v40, %v3490_v5  ;;  %16789 = vst [vmem:[#allocation50_spill] sm:$0xff] %v12811_v49 }
 0x36e   :  { %v3902_v0 = vrot.slane %v3822_v46, 7  ;;  %v4062_v45 = vrot.slane %v3822_v46, 1  ;;  %v3823_v56 = vmul.f32 %v3743_v37, %v16787_v61  ;;  %v12818_v37 = vpop.f32.mrb[45].mxu0  ;;  %v3578_v5 = vmul.f32 %v12716_v40, %v3491_v18  ;;  %v2856_v6 = vpop.f32.mrb[60].mxu1 }
 0x36f   :  { %8619 = vmatmul.mubr.bf16.gmra.mrb[164].mxu1 %v12664_v55  ;;  %v3664_v25 = vadd.f32 %v12728_v32, %v3577_v33  ;;  %16790 = vst [vmem:[#allocation51_spill] sm:$0xff] %v12818_v37  ;;  %v12826_v14 = vpop.f32.mrb[46].mxu0 }
 0x370   :  { %8622 = vmatprep.mubr.bf16.mxu1 %v12703_v17  ;;  %v3903_v1 = vrot.slane %v3823_v56, 7  ;;  %v3997_v10 = vsel %vm318_vm1, %v3901_v51, %v3902_v0  ;;  %v4157_v35 = vsel %vm479_vm0, %v4061_v7, %v4062_v45  ;;  %v4063_v19 = vrot.slane %v3823_v56, 1  ;;  %16793 = vst [vmem:[#allocation56_spill] sm:$0xff] %v12826_v14  ;;  %v2858_v17 = vpop.f32.mrb[61].mxu1  ;;  %v12831_v55 = vpop.f32.mrb[47].mxu0  ;;  %v16798_v14 = vld [vmem:[#allocation114_spill] sm:$0xff] }
 0x371   :  { %v12822_v31 = vpack.c.bf16 %v4157_v35, %v4158_v34  ;;  %v12824_v13 = vpack.c.bf16 %v3823_v56, %v3822_v46  ;;  %v3744_v33 = vmax.f32 %v3664_v25, 0.0  ;;  %v3210_v51 = vadd.f32 %v12542_v29, %v2856_v6  ;;  %v2859_v18 = vpop.f32.mrb[62].mxu1  ;;  %v16795_v46 = vld [vmem:[#allocation185_spill] sm:$0xff]  ;;  %v16796_v35 = vld [vmem:[#allocation20_spill] sm:$0xff]  ;;  %4639 = vmatmul.mubr.bf16.gmra.mrb[116].mxu0 %v12699_v57 }
 0x372   :  { %v3996_v7 = vsel %vm318_vm1, %v3902_v0, %v3903_v1  ;;  %v3665_v49 = vadd.f32 %v12728_v32, %v3578_v5  ;;  %v4156_v34 = vsel %vm479_vm0, %v4062_v45, %v4063_v19  ;;  %v3213_v29 = vadd.f32 %v12568_v59, %v2859_v18  ;;  %v2861_v17 = vpop.f32.mrb[63].mxu1  ;;  %4646 = vmatprep.mubr.bf16.mxu0 %v12739_v16 }
 0x373   :  { %16791 = vst [vmem:[#allocation17_spill] sm:$0xff] %v12822_v31  ;;  %16792 = vst [vmem:[#allocation121_spill] sm:$0xff] %v12824_v13  ;;  %v12834_v37 = vpack.c.bf16 %v3996_v7, %v3997_v10  ;;  %v3824_v56 = vmul.f32 %v3744_v33, %v16795_v46  ;;  %v3492_v25 = vadd.f32 %v16796_v35, %v3210_v51  ;;  %v16797_v10 = vld [vmem:[#allocation124_spill] sm:$0xff] }
 0x374   :  { %v3745_v0 = vmax.f32 %v3665_v49, 0.0  ;;  %v3493_v7 = vadd.f32 %v16797_v10, %v3213_v29  ;;  %v12848_v51 = vpop.f32.mrb[48].mxu0  ;;  %v8980_v29 = vld [vmem:[%s15475_s2 + $0xf0] sm:$0xff]  }
 0x375   :  { %16794 = vst [vmem:[#allocation104_spill] sm:$0xff] %v12834_v37  ;;  %v3904_v6 = vrot.slane %v3824_v56, 7  ;;  %v3579_v5 = vmul.f32 %v12716_v40, %v3492_v25  ;;  %v4064_v45 = vrot.slane %v3824_v56, 1  ;;  %16799 = vst [vmem:[#allocation18_spill] sm:$0xff] %v12848_v51  ;;  %v12856_v25 = vpop.f32.mrb[49].mxu0  ;;  %5414 = vmatpush1.bf16.msra.mxu1 %v8980_v29 }
 0x376   :  { %v3825_v33 = vmul.f32 %v3745_v0, %v16798_v14  ;;  %v3580_v18 = vmul.f32 %v12716_v40, %v3493_v7  ;;  %16800 = vst [vmem:[#allocation21_spill] sm:$0xff] %v12856_v25  ;;  %v2864_v10 = vpop.f32.mrb[64].mxu1  ;;  %5415 = vmatprep.subr.bf16.mxu1 %v16037_v50 }
 0x377   :  { %8623 = vmatmul.mubr.bf16.gmra.mrb[168].mxu1 %v12751_v60  ;;  %v3995_v59 = vsel %vm318_vm1, %v3903_v1, %v3904_v6  ;;  %v3666_v49 = vadd.f32 %v12728_v32, %v3579_v5  ;;  %v4155_v35 = vsel %vm479_vm0, %v4063_v19, %v4064_v45  ;;  %v12865_v1 = vpop.f32.mrb[50].mxu0  ;;  %v3218_v19 = vadd.f32 %v12607_v3, %v2864_v10 }
 0x378   :  { %8626 = vmatprep.mubr.bf16.mxu1 %v12782_v22  ;;  %v3905_v17 = vrot.slane %v3825_v33, 7  ;;  %v4065_v0 = vrot.slane %v3825_v33, 1  ;;  %v12861_v16 = vpack.c.bf16 %v4155_v35, %v4156_v34  ;;  %v12863_v57 = vpack.c.bf16 %v3825_v33, %v3824_v56  ;;  %16803 = vst [vmem:[#allocation59_spill] sm:$0xff] %v12865_v1  ;;  %v2866_v22 = vpop.f32.mrb[65].mxu1  ;;  %v12869_v60 = vpop.f32.mrb[51].mxu0  ;;  %v16806_v33 = vld [vmem:[#allocation152_spill] sm:$0xff] }
 0x379   :  { %v3746_v5 = vmax.f32 %v3666_v49, 0.0  ;;  %v3667_v7 = vadd.f32 %v12728_v32, %v3580_v18  ;;  %16804 = vst [vmem:[#allocation25_spill] sm:$0xff] %v12869_v60  ;;  %v2867_v25 = vpop.f32.mrb[66].mxu1  ;;  %v16807_v35 = vld [vmem:[#allocation81_spill] sm:$0xff]  ;;  %4647 = vmatmul.mubr.bf16.gmra.mrb[120].mxu0 %v12749_v39 }
 0x37a   :  { %16801 = vst [vmem:[#allocation103_spill] sm:$0xff] %v12861_v16  ;;  %16802 = vst [vmem:[#allocation123_spill] sm:$0xff] %v12863_v57  ;;  %v3994_v51 = vsel %vm318_vm1, %v3904_v6, %v3905_v17  ;;  %v4154_v34 = vsel %vm479_vm0, %v4064_v45, %v4065_v0  ;;  %v3494_v3 = vadd.f32 %v16807_v35, %v3218_v19  ;;  %v2869_v22 = vpop.f32.mrb[67].mxu1  ;;  %4654 = vmatprep.mubr.bf16.mxu0 %v12784_v47  ;;  %v16808_v1 = vld [vmem:[#allocation93_spill] sm:$0xff] }
 0x37b   :  { %v12876_v56 = vpack.c.bf16 %v3994_v51, %v3995_v59  ;;  %v3826_v49 = vmul.f32 %v3746_v5, %v16806_v33  ;;  %v3747_v18 = vmax.f32 %v3667_v7, 0.0  ;;  %v3221_v29 = vadd.f32 %v12620_v44, %v2867_v25  ;;  %v16809_v51 = vld [vmem:[#allocation16_spill] sm:$0xff] }
 0x37c   :  { %v3581_v60 = vmul.f32 %v12716_v40, %v3494_v3  ;;  %v12888_v5 = vpop.f32.mrb[52].mxu0 }
 0x37d   :  { %16805 = vst [vmem:[#allocation22_spill] sm:$0xff] %v12876_v56  ;;  %v3906_v6 = vrot.slane %v3826_v49, 7  ;;  %v4066_v10 = vrot.slane %v3826_v49, 1  ;;  %v3827_v45 = vmul.f32 %v3747_v18, %v16808_v1  ;;  %v3495_v59 = vadd.f32 %v16809_v51, %v3221_v29  ;;  %v12895_v18 = vpop.f32.mrb[53].mxu0 }
 0x37e   :  { %v3668_v25 = vadd.f32 %v12728_v32, %v3581_v60  ;;  %v2872_v22 = vpop.f32.mrb[68].mxu1  ;;  %v12902_v47 = vpop.f32.mrb[54].mxu0 }
 0x37f   :  { %8627 = vmatmul.mubr.bf16.gmra.mrb[172].mxu1 %v12822_v31  ;;  %v3993_v7 = vsel %vm318_vm1, %v3905_v17, %v3906_v6  ;;  %v3907_v44 = vrot.slane %v3827_v45, 7  ;;  %v4153_v19 = vsel %vm479_vm0, %v4065_v0, %v4066_v10  ;;  %v3582_v35 = vmul.f32 %v12716_v40, %v3495_v59  ;;  %16812 = vst [vmem:[#allocation125_spill] sm:$0xff] %v12902_v47  ;;  %v12907_v0 = vpop.f32.mrb[55].mxu0 }
 0x380   :  { %8630 = vmatprep.mubr.bf16.mxu1 %v12861_v16  ;;  %v12898_v3 = vpack.c.bf16 %v4153_v19, %v4154_v34  ;;  %v4067_v29 = vrot.slane %v3827_v45, 1  ;;  %v12900_v51 = vpack.c.bf16 %v3827_v45, %v3826_v49  ;;  %v3748_v39 = vmax.f32 %v3668_v25, 0.0  ;;  %v2874_v16 = vpop.f32.mrb[69].mxu1  ;;  %v8981_v45 = vld [vmem:[%s15475_s2 + $0xf8] sm:$0xff]   ;;  %v16814_v25 = vld [vmem:[#allocation122_spill] sm:$0xff] }
 0x381   :  { %v3992_v17 = vsel %vm318_vm1, %v3906_v6, %v3907_v44  ;;  %v3226_v60 = vadd.f32 %v12598_v54, %v2872_v22  ;;  %v3669_v34 = vadd.f32 %v12728_v32, %v3582_v35  ;;  %v2875_v59 = vpop.f32.mrb[70].mxu1  ;;  %4655 = vmatmul.mubr.bf16.gmra.mrb[124].mxu0 %v12804_v62  ;;  %5416 = vmatpush1.bf16.msra.mxu1 %v8981_v45  ;;  %v16815_v22 = vld [vmem:[#allocation66_spill] sm:$0xff] }
 0x382   :  { %16810 = vst [vmem:[#allocation26_spill] sm:$0xff] %v12898_v3  ;;  %16811 = vst [vmem:[#allocation107_spill] sm:$0xff] %v12900_v51  ;;  %v12909_v31 = vpack.c.bf16 %v3992_v17, %v3993_v7  ;;  %v4152_v49 = vsel %vm479_vm0, %v4066_v10, %v4067_v29  ;;  %v3828_v6 = vmul.f32 %v3748_v39, %v12059_v41  ;;  %v2877_v16 = vpop.f32.mrb[71].mxu1  ;;  %4662 = vmatprep.mubr.bf16.mxu0 %v12824_v13  ;;  %v16816_v39 = vld [vmem:[#allocation24_spill] sm:$0xff] }
 0x383   :  { %v3496_v19 = vadd.f32 %v16814_v25, %v3226_v60  ;;  %v3229_v54 = vadd.f32 %v12614_v8, %v2875_v59  ;;  %v3749_v7 = vmax.f32 %v3669_v34, 0.0  ;;  %5417 = vmatprep.subr.bf16.mxu1 %v16037_v50 }
 0x384   :  { %16813 = vst [vmem:[#allocation64_spill] sm:$0xff] %v12909_v31  ;;  %v3908_v35 = vrot.slane %v3828_v6, 7  ;;  %v4068_v47 = vrot.slane %v3828_v6, 1  ;;  %v12927_v8 = vpop.f32.mrb[56].mxu0 }
 0x385   :  { %v3583_v10 = vmul.f32 %v12716_v40, %v3496_v19  ;;  %v3497_v17 = vadd.f32 %v16815_v22, %v3229_v54  ;;  %v3829_v60 = vmul.f32 %v3749_v7, %v16816_v39  ;;  %16817 = vst [vmem:[#allocation35_spill] sm:$0xff] %v12927_v8  ;;  %v12935_v19 = vpop.f32.mrb[57].mxu0 }
 0x386   :  { %v3991_v34 = vsel %vm318_vm1, %v3907_v44, %v3908_v35  ;;  %v4151_v25 = vsel %vm479_vm0, %v4067_v29, %v4068_v47  ;;  %16818 = vst [vmem:[#allocation29_spill] sm:$0xff] %v12935_v19  ;;  %v2880_v22 = vpop.f32.mrb[72].mxu1  ;;  %v12941_v62 = vpop.f32.mrb[58].mxu0 }
 0x387   :  { %8631 = vmatmul.mubr.bf16.gmra.mrb[176].mxu1 %v12898_v3  ;;  %v3670_v59 = vadd.f32 %v12728_v32, %v3583_v10  ;;  %v3584_v45 = vmul.f32 %v12716_v40, %v3497_v17  ;;  %v3909_v54 = vrot.slane %v3829_v60, 7  ;;  %v4069_v16 = vrot.slane %v3829_v60, 1  ;;  %v2882_v17 = vpop.f32.mrb[73].mxu1  ;;  %v12945_v8 = vpop.f32.mrb[59].mxu0 }
 0x388   :  { %v12937_v13 = vpack.c.bf16 %v4151_v25, %v4152_v49  ;;  %v12939_v7 = vpack.c.bf16 %v3829_v60, %v3828_v6  ;;  %v3234_v10 = vadd.f32 %v12645_v26, %v2880_v22  ;;  %v2883_v19 = vpop.f32.mrb[74].mxu1  ;;  %v16823_v17 = vld [vmem:[#allocation170_spill] sm:$0xff] }
 0x389   :  { %v3750_v3 = vmax.f32 %v3670_v59, 0.0  ;;  %v3671_v44 = vadd.f32 %v12728_v32, %v3584_v45  ;;  %v3990_v29 = vsel %vm318_vm1, %v3908_v35, %v3909_v54  ;;  %v4150_v49 = vsel %vm479_vm0, %v4068_v47, %v4069_v16  ;;  %v16822_v45 = vld [vmem:[#allocation172_spill] sm:$0xff]  ;;  %4663 = vmatmul.mubr.bf16.gmra.mrb[128].mxu0 %v12834_v37  ;;  %v2885_v26 = vpop.f32.mrb[75].mxu1  ;;  %v8982_v35 = vld [vmem:[%s15475_s2 + $0x100] sm:$0xff]  }
 0x38a   :  { %16819 = vst [vmem:[#allocation36_spill] sm:$0xff] %v12937_v13  ;;  %16820 = vst [vmem:[#allocation30_spill] sm:$0xff] %v12939_v7  ;;  %8634 = vmatprep.mubr.bf16.mxu1 %v12937_v13  ;;  %v12952_v6 = vpack.c.bf16 %v3990_v29, %v3991_v34  ;;  %v3498_v25 = vadd.f32 %v16822_v45, %v3234_v10  ;;  %v8983_v47 = vld [vmem:[%s15475_s2 + $0x170] sm:$0xff]   ;;  %v3237_v22 = vadd.f32 %v12660_v23, %v2883_v19 }
 0x38b   :  { %v3830_v60 = vmul.f32 %v3750_v3, %v11989_v48  ;;  %v3751_v59 = vmax.f32 %v3671_v44, 0.0  ;;  %4670 = vmatprep.mubr.bf16.mxu0 %v12863_v57  ;;  %5418 = vmatpush1.bf16.msra.mxu1 %v8982_v35 }
 0x38c   :  { %16821 = vst [vmem:[#allocation127_spill] sm:$0xff] %v12952_v6  ;;  %v3585_v10 = vmul.f32 %v12716_v40, %v3498_v25  ;;  %8690 = vmatprep.subr.bf16.mxu0 %v8983_v47  ;;  %v3499_v29 = vadd.f32 %v16823_v17, %v3237_v22  ;;  %v12968_v45 = vpop.f32.mrb[60].mxu0  ;;  %5419 = vmatprep.subr.bf16.mxu1 %v16037_v50 }
 0x38d   :  { %v3910_v34 = vrot.slane %v3830_v60, 7  ;;  %v4070_v3 = vrot.slane %v3830_v60, 1  ;;  %v3831_v44 = vmul.f32 %v3751_v59, %v12015_v43  ;;  %16824 = vst [vmem:[#allocation67_spill] sm:$0xff] %v12968_v45  ;;  %8691 = vmatpush3.bf16.msra.mxu0 %v8983_v47  ;;  %v12976_v57 = vpop.f32.mrb[61].mxu0 }
 0x38e   :  { %v3672_v26 = vadd.f32 %v12728_v32, %v3585_v10  ;;  %16825 = vst [vmem:[#allocation10_spill] sm:$0xff] %v12976_v57  ;;  %v3586_v25 = vmul.f32 %v12716_v40, %v3499_v29  ;;  %v2888_v22 = vpop.f32.mrb[76].mxu1  ;;  %v12983_v37 = vpop.f32.mrb[62].mxu0 }
 0x38f   :  { %v3989_v23 = vsel %vm318_vm1, %v3909_v54, %v3910_v34  ;;  %v3911_v19 = vrot.slane %v3831_v44, 7  ;;  %v4149_v59 = vsel %vm479_vm0, %v4069_v16, %v4070_v3  ;;  %v4071_v17 = vrot.slane %v3831_v44, 1  ;;  %v2890_v45 = vpop.f32.mrb[77].mxu1  ;;  %v12988_v16 = vpop.f32.mrb[63].mxu0 }
 0x390   :  { %v12979_v35 = vpack.c.bf16 %v4149_v59, %v4150_v49  ;;  %v12981_v47 = vpack.c.bf16 %v3831_v44, %v3830_v60  ;;  %v3752_v13 = vmax.f32 %v3672_v26, 0.0  ;;  %v3242_v10 = vadd.f32 %v12639_v38, %v2888_v22  ;;  %v2891_v29 = vpop.f32.mrb[78].mxu1  ;;  %v16829_v38 = vld [vmem:[#allocation86_spill] sm:$0xff]  ;;  %v16830_v22 = vld [vmem:[#allocation28_spill] sm:$0xff] }
 0x391   :  { %v3988_v54 = vsel %vm318_vm1, %v3910_v34, %v3911_v19  ;;  %v3673_v49 = vadd.f32 %v12728_v32, %v3586_v25  ;;  %v4148_v60 = vsel %vm479_vm0, %v4070_v3, %v4071_v17  ;;  %v8984_v34 = vld [vmem:[%s15475_s2 + $0x108] sm:$0xff]   ;;  %v3245_v26 = vadd.f32 %v12654_v21, %v2891_v29  ;;  %4671 = vmatmul.mubr.bf16.gmra.mrb[132].mxu0 %v12876_v56 }
 0x392   :  { %16826 = vst [vmem:[#allocation129_spill] sm:$0xff] %v12979_v35  ;;  %16827 = vst [vmem:[#allocation72_spill] sm:$0xff] %v12981_v47  ;;  %v12990_v57 = vpack.c.bf16 %v3988_v54, %v3989_v23  ;;  %8635 = vmatmul.mubr.bf16.gmra.mrb[180].mxu1 %v12979_v35  ;;  %v3832_v44 = vmul.f32 %v3752_v13, %v11864_v4  ;;  %v3500_v45 = vadd.f32 %v16829_v38, %v3242_v10  ;;  %v2893_v23 = vpop.f32.mrb[79].mxu1 }
 0x393   :  { %v3753_v59 = vmax.f32 %v3673_v49, 0.0  ;;  %4678 = vmatprep.mubr.bf16.mxu0 %v12900_v51  ;;  %5420 = vmatpush1.bf16.msra.mxu1 %v8984_v34  ;;  %v3501_v54 = vadd.f32 %v16830_v22, %v3245_v26 }
 0x394   :  { %16828 = vst [vmem:[#allocation41_spill] sm:$0xff] %v12990_v57  ;;  %v3912_v25 = vrot.slane %v3832_v44, 7  ;;  %v3587_v3 = vmul.f32 %v12716_v40, %v3500_v45  ;;  %v4072_v35 = vrot.slane %v3832_v44, 1  ;;  %5421 = vmatprep.subr.bf16.mxu1 %v16037_v50 }
 0x395   :  { %v3833_v13 = vmul.f32 %v3753_v59, %v12032_v36  ;;  %v3588_v49 = vmul.f32 %v12716_v40, %v3501_v54 }
 0x396   :  { %v3987_v21 = vsel %vm318_vm1, %v3911_v19, %v3912_v25  ;;  %v3674_v10 = vadd.f32 %v12728_v32, %v3587_v3  ;;  %v4147_v29 = vsel %vm479_vm0, %v4071_v17, %v4072_v35  ;;  %v2896_v45 = vpop.f32.mrb[80].mxu1 }
 0x397   :  { %v3913_v34 = vrot.slane %v3833_v13, 7  ;;  %v4073_v38 = vrot.slane %v3833_v13, 1  ;;  %v13014_v23 = vpack.c.bf16 %v4147_v29, %v4148_v60  ;;  %v13016_v26 = vpack.c.bf16 %v3833_v13, %v3832_v44  ;;  %v2898_v19 = vpop.f32.mrb[81].mxu1  ;;  %v16834_v13 = vld [vmem:[#allocation63_spill] sm:$0xff] }
 0x398   :  { %v3754_v22 = vmax.f32 %v3674_v10, 0.0  ;;  %v3675_v59 = vadd.f32 %v12728_v32, %v3588_v49  ;;  %v3250_v51 = vadd.f32 %v12685_v58, %v2896_v45  ;;  %v2899_v54 = vpop.f32.mrb[82].mxu1 }
 0x399   :  { %16831 = vst [vmem:[#allocation153_spill] sm:$0xff] %v13014_v23  ;;  %16832 = vst [vmem:[#allocation7_spill] sm:$0xff] %v13016_v26  ;;  %v3986_v3 = vsel %vm318_vm1, %v3912_v25, %v3913_v34  ;;  %v4146_v17 = vsel %vm479_vm0, %v4072_v35, %v4073_v38  ;;  %8638 = vmatprep.mubr.bf16.mxu1 %v13014_v23  ;;  %4679 = vmatmul.mubr.bf16.gmra.mrb[136].mxu0 %v12909_v31  ;;  %v2901_v58 = vpop.f32.mrb[83].mxu1 }
 0x39a   :  { %v13025_v56 = vpack.c.bf16 %v3986_v3, %v3987_v21  ;;  %v3834_v60 = vmul.f32 %v3754_v22, %v11891_v9  ;;  %v3755_v44 = vmax.f32 %v3675_v59, 0.0  ;;  %v3502_v10 = vadd.f32 %v16834_v13, %v3250_v51  ;;  %4686 = vmatprep.mubr.bf16.mxu0 %v12939_v7  ;;  %v16835_v21 = vld [vmem:[#allocation89_spill] sm:$0xff] }
 0x39b   :  { %v3253_v49 = vadd.f32 %v12697_v20, %v2899_v54  ;;  %v8985_v20 = vld [vmem:[%s15475_s2 + $0x110] sm:$0xff]  }
 0x39c   :  { %16833 = vst [vmem:[#allocation155_spill] sm:$0xff] %v13025_v56  ;;  %v3914_v25 = vrot.slane %v3834_v60, 7  ;;  %v4074_v29 = vrot.slane %v3834_v60, 1  ;;  %v3835_v35 = vmul.f32 %v3755_v44, %v16755_v24  ;;  %v3589_v45 = vmul.f32 %v12716_v40, %v3502_v10  ;;  %5422 = vmatpush1.bf16.msra.mxu1 %v8985_v20  ;;  %v16840_v20 = vld [vmem:[#allocation174_spill] sm:$0xff] }
 0x39d   :  { %v3503_v19 = vadd.f32 %v16835_v21, %v3253_v49  ;;  %5423 = vmatprep.subr.bf16.mxu1 %v16037_v50 }
 0x39e   :  { %v3985_v22 = vsel %vm318_vm1, %v3913_v34, %v3914_v25  ;;  %v3915_v59 = vrot.slane %v3835_v35, 7  ;;  %v3676_v51 = vadd.f32 %v12728_v32, %v3589_v45  ;;  %v4145_v3 = vsel %vm479_vm0, %v4073_v38, %v4074_v29  ;;  %v2904_v13 = vpop.f32.mrb[84].mxu1 }
 0x39f   :  { %v3590_v54 = vmul.f32 %v12716_v40, %v3503_v19  ;;  %v13044_v44 = vpack.c.bf16 %v4145_v3, %v4146_v17  ;;  %v4075_v10 = vrot.slane %v3835_v35, 1  ;;  %v13046_v58 = vpack.c.bf16 %v3835_v35, %v3834_v60  ;;  %v2906_v21 = vpop.f32.mrb[85].mxu1  ;;  %v8986_v60 = vld [vmem:[%s15475_s2 + $0x118] sm:$0xff]  }
 0x3a0   :  { %v3984_v34 = vsel %vm318_vm1, %v3914_v25, %v3915_v59  ;;  %v3756_v49 = vmax.f32 %v3676_v51, 0.0  ;;  %v3258_v45 = vadd.f32 %v12679_v30, %v2904_v13  ;;  %v2907_v31 = vpop.f32.mrb[86].mxu1  ;;  %v16839_v25 = vld [vmem:[#allocation176_spill] sm:$0xff]  ;;  %5424 = vmatpush1.bf16.msra.mxu1 %v8986_v60 }
 0x3a1   :  { %16836 = vst [vmem:[#allocation131_spill] sm:$0xff] %v13044_v44  ;;  %16837 = vst [vmem:[#allocation75_spill] sm:$0xff] %v13046_v58  ;;  %v13051_v38 = vpack.c.bf16 %v3984_v34, %v3985_v22  ;;  %v3677_v7 = vadd.f32 %v12728_v32, %v3590_v54  ;;  %8639 = vmatmul.mubr.bf16.gmra.mrb[184].mxu1 %v13044_v44  ;;  %v4144_v17 = vsel %vm479_vm0, %v4074_v29, %v4075_v10  ;;  %v2909_v22 = vpop.f32.mrb[87].mxu1  ;;  %v8987_v34 = vld [vmem:[%s15475_s2 + $0x120] sm:$0xff]  }
 0x3a2   :  { %v3836_v30 = vmul.f32 %v3756_v49, %v16760_v11  ;;  %v3504_v35 = vadd.f32 %v16839_v25, %v3258_v45  ;;  %v3261_v19 = vadd.f32 %v12691_v15, %v2907_v31  ;;  %4687 = vmatmul.mubr.bf16.gmra.mrb[140].mxu0 %v12952_v6  ;;  %v8988_v15 = vld [vmem:[%s15475_s2 + $0x178] sm:$0xff]   ;;  %5425 = vmatprep.subr.bf16.mxu1 %v16037_v50 }
 0x3a3   :  { %16838 = vst [vmem:[#allocation2_spill] sm:$0xff] %v13051_v38  ;;  %v3757_v51 = vmax.f32 %v3677_v7, 0.0  ;;  %4694 = vmatprep.mubr.bf16.mxu0 %v12981_v47  ;;  %8692 = vmatprep.subr.bf16.mxu0 %v8988_v15  ;;  %v16847_v47 = vld [vmem:[#allocation76_spill] sm:$0xff] }
 0x3a4   :  { %v3916_v3 = vrot.slane %v3836_v30, 7  ;;  %v3591_v29 = vmul.f32 %v12716_v40, %v3504_v35  ;;  %v3505_v54 = vadd.f32 %v16840_v20, %v3261_v19  ;;  %v4076_v13 = vrot.slane %v3836_v30, 1  ;;  %8693 = vmatpush3.bf16.msra.mxu0 %v8988_v15  ;;  %5426 = vmatpush1.bf16.msra.mxu1 %v8987_v34  ;;  %v16844_v34 = vld [vmem:[#allocation134_spill] sm:$0xff] }
 0x3a5   :  { %v3837_v31 = vmul.f32 %v3757_v51, %v16762_v12  ;;  %6300 = vmatprep.subr.bf16.mxu0 %v16037_v50  ;;  %5427 = vmatprep.subr.bf16.mxu1 %v16037_v50 }
 0x3a6   :  { %v3983_v7 = vsel %vm318_vm1, %v3915_v59, %v3916_v3  ;;  %v3678_v49 = vadd.f32 %v12728_v32, %v3591_v29  ;;  %v3592_v45 = vmul.f32 %v12716_v40, %v3505_v54  ;;  %v4143_v21 = vsel %vm479_vm0, %v4075_v10, %v4076_v13  ;;  %v2912_v35 = vpop.f32.mrb[88].mxu1  ;;  %v8989_v10 = vld [vmem:[%s15475_s2 + $0x128] sm:$0xff]  }
 0x3a7   :  { %v3917_v60 = vrot.slane %v3837_v31, 7  ;;  %v4077_v25 = vrot.slane %v3837_v31, 1  ;;  %v13082_v19 = vpack.c.bf16 %v4143_v21, %v4144_v17  ;;  %v13084_v22 = vpack.c.bf16 %v3837_v31, %v3836_v30  ;;  %v2914_v29 = vpop.f32.mrb[89].mxu1 }
 0x3a8   :  { %v3758_v51 = vmax.f32 %v3678_v49, 0.0  ;;  %v3679_v20 = vadd.f32 %v12728_v32, %v3592_v45  ;;  %v3266_v59 = vadd.f32 %v12734_v63, %v2912_v35  ;;  %v2915_v54 = vpop.f32.mrb[90].mxu1  ;;  %v16845_v49 = vld [vmem:[#allocation128_spill] sm:$0xff]  ;;  %v16846_v35 = vld [vmem:[#allocation186_spill] sm:$0xff]  ;;  %5428 = vmatpush1.bf16.msra.mxu1 %v8989_v10 }
 0x3a9   :  { %16841 = vst [vmem:[#allocation39_spill] sm:$0xff] %v13082_v19  ;;  %16842 = vst [vmem:[#allocation157_spill] sm:$0xff] %v13084_v22  ;;  %v3982_v17 = vsel %vm318_vm1, %v3916_v3, %v3917_v60  ;;  %v4142_v30 = vsel %vm479_vm0, %v4076_v13, %v4077_v25  ;;  %8642 = vmatprep.mubr.bf16.mxu1 %v13082_v19  ;;  %v2917_v21 = vpop.f32.mrb[91].mxu1  ;;  %v3269_v3 = vadd.f32 %v16846_v35, %v2915_v54 }
 0x3aa   :  { %v13098_v63 = vpack.c.bf16 %v3982_v17, %v3983_v7  ;;  %v3838_v15 = vmul.f32 %v3758_v51, %v16844_v34  ;;  %v3759_v31 = vmax.f32 %v3679_v20, 0.0  ;;  %v3506_v45 = vadd.f32 %v16845_v49, %v3266_v59  ;;  %4695 = vmatmul.mubr.bf16.gmra.mrb[144].mxu0 %v12990_v57  ;;  %v8990_v7 = vld [vmem:[%s15475_s2 + $0x130] sm:$0xff]   ;;  %v16848_v51 = vld [vmem:[#allocation126_spill] sm:$0xff]  ;;  %5429 = vmatprep.subr.bf16.mxu1 %v16037_v50 }
 0x3ab   :  { %4702 = vmatprep.mubr.bf16.mxu0 %v13016_v26  ;;  %v3507_v20 = vadd.f32 %v16848_v51, %v3269_v3  ;;  %v16851_v26 = vld [vmem:[#allocation43_spill] sm:$0xff] }
 0x3ac   :  { %16843 = vst [vmem:[#allocation133_spill] sm:$0xff] %v13098_v63  ;;  %v3918_v29 = vrot.slane %v3838_v15, 7  ;;  %v4078_v13 = vrot.slane %v3838_v15, 1  ;;  %v3839_v6 = vmul.f32 %v3759_v31, %v16847_v47  ;;  %v3593_v19 = vmul.f32 %v12716_v40, %v3506_v45  ;;  %5430 = vmatpush1.bf16.msra.mxu1 %v8990_v7 }
 0x3ad   :  { %v3594_v49 = vmul.f32 %v12716_v40, %v3507_v20  ;;  %5431 = vmatprep.subr.bf16.mxu1 %v16037_v50 }
 0x3ae   :  { %v3981_v59 = vsel %vm318_vm1, %v3917_v60, %v3918_v29  ;;  %v3919_v17 = vrot.slane %v3839_v6, 7  ;;  %v3680_v54 = vadd.f32 %v12728_v32, %v3593_v19  ;;  %v4141_v31 = vsel %vm479_vm0, %v4077_v25, %v4078_v13  ;;  %v2920_v45 = vpop.f32.mrb[92].mxu1  ;;  %v8991_v25 = vld [vmem:[%s15475_s2 + $0x138] sm:$0xff]  }
 0x3af   :  { %v13118_v10 = vpack.c.bf16 %v4141_v31, %v4142_v30  ;;  %v4079_v21 = vrot.slane %v3839_v6, 1  ;;  %v13120_v35 = vpack.c.bf16 %v3839_v6, %v3838_v15  ;;  %v3274_v60 = vadd.f32 %v16851_v26, %v2920_v45  ;;  %v2922_v57 = vpop.f32.mrb[93].mxu1  ;;  %v16855_v45 = vld [vmem:[#allocation33_spill] sm:$0xff] }
 0x3b0   :  { %v3980_v3 = vsel %vm318_vm1, %v3918_v29, %v3919_v17  ;;  %v3760_v51 = vmax.f32 %v3680_v54, 0.0  ;;  %v3681_v30 = vadd.f32 %v12728_v32, %v3594_v49  ;;  %v2923_v20 = vpop.f32.mrb[94].mxu1  ;;  %v16853_v57 = vld [vmem:[#allocation94_spill] sm:$0xff]  ;;  %v16854_v29 = vld [vmem:[#allocation141_spill] sm:$0xff]  ;;  %5432 = vmatpush1.bf16.msra.mxu1 %v8991_v25 }
 0x3b1   :  { %16849 = vst [vmem:[#allocation80_spill] sm:$0xff] %v13118_v10  ;;  %16850 = vst [vmem:[#allocation46_spill] sm:$0xff] %v13120_v35  ;;  %v13128_v19 = vpack.c.bf16 %v3980_v3, %v3981_v59  ;;  %8643 = vmatmul.mubr.bf16.gmra.mrb[188].mxu1 %v13118_v10  ;;  %v4140_v6 = vsel %vm479_vm0, %v4078_v13, %v4079_v21  ;;  %v3508_v15 = vadd.f32 %v16853_v57, %v3274_v60  ;;  %v2925_v59 = vpop.f32.mrb[95].mxu1 }
 0x3b2   :  { %v3840_v26 = vmul.f32 %v3760_v51, %v16776_v53  ;;  %v3277_v7 = vadd.f32 %v16854_v29, %v2923_v20  ;;  %4703 = vmatmul.mubr.bf16.gmra.mrb[148].mxu0 %v13025_v56  ;;  %v3761_v54 = vmax.f32 %v3681_v30, 0.0 }
 0x3b3   :  { %16852 = vst [vmem:[#allocation158_spill] sm:$0xff] %v13128_v19  ;;  %4710 = vmatprep.mubr.bf16.mxu0 %v13046_v58  ;;  %v3595_v49 = vmul.f32 %v12716_v40, %v3508_v15 }
 0x3b4   :  { %v3920_v31 = vrot.slane %v3840_v26, 7  ;;  %v3509_v3 = vadd.f32 %v16855_v45, %v3277_v7  ;;  %v4080_v13 = vrot.slane %v3840_v26, 1  ;;  %v3841_v10 = vmul.f32 %v3761_v54, %v16779_v27 }
 0x3b5   :  { %v3682_v60 = vadd.f32 %v12728_v32, %v3595_v49 }
 0x3b6   :  { %v3979_v51 = vsel %vm318_vm1, %v3919_v17, %v3920_v31  ;;  %v3596_v20 = vmul.f32 %v12716_v40, %v3509_v3  ;;  %v4139_v30 = vsel %vm479_vm0, %v4079_v21, %v4080_v13  ;;  %v3921_v57 = vrot.slane %v3841_v10, 7  ;;  %v2928_v59 = vpop.f32.mrb[96].mxu1 }
 0x3b7   :  { %v4081_v29 = vrot.slane %v3841_v10, 1  ;;  %v13149_v15 = vpack.c.bf16 %v4139_v30, %v4140_v6  ;;  %v13151_v7 = vpack.c.bf16 %v3841_v10, %v3840_v26  ;;  %v3762_v25 = vmax.f32 %v3682_v60, 0.0  ;;  %v2930_v17 = vpop.f32.mrb[97].mxu1  ;;  %v16859_v26 = vld [vmem:[#allocation71_spill] sm:$0xff] }
 0x3b8   :  { %v3683_v54 = vadd.f32 %v12728_v32, %v3596_v20  ;;  %v3282_v45 = vadd.f32 %v12779_v52, %v2928_v59  ;;  %v3978_v49 = vsel %vm318_vm1, %v3920_v31, %v3921_v57  ;;  %v2931_v3 = vpop.f32.mrb[98].mxu1 }
 0x3b9   :  { %16856 = vst [vmem:[#allocation135_spill] sm:$0xff] %v13149_v15  ;;  %16857 = vst [vmem:[#allocation83_spill] sm:$0xff] %v13151_v7  ;;  %v4138_v21 = vsel %vm479_vm0, %v4080_v13, %v4081_v29  ;;  %8646 = vmatprep.mubr.bf16.mxu1 %v13149_v15  ;;  %v13160_v58 = vpack.c.bf16 %v3978_v49, %v3979_v51  ;;  %v3842_v10 = vmul.f32 %v3762_v25, %v16784_v28  ;;  %v2933_v52 = vpop.f32.mrb[99].mxu1  ;;  %v16860_v51 = vld [vmem:[#allocation96_spill] sm:$0xff] }
 0x3ba   :  { %v3763_v6 = vmax.f32 %v3683_v54, 0.0  ;;  %v3510_v60 = vadd.f32 %v16859_v26, %v3282_v45  ;;  %4711 = vmatmul.mubr.bf16.gmra.mrb[152].mxu0 %v13051_v38  ;;  %v3285_v20 = vadd.f32 %v12790_v2, %v2931_v3 }
 0x3bb   :  { %16858 = vst [vmem:[#allocation49_spill] sm:$0xff] %v13160_v58  ;;  %4718 = vmatprep.mubr.bf16.mxu0 %v13084_v22  ;;  %v3922_v31 = vrot.slane %v3842_v10, 7  ;;  %v4082_v30 = vrot.slane %v3842_v10, 1 }
 0x3bc   :  { %v3843_v13 = vmul.f32 %v3763_v6, %v16787_v61  ;;  %v3597_v59 = vmul.f32 %v12716_v40, %v3510_v60  ;;  %v3511_v17 = vadd.f32 %v16860_v51, %v3285_v20  ;;  %v16863_v51 = vld [vmem:[#allocation48_spill] sm:$0xff] }
 0x3bd   :  { %v3977_v25 = vsel %vm318_vm1, %v3921_v57, %v3922_v31  ;;  %v4137_v49 = vsel %vm479_vm0, %v4081_v29, %v4082_v30 }
 0x3be   :  { %v3923_v54 = vrot.slane %v3843_v13, 7  ;;  %v3684_v45 = vadd.f32 %v12728_v32, %v3597_v59  ;;  %v3598_v2 = vmul.f32 %v12716_v40, %v3511_v17  ;;  %v13176_v3 = vpack.c.bf16 %v4137_v49, %v4138_v21  ;;  %v2936_v26 = vpop.f32.mrb[100].mxu1  ;;  %v16866_v49 = vld [vmem:[#allocation14_spill] sm:$0xff] }
 0x3bf   :  { %v4083_v52 = vrot.slane %v3843_v13, 1  ;;  %v13178_v6 = vpack.c.bf16 %v3843_v13, %v3842_v10  ;;  %v3290_v57 = vadd.f32 %v16863_v51, %v2936_v26  ;;  %v2938_v22 = vpop.f32.mrb[101].mxu1  ;;  %v16865_v13 = vld [vmem:[#allocation178_spill] sm:$0xff]  ;;  %v16867_v26 = vld [vmem:[#allocation44_spill] sm:$0xff] }
 0x3c0   :  { %16861 = vst [vmem:[#allocation6_spill] sm:$0xff] %v13176_v3  ;;  %v3976_v60 = vsel %vm318_vm1, %v3922_v31, %v3923_v54  ;;  %v3764_v20 = vmax.f32 %v3684_v45, 0.0  ;;  %v3685_v59 = vadd.f32 %v12728_v32, %v3598_v2  ;;  %v2939_v29 = vpop.f32.mrb[102].mxu1  ;;  %8647 = vmatmul.mubr.bf16.gmra.mrb[192].mxu1 %v13176_v3 }
 0x3c1   :  { %16862 = vst [vmem:[#allocation137_spill] sm:$0xff] %v13178_v6  ;;  %v13183_v38 = vpack.c.bf16 %v3976_v60, %v3977_v25  ;;  %v4136_v21 = vsel %vm479_vm0, %v4082_v30, %v4083_v52  ;;  %v3512_v17 = vadd.f32 %v16865_v13, %v3290_v57  ;;  %v3293_v31 = vadd.f32 %v16866_v49, %v2939_v29  ;;  %v2941_v45 = vpop.f32.mrb[103].mxu1 }
 0x3c2   :  { %v3844_v10 = vmul.f32 %v3764_v20, %v16795_v46  ;;  %4719 = vmatmul.mubr.bf16.gmra.mrb[156].mxu0 %v13098_v63  ;;  %v3765_v22 = vmax.f32 %v3685_v59, 0.0 }
 0x3c3   :  { %16864 = vst [vmem:[#allocation88_spill] sm:$0xff] %v13183_v38  ;;  %4726 = vmatprep.mubr.bf16.mxu0 %v13120_v35  ;;  %v3599_v2 = vmul.f32 %v12716_v40, %v3512_v17  ;;  %v3513_v60 = vadd.f32 %v16867_v26, %v3293_v31  ;;  %v16870_v26 = vld [vmem:[#allocation51_spill] sm:$0xff] }
 0x3c4   :  { %v3924_v25 = vrot.slane %v3844_v10, 7  ;;  %v4084_v51 = vrot.slane %v3844_v10, 1  ;;  %v3845_v30 = vmul.f32 %v3765_v22, %v16798_v14 }
 0x3c5   :  { %v3686_v57 = vadd.f32 %v12728_v32, %v3599_v2  ;;  %v3600_v29 = vmul.f32 %v12716_v40, %v3513_v60 }
 0x3c6   :  { %v3975_v20 = vsel %vm318_vm1, %v3923_v54, %v3924_v25  ;;  %v4135_v59 = vsel %vm479_vm0, %v4083_v52, %v4084_v51  ;;  %v3925_v13 = vrot.slane %v3845_v30, 7  ;;  %v4085_v49 = vrot.slane %v3845_v30, 1  ;;  %v2944_v45 = vpop.f32.mrb[104].mxu1 }
 0x3c7   :  { %v13203_v35 = vpack.c.bf16 %v4135_v59, %v4136_v21  ;;  %v13205_v17 = vpack.c.bf16 %v3845_v30, %v3844_v10  ;;  %v3766_v31 = vmax.f32 %v3686_v57, 0.0  ;;  %v3687_v22 = vadd.f32 %v12728_v32, %v3600_v29  ;;  %v2946_v54 = vpop.f32.mrb[105].mxu1  ;;  %v16871_v30 = vld [vmem:[#allocation130_spill] sm:$0xff] }
 0x3c8   :  { %v3298_v63 = vadd.f32 %v16870_v26, %v2944_v45  ;;  %v3974_v2 = vsel %vm318_vm1, %v3924_v25, %v3925_v13  ;;  %v2947_v60 = vpop.f32.mrb[106].mxu1  ;;  %v4134_v52 = vsel %vm479_vm0, %v4084_v51, %v4085_v49  ;;  %v13224_v25 = vld [vmem:[%s15475_s2 + $0x200] sm:$0xff]  }
 0x3c9   :  { %16868 = vst [vmem:[#allocation57_spill] sm:$0xff] %v13203_v35  ;;  %16869 = vst [vmem:[#allocation9_spill] sm:$0xff] %v13205_v17  ;;  %8650 = vmatprep.mubr.bf16.mxu1 %v13203_v35  ;;  %v13214_v56 = vpack.c.bf16 %v3974_v2, %v3975_v20  ;;  %v3846_v21 = vmul.f32 %v3766_v31, %v16806_v33  ;;  %v3767_v10 = vmax.f32 %v3687_v22, 0.0  ;;  %v2949_v29 = vpop.f32.mrb[107].mxu1  ;;  %v16872_v22 = vld [vmem:[#allocation82_spill] sm:$0xff]  ;;  %8774 = vmatprep.subr.bf16.mxu1 %v13224_v25 }
 0x3ca   :  { %v3514_v57 = vadd.f32 %v16871_v30, %v3298_v63  ;;  %4727 = vmatmul.mubr.bf16.gmra.mrb[160].mxu0 %v13128_v19  ;;  %v3301_v59 = vadd.f32 %v12831_v55, %v2947_v60  ;;  %v13238_v60 = vld [vmem:[%s15476_s3] ss:$0 sm:$0xff] }
 0x3cb   :  { %4734 = vmatprep.mubr.bf16.mxu0 %v13151_v7  ;;  %v3926_v51 = vrot.slane %v3846_v21, 7  ;;  %v4086_v20 = vrot.slane %v3846_v21, 1  ;;  %v3847_v45 = vmul.f32 %v3767_v10, %v16808_v1  ;;  %v13253_v7 = vld [vmem:[%s15477_s4] ss:$0 sm:$0xff] }
 0x3cc   :  { %v3601_v31 = vmul.f32 %v12716_v40, %v3514_v57  ;;  %v3515_v63 = vadd.f32 %v16872_v22, %v3301_v59  ;;  %v16875_v59 = vld [vmem:[#allocation50_spill] sm:$0xff] }
 0x3cd   :  { %v3973_v55 = vsel %vm318_vm1, %v3925_v13, %v3926_v51  ;;  %v3927_v26 = vrot.slane %v3847_v45, 7  ;;  %v4133_v2 = vsel %vm479_vm0, %v4085_v49, %v4086_v20  ;;  %v4087_v57 = vrot.slane %v3847_v45, 1 }
 0x3ce   :  { %v3688_v54 = vadd.f32 %v12728_v32, %v3601_v31  ;;  %v3602_v40 = vmul.f32 %v13238_v60, %v3515_v63  ;;  %v13241_v10 = vpack.c.bf16 %v4133_v2, %v4134_v52  ;;  %v2952_v30 = vpop.f32.mrb[108].mxu1  ;;  %v13243_v29 = vpack.c.bf16 %v3847_v45, %v3846_v21  ;;  %v16877_v45 = vld [vmem:[#allocation101_spill] sm:$0xff]  ;;  %v16878_v2 = vld [vmem:[#allocation56_spill] sm:$0xff] }
 0x3cf   :  { %v3972_v13 = vsel %vm318_vm1, %v3926_v51, %v3927_v26  ;;  %v3306_v31 = vadd.f32 %v16875_v59, %v2952_v30  ;;  %v2954_v49 = vpop.f32.mrb[109].mxu1  ;;  %v4132_v21 = vsel %vm479_vm0, %v4086_v20, %v4087_v57 }
 0x3d0   :  { %16873 = vst [vmem:[#allocation140_spill] sm:$0xff] %v13241_v10  ;;  %16874 = vst [vmem:[#allocation91_spill] sm:$0xff] %v13243_v29  ;;  %v3768_v32 = vmax.f32 %v3688_v54, 0.0  ;;  %v13248_v22 = vpack.c.bf16 %v3972_v13, %v3973_v55  ;;  %v3689_v52 = vadd.f32 %v13253_v7, %v3602_v40  ;;  %v2955_v63 = vpop.f32.mrb[110].mxu1  ;;  %8651 = vmatmul.mubr.bf16.gmra.mrb[196].mxu1 %v13241_v10  ;;  %v16879_v49 = vld [vmem:[#allocation136_spill] sm:$0xff] }
 0x3d1   :  { %v3516_v54 = vadd.f32 %v16877_v45, %v3306_v31  ;;  %v3309_v55 = vadd.f32 %v16878_v2, %v2955_v63  ;;  %v2957_v30 = vpop.f32.mrb[111].mxu1 }
 0x3d2   :  { %16876 = vst [vmem:[#allocation54_spill] sm:$0xff] %v13248_v22  ;;  %v3848_v51 = vmul.f32 %v3768_v32, %v12059_v41  ;;  %4735 = vmatmul.mubr.bf16.gmra.mrb[164].mxu0 %v13160_v58  ;;  %v3769_v13 = vmax.f32 %v3689_v52, 0.0 }
 0x3d3   :  { %4742 = vmatprep.mubr.bf16.mxu0 %v13178_v6  ;;  %v3603_v40 = vmul.f32 %v13238_v60, %v3516_v54  ;;  %v3517_v19 = vadd.f32 %v16879_v49, %v3309_v55  ;;  %v16882_v49 = vld [vmem:[#allocation21_spill] sm:$0xff] }
 0x3d4   :  { %v3928_v59 = vrot.slane %v3848_v51, 7  ;;  %v4088_v10 = vrot.slane %v3848_v51, 1  ;;  %v3849_v20 = vmul.f32 %v3769_v13, %v16816_v39 }
 0x3d5   :  { %v3690_v31 = vadd.f32 %v13253_v7, %v3603_v40  ;;  %v3604_v63 = vmul.f32 %v13238_v60, %v3517_v19 }
 0x3d6   :  { %v3971_v32 = vsel %vm318_vm1, %v3927_v26, %v3928_v59  ;;  %v4131_v52 = vsel %vm479_vm0, %v4087_v57, %v4088_v10  ;;  %v3929_v45 = vrot.slane %v3849_v20, 7  ;;  %v4089_v2 = vrot.slane %v3849_v20, 1  ;;  %v2960_v30 = vpop.f32.mrb[112].mxu1 }
 0x3d7   :  { %v13273_v41 = vpack.c.bf16 %v4131_v52, %v4132_v21  ;;  %v13275_v54 = vpack.c.bf16 %v3849_v20, %v3848_v51  ;;  %v3770_v55 = vmax.f32 %v3690_v31, 0.0  ;;  %v3691_v13 = vadd.f32 %v13253_v7, %v3604_v63  ;;  %v2962_v26 = vpop.f32.mrb[113].mxu1  ;;  %v16884_v20 = vld [vmem:[#allocation45_spill] sm:$0xff] }
 0x3d8   :  { %v3314_v39 = vadd.f32 %v16882_v49, %v2960_v30  ;;  %v3970_v40 = vsel %vm318_vm1, %v3928_v59, %v3929_v45  ;;  %v2963_v19 = vpop.f32.mrb[114].mxu1  ;;  %v4130_v57 = vsel %vm479_vm0, %v4088_v10, %v4089_v2  ;;  %v16885_v52 = vld [vmem:[#allocation25_spill] sm:$0xff] }
 0x3d9   :  { %16880 = vst [vmem:[#allocation161_spill] sm:$0xff] %v13273_v41  ;;  %16881 = vst [vmem:[#allocation145_spill] sm:$0xff] %v13275_v54  ;;  %8654 = vmatprep.mubr.bf16.mxu1 %v13273_v41  ;;  %v13284_v6 = vpack.c.bf16 %v3970_v40, %v3971_v32  ;;  %v3850_v21 = vmul.f32 %v3770_v55, %v11989_v48  ;;  %v3771_v51 = vmax.f32 %v3691_v13, 0.0  ;;  %v2965_v63 = vpop.f32.mrb[115].mxu1  ;;  %v16886_v32 = vld [vmem:[#allocation102_spill] sm:$0xff] }
 0x3da   :  { %v3518_v31 = vadd.f32 %v16884_v20, %v3314_v39  ;;  %4743 = vmatmul.mubr.bf16.gmra.mrb[168].mxu0 %v13183_v38  ;;  %v3317_v30 = vadd.f32 %v16885_v52, %v2963_v19  ;;  %v16889_v48 = vld [vmem:[#allocation18_spill] sm:$0xff] }
 0x3db   :  { %16883 = vst [vmem:[#allocation95_spill] sm:$0xff] %v13284_v6  ;;  %4750 = vmatprep.mubr.bf16.mxu0 %v13205_v17  ;;  %v3930_v59 = vrot.slane %v3850_v21, 7  ;;  %v4090_v49 = vrot.slane %v3850_v21, 1  ;;  %v3851_v10 = vmul.f32 %v3771_v51, %v12015_v43 }
 0x3dc   :  { %v3605_v26 = vmul.f32 %v13238_v60, %v3518_v31  ;;  %v3519_v40 = vadd.f32 %v16886_v32, %v3317_v30  ;;  %v13294_v58 = vpop.f32.mrb[64].mxu0 }
 0x3dd   :  { %v3969_v39 = vsel %vm318_vm1, %v3929_v45, %v3930_v59  ;;  %v3931_v55 = vrot.slane %v3851_v10, 7  ;;  %v4129_v19 = vsel %vm479_vm0, %v4089_v2, %v4090_v49  ;;  %v4538_v20 = vpop.f32.mrb[65].mxu0  ;;  %v4091_v30 = vrot.slane %v3851_v10, 1 }
 0x3de   :  { %v3692_v13 = vadd.f32 %v13253_v7, %v3605_v26  ;;  %v3606_v63 = vmul.f32 %v13238_v60, %v3519_v40  ;;  %v13302_v52 = vpack.c.bf16 %v4129_v19, %v4130_v57  ;;  %v2968_v51 = vpop.f32.mrb[116].mxu1  ;;  %v13304_v31 = vpop.f32.mrb[66].mxu0  ;;  %v13306_v32 = vpack.c.bf16 %v3851_v10, %v3850_v21  ;;  %v16891_v10 = vld [vmem:[#allocation87_spill] sm:$0xff] }
 0x3df   :  { %v3968_v45 = vsel %vm318_vm1, %v3930_v59, %v3931_v55  ;;  %v3322_v26 = vadd.f32 %v16889_v48, %v2968_v51  ;;  %v2970_v17 = vpop.f32.mrb[117].mxu1  ;;  %v4541_v38 = vpop.f32.mrb[67].mxu0  ;;  %v4128_v19 = vsel %vm479_vm0, %v4090_v49, %v4091_v30  ;;  %v16892_v59 = vld [vmem:[#allocation59_spill] sm:$0xff] }
 0x3e0   :  { %16887 = vst [vmem:[#allocation65_spill] sm:$0xff] %v13302_v52  ;;  %16888 = vst [vmem:[#allocation162_spill] sm:$0xff] %v13306_v32  ;;  %v3772_v43 = vmax.f32 %v3692_v13, 0.0  ;;  %v13311_v2 = vpack.c.bf16 %v3968_v45, %v3969_v39  ;;  %v3693_v40 = vadd.f32 %v13253_v7, %v3606_v63  ;;  %v2971_v57 = vpop.f32.mrb[118].mxu1  ;;  %8655 = vmatmul.mubr.bf16.gmra.mrb[200].mxu1 %v13302_v52  ;;  %v16893_v63 = vld [vmem:[#allocation105_spill] sm:$0xff] }
 0x3e1   :  { %v3520_v20 = vadd.f32 %v16891_v10, %v3322_v26  ;;  %v3325_v13 = vadd.f32 %v16892_v59, %v2971_v57  ;;  %v2973_v48 = vpop.f32.mrb[119].mxu1 }
 0x3e2   :  { %16890 = vst [vmem:[#allocation148_spill] sm:$0xff] %v13311_v2  ;;  %v3852_v21 = vmul.f32 %v3772_v43, %v11864_v4  ;;  %4751 = vmatmul.mubr.bf16.gmra.mrb[172].mxu0 %v13214_v56  ;;  %v3773_v38 = vmax.f32 %v3693_v40, 0.0 }
 0x3e3   :  { %4758 = vmatprep.mubr.bf16.mxu0 %v13243_v29  ;;  %v3607_v39 = vmul.f32 %v13238_v60, %v3520_v20  ;;  %v3521_v51 = vadd.f32 %v16893_v63, %v3325_v13 }
 0x3e4   :  { %v3932_v17 = vrot.slane %v3852_v21, 7  ;;  %v4092_v45 = vrot.slane %v3852_v21, 1  ;;  %v3853_v49 = vmul.f32 %v3773_v38, %v12032_v36  ;;  %v13325_v52 = vpop.f32.mrb[68].mxu0 }
 0x3e5   :  { %v3694_v26 = vadd.f32 %v13253_v7, %v3607_v39  ;;  %v3608_v57 = vmul.f32 %v13238_v60, %v3521_v51  ;;  %v4546_v40 = vpop.f32.mrb[69].mxu0 }
 0x3e6   :  { %v3967_v43 = vsel %vm318_vm1, %v3931_v55, %v3932_v17  ;;  %v4127_v10 = vsel %vm479_vm0, %v4091_v30, %v4092_v45  ;;  %v3933_v59 = vrot.slane %v3853_v49, 7  ;;  %v4093_v20 = vrot.slane %v3853_v49, 1  ;;  %v2976_v48 = vpop.f32.mrb[120].mxu1  ;;  %v13333_v13 = vpop.f32.mrb[70].mxu0 }
 0x3e7   :  { %v13335_v63 = vpack.c.bf16 %v4127_v10, %v4128_v19  ;;  %v13337_v38 = vpack.c.bf16 %v3853_v49, %v3852_v21  ;;  %v3774_v36 = vmax.f32 %v3694_v26, 0.0  ;;  %v3695_v55 = vadd.f32 %v13253_v7, %v3608_v57  ;;  %v2978_v4 = vpop.f32.mrb[121].mxu1  ;;  %v4549_v51 = vpop.f32.mrb[71].mxu0  ;;  %v16897_v26 = vld [vmem:[#allocation90_spill] sm:$0xff] }
 0x3e8   :  { %v3330_v39 = vadd.f32 %v12895_v18, %v2976_v48  ;;  %v3966_v40 = vsel %vm318_vm1, %v3932_v17, %v3933_v59  ;;  %v2979_v30 = vpop.f32.mrb[122].mxu1  ;;  %v4126_v29 = vsel %vm479_vm0, %v4092_v45, %v4093_v20 }
 0x3e9   :  { %16894 = vst [vmem:[#allocation98_spill] sm:$0xff] %v13335_v63  ;;  %16895 = vst [vmem:[#allocation62_spill] sm:$0xff] %v13337_v38  ;;  %8658 = vmatprep.mubr.bf16.mxu1 %v13335_v63  ;;  %v13346_v19 = vpack.c.bf16 %v3966_v40, %v3967_v43  ;;  %v3854_v21 = vmul.f32 %v3774_v36, %v11891_v9  ;;  %v3775_v49 = vmax.f32 %v3695_v55, 0.0  ;;  %v2981_v4 = vpop.f32.mrb[123].mxu1  ;;  %v16898_v43 = vld [vmem:[#allocation53_spill] sm:$0xff] }
 0x3ea   :  { %v3522_v57 = vadd.f32 %v16897_v26, %v3330_v39  ;;  %4759 = vmatmul.mubr.bf16.gmra.mrb[176].mxu0 %v13248_v22  ;;  %v3333_v18 = vadd.f32 %v12907_v0, %v2979_v30 }
 0x3eb   :  { %16896 = vst [vmem:[#allocation159_spill] sm:$0xff] %v13346_v19  ;;  %4766 = vmatprep.mubr.bf16.mxu0 %v13275_v54  ;;  %v3934_v17 = vrot.slane %v3854_v21, 7  ;;  %v4094_v10 = vrot.slane %v3854_v21, 1  ;;  %v3855_v45 = vmul.f32 %v3775_v49, %v16755_v24 }
 0x3ec   :  { %v3609_v48 = vmul.f32 %v13238_v60, %v3522_v57  ;;  %v3523_v51 = vadd.f32 %v16898_v43, %v3333_v18  ;;  %v13356_v40 = vpop.f32.mrb[72].mxu0 }
 0x3ed   :  { %v3965_v36 = vsel %vm318_vm1, %v3933_v59, %v3934_v17  ;;  %v3935_v55 = vrot.slane %v3855_v45, 7  ;;  %v4125_v0 = vsel %vm479_vm0, %v4093_v20, %v4094_v10  ;;  %v4554_v30 = vpop.f32.mrb[73].mxu0  ;;  %v4095_v18 = vrot.slane %v3855_v45, 1 }
 0x3ee   :  { %v3696_v39 = vadd.f32 %v13253_v7, %v3609_v48  ;;  %v3610_v26 = vmul.f32 %v13238_v60, %v3523_v51  ;;  %v13364_v4 = vpack.c.bf16 %v4125_v0, %v4126_v29  ;;  %v2984_v49 = vpop.f32.mrb[124].mxu1  ;;  %v13366_v57 = vpop.f32.mrb[74].mxu0  ;;  %v13368_v43 = vpack.c.bf16 %v3855_v45, %v3854_v21  ;;  %v16902_v45 = vld [vmem:[#allocation139_spill] sm:$0xff] }
 0x3ef   :  { %v3964_v59 = vsel %vm318_vm1, %v3934_v17, %v3935_v55  ;;  %v3338_v48 = vadd.f32 %v12888_v5, %v2984_v49  ;;  %v2986_v9 = vpop.f32.mrb[125].mxu1  ;;  %v4557_v54 = vpop.f32.mrb[75].mxu0  ;;  %v4124_v0 = vsel %vm479_vm0, %v4094_v10, %v4095_v18  ;;  %v16903_v17 = vld [vmem:[#allocation125_spill] sm:$0xff] }
 0x3f0   :  { %16899 = vst [vmem:[#allocation151_spill] sm:$0xff] %v13364_v4  ;;  %16900 = vst [vmem:[#allocation70_spill] sm:$0xff] %v13368_v43  ;;  %v3776_v24 = vmax.f32 %v3696_v39, 0.0  ;;  %v13373_v20 = vpack.c.bf16 %v3964_v59, %v3965_v36  ;;  %v3697_v51 = vadd.f32 %v13253_v7, %v3610_v26  ;;  %v2987_v29 = vpop.f32.mrb[126].mxu1  ;;  %8659 = vmatmul.mubr.bf16.gmra.mrb[204].mxu1 %v13364_v4  ;;  %v16904_v26 = vld [vmem:[#allocation97_spill] sm:$0xff] }
 0x3f1   :  { %v3524_v30 = vadd.f32 %v16902_v45, %v3338_v48  ;;  %v3341_v39 = vadd.f32 %v16903_v17, %v2987_v29  ;;  %v2989_v9 = vpop.f32.mrb[127].mxu1 }
 0x3f2   :  { %16901 = vst [vmem:[#allocation12_spill] sm:$0xff] %v13373_v20  ;;  %v3856_v21 = vmul.f32 %v3776_v24, %v16760_v11  ;;  %4767 = vmatmul.mubr.bf16.gmra.mrb[180].mxu0 %v13284_v6  ;;  %v3777_v5 = vmax.f32 %v3697_v51, 0.0  ;;  %v16907_v11 = vld [vmem:[#allocation29_spill] sm:$0xff] }
 0x3f3   :  { %4774 = vmatprep.mubr.bf16.mxu0 %v13306_v32  ;;  %v3611_v36 = vmul.f32 %v13238_v60, %v3524_v30  ;;  %v3525_v49 = vadd.f32 %v16904_v26, %v3341_v39 }
 0x3f4   :  { %v3936_v54 = vrot.slane %v3856_v21, 7  ;;  %v4096_v59 = vrot.slane %v3856_v21, 1  ;;  %v3857_v10 = vmul.f32 %v3777_v5, %v16762_v12  ;;  %v13387_v22 = vpop.f32.mrb[76].mxu0 }
 0x3f5   :  { %v3698_v48 = vadd.f32 %v13253_v7, %v3611_v36  ;;  %v3612_v29 = vmul.f32 %v13238_v60, %v3525_v49  ;;  %v4562_v51 = vpop.f32.mrb[77].mxu0 }
 0x3f6   :  { %v3963_v24 = vsel %vm318_vm1, %v3935_v55, %v3936_v54  ;;  %v4123_v45 = vsel %vm479_vm0, %v4095_v18, %v4096_v59  ;;  %v3937_v17 = vrot.slane %v3857_v10, 7  ;;  %v4097_v30 = vrot.slane %v3857_v10, 1  ;;  %v2992_v9 = vpop.f32.mrb[128].mxu1  ;;  %v13395_v39 = vpop.f32.mrb[78].mxu0 }
 0x3f7   :  { %v13397_v26 = vpack.c.bf16 %v4123_v45, %v4124_v0  ;;  %v13399_v5 = vpack.c.bf16 %v3857_v10, %v3856_v21  ;;  %v3778_v12 = vmax.f32 %v3698_v48, 0.0  ;;  %v3699_v55 = vadd.f32 %v13253_v7, %v3612_v29  ;;  %v2994_v32 = vpop.f32.mrb[129].mxu1  ;;  %v4565_v49 = vpop.f32.mrb[79].mxu0  ;;  %v16909_v48 = vld [vmem:[#allocation144_spill] sm:$0xff] }
 0x3f8   :  { %v3346_v36 = vadd.f32 %v16907_v11, %v2992_v9  ;;  %v3962_v51 = vsel %vm318_vm1, %v3936_v54, %v3937_v17  ;;  %v2995_v18 = vpop.f32.mrb[130].mxu1  ;;  %v4122_v6 = vsel %vm479_vm0, %v4096_v59, %v4097_v30 }
 0x3f9   :  { %16905 = vst [vmem:[#allocation55_spill] sm:$0xff] %v13397_v26  ;;  %16906 = vst [vmem:[#allocation73_spill] sm:$0xff] %v13399_v5  ;;  %8662 = vmatprep.mubr.bf16.mxu1 %v13397_v26  ;;  %v13408_v0 = vpack.c.bf16 %v3962_v51, %v3963_v24  ;;  %v3858_v21 = vmul.f32 %v3778_v12, %v16844_v34  ;;  %v3779_v10 = vmax.f32 %v3699_v55, 0.0  ;;  %v2997_v11 = vpop.f32.mrb[131].mxu1  ;;  %v16910_v24 = vld [vmem:[#allocation183_spill] sm:$0xff] }
 0x3fa   :  { %v3526_v29 = vadd.f32 %v16909_v48, %v3346_v36  ;;  %4775 = vmatmul.mubr.bf16.gmra.mrb[184].mxu0 %v13311_v2  ;;  %v3349_v32 = vadd.f32 %v12945_v8, %v2995_v18  ;;  %v16913_v34 = vld [vmem:[#allocation35_spill] sm:$0xff] }
 0x3fb   :  { %16908 = vst [vmem:[#allocation164_spill] sm:$0xff] %v13408_v0  ;;  %4782 = vmatprep.mubr.bf16.mxu0 %v13337_v38  ;;  %v3938_v54 = vrot.slane %v3858_v21, 7  ;;  %v4098_v45 = vrot.slane %v3858_v21, 1  ;;  %v3859_v59 = vmul.f32 %v3779_v10, %v16847_v47 }
 0x3fc   :  { %v3613_v9 = vmul.f32 %v13238_v60, %v3526_v29  ;;  %v3527_v49 = vadd.f32 %v16910_v24, %v3349_v32  ;;  %v13418_v51 = vpop.f32.mrb[80].mxu0 }
 0x3fd   :  { %v3961_v12 = vsel %vm318_vm1, %v3937_v17, %v3938_v54  ;;  %v3939_v55 = vrot.slane %v3859_v59, 7  ;;  %v4121_v8 = vsel %vm479_vm0, %v4097_v30, %v4098_v45  ;;  %v4570_v18 = vpop.f32.mrb[81].mxu0  ;;  %v4099_v32 = vrot.slane %v3859_v59, 1 }
 0x3fe   :  { %v3700_v36 = vadd.f32 %v13253_v7, %v3613_v9  ;;  %v3614_v48 = vmul.f32 %v13238_v60, %v3527_v49  ;;  %v13426_v11 = vpack.c.bf16 %v4121_v8, %v4122_v6  ;;  %v13428_v29 = vpop.f32.mrb[82].mxu0  ;;  %v13430_v24 = vpack.c.bf16 %v3859_v59, %v3858_v21  ;;  %v16915_v59 = vld [vmem:[#allocation108_spill] sm:$0xff] }
 0x3ff   :  { %v3960_v17 = vsel %vm318_vm1, %v3938_v54, %v3939_v55  ;;  %v4573_v2 = vpop.f32.mrb[83].mxu0  ;;  %v4120_v8 = vsel %vm479_vm0, %v4098_v45, %v4099_v32 }
 0x400   :  { %16911 = vst [vmem:[#allocation166_spill] sm:$0xff] %v13426_v11  ;;  %v3000_v10 = vpop.f32.mrb[132].mxu1  ;;  %16912 = vst [vmem:[#allocation78_spill] sm:$0xff] %v13430_v24  ;;  %v3780_v47 = vmax.f32 %v3700_v36, 0.0  ;;  %v13435_v30 = vpack.c.bf16 %v3960_v17, %v3961_v12  ;;  %v3701_v49 = vadd.f32 %v13253_v7, %v3614_v48  ;;  %8663 = vmatmul.mubr.bf16.gmra.mrb[208].mxu1 %v13426_v11  ;;  %v16916_v36 = vld [vmem:[#allocation188_spill] sm:$0xff] }
 0x401   :  { %v3354_v9 = vadd.f32 %v16913_v34, %v3000_v10  ;;  %v3002_v38 = vpop.f32.mrb[133].mxu1 }
 0x402   :  { %16914 = vst [vmem:[#allocation168_spill] sm:$0xff] %v13435_v30  ;;  %v3003_v6 = vpop.f32.mrb[134].mxu1  ;;  %v3860_v21 = vmul.f32 %v3780_v47, %v16776_v53  ;;  %4783 = vmatmul.mubr.bf16.gmra.mrb[188].mxu0 %v13346_v19  ;;  %v3781_v2 = vmax.f32 %v3701_v49, 0.0  ;;  %v16919_v53 = vld [vmem:[#allocation10_spill] sm:$0xff] }
 0x403   :  { %v3528_v18 = vadd.f32 %v16915_v59, %v3354_v9  ;;  %v3357_v54 = vadd.f32 %v12941_v62, %v3003_v6  ;;  %v3005_v34 = vpop.f32.mrb[135].mxu1  ;;  %4790 = vmatprep.mubr.bf16.mxu0 %v13368_v43 }
 0x404   :  { %v3940_v38 = vrot.slane %v3860_v21, 7  ;;  %v4100_v10 = vrot.slane %v3860_v21, 1  ;;  %v3861_v45 = vmul.f32 %v3781_v2, %v16779_v27  ;;  %v13449_v17 = vpop.f32.mrb[84].mxu0 }
 0x405   :  { %v3615_v12 = vmul.f32 %v13238_v60, %v3528_v18  ;;  %v3529_v48 = vadd.f32 %v16916_v36, %v3357_v54  ;;  %v4578_v49 = vpop.f32.mrb[85].mxu0 }
 0x406   :  { %v3959_v47 = vsel %vm318_vm1, %v3939_v55, %v3940_v38  ;;  %v4119_v6 = vsel %vm479_vm0, %v4099_v32, %v4100_v10  ;;  %v3941_v59 = vrot.slane %v3861_v45, 7  ;;  %v4101_v18 = vrot.slane %v3861_v45, 1  ;;  %v13457_v54 = vpop.f32.mrb[86].mxu0 }
 0x407   :  { %v3702_v62 = vadd.f32 %v13253_v7, %v3615_v12  ;;  %v3616_v9 = vmul.f32 %v13238_v60, %v3529_v48  ;;  %v13459_v36 = vpack.c.bf16 %v4119_v6, %v4120_v8  ;;  %v13461_v2 = vpack.c.bf16 %v3861_v45, %v3860_v21  ;;  %v4581_v48 = vpop.f32.mrb[87].mxu0 }
 0x408   :  { %v3958_v49 = vsel %vm318_vm1, %v3940_v38, %v3941_v59  ;;  %v4118_v19 = vsel %vm479_vm0, %v4100_v10, %v4101_v18 }
 0x409   :  { %v3008_v34 = vpop.f32.mrb[136].mxu1  ;;  %16917 = vst [vmem:[#allocation58_spill] sm:$0xff] %v13459_v36  ;;  %16918 = vst [vmem:[#allocation20_spill] sm:$0xff] %v13461_v2  ;;  %v3782_v27 = vmax.f32 %v3702_v62, 0.0  ;;  %v3703_v55 = vadd.f32 %v13253_v7, %v3616_v9  ;;  %8666 = vmatprep.mubr.bf16.mxu1 %v13459_v36  ;;  %v13470_v8 = vpack.c.bf16 %v3958_v49, %v3959_v47  ;;  %v16921_v62 = vld [vmem:[#allocation61_spill] sm:$0xff] }
 0x40a   :  { %v3362_v12 = vadd.f32 %v16919_v53, %v3008_v34  ;;  %v3010_v43 = vpop.f32.mrb[137].mxu1  ;;  %4791 = vmatmul.mubr.bf16.gmra.mrb[192].mxu0 %v13373_v20  ;;  %v16922_v47 = vld [vmem:[#allocation109_spill] sm:$0xff] }
 0x40b   :  { %v3011_v32 = vpop.f32.mrb[138].mxu1  ;;  %16920 = vst [vmem:[#allocation124_spill] sm:$0xff] %v13470_v8  ;;  %v3862_v21 = vmul.f32 %v3782_v27, %v16784_v28  ;;  %v3783_v45 = vmax.f32 %v3703_v55, 0.0  ;;  %4798 = vmatprep.mubr.bf16.mxu0 %v13399_v5  ;;  %v16925_v28 = vld [vmem:[#allocation67_spill] sm:$0xff] }
 0x40c   :  { %v3530_v9 = vadd.f32 %v16921_v62, %v3362_v12  ;;  %v3013_v53 = vpop.f32.mrb[139].mxu1  ;;  %v3365_v43 = vadd.f32 %v12988_v16, %v3011_v32  ;;  %v13480_v49 = vpop.f32.mrb[88].mxu0 }
 0x40d   :  { %v3942_v38 = vrot.slane %v3862_v21, 7  ;;  %v4102_v6 = vrot.slane %v3862_v21, 1  ;;  %v3863_v10 = vmul.f32 %v3783_v45, %v16787_v61  ;;  %v4586_v32 = vpop.f32.mrb[89].mxu0 }
 0x40e   :  { %v3617_v34 = vmul.f32 %v13238_v60, %v3530_v9  ;;  %v3531_v48 = vadd.f32 %v16922_v47, %v3365_v43  ;;  %v13490_v9 = vpop.f32.mrb[90].mxu0 }
 0x40f   :  { %v3957_v27 = vsel %vm318_vm1, %v3941_v59, %v3942_v38  ;;  %v3943_v55 = vrot.slane %v3863_v10, 7  ;;  %v4117_v16 = vsel %vm479_vm0, %v4101_v18, %v4102_v6  ;;  %v4103_v43 = vrot.slane %v3863_v10, 1  ;;  %v4589_v20 = vpop.f32.mrb[91].mxu0 }
 0x410   :  { %v3704_v12 = vadd.f32 %v13253_v7, %v3617_v34  ;;  %v3618_v62 = vmul.f32 %v13238_v60, %v3531_v48  ;;  %v13488_v53 = vpack.c.bf16 %v4117_v16, %v4118_v19  ;;  %v13492_v47 = vpack.c.bf16 %v3863_v10, %v3862_v21  ;;  %v16927_v10 = vld [vmem:[#allocation147_spill] sm:$0xff] }
 0x411   :  { %v3956_v59 = vsel %vm318_vm1, %v3942_v38, %v3943_v55  ;;  %v4116_v16 = vsel %vm479_vm0, %v4102_v6, %v4103_v43 }
 0x412   :  { %16923 = vst [vmem:[#allocation81_spill] sm:$0xff] %v13488_v53  ;;  %v3016_v45 = vpop.f32.mrb[140].mxu1  ;;  %16924 = vst [vmem:[#allocation16_spill] sm:$0xff] %v13492_v47  ;;  %v3784_v61 = vmax.f32 %v3704_v12, 0.0  ;;  %v13497_v18 = vpack.c.bf16 %v3956_v59, %v3957_v27  ;;  %v3705_v48 = vadd.f32 %v13253_v7, %v3618_v62  ;;  %8667 = vmatmul.mubr.bf16.gmra.mrb[212].mxu1 %v13488_v53  ;;  %4799 = vmatmul.mubr.bf16.gmra.mrb[196].mxu0 %v13408_v0  ;;  %v16928_v12 = vld [vmem:[#allocation187_spill] sm:$0xff] }
 0x413   :  { %v3370_v34 = vadd.f32 %v16925_v28, %v3016_v45  ;;  %v3018_v5 = vpop.f32.mrb[141].mxu1  ;;  %4806 = vmatprep.mubr.bf16.mxu0 %v13430_v24  ;;  %v17006_v24 = vld [vmem:[#allocation32_spill] sm:$0xff]  ;;  %v17007_v0 = vld [vmem:[#allocation119_spill] sm:$0xff] }
 0x414   :  { %16926 = vst [vmem:[#allocation122_spill] sm:$0xff] %v13497_v18  ;;  %v3019_v19 = vpop.f32.mrb[142].mxu1  ;;  %v3864_v21 = vmul.f32 %v3784_v61, %v16795_v46  ;;  %v3785_v20 = vmax.f32 %v3705_v48, 0.0  ;;  %v13511_v59 = vpop.f32.mrb[92].mxu0 }
 0x415   :  { %v3532_v32 = vadd.f32 %v16927_v10, %v3370_v34  ;;  %v3373_v38 = vadd.f32 %v12983_v37, %v3019_v19  ;;  %v3021_v28 = vpop.f32.mrb[143].mxu1  ;;  %v4594_v48 = vpop.f32.mrb[93].mxu0 }
 0x416   :  { %v3944_v5 = vrot.slane %v3864_v21, 7  ;;  %v4104_v45 = vrot.slane %v3864_v21, 1  ;;  %v3865_v6 = vmul.f32 %v3785_v20, %v16798_v14 }
 0x417   :  { %v3619_v27 = vmul.f32 %v13238_v60, %v3532_v32  ;;  %v3533_v62 = vadd.f32 %v16928_v12, %v3373_v38  ;;  %v13519_v38 = vpop.f32.mrb[94].mxu0 }
 0x418   :  { %v3955_v61 = vsel %vm318_vm1, %v3943_v55, %v3944_v5  ;;  %v4115_v19 = vsel %vm479_vm0, %v4103_v43, %v4104_v45  ;;  %v3945_v10 = vrot.slane %v3865_v6, 7  ;;  %v4105_v32 = vrot.slane %v3865_v6, 1 }
 0x419   :  { %v3706_v37 = vadd.f32 %v13253_v7, %v3619_v27  ;;  %v3620_v34 = vmul.f32 %v13238_v60, %v3533_v62  ;;  %v13521_v12 = vpack.c.bf16 %v4115_v19, %v4116_v16  ;;  %v13523_v20 = vpack.c.bf16 %v3865_v6, %v3864_v21  ;;  %v4597_v62 = vpop.f32.mrb[95].mxu0 }
 0x41a   :  { %v8600_v28 = vpop.f32.mrb[144].mxu1  ;;  %v3954_v43 = vsel %vm318_vm1, %v3944_v5, %v3945_v10  ;;  %v4114_v16 = vsel %vm479_vm0, %v4104_v45, %v4105_v32  ;;  %4807 = vmatmul.mubr.bf16.gmra.mrb[200].mxu0 %v13435_v30  ;;  %v16994_v30 = vld [vmem:[#allocation116_spill] sm:$0xff] }
 0x41b   :  { %16929 = vst [vmem:[#allocation66_spill] sm:$0xff] %v13521_v12  ;;  %16930 = vst [vmem:[#allocation172_spill] sm:$0xff] %v13523_v20  ;;  %v3786_v14 = vmax.f32 %v3706_v37, 0.0  ;;  %v3707_v55 = vadd.f32 %v13253_v7, %v3620_v34  ;;  %v13527_v27 = vadd.f32 %v8600_v28, %v13325_v52  ;;  %v4889_v60 = vpop.f32.mrb[145].mxu1  ;;  %8670 = vmatprep.mubr.bf16.mxu1 %v13521_v12  ;;  %4814 = vmatprep.mubr.bf16.mxu0 %v13461_v2 }
 0x41c   :  { %v13532_v48 = vadd.f32 %v4889_v60, %v13294_v58  ;;  %v8601_v46 = vpop.f32.mrb[146].mxu1  ;;  %v13537_v21 = vpack.c.bf16 %v3954_v43, %v3955_v61  ;;  %v13549_v61 = vpop.f32.mrb[96].mxu0 }
 0x41d   :  { %v3866_v7 = vmul.f32 %v3786_v14, %v16806_v33  ;;  %v3787_v52 = vmax.f32 %v3707_v55, 0.0  ;;  %v13541_v6 = vadd.f32 %v8601_v46, %v13333_v13  ;;  %v4892_v37 = vpop.f32.mrb[147].mxu1  ;;  %v4602_v13 = vpop.f32.mrb[97].mxu0 }
 0x41e   :  { %16931 = vst [vmem:[#allocation170_spill] sm:$0xff] %v13537_v21  ;;  %v13545_v58 = vadd.f32 %v4892_v37, %v13304_v31  ;;  %v13557_v60 = vpop.f32.mrb[98].mxu0  ;;  %v16938_v13 = vld [vmem:[#allocation175_spill] sm:$0xff] }
 0x41f   :  { %v3946_v5 = vrot.slane %v3866_v7, 7  ;;  %v4106_v45 = vrot.slane %v3866_v7, 1  ;;  %v3867_v34 = vmul.f32 %v3787_v52, %v16808_v1  ;;  %v4605_v37 = vpop.f32.mrb[99].mxu0  ;;  %v16934_v1 = vld [vmem:[#allocation110_spill] sm:$0xff] }
 0x420   :  { %v16935_v33 = vrot.slane %v16934_v1, 7 }
 0x421   :  { %v3953_v14 = vsel %vm318_vm1, %v3945_v10, %v3946_v5  ;;  %v3947_v19 = vrot.slane %v3867_v34, 7  ;;  %v4113_v46 = vsel %vm479_vm0, %v4105_v32, %v4106_v45  ;;  %v4107_v28 = vrot.slane %v3867_v34, 1 }
 0x422   :  { %v13555_v55 = vpack.c.bf16 %v4113_v46, %v4114_v16  ;;  %v8604_v31 = vpop.f32.mrb[148].mxu1  ;;  %v13559_v62 = vpack.c.bf16 %v3867_v34, %v3866_v7  ;;  %v16936_v16 = vrot.slane %v16934_v1, 1  ;;  %4815 = vmatmul.mubr.bf16.gmra.mrb[204].mxu0 %v13470_v8  ;;  %v16956_v8 = vld [vmem:[#allocation112_spill] sm:$0xff] }
 0x423   :  { %v3952_v43 = vsel %vm318_vm1, %v3946_v5, %v3947_v19  ;;  %v13564_v52 = vadd.f32 %v8604_v31, %v13387_v22  ;;  %v4905_v10 = vpop.f32.mrb[149].mxu1  ;;  %v3951_v32 = vsel %vm318_vm1, %v3947_v19, %v16935_v33  ;;  %v4112_v22 = vsel %vm479_vm0, %v4106_v45, %v4107_v28  ;;  %4822 = vmatprep.mubr.bf16.mxu0 %v13492_v47 }
 0x424   :  { %16932 = vst [vmem:[#allocation86_spill] sm:$0xff] %v13555_v55  ;;  %16933 = vst [vmem:[#allocation28_spill] sm:$0xff] %v13559_v62  ;;  %v4111_v46 = vsel %vm479_vm0, %v4107_v28, %v16936_v16  ;;  %v13574_v7 = vpack.c.bf16 %v3952_v43, %v3953_v14  ;;  %v13577_v34 = vadd.f32 %v4905_v10, %v13356_v40  ;;  %v8605_v5 = vpop.f32.mrb[150].mxu1  ;;  %8671 = vmatmul.mubr.bf16.gmra.mrb[216].mxu1 %v13555_v55  ;;  %v4608_v42 = vpop.f32.mrb[100].mxu0  ;;  %v16943_v16 = vld [vmem:[#allocation34_spill] sm:$0xff] }
 0x425   :  { %v13583_v31 = vpack.c.bf16 %v16938_v13, %v3951_v32  ;;  %v13586_v33 = vadd.f32 %v8605_v5, %v13395_v39  ;;  %v4908_v1 = vpop.f32.mrb[151].mxu1  ;;  %v13589_v14 = vpack.c.bf16 %v4111_v46, %v4112_v22  ;;  %v4610_v45 = vpop.f32.mrb[101].mxu0  ;;  %v16945_v5 = vld [vmem:[#allocation111_spill] sm:$0xff] }
 0x426   :  { %16937 = vst [vmem:[#allocation63_spill] sm:$0xff] %v13574_v7  ;;  %v13592_v40 = vadd.f32 %v4908_v1, %v13366_v57  ;;  %v4611_v28 = vpop.f32.mrb[102].mxu0 }
 0x427   :  { %16939 = vst [vmem:[#allocation89_spill] sm:$0xff] %v13583_v31  ;;  %16940 = vst [vmem:[#allocation176_spill] sm:$0xff] %v13586_v33  ;;  %8674 = vmatprep.mubr.bf16.mxu1 %v13589_v14  ;;  %v4613_v10 = vpop.f32.mrb[103].mxu0  ;;  %v17021_v33 = vld [vmem:[#allocation36_spill] sm:$0xff] }
 0x428   :  { %16941 = vst [vmem:[#allocation174_spill] sm:$0xff] %v13589_v14 }
 0x42a   :  { %v8608_v19 = vpop.f32.mrb[152].mxu1  ;;  %4823 = vmatmul.mubr.bf16.gmra.mrb[208].mxu0 %v13497_v18 }
 0x42b   :  { %v13597_v43 = vadd.f32 %v8608_v19, %v13449_v17  ;;  %v4921_v39 = vpop.f32.mrb[153].mxu1  ;;  %4830 = vmatprep.mubr.bf16.mxu0 %v13523_v20  ;;  %v16950_v20 = vld [vmem:[#allocation156_spill] sm:$0xff] }
 0x42c   :  { %v13600_v37 = vadd.f32 %v4921_v39, %v13418_v51  ;;  %v8609_v32 = vpop.f32.mrb[154].mxu1  ;;  %8675 = vmatmul.mubr.bf16.gmra.mrb[220].mxu1 %v16943_v16  ;;  %v4616_v17 = vpop.f32.mrb[104].mxu0  ;;  %v8997_v39 = vld [vmem:[%s15475_s2 + $0x208] sm:$0xff]  }
 0x42d   :  { %16942 = vst [vmem:[#allocation128_spill] sm:$0xff] %v13597_v43  ;;  %v13604_v57 = vadd.f32 %v8609_v32, %v13457_v54  ;;  %v4924_v46 = vpop.f32.mrb[155].mxu1  ;;  %5433 = vmatprep.mubr.bf16.mxu1 %v16945_v5  ;;  %v4618_v13 = vpop.f32.mrb[105].mxu0  ;;  %v16948_v32 = vld [vmem:[#allocation4_spill] sm:$0xff]  ;;  %v17014_v43 = vld [vmem:[#allocation17_spill] sm:$0xff] }
 0x42e   :  { %v13609_v22 = vadd.f32 %v4924_v46, %v13428_v29  ;;  %v4619_v1 = vpop.f32.mrb[106].mxu0 }
 0x42f   :  { %16944 = vst [vmem:[#allocation186_spill] sm:$0xff] %v13604_v57  ;;  %v4621_v54 = vpop.f32.mrb[107].mxu0  ;;  %v17002_v57 = vld [vmem:[#allocation52_spill] sm:$0xff] }
 0x432   :  { %v8612_v51 = vpop.f32.mrb[156].mxu1  ;;  %4831 = vmatmul.mubr.bf16.gmra.mrb[212].mxu0 %v13537_v21 }
 0x433   :  { %v13613_v45 = vadd.f32 %v8612_v51, %v13511_v59  ;;  %v4937_v19 = vpop.f32.mrb[157].mxu1  ;;  %4838 = vmatprep.mubr.bf16.mxu0 %v13559_v62 }
 0x434   :  { %v13619_v10 = vadd.f32 %v4937_v19, %v13480_v49  ;;  %v8613_v29 = vpop.f32.mrb[158].mxu1  ;;  %5434 = vmatmul.mubr.bf16.vlgmr.msra.gmra.mrb[224].mxu1 %v16948_v32  ;;  %v9002_v49 = vld [vmem:[%s15475_s2 + $0x210] sm:$0xff]   ;;  %v4624_v51 = vpop.f32.mrb[108].mxu0 }
 0x435   :  { %16946 = vst [vmem:[#allocation126_spill] sm:$0xff] %v13613_v45  ;;  %v13623_v46 = vadd.f32 %v8613_v29, %v13519_v38  ;;  %v4940_v13 = vpop.f32.mrb[159].mxu1  ;;  %5441 = vmatprep.mubr.bf16.mxu1 %v16950_v20  ;;  %8775 = vmatpush3.bf16.msra.mxu1 %v13224_v25  ;;  %v4626_v38 = vpop.f32.mrb[109].mxu0  ;;  %v16954_v25 = vld [vmem:[#allocation154_spill] sm:$0xff] }
 0x436   :  { %16947 = vst [vmem:[#allocation43_spill] sm:$0xff] %v13619_v10  ;;  %v13628_v59 = vadd.f32 %v4940_v13, %v13490_v9  ;;  %8776 = vmatprep.subr.bf16.mxu1 %v8997_v39  ;;  %v4627_v54 = vpop.f32.mrb[110].mxu0  ;;  %v16990_v45 = vld [vmem:[#allocation118_spill] sm:$0xff]  ;;  %v17001_v10 = vld [vmem:[#allocation100_spill] sm:$0xff] }
 0x437   :  { %16949 = vst [vmem:[#allocation94_spill] sm:$0xff] %v13623_v46  ;;  %v4629_v18 = vpop.f32.mrb[111].mxu0  ;;  %v16989_v46 = vld [vmem:[#allocation169_spill] sm:$0xff] }
 0x438   :  { %16951 = vst [vmem:[#allocation141_spill] sm:$0xff] %v13628_v59  ;;  %v16995_v59 = vld [vmem:[#allocation19_spill] sm:$0xff] }
 0x439   :  { %8777 = vmatpush3.bf16.msra.mxu1 %v8997_v39 }
 0x43a   :  { %v8616_v19 = vpop.f32.mrb[160].mxu1  ;;  %8778 = vmatprep.subr.bf16.mxu1 %v9002_v49  ;;  %4839 = vmatmul.mubr.bf16.gmra.mrb[216].mxu0 %v13574_v7 }
 0x43b   :  { %v13635_v29 = vadd.f32 %v8616_v19, %v4608_v42  ;;  %v4953_v21 = vpop.f32.mrb[161].mxu1  ;;  %v16958_v42 = vld [vmem:[#allocation177_spill] sm:$0xff] }
 0x43c   :  { %v13638_v9 = vadd.f32 %v4953_v21, %v13549_v61  ;;  %v8617_v13 = vpop.f32.mrb[162].mxu1  ;;  %5442 = vmatmul.mubr.bf16.gmra.mrb[228].mxu1 %v16954_v25  ;;  %4846 = vmatprep.mubr.bf16.mxu0 %v16958_v42  ;;  %v4632_v18 = vpop.f32.mrb[112].mxu0 }
 0x43d   :  { %16952 = vst [vmem:[#allocation33_spill] sm:$0xff] %v13635_v29  ;;  %v13641_v62 = vadd.f32 %v8617_v13, %v4611_v28  ;;  %v4956_v47 = vpop.f32.mrb[163].mxu1  ;;  %5449 = vmatprep.mubr.bf16.mxu1 %v16956_v8  ;;  %8779 = vmatpush3.bf16.msra.mxu1 %v9002_v49  ;;  %v4634_v38 = vpop.f32.mrb[113].mxu0  ;;  %v9007_v49 = vld [vmem:[%s15475_s2 + $0x218] sm:$0xff]  }
 0x43e   :  { %16953 = vst [vmem:[#allocation71_spill] sm:$0xff] %v13638_v9  ;;  %v13646_v39 = vadd.f32 %v4956_v47, %v13557_v60  ;;  %v4635_v61 = vpop.f32.mrb[114].mxu0  ;;  %v16961_v9 = vld [vmem:[#allocation77_spill] sm:$0xff]  ;;  %v16963_v60 = vld [vmem:[#allocation163_spill] sm:$0xff]  ;;  %v16965_v38 = vld [vmem:[#allocation92_spill] sm:$0xff]  ;;  %8780 = vmatprep.subr.bf16.mxu1 %v9007_v49 }
 0x43f   :  { %16955 = vst [vmem:[#allocation96_spill] sm:$0xff] %v13641_v62  ;;  %v4637_v28 = vpop.f32.mrb[115].mxu0 }
 0x440   :  { %16957 = vst [vmem:[#allocation48_spill] sm:$0xff] %v13646_v39 }
 0x441   :  { %8781 = vmatpush3.bf16.msra.mxu1 %v9007_v49  ;;  %v16970_v49 = vld [vmem:[#allocation84_spill] sm:$0xff] }
 0x442   :  { %v8620_v21 = vpop.f32.mrb[164].mxu1  ;;  %4847 = vmatmul.mubr.bf16.gmra.mrb[220].mxu0 %v13583_v31 }
 0x443   :  { %v13649_v19 = vadd.f32 %v8620_v21, %v4624_v51  ;;  %v4969_v29 = vpop.f32.mrb[165].mxu1  ;;  %8694 = vmatprep.mubr.bf16.mxu0 %v16965_v38 }
 0x444   :  { %v13651_v13 = vadd.f32 %v4969_v29, %v4616_v17  ;;  %v8621_v62 = vpop.f32.mrb[166].mxu1  ;;  %5450 = vmatmul.mubr.bf16.gmra.mrb[232].mxu1 %v16961_v9  ;;  %v4640_v17 = vpop.f32.mrb[116].mxu0 }
 0x445   :  { %16959 = vst [vmem:[#allocation178_spill] sm:$0xff] %v13649_v19  ;;  %v13654_v7 = vadd.f32 %v8621_v62, %v4627_v54  ;;  %v4972_v47 = vpop.f32.mrb[167].mxu1  ;;  %5457 = vmatprep.mubr.bf16.mxu1 %v16963_v60  ;;  %v4642_v29 = vpop.f32.mrb[117].mxu0  ;;  %v8993_v54 = vld [vmem:[%s15475_s2 + $0x180] sm:$0xff]  }
 0x446   :  { %16960 = vst [vmem:[#allocation14_spill] sm:$0xff] %v13651_v13  ;;  %v13661_v51 = vadd.f32 %v4972_v47, %v4619_v1  ;;  %v4643_v62 = vpop.f32.mrb[118].mxu0  ;;  %v16968_v47 = vld [vmem:[#allocation8_spill] sm:$0xff]  ;;  %v16971_v29 = vld [vmem:[#allocation167_spill] sm:$0xff] }
 0x447   :  { %16962 = vst [vmem:[#allocation44_spill] sm:$0xff] %v13654_v7  ;;  %v4645_v7 = vpop.f32.mrb[119].mxu0  ;;  %v16973_v13 = vld [vmem:[#allocation31_spill] sm:$0xff] }
 0x448   :  { %16964 = vst [vmem:[#allocation51_spill] sm:$0xff] %v13661_v51  ;;  %v8994_v7 = vld [vmem:[%s15475_s2 + $0x188] sm:$0xff]  }
 0x44a   :  { %v8624_v21 = vpop.f32.mrb[168].mxu1  ;;  %8695 = vmatmul.mubr.bf16.vlgmr.msra.gmra.mrb[224].mxu0 %v16971_v29 }
 0x44b   :  { %v13667_v28 = vadd.f32 %v8624_v21, %v4640_v17  ;;  %v4985_v31 = vpop.f32.mrb[169].mxu1  ;;  %8698 = vmatprep.mubr.bf16.mxu0 %v16973_v13  ;;  %6301 = vmatpush1.bf16.msra.mxu0 %v8993_v54  ;;  %v16976_v13 = vld [vmem:[#allocation85_spill] sm:$0xff] }
 0x44c   :  { %v13669_v19 = vadd.f32 %v4985_v31, %v4632_v18  ;;  %v8625_v1 = vpop.f32.mrb[170].mxu1  ;;  %5458 = vmatmul.mubr.bf16.gmra.mrb[236].mxu1 %v16968_v47  ;;  %6302 = vmatprep.subr.bf16.mxu0 %v16037_v50  ;;  %v4648_v31 = vpop.f32.mrb[120].mxu0 }
 0x44d   :  { %16966 = vst [vmem:[#allocation130_spill] sm:$0xff] %v13667_v28  ;;  %v13672_v38 = vadd.f32 %v8625_v1, %v4643_v62  ;;  %v4988_v42 = vpop.f32.mrb[171].mxu1  ;;  %5465 = vmatprep.mubr.bf16.mxu1 %v16970_v49  ;;  %v4650_v18 = vpop.f32.mrb[121].mxu0  ;;  %v8995_v62 = vld [vmem:[%s15475_s2 + $0x190] sm:$0xff]  }
 0x44e   :  { %16967 = vst [vmem:[#allocation82_spill] sm:$0xff] %v13669_v19  ;;  %v13676_v51 = vadd.f32 %v4988_v42, %v4635_v61  ;;  %v4651_v21 = vpop.f32.mrb[122].mxu0  ;;  %v16977_v18 = vld [vmem:[#allocation23_spill] sm:$0xff] }
 0x44f   :  { %16969 = vst [vmem:[#allocation50_spill] sm:$0xff] %v13672_v38  ;;  %6303 = vmatpush1.bf16.msra.mxu0 %v8994_v7  ;;  %v4653_v61 = vpop.f32.mrb[123].mxu0  ;;  %v16975_v38 = vld [vmem:[#allocation160_spill] sm:$0xff]  ;;  %v16979_v7 = vld [vmem:[#allocation171_spill] sm:$0xff] }
 0x450   :  { %16972 = vst [vmem:[#allocation101_spill] sm:$0xff] %v13676_v51  ;;  %6304 = vmatprep.subr.bf16.mxu0 %v16037_v50  ;;  %v8996_v61 = vld [vmem:[%s15475_s2 + $0x198] sm:$0xff]  }
 0x452   :  { %v8628_v17 = vpop.f32.mrb[172].mxu1  ;;  %8699 = vmatmul.mubr.bf16.gmra.mrb[228].mxu0 %v16977_v18  ;;  %v16982_v18 = vld [vmem:[#allocation115_spill] sm:$0xff] }
 0x453   :  { %v5001_v42 = vpop.f32.mrb[173].mxu1  ;;  %8702 = vmatprep.mubr.bf16.mxu0 %v16979_v7  ;;  %6305 = vmatpush1.bf16.msra.mxu0 %v8995_v62 }
 0x454   :  { %v13687_v54 = vadd.f32 %v5001_v42, %v4648_v31  ;;  %v8629_v1 = vpop.f32.mrb[174].mxu1  ;;  %5466 = vmatmul.mubr.bf16.gmra.mrb[240].mxu1 %v16975_v38  ;;  %6306 = vmatprep.subr.bf16.mxu0 %v16037_v50  ;;  %v4656_v31 = vpop.f32.mrb[124].mxu0 }
 0x455   :  { %v5004_v28 = vpop.f32.mrb[175].mxu1  ;;  %5473 = vmatprep.mubr.bf16.mxu1 %v16976_v13  ;;  %v13699_v42 = vadd.f32 %v8628_v17, %v4656_v31  ;;  %v16983_v17 = vld [vmem:[#allocation11_spill] sm:$0xff]  ;;  %v16985_v31 = vld [vmem:[#allocation117_spill] sm:$0xff] }
 0x456   :  { %16974 = vst [vmem:[#allocation56_spill] sm:$0xff] %v13687_v54  ;;  %v13692_v29 = vadd.f32 %v5004_v28, %v4651_v21  ;;  %v4658_v54 = vpop.f32.mrb[125].mxu0  ;;  %v8998_v28 = vld [vmem:[%s15475_s2 + $0x1a0] sm:$0xff]  }
 0x457   :  { %16980 = vst [vmem:[#allocation21_spill] sm:$0xff] %v13699_v42  ;;  %v4659_v19 = vpop.f32.mrb[126].mxu0  ;;  %6307 = vmatpush1.bf16.msra.mxu0 %v8996_v61  ;;  %v16984_v54 = vld [vmem:[#allocation99_spill] sm:$0xff]  ;;  %v9000_v42 = vld [vmem:[%s15475_s2 + $0x1b0] sm:$0xff]  }
 0x458   :  { %16978 = vst [vmem:[#allocation136_spill] sm:$0xff] %v13692_v29  ;;  %v13704_v21 = vadd.f32 %v8629_v1, %v4659_v19  ;;  %v4661_v29 = vpop.f32.mrb[127].mxu0  ;;  %6308 = vmatprep.subr.bf16.mxu0 %v16037_v50  ;;  %v8999_v19 = vld [vmem:[%s15475_s2 + $0x1a8] sm:$0xff]  }
 0x45a   :  { %v8632_v51 = vpop.f32.mrb[176].mxu1  ;;  %16981 = vst [vmem:[#allocation45_spill] sm:$0xff] %v13704_v21  ;;  %8703 = vmatmul.mubr.bf16.gmra.mrb[232].mxu0 %v16984_v54 }
 0x45b   :  { %v5017_v62 = vpop.f32.mrb[177].mxu1  ;;  %8706 = vmatprep.mubr.bf16.mxu0 %v16985_v31  ;;  %6309 = vmatpush1.bf16.msra.mxu0 %v8998_v28  ;;  %v16988_v28 = vld [vmem:[#allocation15_spill] sm:$0xff] }
 0x45c   :  { %v8633_v7 = vpop.f32.mrb[178].mxu1  ;;  %5474 = vmatmul.mubr.bf16.gmra.mrb[244].mxu1 %v16982_v18  ;;  %6310 = vmatprep.subr.bf16.mxu0 %v16037_v50  ;;  %v4664_v29 = vpop.f32.mrb[128].mxu0 }
 0x45d   :  { %v5020_v39 = vpop.f32.mrb[179].mxu1  ;;  %5481 = vmatprep.mubr.bf16.mxu1 %v16983_v17  ;;  %v13715_v1 = vadd.f32 %v5017_v62, %v4664_v29  ;;  %v4666_v61 = vpop.f32.mrb[129].mxu0  ;;  %v16991_v62 = vld [vmem:[#allocation27_spill] sm:$0xff] }
 0x45e   :  { %v4667_v21 = vpop.f32.mrb[130].mxu0 }
 0x45f   :  { %16986 = vst [vmem:[#allocation25_spill] sm:$0xff] %v13715_v1  ;;  %6311 = vmatpush1.bf16.msra.mxu0 %v8999_v19  ;;  %v13720_v54 = vadd.f32 %v5020_v39, %v4667_v21  ;;  %v4669_v31 = vpop.f32.mrb[131].mxu0  ;;  %v9001_v19 = vld [vmem:[%s15475_s2 + $0x1b8] sm:$0xff]  }
 0x460   :  { %6312 = vmatprep.subr.bf16.mxu0 %v16037_v50 }
 0x461   :  { %16987 = vst [vmem:[#allocation102_spill] sm:$0xff] %v13720_v54 }
 0x462   :  { %8707 = vmatmul.mubr.bf16.gmra.mrb[236].mxu0 %v16990_v45 }
 0x463   :  { %8710 = vmatprep.mubr.bf16.mxu0 %v16991_v62  ;;  %6313 = vmatpush1.bf16.msra.mxu0 %v9000_v42  ;;  %v9003_v42 = vld [vmem:[%s15475_s2 + $0x1c0] sm:$0xff]  }
 0x464   :  { %5482 = vmatmul.mubr.bf16.gmra.mrb[248].mxu1 %v16988_v28  ;;  %6314 = vmatprep.subr.bf16.mxu0 %v16037_v50  ;;  %v4672_v21 = vpop.f32.mrb[132].mxu0 }
 0x465   :  { %5489 = vmatprep.mubr.bf16.mxu1 %v16989_v46  ;;  %v8636_v29 = vpop.f32.mrb[180].mxu1  ;;  %v13731_v31 = vadd.f32 %v8632_v51, %v4672_v21  ;;  %v4674_v54 = vpop.f32.mrb[133].mxu0  ;;  %v16996_v51 = vld [vmem:[#allocation37_spill] sm:$0xff] }
 0x466   :  { %v5033_v39 = vpop.f32.mrb[181].mxu1  ;;  %v4675_v2 = vpop.f32.mrb[134].mxu0  ;;  %v9012_v54 = vld [vmem:[%s15475_s2 + $0x220] sm:$0xff]  }
 0x467   :  { %16992 = vst [vmem:[#allocation18_spill] sm:$0xff] %v13731_v31  ;;  %v8637_v61 = vpop.f32.mrb[182].mxu1  ;;  %6315 = vmatpush1.bf16.msra.mxu0 %v9001_v19  ;;  %v13736_v62 = vadd.f32 %v8633_v7, %v4675_v2  ;;  %v4677_v45 = vpop.f32.mrb[135].mxu0  ;;  %v16997_v19 = vld [vmem:[#allocation120_spill] sm:$0xff]  ;;  %v9004_v2 = vld [vmem:[%s15475_s2 + $0x1c8] sm:$0xff]   ;;  %8782 = vmatprep.subr.bf16.mxu1 %v9012_v54 }
 0x468   :  { %v5036_v1 = vpop.f32.mrb[183].mxu1  ;;  %6316 = vmatprep.subr.bf16.mxu0 %v16037_v50  ;;  %8783 = vmatpush3.bf16.msra.mxu1 %v9012_v54  ;;  %v9005_v31 = vld [vmem:[%s15475_s2 + $0x1d0] sm:$0xff]   ;;  %v9006_v54 = vld [vmem:[%s15475_s2 + $0x1d8] sm:$0xff]  }
 0x469   :  { %16993 = vst [vmem:[#allocation87_spill] sm:$0xff] %v13736_v62 }
 0x46a   :  { %8711 = vmatmul.mubr.bf16.gmra.mrb[240].mxu0 %v16996_v51  ;;  %v17000_v51 = vld [vmem:[#allocation173_spill] sm:$0xff] }
 0x46b   :  { %8714 = vmatprep.mubr.bf16.mxu0 %v16997_v19  ;;  %6317 = vmatpush1.bf16.msra.mxu0 %v9003_v42 }
 0x46c   :  { %5490 = vmatmul.mubr.bf16.gmra.mrb[252].mxu1 %v16994_v30  ;;  %6318 = vmatprep.subr.bf16.mxu0 %v16037_v50  ;;  %v4680_v45 = vpop.f32.mrb[136].mxu0 }
 0x46d   :  { %5497 = vmatprep.mubr.bf16.mxu1 %v16995_v59  ;;  %v13750_v7 = vadd.f32 %v5033_v39, %v4680_v45  ;;  %v4682_v21 = vpop.f32.mrb[137].mxu0  ;;  %v17003_v39 = vld [vmem:[#allocation42_spill] sm:$0xff] }
 0x46e   :  { %v4683_v62 = vpop.f32.mrb[138].mxu0 }
 0x46f   :  { %16998 = vst [vmem:[#allocation59_spill] sm:$0xff] %v13750_v7  ;;  %6319 = vmatpush1.bf16.msra.mxu0 %v9004_v2  ;;  %v13755_v19 = vadd.f32 %v5036_v1, %v4683_v62  ;;  %v4685_v42 = vpop.f32.mrb[139].mxu0 }
 0x470   :  { %6320 = vmatprep.subr.bf16.mxu0 %v16037_v50 }
 0x471   :  { %16999 = vst [vmem:[#allocation105_spill] sm:$0xff] %v13755_v19 }
 0x472   :  { %8715 = vmatmul.mubr.bf16.gmra.mrb[244].mxu0 %v17002_v57 }
 0x473   :  { %8718 = vmatprep.mubr.bf16.mxu0 %v17003_v39  ;;  %6321 = vmatpush1.bf16.msra.mxu0 %v9005_v31  ;;  %v9008_v31 = vld [vmem:[%s15475_s2 + $0x1e0] sm:$0xff]  }
 0x474   :  { %5498 = vmatmul.mubr.bf16.gmra.mrb[0].mxu1 %v17000_v51  ;;  %v8640_v2 = vpop.f32.mrb[184].mxu1  ;;  %6322 = vmatprep.subr.bf16.mxu0 %v16037_v50 }
 0x475   :  { %5505 = vmatprep.mubr.bf16.mxu1 %v17001_v10  ;;  %v5049_v1 = vpop.f32.mrb[185].mxu1  ;;  %v4688_v62 = vpop.f32.mrb[140].mxu0 }
 0x476   :  { %v13766_v45 = vadd.f32 %v8636_v29, %v4688_v62  ;;  %v8641_v21 = vpop.f32.mrb[186].mxu1  ;;  %v4690_v42 = vpop.f32.mrb[141].mxu0  ;;  %v17008_v29 = vld [vmem:[#allocation47_spill] sm:$0xff]  ;;  %v17009_v62 = vld [vmem:[#allocation13_spill] sm:$0xff] }
 0x477   :  { %v5052_v19 = vpop.f32.mrb[187].mxu1  ;;  %v4691_v7 = vpop.f32.mrb[142].mxu0  ;;  %6323 = vmatpush1.bf16.msra.mxu0 %v9006_v54  ;;  %v9009_v54 = vld [vmem:[%s15475_s2 + $0x1e8] sm:$0xff]  }
 0x478   :  { %17004 = vst [vmem:[#allocation90_spill] sm:$0xff] %v13766_v45  ;;  %v13771_v39 = vadd.f32 %v8637_v61, %v4691_v7  ;;  %v4693_v57 = vpop.f32.mrb[143].mxu0  ;;  %6324 = vmatprep.subr.bf16.mxu0 %v16037_v50 }
 0x47a   :  { %17005 = vst [vmem:[#allocation53_spill] sm:$0xff] %v13771_v39  ;;  %8719 = vmatmul.mubr.bf16.gmra.mrb[248].mxu0 %v17008_v29  ;;  %v9010_v39 = vld [vmem:[%s15475_s2 + $0x1f0] sm:$0xff]  }
 0x47b   :  { %8722 = vmatprep.mubr.bf16.mxu0 %v17009_v62  ;;  %6325 = vmatpush1.bf16.msra.mxu0 %v9008_v31  ;;  %v17012_v31 = vld [vmem:[#allocation179_spill] sm:$0xff]  ;;  %v17013_v29 = vld [vmem:[#allocation180_spill] sm:$0xff] }
 0x47c   :  { %5506 = vmatmul.mubr.bf16.gmra.mrb[4].mxu1 %v17006_v24  ;;  %6326 = vmatprep.subr.bf16.mxu0 %v16037_v50 }
 0x47d   :  { %5513 = vmatprep.mubr.bf16.mxu1 %v17007_v0  ;;  %v4696_v61 = vpop.f32.mrb[144].mxu0  ;;  %v17020_v0 = vld [vmem:[#allocation26_spill] sm:$0xff] }
 0x47e   :  { %v13782_v7 = vadd.f32 %v5049_v1, %v4696_v61  ;;  %v4698_v57 = vpop.f32.mrb[145].mxu0  ;;  %v17015_v1 = vld [vmem:[#allocation103_spill] sm:$0xff] }
 0x47f   :  { %v4699_v42 = vpop.f32.mrb[146].mxu0  ;;  %6327 = vmatpush1.bf16.msra.mxu0 %v9009_v54  ;;  %v9011_v54 = vld [vmem:[%s15475_s2 + $0x1f8] sm:$0xff]  }
 0x480   :  { %17010 = vst [vmem:[#allocation139_spill] sm:$0xff] %v13782_v7  ;;  %v13787_v45 = vadd.f32 %v5052_v19, %v4699_v42  ;;  %v4701_v62 = vpop.f32.mrb[147].mxu0  ;;  %6328 = vmatprep.subr.bf16.mxu0 %v16037_v50 }
 0x482   :  { %17011 = vst [vmem:[#allocation125_spill] sm:$0xff] %v13787_v45  ;;  %8723 = vmatmul.mubr.bf16.gmra.mrb[252].mxu0 %v17014_v43 }
 0x483   :  { %8726 = vmatprep.mubr.bf16.mxu0 %v17015_v1  ;;  %6329 = vmatpush1.bf16.msra.mxu0 %v9010_v39  ;;  %v17018_v39 = vld [vmem:[#allocation38_spill] sm:$0xff] }
 0x484   :  { %5514 = vmatmul.mubr.bf16.gmra.mrb[8].mxu1 %v17012_v31  ;;  %v8644_v61 = vpop.f32.mrb[188].mxu1  ;;  %6330 = vmatprep.subr.bf16.mxu0 %v16037_v50  ;;  %v17019_v31 = vld [vmem:[#allocation40_spill] sm:$0xff] }
 0x485   :  { %5521 = vmatprep.mubr.bf16.mxu1 %v17013_v29  ;;  %v5065_v19 = vpop.f32.mrb[189].mxu1  ;;  %v4704_v62 = vpop.f32.mrb[148].mxu0 }
 0x486   :  { %v13798_v57 = vadd.f32 %v8640_v2, %v4704_v62  ;;  %v8645_v42 = vpop.f32.mrb[190].mxu1  ;;  %v4706_v45 = vpop.f32.mrb[149].mxu0 }
 0x487   :  { %v5068_v7 = vpop.f32.mrb[191].mxu1  ;;  %v4707_v29 = vpop.f32.mrb[150].mxu0  ;;  %6331 = vmatpush1.bf16.msra.mxu0 %v9011_v54  ;;  %v17024_v54 = vld [vmem:[#allocation181_spill] sm:$0xff] }
 0x488   :  { %17016 = vst [vmem:[#allocation97_spill] sm:$0xff] %v13798_v57  ;;  %v13800_v43 = vadd.f32 %v8641_v21, %v4707_v29  ;;  %v4709_v1 = vpop.f32.mrb[151].mxu0  ;;  %v17025_v21 = vld [vmem:[#allocation182_spill] sm:$0xff]  ;;  %v17026_v29 = vld [vmem:[#allocation129_spill] sm:$0xff] }
 0x489   :  { %v9013_v1 = vld [vmem:[%s15475_s2 + $0x228] sm:$0xff]  }
 0x48a   :  { %17017 = vst [vmem:[#allocation29_spill] sm:$0xff] %v13800_v43  ;;  %8727 = vmatmul.mubr.bf16.gmra.mrb[0].mxu0 %v17020_v0  ;;  %8784 = vmatprep.subr.bf16.mxu1 %v9013_v1  ;;  %v17030_v0 = vld [vmem:[#allocation184_spill] sm:$0xff] }
 0x48b   :  { %8730 = vmatprep.mubr.bf16.mxu0 %v17021_v33  ;;  %8785 = vmatpush3.bf16.msra.mxu1 %v9013_v1  ;;  %v17029_v33 = vld [vmem:[#allocation138_spill] sm:$0xff] }
 0x48c   :  { %5522 = vmatmul.mubr.bf16.gmra.mrb[12].mxu1 %v17018_v39 }
 0x48d   :  { %5529 = vmatprep.mubr.bf16.mxu1 %v17019_v31  ;;  %v4712_v50 = vpop.f32.mrb[152].mxu0 }
 0x48e   :  { %v13806_v24 = vadd.f32 %v5065_v19, %v4712_v50  ;;  %v4714_v2 = vpop.f32.mrb[153].mxu0 }
 0x48f   :  { %v4715_v62 = vpop.f32.mrb[154].mxu0 }
 0x490   :  { %17022 = vst [vmem:[#allocation144_spill] sm:$0xff] %v13806_v24  ;;  %v13808_v45 = vadd.f32 %v5068_v7, %v4715_v62  ;;  %v4717_v57 = vpop.f32.mrb[155].mxu0 }
 0x492   :  { %17023 = vst [vmem:[#allocation183_spill] sm:$0xff] %v13808_v45  ;;  %8731 = vmatmul.mubr.bf16.gmra.mrb[4].mxu0 %v17026_v29 }
 0x493   :  { %8734 = vmatprep.mubr.bf16.mxu0 %v13014_v23  ;;  %v8648_v43 = vpop.f32.mrb[192].mxu1  ;;  %v17031_v23 = vld [vmem:[#allocation39_spill] sm:$0xff] }
 0x494   :  { %5530 = vmatmul.mubr.bf16.gmra.mrb[16].mxu1 %v17024_v54  ;;  %v5081_v19 = vpop.f32.mrb[193].mxu1 }
 0x495   :  { %5537 = vmatprep.mubr.bf16.mxu1 %v17025_v21  ;;  %v4720_v50 = vpop.f32.mrb[156].mxu0  ;;  %v8649_v57 = vpop.f32.mrb[194].mxu1 }
 0x496   :  { %v13817_v7 = vadd.f32 %v8644_v61, %v4720_v50  ;;  %v4722_v2 = vpop.f32.mrb[157].mxu0  ;;  %v5084_v62 = vpop.f32.mrb[195].mxu1 }
 0x497   :  { %v4723_v45 = vpop.f32.mrb[158].mxu0 }
 0x498   :  { %17027 = vst [vmem:[#allocation35_spill] sm:$0xff] %v13817_v7  ;;  %v13819_v24 = vadd.f32 %v8645_v42, %v4723_v45  ;;  %v4725_v29 = vpop.f32.mrb[159].mxu0  ;;  %v17034_v7 = vld [vmem:[#allocation143_spill] sm:$0xff]  ;;  %v17036_v45 = vld [vmem:[#allocation80_spill] sm:$0xff] }
 0x499   :  { %v17035_v42 = vld [vmem:[#allocation3_spill] sm:$0xff] }
 0x49a   :  { %17028 = vst [vmem:[#allocation108_spill] sm:$0xff] %v13819_v24  ;;  %8735 = vmatmul.mubr.bf16.gmra.mrb[8].mxu0 %v13044_v44 }
 0x49b   :  { %8738 = vmatprep.mubr.bf16.mxu0 %v17031_v23 }
 0x49c   :  { %5538 = vmatmul.mubr.bf16.gmra.mrb[20].mxu1 %v17029_v33 }
 0x49d   :  { %5545 = vmatprep.mubr.bf16.mxu1 %v17030_v0  ;;  %v4728_v21 = vpop.f32.mrb[160].mxu0 }
 0x49e   :  { %v13825_v54 = vadd.f32 %v5081_v19, %v4728_v21  ;;  %v4730_v61 = vpop.f32.mrb[161].mxu0 }
 0x49f   :  { %v4731_v1 = vpop.f32.mrb[162].mxu0 }
 0x4a0   :  { %17032 = vst [vmem:[#allocation188_spill] sm:$0xff] %v13825_v54  ;;  %v13827_v50 = vadd.f32 %v5084_v62, %v4731_v1  ;;  %v4733_v2 = vpop.f32.mrb[163].mxu0 }
 0x4a1   :  { %v17039_v2 = vld [vmem:[#allocation146_spill] sm:$0xff] }
 0x4a2   :  { %17033 = vst [vmem:[#allocation10_spill] sm:$0xff] %v13827_v50  ;;  %8739 = vmatmul.mubr.bf16.gmra.mrb[12].mxu0 %v17036_v45  ;;  %v17040_v50 = vld [vmem:[#allocation121_spill] sm:$0xff] }
 0x4a3   :  { %8742 = vmatprep.mubr.bf16.mxu0 %v13149_v15  ;;  %v8652_v29 = vpop.f32.mrb[196].mxu1 }
 0x4a4   :  { %5546 = vmatmul.mubr.bf16.gmra.mrb[24].mxu1 %v17034_v7  ;;  %v5097_v24 = vpop.f32.mrb[197].mxu1 }
 0x4a5   :  { %5553 = vmatprep.mubr.bf16.mxu1 %v17035_v42  ;;  %v4736_v44 = vpop.f32.mrb[164].mxu0  ;;  %v8653_v21 = vpop.f32.mrb[198].mxu1  ;;  %v17043_v42 = vld [vmem:[#allocation104_spill] sm:$0xff] }
 0x4a6   :  { %v13833_v23 = vadd.f32 %v8648_v43, %v4736_v44  ;;  %v4738_v19 = vpop.f32.mrb[165].mxu0  ;;  %v5100_v61 = vpop.f32.mrb[199].mxu1 }
 0x4a7   :  { %v4739_v54 = vpop.f32.mrb[166].mxu0 }
 0x4a8   :  { %17037 = vst [vmem:[#allocation61_spill] sm:$0xff] %v13833_v23  ;;  %v13835_v62 = vadd.f32 %v8649_v57, %v4739_v54  ;;  %v4741_v1 = vpop.f32.mrb[167].mxu0  ;;  %v17044_v54 = vld [vmem:[#allocation123_spill] sm:$0xff]  ;;  %v17045_v57 = vld [vmem:[#allocation140_spill] sm:$0xff] }
 0x4aa   :  { %17038 = vst [vmem:[#allocation109_spill] sm:$0xff] %v13835_v62  ;;  %8743 = vmatmul.mubr.bf16.gmra.mrb[16].mxu0 %v13176_v3 }
 0x4ab   :  { %8746 = vmatprep.mubr.bf16.mxu0 %v13203_v35 }
 0x4ac   :  { %5554 = vmatmul.mubr.bf16.gmra.mrb[28].mxu1 %v17039_v2 }
 0x4ad   :  { %5561 = vmatprep.mubr.bf16.mxu1 %v17040_v50  ;;  %v4744_v15 = vpop.f32.mrb[168].mxu0 }
 0x4ae   :  { %v13841_v45 = vadd.f32 %v5097_v24, %v4744_v15  ;;  %v4746_v44 = vpop.f32.mrb[169].mxu0 }
 0x4af   :  { %v4747_v43 = vpop.f32.mrb[170].mxu0 }
 0x4b0   :  { %17041 = vst [vmem:[#allocation67_spill] sm:$0xff] %v13841_v45  ;;  %v13843_v23 = vadd.f32 %v5100_v61, %v4747_v43  ;;  %v4749_v19 = vpop.f32.mrb[171].mxu0 }
 0x4b1   :  { %v17048_v19 = vld [vmem:[#allocation22_spill] sm:$0xff] }
 0x4b2   :  { %17042 = vst [vmem:[#allocation147_spill] sm:$0xff] %v13843_v23  ;;  %8747 = vmatmul.mubr.bf16.gmra.mrb[20].mxu0 %v17045_v57  ;;  %v17049_v23 = vld [vmem:[#allocation107_spill] sm:$0xff] }
 0x4b3   :  { %8750 = vmatprep.mubr.bf16.mxu0 %v13273_v41  ;;  %v8656_v1 = vpop.f32.mrb[200].mxu1  ;;  %v17054_v41 = vld [vmem:[#allocation30_spill] sm:$0xff] }
 0x4b4   :  { %5562 = vmatmul.mubr.bf16.gmra.mrb[32].mxu1 %v17043_v42  ;;  %v5113_v62 = vpop.f32.mrb[201].mxu1 }
 0x4b5   :  { %5569 = vmatprep.mubr.bf16.mxu1 %v17044_v54  ;;  %v4752_v3 = vpop.f32.mrb[172].mxu0  ;;  %v8657_v15 = vpop.f32.mrb[202].mxu1  ;;  %v17050_v54 = vld [vmem:[#allocation65_spill] sm:$0xff] }
 0x4b6   :  { %v13849_v35 = vadd.f32 %v8652_v29, %v4752_v3  ;;  %v4754_v24 = vpop.f32.mrb[173].mxu0  ;;  %v5116_v44 = vpop.f32.mrb[203].mxu1  ;;  %v9014_v3 = vld [vmem:[%s15475_s2 + $0x230] sm:$0xff]  }
 0x4b7   :  { %v4755_v45 = vpop.f32.mrb[174].mxu0  ;;  %8786 = vmatprep.subr.bf16.mxu1 %v9014_v3 }
 0x4b8   :  { %17046 = vst [vmem:[#allocation187_spill] sm:$0xff] %v13849_v35  ;;  %v13851_v61 = vadd.f32 %v8653_v21, %v4755_v45  ;;  %v4757_v43 = vpop.f32.mrb[175].mxu0  ;;  %8787 = vmatpush3.bf16.msra.mxu1 %v9014_v3 }
 0x4ba   :  { %17047 = vst [vmem:[#allocation110_spill] sm:$0xff] %v13851_v61  ;;  %8751 = vmatmul.mubr.bf16.gmra.mrb[24].mxu0 %v17050_v54  ;;  %v17053_v61 = vld [vmem:[#allocation64_spill] sm:$0xff] }
 0x4bb   :  { %8754 = vmatprep.mubr.bf16.mxu0 %v13335_v63 }
 0x4bc   :  { %5570 = vmatmul.mubr.bf16.gmra.mrb[36].mxu1 %v17048_v19 }
 0x4bd   :  { %5577 = vmatprep.mubr.bf16.mxu1 %v17049_v23  ;;  %v4760_v29 = vpop.f32.mrb[176].mxu0 }
 0x4be   :  { %v13860_v24 = vadd.f32 %v5113_v62, %v4760_v29  ;;  %v4762_v35 = vpop.f32.mrb[177].mxu0 }
 0x4bf   :  { %v4763_v45 = vpop.f32.mrb[178].mxu0 }
 0x4c0   :  { %17051 = vst [vmem:[#allocation175_spill] sm:$0xff] %v13860_v24  ;;  %v13862_v21 = vadd.f32 %v5116_v44, %v4763_v45  ;;  %v4765_v43 = vpop.f32.mrb[179].mxu0 }
 0x4c1   :  { %v17057_v43 = vld [vmem:[#allocation127_spill] sm:$0xff] }
 0x4c2   :  { %17052 = vst [vmem:[#allocation111_spill] sm:$0xff] %v13862_v21  ;;  %8755 = vmatmul.mubr.bf16.gmra.mrb[28].mxu0 %v13364_v4  ;;  %v17058_v21 = vld [vmem:[#allocation72_spill] sm:$0xff]  ;;  %v17061_v4 = vld [vmem:[#allocation41_spill] sm:$0xff] }
 0x4c3   :  { %8758 = vmatprep.mubr.bf16.mxu0 %v13397_v26  ;;  %v8660_v63 = vpop.f32.mrb[204].mxu1 }
 0x4c4   :  { %5578 = vmatmul.mubr.bf16.gmra.mrb[40].mxu1 %v17053_v61  ;;  %v5129_v54 = vpop.f32.mrb[205].mxu1 }
 0x4c5   :  { %5585 = vmatprep.mubr.bf16.mxu1 %v17054_v41  ;;  %v4768_v57 = vpop.f32.mrb[180].mxu0  ;;  %v8661_v62 = vpop.f32.mrb[206].mxu1 }
 0x4c6   :  { %v13868_v23 = vadd.f32 %v8656_v1, %v4768_v57  ;;  %v4770_v35 = vpop.f32.mrb[181].mxu0  ;;  %v5132_v3 = vpop.f32.mrb[207].mxu1 }
 0x4c7   :  { %v4771_v29 = vpop.f32.mrb[182].mxu0 }
 0x4c8   :  { %17055 = vst [vmem:[#allocation4_spill] sm:$0xff] %v13868_v23  ;;  %v13870_v44 = vadd.f32 %v8657_v15, %v4771_v29  ;;  %v4773_v45 = vpop.f32.mrb[183].mxu0  ;;  %v17062_v15 = vld [vmem:[#allocation7_spill] sm:$0xff] }
 0x4ca   :  { %17056 = vst [vmem:[#allocation156_spill] sm:$0xff] %v13870_v44  ;;  %8759 = vmatmul.mubr.bf16.gmra.mrb[32].mxu0 %v13426_v11  ;;  %v17069_v11 = vld [vmem:[#allocation2_spill] sm:$0xff] }
 0x4cb   :  { %8762 = vmatprep.mubr.bf16.mxu0 %v13459_v36 }
 0x4cc   :  { %5586 = vmatmul.mubr.bf16.gmra.mrb[44].mxu1 %v17057_v43 }
 0x4cd   :  { %5593 = vmatprep.mubr.bf16.mxu1 %v17058_v21  ;;  %v4776_v24 = vpop.f32.mrb[184].mxu0 }
 0x4ce   :  { %v13876_v26 = vadd.f32 %v5129_v54, %v4776_v24  ;;  %v4778_v57 = vpop.f32.mrb[185].mxu0 }
 0x4cf   :  { %v4779_v1 = vpop.f32.mrb[186].mxu0 }
 0x4d0   :  { %17059 = vst [vmem:[#allocation154_spill] sm:$0xff] %v13876_v26  ;;  %v13878_v23 = vadd.f32 %v5132_v3, %v4779_v1  ;;  %v4781_v35 = vpop.f32.mrb[187].mxu0 }
 0x4d1   :  { %v17065_v35 = vld [vmem:[#allocation155_spill] sm:$0xff] }
 0x4d2   :  { %17060 = vst [vmem:[#allocation112_spill] sm:$0xff] %v13878_v23  ;;  %8763 = vmatmul.mubr.bf16.gmra.mrb[36].mxu0 %v13488_v53  ;;  %v17066_v23 = vld [vmem:[#allocation75_spill] sm:$0xff] }
 0x4d3   :  { %8766 = vmatprep.mubr.bf16.mxu0 %v13521_v12  ;;  %v8664_v29 = vpop.f32.mrb[208].mxu1 }
 0x4d4   :  { %5594 = vmatmul.mubr.bf16.gmra.mrb[48].mxu1 %v17061_v4  ;;  %v5145_v45 = vpop.f32.mrb[209].mxu1 }
 0x4d5   :  { %5601 = vmatprep.mubr.bf16.mxu1 %v17062_v15  ;;  %v4784_v44 = vpop.f32.mrb[188].mxu0  ;;  %v8665_v54 = vpop.f32.mrb[210].mxu1 }
 0x4d6   :  { %v13884_v36 = vadd.f32 %v8660_v63, %v4784_v44  ;;  %v4786_v24 = vpop.f32.mrb[189].mxu0  ;;  %v5148_v57 = vpop.f32.mrb[211].mxu1 }
 0x4d7   :  { %v4787_v26 = vpop.f32.mrb[190].mxu0 }
 0x4d8   :  { %17063 = vst [vmem:[#allocation77_spill] sm:$0xff] %v13884_v36  ;;  %v13886_v3 = vadd.f32 %v8661_v62, %v4787_v26  ;;  %v4789_v1 = vpop.f32.mrb[191].mxu0  ;;  %v17070_v26 = vld [vmem:[#allocation157_spill] sm:$0xff] }
 0x4d9   :  { %v9015_v62 = vld [vmem:[%s15475_s2 + $0x238] sm:$0xff]  }
 0x4da   :  { %17064 = vst [vmem:[#allocation163_spill] sm:$0xff] %v13886_v3  ;;  %8767 = vmatmul.mubr.bf16.gmra.mrb[40].mxu0 %v13555_v55  ;;  %8788 = vmatprep.subr.bf16.mxu1 %v9015_v62  ;;  %v17073_v3 = vld [vmem:[#allocation133_spill] sm:$0xff] }
 0x4db   :  { %8770 = vmatprep.mubr.bf16.mxu0 %v13589_v14  ;;  %8789 = vmatpush3.bf16.msra.mxu1 %v9015_v62  ;;  %v17074_v14 = vld [vmem:[#allocation46_spill] sm:$0xff] }
 0x4dc   :  { %5602 = vmatmul.mubr.bf16.gmra.mrb[52].mxu1 %v17065_v35 }
 0x4dd   :  { %5609 = vmatprep.mubr.bf16.mxu1 %v17066_v23  ;;  %v4792_v12 = vpop.f32.mrb[192].mxu0 }
 0x4de   :  { %v13892_v53 = vadd.f32 %v5145_v45, %v4792_v12  ;;  %v4794_v63 = vpop.f32.mrb[193].mxu0 }
 0x4df   :  { %v4795_v44 = vpop.f32.mrb[194].mxu0 }
 0x4e0   :  { %17067 = vst [vmem:[#allocation8_spill] sm:$0xff] %v13892_v53  ;;  %v13894_v36 = vadd.f32 %v5148_v57, %v4795_v44  ;;  %v4797_v24 = vpop.f32.mrb[195].mxu0 }
 0x4e2   :  { %17068 = vst [vmem:[#allocation84_spill] sm:$0xff] %v13894_v36  ;;  %8771 = vmatmul.mubr.bf16.gmra.mrb[44].mxu0 %v16943_v16 }
 0x4e3   :  { %6332 = vmatprep.mubr.bf16.mxu0 %v16945_v5 }
 0x4e4   :  { %5610 = vmatmul.mubr.bf16.gmra.mrb[56].mxu1 %v17069_v11 }
 0x4e5   :  { %5617 = vmatprep.mubr.bf16.mxu1 %v17070_v26  ;;  %v8668_v1 = vpop.f32.mrb[212].mxu1  ;;  %v4800_v45 = vpop.f32.mrb[196].mxu0 }
 0x4e6   :  { %v5161_v12 = vpop.f32.mrb[213].mxu1  ;;  %v13903_v57 = vadd.f32 %v8664_v29, %v4800_v45  ;;  %v4802_v44 = vpop.f32.mrb[197].mxu0 }
 0x4e7   :  { %v8669_v63 = vpop.f32.mrb[214].mxu1  ;;  %v4803_v36 = vpop.f32.mrb[198].mxu0 }
 0x4e8   :  { %17071 = vst [vmem:[#allocation160_spill] sm:$0xff] %v13903_v57  ;;  %v5164_v24 = vpop.f32.mrb[215].mxu1  ;;  %v13905_v53 = vadd.f32 %v8665_v54, %v4803_v36  ;;  %v4805_v16 = vpop.f32.mrb[199].mxu0  ;;  %v17077_v57 = vld [vmem:[#allocation158_spill] sm:$0xff]  ;;  %v17078_v36 = vld [vmem:[#allocation83_spill] sm:$0xff] }
 0x4ea   :  { %17072 = vst [vmem:[#allocation85_spill] sm:$0xff] %v13905_v53  ;;  %6333 = vmatmul.mubr.bf16.vlgmr.msra.gmra.mrb[48].mxu0 %v16948_v32 }
 0x4eb   :  { %6340 = vmatprep.mubr.bf16.mxu0 %v16950_v20 }
 0x4ec   :  { %5618 = vmatmul.mubr.bf16.gmra.mrb[60].mxu1 %v17073_v3 }
 0x4ed   :  { %5625 = vmatprep.mubr.bf16.mxu1 %v17074_v14  ;;  %v4808_v5 = vpop.f32.mrb[200].mxu0 }
 0x4ee   :  { %v13911_v55 = vadd.f32 %v5161_v12, %v4808_v5  ;;  %v4810_v29 = vpop.f32.mrb[201].mxu0 }
 0x4ef   :  { %v4811_v62 = vpop.f32.mrb[202].mxu0 }
 0x4f0   :  { %17075 = vst [vmem:[#allocation115_spill] sm:$0xff] %v13911_v55  ;;  %v13913_v45 = vadd.f32 %v5164_v24, %v4811_v62  ;;  %v4813_v44 = vpop.f32.mrb[203].mxu0 }
 0x4f1   :  { %v17081_v44 = vld [vmem:[#allocation49_spill] sm:$0xff] }
 0x4f2   :  { %17076 = vst [vmem:[#allocation11_spill] sm:$0xff] %v13913_v45  ;;  %6341 = vmatmul.mubr.bf16.gmra.mrb[52].mxu0 %v16954_v25  ;;  %v17082_v45 = vld [vmem:[#allocation137_spill] sm:$0xff] }
 0x4f3   :  { %6348 = vmatprep.mubr.bf16.mxu0 %v16956_v8 }
 0x4f4   :  { %5626 = vmatmul.mubr.bf16.gmra.mrb[64].mxu1 %v17077_v57 }
 0x4f5   :  { %5633 = vmatprep.mubr.bf16.mxu1 %v17078_v36  ;;  %v4816_v54 = vpop.f32.mrb[204].mxu0 }
 0x4f6   :  { %v13919_v20 = vadd.f32 %v8668_v1, %v4816_v54  ;;  %v4818_v5 = vpop.f32.mrb[205].mxu0 }
 0x4f7   :  { %v8672_v16 = vpop.f32.mrb[216].mxu1  ;;  %v4819_v55 = vpop.f32.mrb[206].mxu0 }
 0x4f8   :  { %v5177_v32 = vpop.f32.mrb[217].mxu1  ;;  %17079 = vst [vmem:[#allocation15_spill] sm:$0xff] %v13919_v20  ;;  %v13921_v24 = vadd.f32 %v8669_v63, %v4819_v55  ;;  %v4821_v62 = vpop.f32.mrb[207].mxu0 }
 0x4f9   :  { %v8673_v12 = vpop.f32.mrb[218].mxu1  ;;  %v17085_v62 = vld [vmem:[#allocation88_spill] sm:$0xff] }
 0x4fa   :  { %v5180_v29 = vpop.f32.mrb[219].mxu1  ;;  %17080 = vst [vmem:[#allocation169_spill] sm:$0xff] %v13921_v24  ;;  %6349 = vmatmul.mubr.bf16.gmra.mrb[56].mxu0 %v16961_v9  ;;  %v17086_v24 = vld [vmem:[#allocation9_spill] sm:$0xff] }
 0x4fb   :  { %6356 = vmatprep.mubr.bf16.mxu0 %v16963_v60 }
 0x4fc   :  { %5634 = vmatmul.mubr.bf16.gmra.mrb[68].mxu1 %v17081_v44 }
 0x4fd   :  { %5641 = vmatprep.mubr.bf16.mxu1 %v17082_v45  ;;  %v4824_v53 = vpop.f32.mrb[208].mxu0 }
 0x4fe   :  { %v13927_v1 = vadd.f32 %v5177_v32, %v4824_v53  ;;  %v4826_v5 = vpop.f32.mrb[209].mxu0 }
 0x4ff   :  { %v8676_v8 = vpop.f32.mrb[220].mxu1  ;;  %v4827_v36 = vpop.f32.mrb[210].mxu0 }
 0x500   :  { %v5193_v25 = vpop.f32.mrb[221].mxu1  ;;  %17083 = vst [vmem:[#allocation116_spill] sm:$0xff] %v13927_v1  ;;  %v13929_v55 = vadd.f32 %v5180_v29, %v4827_v36  ;;  %v4829_v63 = vpop.f32.mrb[211].mxu0 }
 0x501   :  { %v8677_v54 = vpop.f32.mrb[222].mxu1  ;;  %v17089_v63 = vld [vmem:[#allocation91_spill] sm:$0xff] }
 0x502   :  { %v5196_v20 = vpop.f32.mrb[223].mxu1  ;;  %17084 = vst [vmem:[#allocation19_spill] sm:$0xff] %v13929_v55  ;;  %6357 = vmatmul.mubr.bf16.gmra.mrb[60].mxu0 %v16968_v47 }
 0x503   :  { %6364 = vmatprep.mubr.bf16.mxu0 %v16970_v49 }
 0x504   :  { %5642 = vmatmul.mubr.bf16.gmra.mrb[72].mxu1 %v17085_v62 }
 0x505   :  { %5649 = vmatprep.mubr.bf16.mxu1 %v17086_v24  ;;  %v4832_v45 = vpop.f32.mrb[212].mxu0 }
 0x506   :  { %v13935_v53 = vadd.f32 %v8672_v16, %v4832_v45  ;;  %v4834_v5 = vpop.f32.mrb[213].mxu0 }
 0x507   :  { %v5435_v9 = vpop.f32.mrb[224].mxu1  ;;  %v4835_v44 = vpop.f32.mrb[214].mxu0 }
 0x508   :  { %v5437_v60 = vpop.f32.mrb[225].mxu1  ;;  %17087 = vst [vmem:[#allocation173_spill] sm:$0xff] %v13935_v53  ;;  %v13937_v36 = vadd.f32 %v8673_v12, %v4835_v44  ;;  %v4837_v29 = vpop.f32.mrb[215].mxu0 }
 0x509   :  { %v5438_v32 = vpop.f32.mrb[226].mxu1  ;;  %v17092_v29 = vld [vmem:[#allocation54_spill] sm:$0xff] }
 0x50a   :  { %v5440_v1 = vpop.f32.mrb[227].mxu1  ;;  %17088 = vst [vmem:[#allocation100_spill] sm:$0xff] %v13937_v36  ;;  %6365 = vmatmul.mubr.bf16.gmra.mrb[64].mxu0 %v16975_v38  ;;  %v17093_v36 = vld [vmem:[#allocation145_spill] sm:$0xff] }
 0x50b   :  { %6372 = vmatprep.mubr.bf16.mxu0 %v16976_v13 }
 0x50c   :  { %5650 = vmatmul.mubr.bf16.gmra.mrb[76].mxu1 %v13214_v56 }
 0x50d   :  { %5657 = vmatprep.mubr.bf16.mxu1 %v17089_v63  ;;  %v4840_v60 = vpop.f32.mrb[216].mxu0 }
 0x50e   :  { %v13943_v45 = vadd.f32 %v5193_v25, %v4840_v60  ;;  %v4842_v5 = vpop.f32.mrb[217].mxu0 }
 0x50f   :  { %v5443_v47 = vpop.f32.mrb[228].mxu1  ;;  %v4843_v53 = vpop.f32.mrb[218].mxu0 }
 0x510   :  { %v5445_v49 = vpop.f32.mrb[229].mxu1  ;;  %17090 = vst [vmem:[#allocation38_spill] sm:$0xff] %v13943_v45  ;;  %v13945_v12 = vadd.f32 %v5196_v20, %v4843_v53  ;;  %v4845_v44 = vpop.f32.mrb[219].mxu0  ;;  %v17094_v53 = vld [vmem:[#allocation95_spill] sm:$0xff] }
 0x511   :  { %v5446_v16 = vpop.f32.mrb[230].mxu1  ;;  %v17095_v44 = vld [vmem:[#allocation162_spill] sm:$0xff] }
 0x512   :  { %v5448_v1 = vpop.f32.mrb[231].mxu1  ;;  %17091 = vst [vmem:[#allocation40_spill] sm:$0xff] %v13945_v12  ;;  %6373 = vmatmul.mubr.bf16.gmra.mrb[68].mxu0 %v16982_v18 }
 0x513   :  { %6380 = vmatprep.mubr.bf16.mxu0 %v16983_v17 }
 0x514   :  { %5658 = vmatmul.mubr.bf16.gmra.mrb[80].mxu1 %v17092_v29 }
 0x515   :  { %5665 = vmatprep.mubr.bf16.mxu1 %v17093_v36  ;;  %v4848_v49 = vpop.f32.mrb[220].mxu0 }
 0x516   :  { %v5202_v25 = vadd.f32 %v8676_v8, %v4848_v49  ;;  %v4850_v45 = vpop.f32.mrb[221].mxu0 }
 0x517   :  { %v5451_v13 = vpop.f32.mrb[232].mxu1  ;;  %v4851_v1 = vpop.f32.mrb[222].mxu0 }
 0x518   :  { %v5453_v38 = vpop.f32.mrb[233].mxu1  ;;  %v5205_v55 = vadd.f32 %v8677_v54, %v4851_v1  ;;  %v4853_v20 = vpop.f32.mrb[223].mxu0 }
 0x519   :  { %v5454_v60 = vpop.f32.mrb[234].mxu1 }
 0x51a   :  { %v5456_v5 = vpop.f32.mrb[235].mxu1  ;;  %6381 = vmatmul.mubr.bf16.gmra.mrb[72].mxu0 %v16988_v28 }
 0x51b   :  { %6388 = vmatprep.mubr.bf16.mxu0 %v16989_v46 }
 0x51c   :  { %5666 = vmatmul.mubr.bf16.gmra.mrb[84].mxu1 %v17094_v53 }
 0x51d   :  { %5673 = vmatprep.mubr.bf16.mxu1 %v17095_v44  ;;  %v8696_v12 = vpop.f32.mrb[224].mxu0  ;;  %v17098_v44 = vld [vmem:[#allocation148_spill] sm:$0xff] }
 0x51e   :  { %v5797_v36 = vadd.f32 %v8696_v12, %v5443_v47  ;;  %v5788_v8 = vpop.f32.mrb[225].mxu0 }
 0x51f   :  { %v5459_v18 = vpop.f32.mrb[236].mxu1  ;;  %v5789_v45 = vadd.f32 %v5788_v8, %v5435_v9  ;;  %v8697_v5 = vpop.f32.mrb[226].mxu0 }
 0x520   :  { %v5461_v17 = vpop.f32.mrb[237].mxu1  ;;  %v13956_v54 = vadd.f32 %v5797_v36, %v13532_v48  ;;  %v5800_v1 = vadd.f32 %v8697_v5, %v5446_v16  ;;  %v5791_v20 = vpop.f32.mrb[227].mxu0 }
 0x521   :  { %v5462_v38 = vpop.f32.mrb[238].mxu1  ;;  %v13958_v53 = vadd.f32 %v5789_v45, %v5202_v25  ;;  %v5792_v28 = vadd.f32 %v5791_v20, %v5438_v32  ;;  %v17100_v17 = vld [vmem:[#allocation62_spill] sm:$0xff] }
 0x522   :  { %v5464_v49 = vpop.f32.mrb[239].mxu1  ;;  %17096 = vst [vmem:[#allocation138_spill] sm:$0xff] %v13956_v54  ;;  %v13962_v46 = vadd.f32 %v5800_v1, %v13545_v58  ;;  %6389 = vmatmul.mubr.bf16.gmra.mrb[76].mxu0 %v16994_v30  ;;  %v17106_v20 = vld [vmem:[#allocation70_spill] sm:$0xff] }
 0x523   :  { %17097 = vst [vmem:[#allocation184_spill] sm:$0xff] %v13958_v53  ;;  %v13966_v47 = vadd.f32 %v5792_v28, %v5205_v55  ;;  %6396 = vmatprep.mubr.bf16.mxu0 %v16995_v59  ;;  %v17104_v55 = vld [vmem:[#allocation159_spill] sm:$0xff] }
 0x524   :  { %5674 = vmatmul.mubr.bf16.gmra.mrb[88].mxu1 %v17098_v44  ;;  %17099 = vst [vmem:[#allocation143_spill] sm:$0xff] %v13962_v46 }
 0x525   :  { %5681 = vmatprep.mubr.bf16.mxu1 %v17100_v17  ;;  %17101 = vst [vmem:[#allocation146_spill] sm:$0xff] %v13966_v47  ;;  %v8700_v36 = vpop.f32.mrb[228].mxu0 }
 0x526   :  { %v5813_v12 = vadd.f32 %v8700_v36, %v5459_v18  ;;  %v5804_v25 = vpop.f32.mrb[229].mxu0 }
 0x527   :  { %v5467_v48 = vpop.f32.mrb[240].mxu1  ;;  %v5805_v49 = vadd.f32 %v5804_v25, %v5451_v13  ;;  %v8701_v32 = vpop.f32.mrb[230].mxu0 }
 0x528   :  { %v5469_v9 = vpop.f32.mrb[241].mxu1  ;;  %v13970_v58 = vadd.f32 %v5813_v12, %v13577_v34  ;;  %v5816_v45 = vadd.f32 %v8701_v32, %v5462_v38  ;;  %v5807_v5 = vpop.f32.mrb[231].mxu0  ;;  %v17112_v32 = vld [vmem:[#allocation73_spill] sm:$0xff] }
 0x529   :  { %v5470_v16 = vpop.f32.mrb[242].mxu1  ;;  %v13973_v30 = vadd.f32 %v5805_v49, %v13527_v27  ;;  %v5808_v59 = vadd.f32 %v5807_v5, %v5454_v60 }
 0x52a   :  { %v5472_v8 = vpop.f32.mrb[243].mxu1  ;;  %17102 = vst [vmem:[#allocation121_spill] sm:$0xff] %v13970_v58  ;;  %v13977_v1 = vadd.f32 %v5816_v45, %v13592_v40  ;;  %6397 = vmatmul.mubr.bf16.gmra.mrb[80].mxu0 %v17000_v51  ;;  %v17113_v45 = vld [vmem:[#allocation32_spill] sm:$0xff] }
 0x52b   :  { %17103 = vst [vmem:[#allocation104_spill] sm:$0xff] %v13973_v30  ;;  %v13982_v13 = vadd.f32 %v5808_v59, %v13541_v6  ;;  %6404 = vmatprep.mubr.bf16.mxu0 %v17001_v10  ;;  %v17110_v6 = vld [vmem:[#allocation12_spill] sm:$0xff] }
 0x52c   :  { %5682 = vmatmul.mubr.bf16.gmra.mrb[92].mxu1 %v17104_v55  ;;  %17105 = vst [vmem:[#allocation22_spill] sm:$0xff] %v13977_v1  ;;  %v17127_v1 = vld [vmem:[#allocation141_spill] sm:$0xff] }
 0x52d   :  { %5689 = vmatprep.mubr.bf16.mxu1 %v17106_v20  ;;  %17107 = vst [vmem:[#allocation64_spill] sm:$0xff] %v13982_v13  ;;  %v8704_v38 = vpop.f32.mrb[232].mxu0  ;;  %v17143_v13 = vld [vmem:[#allocation122_spill] sm:$0xff] }
 0x52e   :  { %v5820_v9 = vpop.f32.mrb[233].mxu0 }
 0x52f   :  { %v5475_v34 = vpop.f32.mrb[244].mxu1  ;;  %v5821_v60 = vadd.f32 %v5820_v9, %v5467_v48  ;;  %v8705_v12 = vpop.f32.mrb[234].mxu0  ;;  %v17114_v48 = vld [vmem:[#allocation176_spill] sm:$0xff] }
 0x530   :  { %v5477_v18 = vpop.f32.mrb[245].mxu1  ;;  %v5829_v28 = vadd.f32 %v8704_v38, %v5475_v34  ;;  %v5823_v8 = vpop.f32.mrb[235].mxu0 }
 0x531   :  { %v5478_v27 = vpop.f32.mrb[246].mxu1  ;;  %v13989_v51 = vadd.f32 %v5821_v60, %v13564_v52  ;;  %v5824_v10 = vadd.f32 %v5823_v8, %v5470_v16  ;;  %v17119_v60 = vld [vmem:[#allocation164_spill] sm:$0xff]  ;;  %v17121_v8 = vld [vmem:[#allocation179_spill] sm:$0xff] }
 0x532   :  { %v5480_v36 = vpop.f32.mrb[247].mxu1  ;;  %v13986_v40 = vadd.f32 %v5829_v28, %v13600_v37  ;;  %v5832_v25 = vadd.f32 %v8705_v12, %v5478_v27  ;;  %6405 = vmatmul.mubr.bf16.gmra.mrb[84].mxu0 %v17113_v45  ;;  %v17116_v37 = vld [vmem:[#allocation119_spill] sm:$0xff] }
 0x533   :  { %17109 = vst [vmem:[#allocation127_spill] sm:$0xff] %v13989_v51  ;;  %v13998_v5 = vadd.f32 %v5824_v10, %v17114_v48  ;;  %6412 = vmatprep.mubr.bf16.mxu0 %v17116_v37  ;;  %v17122_v10 = vld [vmem:[#allocation186_spill] sm:$0xff]  ;;  %v17124_v48 = vld [vmem:[#allocation180_spill] sm:$0xff] }
 0x534   :  { %17108 = vst [vmem:[#allocation30_spill] sm:$0xff] %v13986_v40  ;;  %5690 = vmatmul.mubr.bf16.gmra.mrb[96].mxu1 %v17110_v6  ;;  %v13993_v49 = vadd.f32 %v5832_v25, %v13609_v22  ;;  %v17117_v22 = vld [vmem:[#allocation128_spill] sm:$0xff]  ;;  %v17120_v25 = vld [vmem:[#allocation78_spill] sm:$0xff] }
 0x535   :  { %5697 = vmatprep.mubr.bf16.mxu1 %v17112_v32  ;;  %17115 = vst [vmem:[#allocation41_spill] sm:$0xff] %v13998_v5  ;;  %v8708_v18 = vpop.f32.mrb[236].mxu0  ;;  %v17135_v5 = vld [vmem:[#allocation124_spill] sm:$0xff] }
 0x536   :  { %17111 = vst [vmem:[#allocation72_spill] sm:$0xff] %v13993_v49  ;;  %v5836_v38 = vpop.f32.mrb[237].mxu0  ;;  %v17141_v51 = vld [vmem:[#allocation48_spill] sm:$0xff] }
 0x537   :  { %v5483_v59 = vpop.f32.mrb[248].mxu1  ;;  %v8709_v16 = vpop.f32.mrb[238].mxu0 }
 0x538   :  { %v5485_v34 = vpop.f32.mrb[249].mxu1  ;;  %v5837_v28 = vadd.f32 %v5836_v38, %v5483_v59  ;;  %v5839_v9 = vpop.f32.mrb[239].mxu0 }
 0x539   :  { %v5486_v52 = vpop.f32.mrb[250].mxu1 }
 0x53a   :  { %v5488_v27 = vpop.f32.mrb[251].mxu1  ;;  %v14002_v36 = vadd.f32 %v5837_v28, %v17117_v22  ;;  %v5840_v12 = vadd.f32 %v5839_v9, %v5486_v52  ;;  %6413 = vmatmul.mubr.bf16.gmra.mrb[88].mxu0 %v17121_v8  ;;  %v17125_v28 = vld [vmem:[#allocation43_spill] sm:$0xff] }
 0x53b   :  { %6420 = vmatprep.mubr.bf16.mxu0 %v17124_v48 }
 0x53c   :  { %17118 = vst [vmem:[#allocation7_spill] sm:$0xff] %v14002_v36  ;;  %5698 = vmatmul.mubr.bf16.gmra.mrb[100].mxu1 %v17119_v60  ;;  %v14008_v45 = vadd.f32 %v5840_v12, %v17122_v10  ;;  %v17129_v12 = vld [vmem:[#allocation168_spill] sm:$0xff] }
 0x53d   :  { %5705 = vmatprep.mubr.bf16.mxu1 %v17120_v25  ;;  %v8712_v38 = vpop.f32.mrb[240].mxu0  ;;  %v17130_v10 = vld [vmem:[#allocation20_spill] sm:$0xff] }
 0x53e   :  { %17123 = vst [vmem:[#allocation155_spill] sm:$0xff] %v14008_v45  ;;  %v5852_v49 = vpop.f32.mrb[241].mxu0 }
 0x53f   :  { %v5491_v37 = vpop.f32.mrb[252].mxu1  ;;  %v8713_v9 = vpop.f32.mrb[242].mxu0 }
 0x540   :  { %v5845_v34 = vadd.f32 %v8708_v18, %v5491_v37  ;;  %v5493_v59 = vpop.f32.mrb[253].mxu1  ;;  %v5855_v36 = vpop.f32.mrb[243].mxu0 }
 0x541   :  { %v5494_v27 = vpop.f32.mrb[254].mxu1 }
 0x542   :  { %v14012_v22 = vadd.f32 %v5845_v34, %v17125_v28  ;;  %v5848_v40 = vadd.f32 %v8709_v16, %v5494_v27  ;;  %v5496_v52 = vpop.f32.mrb[255].mxu1  ;;  %6421 = vmatmul.mubr.bf16.gmra.mrb[92].mxu0 %v17018_v39  ;;  %v17131_v27 = vld [vmem:[#allocation126_spill] sm:$0xff]  ;;  %v17136_v39 = vld [vmem:[#allocation16_spill] sm:$0xff] }
 0x543   :  { %6428 = vmatprep.mubr.bf16.mxu0 %v17019_v31  ;;  %v17137_v31 = vld [vmem:[#allocation181_spill] sm:$0xff] }
 0x544   :  { %17126 = vst [vmem:[#allocation75_spill] sm:$0xff] %v14012_v22  ;;  %v14015_v8 = vadd.f32 %v5848_v40, %v17127_v1  ;;  %5706 = vmatmul.mubr.bf16.gmra.mrb[104].mxu1 %v17129_v12  ;;  %v17133_v22 = vld [vmem:[#allocation94_spill] sm:$0xff] }
 0x545   :  { %5713 = vmatprep.mubr.bf16.mxu1 %v17130_v10  ;;  %v8716_v34 = vpop.f32.mrb[244].mxu0 }
 0x546   :  { %17128 = vst [vmem:[#allocation2_spill] sm:$0xff] %v14015_v8  ;;  %v5868_v16 = vpop.f32.mrb[245].mxu0 }
 0x547   :  { %v5499_v18 = vpop.f32.mrb[0].mxu1  ;;  %v8717_v40 = vpop.f32.mrb[246].mxu0 }
 0x548   :  { %v5853_v48 = vadd.f32 %v5852_v49, %v5499_v18  ;;  %v5501_v37 = vpop.f32.mrb[1].mxu1  ;;  %v5871_v8 = vpop.f32.mrb[247].mxu0  ;;  %v17138_v49 = vld [vmem:[#allocation182_spill] sm:$0xff] }
 0x549   :  { %v5502_v59 = vpop.f32.mrb[2].mxu1 }
 0x54a   :  { %v14022_v28 = vadd.f32 %v5853_v48, %v17131_v27  ;;  %v5856_v52 = vadd.f32 %v5855_v36, %v5502_v59  ;;  %v5504_v1 = vpop.f32.mrb[3].mxu1  ;;  %6429 = vmatmul.mubr.bf16.gmra.mrb[96].mxu0 %v17137_v31  ;;  %v17139_v59 = vld [vmem:[#allocation71_spill] sm:$0xff]  ;;  %v17144_v31 = vld [vmem:[#allocation172_spill] sm:$0xff] }
 0x54b   :  { %6436 = vmatprep.mubr.bf16.mxu0 %v17138_v49 }
 0x54c   :  { %17132 = vst [vmem:[#allocation157_spill] sm:$0xff] %v14022_v28  ;;  %v14025_v45 = vadd.f32 %v5856_v52, %v17133_v22  ;;  %5714 = vmatmul.mubr.bf16.gmra.mrb[108].mxu1 %v17135_v5 }
 0x54d   :  { %5721 = vmatprep.mubr.bf16.mxu1 %v17136_v39  ;;  %v8720_v48 = vpop.f32.mrb[248].mxu0 }
 0x54e   :  { %17134 = vst [vmem:[#allocation133_spill] sm:$0xff] %v14025_v45  ;;  %v5884_v36 = vpop.f32.mrb[249].mxu0 }
 0x54f   :  { %v5507_v18 = vpop.f32.mrb[4].mxu1  ;;  %v8721_v52 = vpop.f32.mrb[250].mxu0 }
 0x550   :  { %v5861_v37 = vadd.f32 %v8712_v38, %v5507_v18  ;;  %v5509_v58 = vpop.f32.mrb[5].mxu1  ;;  %v5887_v45 = vpop.f32.mrb[251].mxu0 }
 0x551   :  { %v5510_v27 = vpop.f32.mrb[6].mxu1 }
 0x552   :  { %v14032_v1 = vadd.f32 %v5861_v37, %v17139_v59  ;;  %v5864_v28 = vadd.f32 %v8713_v9, %v5510_v27  ;;  %v5512_v22 = vpop.f32.mrb[7].mxu1  ;;  %6437 = vmatmul.mubr.bf16.gmra.mrb[100].mxu0 %v17029_v33  ;;  %v17145_v27 = vld [vmem:[#allocation33_spill] sm:$0xff]  ;;  %v17149_v33 = vld [vmem:[#allocation170_spill] sm:$0xff] }
 0x553   :  { %6444 = vmatprep.mubr.bf16.mxu0 %v17030_v0  ;;  %v17150_v0 = vld [vmem:[#allocation28_spill] sm:$0xff] }
 0x554   :  { %17140 = vst [vmem:[#allocation46_spill] sm:$0xff] %v14032_v1  ;;  %v14035_v46 = vadd.f32 %v5864_v28, %v17141_v51  ;;  %5722 = vmatmul.mubr.bf16.gmra.mrb[112].mxu1 %v17143_v13  ;;  %v17147_v1 = vld [vmem:[#allocation96_spill] sm:$0xff] }
 0x555   :  { %5729 = vmatprep.mubr.bf16.mxu1 %v17144_v31  ;;  %v14041_v18 = vpop.f32.mrb[252].mxu0 }
 0x556   :  { %17142 = vst [vmem:[#allocation158_spill] sm:$0xff] %v14035_v46  ;;  %v5900_v37 = vpop.f32.mrb[253].mxu0 }
 0x557   :  { %v5515_v58 = vpop.f32.mrb[8].mxu1  ;;  %v14046_v22 = vpop.f32.mrb[254].mxu0 }
 0x558   :  { %v5869_v38 = vadd.f32 %v5868_v16, %v5515_v58  ;;  %v5517_v49 = vpop.f32.mrb[9].mxu1  ;;  %v5903_v46 = vpop.f32.mrb[255].mxu0  ;;  %v17151_v16 = vld [vmem:[#allocation3_spill] sm:$0xff] }
 0x559   :  { %v5518_v9 = vpop.f32.mrb[10].mxu1 }
 0x55a   :  { %v14044_v59 = vadd.f32 %v5869_v38, %v17145_v27  ;;  %v5872_v51 = vadd.f32 %v5871_v8, %v5518_v9  ;;  %v5520_v28 = vpop.f32.mrb[11].mxu1  ;;  %6445 = vmatmul.mubr.bf16.gmra.mrb[104].mxu0 %v17034_v7  ;;  %v17154_v7 = vld [vmem:[#allocation51_spill] sm:$0xff] }
 0x55b   :  { %6452 = vmatprep.mubr.bf16.mxu0 %v17151_v16  ;;  %v17152_v28 = vld [vmem:[#allocation14_spill] sm:$0xff]  ;;  %v17156_v16 = vld [vmem:[#allocation63_spill] sm:$0xff] }
 0x55c   :  { %17146 = vst [vmem:[#allocation88_spill] sm:$0xff] %v14044_v59  ;;  %v14049_v54 = vadd.f32 %v5872_v51, %v17147_v1  ;;  %5730 = vmatmul.mubr.bf16.gmra.mrb[116].mxu1 %v17149_v33 }
 0x55d   :  { %5737 = vmatprep.mubr.bf16.mxu1 %v17150_v0  ;;  %v14055_v27 = vpop.f32.mrb[0].mxu0 }
 0x55e   :  { %17148 = vst [vmem:[#allocation9_spill] sm:$0xff] %v14049_v54  ;;  %v14057_v9 = vpop.f32.mrb[1].mxu0 }
 0x55f   :  { %v5523_v58 = vpop.f32.mrb[12].mxu1  ;;  %v14062_v54 = vpop.f32.mrb[2].mxu0 }
 0x560   :  { %v5877_v49 = vadd.f32 %v8716_v34, %v5523_v58  ;;  %v5525_v38 = vpop.f32.mrb[13].mxu1  ;;  %v14064_v30 = vpop.f32.mrb[3].mxu0  ;;  %v17157_v34 = vld [vmem:[#allocation177_spill] sm:$0xff] }
 0x561   :  { %v5526_v8 = vpop.f32.mrb[14].mxu1 }
 0x562   :  { %v14060_v59 = vadd.f32 %v5877_v49, %v17152_v28  ;;  %v5880_v1 = vadd.f32 %v8717_v40, %v5526_v8  ;;  %v5528_v51 = vpop.f32.mrb[15].mxu1  ;;  %6453 = vmatmul.mubr.bf16.gmra.mrb[108].mxu0 %v17039_v2  ;;  %v17160_v2 = vld [vmem:[#allocation44_spill] sm:$0xff] }
 0x563   :  { %6460 = vmatprep.mubr.bf16.mxu0 %v17040_v50  ;;  %v17158_v51 = vld [vmem:[#allocation178_spill] sm:$0xff]  ;;  %v17162_v50 = vld [vmem:[#allocation89_spill] sm:$0xff] }
 0x564   :  { %17153 = vst [vmem:[#allocation91_spill] sm:$0xff] %v14060_v59  ;;  %v14067_v47 = vadd.f32 %v5880_v1, %v17154_v7  ;;  %5738 = vmatmul.mubr.bf16.gmra.mrb[120].mxu1 %v17156_v16 }
 0x565   :  { %5745 = vmatprep.mubr.bf16.mxu1 %v17157_v34  ;;  %v14073_v40 = vpop.f32.mrb[4].mxu0 }
 0x566   :  { %17155 = vst [vmem:[#allocation54_spill] sm:$0xff] %v14067_v47  ;;  %v14075_v28 = vpop.f32.mrb[5].mxu0 }
 0x567   :  { %v5531_v58 = vpop.f32.mrb[16].mxu1  ;;  %v14080_v47 = vpop.f32.mrb[6].mxu0 }
 0x568   :  { %v5885_v49 = vadd.f32 %v5884_v36, %v5531_v58  ;;  %v5533_v38 = vpop.f32.mrb[17].mxu1  ;;  %v14082_v53 = vpop.f32.mrb[7].mxu0  ;;  %v17163_v36 = vld [vmem:[#allocation92_spill] sm:$0xff]  ;;  %v17164_v58 = vld [vmem:[#allocation123_spill] sm:$0xff] }
 0x569   :  { %v5534_v8 = vpop.f32.mrb[18].mxu1 }
 0x56a   :  { %v14078_v59 = vadd.f32 %v5885_v49, %v17158_v51  ;;  %v5888_v1 = vadd.f32 %v5887_v45, %v5534_v8  ;;  %v5536_v7 = vpop.f32.mrb[19].mxu1  ;;  %6461 = vmatmul.mubr.bf16.gmra.mrb[112].mxu0 %v17043_v42  ;;  %v17167_v42 = vld [vmem:[#allocation101_spill] sm:$0xff] }
 0x56b   :  { %6468 = vmatprep.mubr.bf16.mxu0 %v17164_v58  ;;  %v17169_v58 = vld [vmem:[#allocation167_spill] sm:$0xff] }
 0x56c   :  { %17159 = vst [vmem:[#allocation148_spill] sm:$0xff] %v14078_v59  ;;  %v14085_v34 = vadd.f32 %v5888_v1, %v17160_v2  ;;  %5746 = vmatmul.mubr.bf16.gmra.mrb[124].mxu1 %v17162_v50  ;;  %v17165_v59 = vld [vmem:[#allocation82_spill] sm:$0xff] }
 0x56d   :  { %8790 = vmatprep.mubr.bf16.mxu1 %v17163_v36  ;;  %v14091_v45 = vpop.f32.mrb[8].mxu0 }
 0x56e   :  { %17161 = vst [vmem:[#allocation62_spill] sm:$0xff] %v14085_v34  ;;  %v14093_v7 = vpop.f32.mrb[9].mxu0 }
 0x56f   :  { %v5539_v38 = vpop.f32.mrb[20].mxu1  ;;  %v14098_v34 = vpop.f32.mrb[10].mxu0 }
 0x570   :  { %v5893_v49 = vadd.f32 %v8720_v48, %v5539_v38  ;;  %v5541_v51 = vpop.f32.mrb[21].mxu1  ;;  %v14100_v36 = vpop.f32.mrb[11].mxu0  ;;  %v17170_v48 = vld [vmem:[#allocation31_spill] sm:$0xff] }
 0x571   :  { %v5542_v8 = vpop.f32.mrb[22].mxu1  ;;  %v17171_v38 = vld [vmem:[#allocation107_spill] sm:$0xff] }
 0x572   :  { %v14096_v16 = vadd.f32 %v5893_v49, %v17165_v59  ;;  %v5896_v1 = vadd.f32 %v8721_v52, %v5542_v8  ;;  %v5544_v2 = vpop.f32.mrb[23].mxu1  ;;  %6469 = vmatmul.mubr.bf16.gmra.mrb[116].mxu0 %v17048_v19  ;;  %v17174_v19 = vld [vmem:[#allocation50_spill] sm:$0xff] }
 0x573   :  { %6476 = vmatprep.mubr.bf16.mxu0 %v17171_v38  ;;  %v17176_v38 = vld [vmem:[#allocation23_spill] sm:$0xff] }
 0x574   :  { %17166 = vst [vmem:[#allocation159_spill] sm:$0xff] %v14096_v16  ;;  %v14103_v50 = vadd.f32 %v5896_v1, %v17167_v42  ;;  %8791 = vmatmul.mubr.bf16.vlgmr.msra.gmra.mrb[128].mxu1 %v17169_v58  ;;  %v17172_v16 = vld [vmem:[#allocation130_spill] sm:$0xff] }
 0x575   :  { %8794 = vmatprep.mubr.bf16.mxu1 %v17170_v48  ;;  %v14109_v52 = vpop.f32.mrb[12].mxu0 }
 0x576   :  { %17168 = vst [vmem:[#allocation70_spill] sm:$0xff] %v14103_v50  ;;  %v14111_v2 = vpop.f32.mrb[13].mxu0 }
 0x577   :  { %v5547_v51 = vpop.f32.mrb[24].mxu1  ;;  %v14116_v58 = vpop.f32.mrb[14].mxu0 }
 0x578   :  { %v5901_v59 = vadd.f32 %v5900_v37, %v5547_v51  ;;  %v5549_v49 = vpop.f32.mrb[25].mxu1  ;;  %v14118_v48 = vpop.f32.mrb[15].mxu0  ;;  %v17177_v37 = vld [vmem:[#allocation171_spill] sm:$0xff] }
 0x579   :  { %v5550_v8 = vpop.f32.mrb[26].mxu1 }
 0x57a   :  { %v14114_v0 = vadd.f32 %v5901_v59, %v17172_v16  ;;  %v5904_v1 = vadd.f32 %v5903_v46, %v5550_v8  ;;  %v5552_v42 = vpop.f32.mrb[27].mxu1  ;;  %6477 = vmatmul.mubr.bf16.gmra.mrb[120].mxu0 %v17053_v61 }
 0x57b   :  { %6484 = vmatprep.mubr.bf16.mxu0 %v17054_v41  ;;  %v17178_v42 = vld [vmem:[#allocation56_spill] sm:$0xff] }
 0x57c   :  { %17173 = vst [vmem:[#allocation12_spill] sm:$0xff] %v14114_v0  ;;  %v14121_v50 = vadd.f32 %v5904_v1, %v17174_v19  ;;  %8795 = vmatmul.mubr.bf16.gmra.mrb[132].mxu1 %v17176_v38  ;;  %v17180_v41 = vld [vmem:[#allocation136_spill] sm:$0xff]  ;;  %v17216_v0 = vld [vmem:[#allocation139_spill] sm:$0xff] }
 0x57d   :  { %8798 = vmatprep.mubr.bf16.mxu1 %v17177_v37  ;;  %v14128_v59 = vpop.f32.mrb[16].mxu0 }
 0x57e   :  { %17175 = vst [vmem:[#allocation73_spill] sm:$0xff] %v14121_v50  ;;  %v14130_v8 = vpop.f32.mrb[17].mxu0 }
 0x57f   :  { %v5555_v51 = vpop.f32.mrb[28].mxu1  ;;  %v14136_v37 = vpop.f32.mrb[18].mxu0 }
 0x580   :  { %v5909_v16 = vadd.f32 %v14041_v18, %v5555_v51  ;;  %v5557_v46 = vpop.f32.mrb[29].mxu1  ;;  %v14138_v61 = vpop.f32.mrb[19].mxu0  ;;  %v17182_v18 = vld [vmem:[#allocation99_spill] sm:$0xff]  ;;  %v17183_v51 = vld [vmem:[#allocation117_spill] sm:$0xff] }
 0x581   :  { %v5558_v49 = vpop.f32.mrb[30].mxu1 }
 0x582   :  { %v14133_v1 = vadd.f32 %v5909_v16, %v17178_v42  ;;  %v5912_v19 = vadd.f32 %v14046_v22, %v5558_v49  ;;  %v5560_v38 = vpop.f32.mrb[31].mxu1  ;;  %6485 = vmatmul.mubr.bf16.gmra.mrb[124].mxu0 %v17057_v43 }
 0x583   :  { %6492 = vmatprep.mubr.bf16.mxu0 %v17058_v21  ;;  %v17186_v21 = vld [vmem:[#allocation45_spill] sm:$0xff] }
 0x584   :  { %17179 = vst [vmem:[#allocation32_spill] sm:$0xff] %v14133_v1  ;;  %v14141_v50 = vadd.f32 %v5912_v19, %v17180_v41  ;;  %8799 = vmatmul.mubr.bf16.gmra.mrb[136].mxu1 %v17182_v18  ;;  %v17184_v1 = vld [vmem:[#allocation21_spill] sm:$0xff] }
 0x585   :  { %8802 = vmatprep.mubr.bf16.mxu1 %v17183_v51  ;;  %v14148_v49 = vpop.f32.mrb[20].mxu0 }
 0x586   :  { %17181 = vst [vmem:[#allocation176_spill] sm:$0xff] %v14141_v50  ;;  %v14150_v38 = vpop.f32.mrb[21].mxu0 }
 0x587   :  { %v5563_v16 = vpop.f32.mrb[32].mxu1  ;;  %v14156_v51 = vpop.f32.mrb[22].mxu0 }
 0x588   :  { %v5917_v46 = vadd.f32 %v14057_v9, %v5563_v16  ;;  %v5565_v22 = vpop.f32.mrb[33].mxu1  ;;  %v14158_v43 = vpop.f32.mrb[23].mxu0  ;;  %v17188_v9 = vld [vmem:[#allocation118_spill] sm:$0xff]  ;;  %v17189_v16 = vld [vmem:[#allocation27_spill] sm:$0xff] }
 0x589   :  { %v5566_v42 = vpop.f32.mrb[34].mxu1 }
 0x58a   :  { %v14153_v19 = vadd.f32 %v5917_v46, %v17184_v1  ;;  %v5920_v41 = vadd.f32 %v14064_v30, %v5566_v42  ;;  %v5568_v18 = vpop.f32.mrb[35].mxu1  ;;  %6493 = vmatmul.mubr.bf16.gmra.mrb[128].mxu0 %v17061_v4 }
 0x58b   :  { %6500 = vmatprep.mubr.bf16.mxu0 %v17062_v15  ;;  %v17192_v15 = vld [vmem:[#allocation102_spill] sm:$0xff] }
 0x58c   :  { %17185 = vst [vmem:[#allocation119_spill] sm:$0xff] %v14153_v19  ;;  %v14161_v50 = vadd.f32 %v5920_v41, %v17186_v21  ;;  %8803 = vmatmul.mubr.bf16.gmra.mrb[140].mxu1 %v17188_v9  ;;  %v17190_v19 = vld [vmem:[#allocation25_spill] sm:$0xff] }
 0x58d   :  { %8806 = vmatprep.mubr.bf16.mxu1 %v17189_v16  ;;  %v14168_v22 = vpop.f32.mrb[24].mxu0 }
 0x58e   :  { %17187 = vst [vmem:[#allocation128_spill] sm:$0xff] %v14161_v50  ;;  %v14170_v18 = vpop.f32.mrb[25].mxu0 }
 0x58f   :  { %v5571_v1 = vpop.f32.mrb[36].mxu1  ;;  %v14176_v16 = vpop.f32.mrb[26].mxu0 }
 0x590   :  { %v5925_v46 = vadd.f32 %v14055_v27, %v5571_v1  ;;  %v5573_v30 = vpop.f32.mrb[37].mxu1  ;;  %v14178_v4 = vpop.f32.mrb[27].mxu0  ;;  %v17194_v27 = vld [vmem:[#allocation37_spill] sm:$0xff]  ;;  %v17195_v1 = vld [vmem:[#allocation120_spill] sm:$0xff] }
 0x591   :  { %v5574_v42 = vpop.f32.mrb[38].mxu1 }
 0x592   :  { %v14173_v41 = vadd.f32 %v5925_v46, %v17190_v19  ;;  %v5928_v21 = vadd.f32 %v14062_v54, %v5574_v42  ;;  %v5576_v9 = vpop.f32.mrb[39].mxu1  ;;  %6501 = vmatmul.mubr.bf16.gmra.mrb[132].mxu0 %v17065_v35 }
 0x593   :  { %6508 = vmatprep.mubr.bf16.mxu0 %v17066_v23  ;;  %v17198_v23 = vld [vmem:[#allocation87_spill] sm:$0xff] }
 0x594   :  { %17191 = vst [vmem:[#allocation164_spill] sm:$0xff] %v14173_v41  ;;  %v14181_v50 = vadd.f32 %v5928_v21, %v17192_v15  ;;  %8807 = vmatmul.mubr.bf16.gmra.mrb[144].mxu1 %v17194_v27  ;;  %v17196_v41 = vld [vmem:[#allocation18_spill] sm:$0xff] }
 0x595   :  { %8810 = vmatprep.mubr.bf16.mxu1 %v17195_v1  ;;  %v14188_v30 = vpop.f32.mrb[28].mxu0 }
 0x596   :  { %17193 = vst [vmem:[#allocation78_spill] sm:$0xff] %v14181_v50  ;;  %v14190_v9 = vpop.f32.mrb[29].mxu0 }
 0x597   :  { %v5579_v19 = vpop.f32.mrb[40].mxu1  ;;  %v14196_v1 = vpop.f32.mrb[30].mxu0 }
 0x598   :  { %v5933_v46 = vadd.f32 %v14075_v28, %v5579_v19  ;;  %v5581_v54 = vpop.f32.mrb[41].mxu1  ;;  %v14198_v35 = vpop.f32.mrb[31].mxu0  ;;  %v17200_v28 = vld [vmem:[#allocation52_spill] sm:$0xff]  ;;  %v17201_v19 = vld [vmem:[#allocation42_spill] sm:$0xff] }
 0x599   :  { %v5582_v42 = vpop.f32.mrb[42].mxu1 }
 0x59a   :  { %v14193_v21 = vadd.f32 %v5933_v46, %v17196_v41  ;;  %v5936_v15 = vadd.f32 %v14082_v53, %v5582_v42  ;;  %v5584_v27 = vpop.f32.mrb[43].mxu1  ;;  %6509 = vmatmul.mubr.bf16.gmra.mrb[136].mxu0 %v17069_v11 }
 0x59b   :  { %6516 = vmatprep.mubr.bf16.mxu0 %v17070_v26  ;;  %v17204_v26 = vld [vmem:[#allocation105_spill] sm:$0xff] }
 0x59c   :  { %17197 = vst [vmem:[#allocation179_spill] sm:$0xff] %v14193_v21  ;;  %v14201_v50 = vadd.f32 %v5936_v15, %v17198_v23  ;;  %8811 = vmatmul.mubr.bf16.gmra.mrb[148].mxu1 %v17200_v28  ;;  %v17202_v21 = vld [vmem:[#allocation59_spill] sm:$0xff] }
 0x59d   :  { %8814 = vmatprep.mubr.bf16.mxu1 %v17201_v19  ;;  %v14208_v54 = vpop.f32.mrb[32].mxu0 }
 0x59e   :  { %17199 = vst [vmem:[#allocation186_spill] sm:$0xff] %v14201_v50  ;;  %v14210_v27 = vpop.f32.mrb[33].mxu0 }
 0x59f   :  { %v5587_v41 = vpop.f32.mrb[44].mxu1  ;;  %v14216_v19 = vpop.f32.mrb[34].mxu0 }
 0x5a0   :  { %v5941_v46 = vadd.f32 %v14073_v40, %v5587_v41  ;;  %v5589_v53 = vpop.f32.mrb[45].mxu1  ;;  %v14218_v11 = vpop.f32.mrb[35].mxu0  ;;  %v17206_v40 = vld [vmem:[#allocation47_spill] sm:$0xff]  ;;  %v17207_v41 = vld [vmem:[#allocation13_spill] sm:$0xff] }
 0x5a1   :  { %v5590_v42 = vpop.f32.mrb[46].mxu1 }
 0x5a2   :  { %v14213_v15 = vadd.f32 %v5941_v46, %v17202_v21  ;;  %v5944_v23 = vadd.f32 %v14080_v47, %v5590_v42  ;;  %v5592_v28 = vpop.f32.mrb[47].mxu1  ;;  %6517 = vmatmul.mubr.bf16.gmra.mrb[140].mxu0 %v17073_v3 }
 0x5a3   :  { %6524 = vmatprep.mubr.bf16.mxu0 %v17074_v14  ;;  %v17210_v14 = vld [vmem:[#allocation53_spill] sm:$0xff] }
 0x5a4   :  { %17203 = vst [vmem:[#allocation180_spill] sm:$0xff] %v14213_v15  ;;  %v14221_v50 = vadd.f32 %v5944_v23, %v17204_v26  ;;  %8815 = vmatmul.mubr.bf16.gmra.mrb[152].mxu1 %v17206_v40  ;;  %v17208_v15 = vld [vmem:[#allocation90_spill] sm:$0xff] }
 0x5a5   :  { %8818 = vmatprep.mubr.bf16.mxu1 %v17207_v41  ;;  %v14228_v53 = vpop.f32.mrb[36].mxu0 }
 0x5a6   :  { %17205 = vst [vmem:[#allocation43_spill] sm:$0xff] %v14221_v50  ;;  %v14230_v28 = vpop.f32.mrb[37].mxu0 }
 0x5a7   :  { %v5595_v21 = vpop.f32.mrb[48].mxu1  ;;  %v14236_v41 = vpop.f32.mrb[38].mxu0 }
 0x5a8   :  { %v5949_v46 = vadd.f32 %v14093_v7, %v5595_v21  ;;  %v5597_v47 = vpop.f32.mrb[49].mxu1  ;;  %v14238_v3 = vpop.f32.mrb[39].mxu0  ;;  %v17212_v7 = vld [vmem:[#allocation17_spill] sm:$0xff]  ;;  %v17213_v21 = vld [vmem:[#allocation103_spill] sm:$0xff] }
 0x5a9   :  { %v5598_v42 = vpop.f32.mrb[50].mxu1  ;;  %v17214_v47 = vld [vmem:[#allocation83_spill] sm:$0xff] }
 0x5aa   :  { %v14233_v23 = vadd.f32 %v5949_v46, %v17208_v15  ;;  %v5952_v26 = vadd.f32 %v14100_v36, %v5598_v42  ;;  %v5600_v40 = vpop.f32.mrb[51].mxu1  ;;  %6525 = vmatmul.mubr.bf16.gmra.mrb[144].mxu0 %v17077_v57 }
 0x5ab   :  { %6532 = vmatprep.mubr.bf16.mxu0 %v17214_v47  ;;  %v17219_v47 = vld [vmem:[#allocation125_spill] sm:$0xff] }
 0x5ac   :  { %17209 = vst [vmem:[#allocation141_spill] sm:$0xff] %v14233_v23  ;;  %v14241_v50 = vadd.f32 %v5952_v26, %v17210_v14  ;;  %8819 = vmatmul.mubr.bf16.gmra.mrb[156].mxu1 %v17212_v7 }
 0x5ad   :  { %8822 = vmatprep.mubr.bf16.mxu1 %v17213_v21  ;;  %v14248_v42 = vpop.f32.mrb[40].mxu0 }
 0x5ae   :  { %17211 = vst [vmem:[#allocation168_spill] sm:$0xff] %v14241_v50  ;;  %17215 = vst [vmem:[#allocation20_spill] sm:$0xff] %v14248_v42  ;;  %v14250_v23 = vpop.f32.mrb[41].mxu0  ;;  %v17224_v42 = vld [vmem:[#allocation137_spill] sm:$0xff] }
 0x5af   :  { %v5603_v15 = vpop.f32.mrb[52].mxu1  ;;  %v14256_v21 = vpop.f32.mrb[42].mxu0 }
 0x5b0   :  { %v5957_v46 = vadd.f32 %v14091_v45, %v5603_v15  ;;  %v5605_v36 = vpop.f32.mrb[53].mxu1  ;;  %17218 = vst [vmem:[#allocation94_spill] sm:$0xff] %v14256_v21  ;;  %v14258_v57 = vpop.f32.mrb[43].mxu0  ;;  %v17221_v45 = vld [vmem:[#allocation26_spill] sm:$0xff]  ;;  %v17222_v15 = vld [vmem:[#allocation36_spill] sm:$0xff]  ;;  %v17225_v21 = vld [vmem:[#allocation97_spill] sm:$0xff] }
 0x5b1   :  { %v5606_v40 = vpop.f32.mrb[54].mxu1  ;;  %v17223_v36 = vld [vmem:[#allocation49_spill] sm:$0xff] }
 0x5b2   :  { %v14253_v26 = vadd.f32 %v5957_v46, %v17216_v0  ;;  %v5960_v14 = vadd.f32 %v14098_v34, %v5606_v40  ;;  %v5608_v7 = vpop.f32.mrb[55].mxu1  ;;  %6533 = vmatmul.mubr.bf16.gmra.mrb[148].mxu0 %v17223_v36 }
 0x5b3   :  { %6540 = vmatprep.mubr.bf16.mxu0 %v17224_v42  ;;  %v17228_v42 = vld [vmem:[#allocation29_spill] sm:$0xff] }
 0x5b4   :  { %17217 = vst [vmem:[#allocation126_spill] sm:$0xff] %v14253_v26  ;;  %v14261_v50 = vadd.f32 %v5960_v14, %v17219_v47  ;;  %8823 = vmatmul.mubr.bf16.gmra.mrb[160].mxu1 %v17221_v45 }
 0x5b5   :  { %8826 = vmatprep.mubr.bf16.mxu1 %v17222_v15  ;;  %v14268_v40 = vpop.f32.mrb[44].mxu0 }
 0x5b6   :  { %17220 = vst [vmem:[#allocation124_spill] sm:$0xff] %v14261_v50  ;;  %v14270_v26 = vpop.f32.mrb[45].mxu0 }
 0x5b7   :  { %v5611_v0 = vpop.f32.mrb[56].mxu1  ;;  %v14276_v15 = vpop.f32.mrb[46].mxu0 }
 0x5b8   :  { %v5965_v46 = vadd.f32 %v14111_v2, %v5611_v0  ;;  %v5613_v34 = vpop.f32.mrb[57].mxu1  ;;  %17227 = vst [vmem:[#allocation181_spill] sm:$0xff] %v14276_v15  ;;  %v14278_v36 = vpop.f32.mrb[47].mxu0  ;;  %v17230_v2 = vld [vmem:[#allocation129_spill] sm:$0xff] }
 0x5b9   :  { %v5614_v7 = vpop.f32.mrb[58].mxu1  ;;  %v17231_v0 = vld [vmem:[#allocation153_spill] sm:$0xff] }
 0x5ba   :  { %v14273_v14 = vadd.f32 %v5965_v46, %v17225_v21  ;;  %v5968_v47 = vadd.f32 %v14118_v48, %v5614_v7  ;;  %v5616_v45 = vpop.f32.mrb[59].mxu1  ;;  %6541 = vmatmul.mubr.bf16.gmra.mrb[152].mxu0 %v17085_v62  ;;  %v17234_v62 = vld [vmem:[#allocation183_spill] sm:$0xff] }
 0x5bb   :  { %6548 = vmatprep.mubr.bf16.mxu0 %v17086_v24  ;;  %v17236_v24 = vld [vmem:[#allocation131_spill] sm:$0xff] }
 0x5bc   :  { %17226 = vst [vmem:[#allocation16_spill] sm:$0xff] %v14273_v14  ;;  %v14281_v50 = vadd.f32 %v5968_v47, %v17228_v42  ;;  %8827 = vmatmul.mubr.bf16.gmra.mrb[164].mxu1 %v17230_v2  ;;  %v17232_v14 = vld [vmem:[#allocation144_spill] sm:$0xff] }
 0x5bd   :  { %8830 = vmatprep.mubr.bf16.mxu1 %v17231_v0  ;;  %v14288_v34 = vpop.f32.mrb[48].mxu0 }
 0x5be   :  { %17229 = vst [vmem:[#allocation182_spill] sm:$0xff] %v14281_v50  ;;  %v6336_v45 = vpop.f32.mrb[49].mxu0 }
 0x5bf   :  { %v5619_v21 = vpop.f32.mrb[60].mxu1  ;;  %v14294_v2 = vpop.f32.mrb[50].mxu0  ;;  %v17238_v45 = vld [vmem:[#allocation35_spill] sm:$0xff] }
 0x5c0   :  { %v5973_v46 = vadd.f32 %v14109_v52, %v5619_v21  ;;  %v5621_v48 = vpop.f32.mrb[61].mxu1  ;;  %v6339_v0 = vpop.f32.mrb[51].mxu0  ;;  %v17237_v52 = vld [vmem:[#allocation39_spill] sm:$0xff] }
 0x5c1   :  { %v5622_v7 = vpop.f32.mrb[62].mxu1 }
 0x5c2   :  { %v14291_v15 = vadd.f32 %v5973_v46, %v17232_v14  ;;  %v5976_v47 = vadd.f32 %v14116_v58, %v5622_v7  ;;  %v5624_v42 = vpop.f32.mrb[63].mxu1  ;;  %6549 = vmatmul.mubr.bf16.gmra.mrb[156].mxu0 %v13214_v56  ;;  %v17240_v56 = vld [vmem:[#allocation108_spill] sm:$0xff] }
 0x5c3   :  { %6556 = vmatprep.mubr.bf16.mxu0 %v17089_v63  ;;  %v17242_v63 = vld [vmem:[#allocation80_spill] sm:$0xff] }
 0x5c4   :  { %17233 = vst [vmem:[#allocation71_spill] sm:$0xff] %v14291_v15  ;;  %v14297_v50 = vadd.f32 %v5976_v47, %v17234_v62  ;;  %8831 = vmatmul.mubr.bf16.gmra.mrb[168].mxu1 %v17236_v24 }
 0x5c5   :  { %8834 = vmatprep.mubr.bf16.mxu1 %v17237_v52  ;;  %v14304_v58 = vpop.f32.mrb[52].mxu0 }
 0x5c6   :  { %17235 = vst [vmem:[#allocation48_spill] sm:$0xff] %v14297_v50  ;;  %v6344_v7 = vpop.f32.mrb[53].mxu0 }
 0x5c7   :  { %v5627_v21 = vpop.f32.mrb[64].mxu1  ;;  %v14310_v62 = vpop.f32.mrb[54].mxu0 }
 0x5c8   :  { %v5981_v14 = vadd.f32 %v14130_v8, %v5627_v21  ;;  %v5629_v46 = vpop.f32.mrb[65].mxu1  ;;  %v6347_v24 = vpop.f32.mrb[55].mxu0  ;;  %v17243_v8 = vld [vmem:[#allocation135_spill] sm:$0xff]  ;;  %v17244_v21 = vld [vmem:[#allocation145_spill] sm:$0xff] }
 0x5c9   :  { %v5630_v48 = vpop.f32.mrb[66].mxu1 }
 0x5ca   :  { %v14307_v42 = vadd.f32 %v5981_v14, %v17238_v45  ;;  %v5984_v47 = vadd.f32 %v14138_v61, %v5630_v48  ;;  %v5632_v0 = vpop.f32.mrb[67].mxu1  ;;  %6557 = vmatmul.mubr.bf16.gmra.mrb[160].mxu0 %v17092_v29  ;;  %v17247_v29 = vld [vmem:[#allocation10_spill] sm:$0xff] }
 0x5cb   :  { %6564 = vmatprep.mubr.bf16.mxu0 %v17244_v21  ;;  %v17245_v0 = vld [vmem:[#allocation188_spill] sm:$0xff]  ;;  %v17249_v21 = vld [vmem:[#allocation6_spill] sm:$0xff] }
 0x5cc   :  { %17239 = vst [vmem:[#allocation122_spill] sm:$0xff] %v14307_v42  ;;  %v14313_v52 = vadd.f32 %v5984_v47, %v17240_v56  ;;  %8835 = vmatmul.mubr.bf16.gmra.mrb[172].mxu1 %v17242_v63  ;;  %v17359_v42 = vld [vmem:[#allocation2_spill] sm:$0xff] }
 0x5cd   :  { %8838 = vmatprep.mubr.bf16.mxu1 %v17243_v8  ;;  %v14320_v61 = vpop.f32.mrb[56].mxu0 }
 0x5ce   :  { %17241 = vst [vmem:[#allocation172_spill] sm:$0xff] %v14313_v52  ;;  %v6352_v45 = vpop.f32.mrb[57].mxu0  ;;  %v17351_v52 = vld [vmem:[#allocation72_spill] sm:$0xff] }
 0x5cf   :  { %v5635_v46 = vpop.f32.mrb[68].mxu1  ;;  %v14326_v63 = vpop.f32.mrb[58].mxu0 }
 0x5d0   :  { %v5989_v14 = vadd.f32 %v14128_v59, %v5635_v46  ;;  %v5637_v7 = vpop.f32.mrb[69].mxu1  ;;  %v6355_v8 = vpop.f32.mrb[59].mxu0  ;;  %v17250_v59 = vld [vmem:[#allocation57_spill] sm:$0xff]  ;;  %v17251_v46 = vld [vmem:[#allocation95_spill] sm:$0xff] }
 0x5d1   :  { %v5638_v48 = vpop.f32.mrb[70].mxu1  ;;  %v17252_v7 = vld [vmem:[#allocation162_spill] sm:$0xff]  ;;  %v17253_v8 = vld [vmem:[#allocation61_spill] sm:$0xff] }
 0x5d2   :  { %v14323_v24 = vadd.f32 %v5989_v14, %v17245_v0  ;;  %v5992_v47 = vadd.f32 %v14136_v37, %v5638_v48  ;;  %v5640_v56 = vpop.f32.mrb[71].mxu1  ;;  %6565 = vmatmul.mubr.bf16.gmra.mrb[164].mxu0 %v17251_v46  ;;  %v17255_v46 = vld [vmem:[#allocation109_spill] sm:$0xff] }
 0x5d3   :  { %6572 = vmatprep.mubr.bf16.mxu0 %v17252_v7  ;;  %v17257_v7 = vld [vmem:[#allocation140_spill] sm:$0xff] }
 0x5d4   :  { %17246 = vst [vmem:[#allocation33_spill] sm:$0xff] %v14323_v24  ;;  %v14329_v50 = vadd.f32 %v5992_v47, %v17247_v29  ;;  %8839 = vmatmul.mubr.bf16.gmra.mrb[176].mxu1 %v17249_v21 }
 0x5d5   :  { %8842 = vmatprep.mubr.bf16.mxu1 %v17250_v59  ;;  %v14336_v37 = vpop.f32.mrb[60].mxu0 }
 0x5d6   :  { %17248 = vst [vmem:[#allocation96_spill] sm:$0xff] %v14329_v50  ;;  %v6360_v56 = vpop.f32.mrb[61].mxu0 }
 0x5d7   :  { %v5643_v45 = vpop.f32.mrb[72].mxu1  ;;  %v14342_v21 = vpop.f32.mrb[62].mxu0 }
 0x5d8   :  { %v5997_v14 = vadd.f32 %v14150_v38, %v5643_v45  ;;  %v5645_v0 = vpop.f32.mrb[73].mxu1  ;;  %v6363_v59 = vpop.f32.mrb[63].mxu0  ;;  %v17258_v38 = vld [vmem:[#allocation161_spill] sm:$0xff] }
 0x5d9   :  { %v5646_v48 = vpop.f32.mrb[74].mxu1 }
 0x5da   :  { %v14339_v24 = vadd.f32 %v5997_v14, %v17253_v8  ;;  %v6000_v47 = vadd.f32 %v14158_v43, %v5646_v48  ;;  %v5648_v29 = vpop.f32.mrb[75].mxu1  ;;  %6573 = vmatmul.mubr.bf16.gmra.mrb[168].mxu0 %v17098_v44  ;;  %v17259_v8 = vld [vmem:[#allocation67_spill] sm:$0xff] }
 0x5db   :  { %6580 = vmatprep.mubr.bf16.mxu0 %v17100_v17  ;;  %v17261_v44 = vld [vmem:[#allocation147_spill] sm:$0xff]  ;;  %v17263_v17 = vld [vmem:[#allocation65_spill] sm:$0xff] }
 0x5dc   :  { %17254 = vst [vmem:[#allocation170_spill] sm:$0xff] %v14339_v24  ;;  %v14345_v50 = vadd.f32 %v6000_v47, %v17255_v46  ;;  %8843 = vmatmul.mubr.bf16.gmra.mrb[180].mxu1 %v17257_v7 }
 0x5dd   :  { %8846 = vmatprep.mubr.bf16.mxu1 %v17258_v38  ;;  %v14352_v43 = vpop.f32.mrb[64].mxu0 }
 0x5de   :  { %17256 = vst [vmem:[#allocation3_spill] sm:$0xff] %v14345_v50  ;;  %v6368_v56 = vpop.f32.mrb[65].mxu0  ;;  %v17342_v50 = vld [vmem:[#allocation22_spill] sm:$0xff] }
 0x5df   :  { %v5651_v45 = vpop.f32.mrb[76].mxu1  ;;  %v14358_v46 = vpop.f32.mrb[66].mxu0 }
 0x5e0   :  { %v6005_v14 = vadd.f32 %v14148_v49, %v5651_v45  ;;  %v5653_v0 = vpop.f32.mrb[77].mxu1  ;;  %v6371_v7 = vpop.f32.mrb[67].mxu0  ;;  %v17264_v49 = vld [vmem:[#allocation98_spill] sm:$0xff] }
 0x5e1   :  { %v5654_v48 = vpop.f32.mrb[78].mxu1 }
 0x5e2   :  { %v14355_v29 = vadd.f32 %v6005_v14, %v17259_v8  ;;  %v6008_v47 = vadd.f32 %v14156_v51, %v5654_v48  ;;  %v5656_v59 = vpop.f32.mrb[79].mxu1  ;;  %6581 = vmatmul.mubr.bf16.gmra.mrb[172].mxu0 %v17104_v55  ;;  %v17265_v8 = vld [vmem:[#allocation187_spill] sm:$0xff]  ;;  %v17267_v55 = vld [vmem:[#allocation110_spill] sm:$0xff] }
 0x5e3   :  { %6588 = vmatprep.mubr.bf16.mxu0 %v17106_v20  ;;  %v17269_v20 = vld [vmem:[#allocation151_spill] sm:$0xff] }
 0x5e4   :  { %17260 = vst [vmem:[#allocation14_spill] sm:$0xff] %v14355_v29  ;;  %v14361_v38 = vadd.f32 %v6008_v47, %v17261_v44  ;;  %8847 = vmatmul.mubr.bf16.gmra.mrb[184].mxu1 %v17263_v17  ;;  %v17334_v29 = vld [vmem:[#allocation143_spill] sm:$0xff] }
 0x5e5   :  { %8850 = vmatprep.mubr.bf16.mxu1 %v17264_v49  ;;  %v14368_v51 = vpop.f32.mrb[68].mxu0 }
 0x5e6   :  { %17262 = vst [vmem:[#allocation51_spill] sm:$0xff] %v14361_v38  ;;  %v6376_v56 = vpop.f32.mrb[69].mxu0 }
 0x5e7   :  { %v5659_v45 = vpop.f32.mrb[80].mxu1  ;;  %v14374_v44 = vpop.f32.mrb[70].mxu0 }
 0x5e8   :  { %v6013_v14 = vadd.f32 %v14170_v18, %v5659_v45  ;;  %v5661_v0 = vpop.f32.mrb[81].mxu1  ;;  %v6379_v17 = vpop.f32.mrb[71].mxu0  ;;  %v17270_v18 = vld [vmem:[#allocation55_spill] sm:$0xff] }
 0x5e9   :  { %v5662_v48 = vpop.f32.mrb[82].mxu1 }
 0x5ea   :  { %v14371_v59 = vadd.f32 %v6013_v14, %v17265_v8  ;;  %v6016_v47 = vadd.f32 %v14178_v4, %v5662_v48  ;;  %v5664_v7 = vpop.f32.mrb[83].mxu1  ;;  %6589 = vmatmul.mubr.bf16.gmra.mrb[176].mxu0 %v17110_v6  ;;  %v17271_v8 = vld [vmem:[#allocation175_spill] sm:$0xff] }
 0x5eb   :  { %6596 = vmatprep.mubr.bf16.mxu0 %v17112_v32  ;;  %v17273_v6 = vld [vmem:[#allocation111_spill] sm:$0xff]  ;;  %v17275_v32 = vld [vmem:[#allocation166_spill] sm:$0xff] }
 0x5ec   :  { %17266 = vst [vmem:[#allocation178_spill] sm:$0xff] %v14371_v59  ;;  %v14377_v49 = vadd.f32 %v6016_v47, %v17267_v55  ;;  %8851 = vmatmul.mubr.bf16.gmra.mrb[188].mxu1 %v17269_v20 }
 0x5ed   :  { %8854 = vmatprep.mubr.bf16.mxu1 %v17270_v18  ;;  %v14384_v4 = vpop.f32.mrb[72].mxu0 }
 0x5ee   :  { %17268 = vst [vmem:[#allocation44_spill] sm:$0xff] %v14377_v49  ;;  %v6384_v56 = vpop.f32.mrb[73].mxu0 }
 0x5ef   :  { %v5667_v45 = vpop.f32.mrb[84].mxu1  ;;  %v14390_v55 = vpop.f32.mrb[74].mxu0 }
 0x5f0   :  { %v6021_v14 = vadd.f32 %v14168_v22, %v5667_v45  ;;  %v5669_v0 = vpop.f32.mrb[85].mxu1  ;;  %v6387_v20 = vpop.f32.mrb[75].mxu0  ;;  %v17276_v22 = vld [vmem:[#allocation58_spill] sm:$0xff] }
 0x5f1   :  { %v5670_v48 = vpop.f32.mrb[86].mxu1 }
 0x5f2   :  { %v14387_v7 = vadd.f32 %v6021_v14, %v17271_v8  ;;  %v6024_v47 = vadd.f32 %v14176_v16, %v5670_v48  ;;  %v5672_v17 = vpop.f32.mrb[87].mxu1  ;;  %6597 = vmatmul.mubr.bf16.gmra.mrb[180].mxu0 %v17119_v60  ;;  %v17277_v8 = vld [vmem:[#allocation4_spill] sm:$0xff] }
 0x5f3   :  { %6604 = vmatprep.mubr.bf16.mxu0 %v17120_v25  ;;  %v17279_v60 = vld [vmem:[#allocation156_spill] sm:$0xff]  ;;  %v17281_v25 = vld [vmem:[#allocation81_spill] sm:$0xff] }
 0x5f4   :  { %17272 = vst [vmem:[#allocation92_spill] sm:$0xff] %v14387_v7  ;;  %v14393_v18 = vadd.f32 %v6024_v47, %v17273_v6  ;;  %8855 = vmatmul.mubr.bf16.gmra.mrb[192].mxu1 %v17275_v32 }
 0x5f5   :  { %8858 = vmatprep.mubr.bf16.mxu1 %v17276_v22  ;;  %v14400_v16 = vpop.f32.mrb[76].mxu0 }
 0x5f6   :  { %17274 = vst [vmem:[#allocation123_spill] sm:$0xff] %v14393_v18  ;;  %v6392_v56 = vpop.f32.mrb[77].mxu0 }
 0x5f7   :  { %v5675_v45 = vpop.f32.mrb[88].mxu1  ;;  %v14406_v6 = vpop.f32.mrb[78].mxu0 }
 0x5f8   :  { %v6029_v14 = vadd.f32 %v14190_v9, %v5675_v45  ;;  %v5677_v0 = vpop.f32.mrb[89].mxu1  ;;  %v6395_v32 = vpop.f32.mrb[79].mxu0  ;;  %v17282_v9 = vld [vmem:[#allocation66_spill] sm:$0xff] }
 0x5f9   :  { %v5678_v48 = vpop.f32.mrb[90].mxu1 }
 0x5fa   :  { %v14403_v17 = vadd.f32 %v6029_v14, %v17277_v8  ;;  %v6032_v47 = vadd.f32 %v14198_v35, %v5678_v48  ;;  %v5680_v20 = vpop.f32.mrb[91].mxu1  ;;  %6605 = vmatmul.mubr.bf16.gmra.mrb[184].mxu0 %v17129_v12  ;;  %v17283_v8 = vld [vmem:[#allocation154_spill] sm:$0xff]  ;;  %v17285_v12 = vld [vmem:[#allocation112_spill] sm:$0xff] }
 0x5fb   :  { %6612 = vmatprep.mubr.bf16.mxu0 %v17130_v10  ;;  %v17287_v10 = vld [vmem:[#allocation86_spill] sm:$0xff] }
 0x5fc   :  { %17278 = vst [vmem:[#allocation82_spill] sm:$0xff] %v14403_v17  ;;  %v14409_v22 = vadd.f32 %v6032_v47, %v17279_v60  ;;  %8859 = vmatmul.mubr.bf16.gmra.mrb[196].mxu1 %v17281_v25  ;;  %v17331_v17 = vld [vmem:[#allocation142_spill] sm:$0xff] }
 0x5fd   :  { %8862 = vmatprep.mubr.bf16.mxu1 %v17282_v9  ;;  %v14416_v35 = vpop.f32.mrb[80].mxu0 }
 0x5fe   :  { %17280 = vst [vmem:[#allocation101_spill] sm:$0xff] %v14409_v22  ;;  %v6400_v56 = vpop.f32.mrb[81].mxu0 }
 0x5ff   :  { %v5683_v45 = vpop.f32.mrb[92].mxu1  ;;  %v14422_v60 = vpop.f32.mrb[82].mxu0 }
 0x600   :  { %v6037_v14 = vadd.f32 %v14188_v30, %v5683_v45  ;;  %v5685_v0 = vpop.f32.mrb[93].mxu1  ;;  %v6403_v25 = vpop.f32.mrb[83].mxu0  ;;  %v17288_v30 = vld [vmem:[#allocation174_spill] sm:$0xff] }
 0x601   :  { %v5686_v48 = vpop.f32.mrb[94].mxu1 }
 0x602   :  { %v14419_v20 = vadd.f32 %v6037_v14, %v17283_v8  ;;  %v6040_v47 = vadd.f32 %v14196_v1, %v5686_v48  ;;  %v5688_v32 = vpop.f32.mrb[95].mxu1  ;;  %6613 = vmatmul.mubr.bf16.gmra.mrb[188].mxu0 %v17135_v5  ;;  %v17289_v8 = vld [vmem:[#allocation77_spill] sm:$0xff]  ;;  %v17291_v5 = vld [vmem:[#allocation163_spill] sm:$0xff] }
 0x603   :  { %6620 = vmatprep.mubr.bf16.mxu0 %v17136_v39  ;;  %v17293_v39 = vld [vmem:[#allocation34_spill] sm:$0xff] }
 0x604   :  { %17284 = vst [vmem:[#allocation167_spill] sm:$0xff] %v14419_v20  ;;  %v14425_v9 = vadd.f32 %v6040_v47, %v17285_v12  ;;  %8863 = vmatmul.mubr.bf16.gmra.mrb[200].mxu1 %v17287_v10 }
 0x605   :  { %8866 = vmatprep.mubr.bf16.mxu1 %v17288_v30  ;;  %v14432_v1 = vpop.f32.mrb[84].mxu0 }
 0x606   :  { %17286 = vst [vmem:[#allocation31_spill] sm:$0xff] %v14425_v9  ;;  %v6408_v56 = vpop.f32.mrb[85].mxu0  ;;  %v17315_v9 = vld [vmem:[#allocation116_spill] sm:$0xff] }
 0x607   :  { %v5691_v45 = vpop.f32.mrb[96].mxu1  ;;  %v14438_v12 = vpop.f32.mrb[86].mxu0  ;;  %v17294_v56 = vld [vmem:[#allocation8_spill] sm:$0xff] }
 0x608   :  { %v6045_v14 = vadd.f32 %v14210_v27, %v5691_v45  ;;  %v5693_v0 = vpop.f32.mrb[97].mxu1  ;;  %v6411_v10 = vpop.f32.mrb[87].mxu0 }
 0x609   :  { %v5694_v48 = vpop.f32.mrb[98].mxu1 }
 0x60a   :  { %v14435_v32 = vadd.f32 %v6045_v14, %v17289_v8  ;;  %v6048_v47 = vadd.f32 %v14218_v11, %v5694_v48  ;;  %v5696_v25 = vpop.f32.mrb[99].mxu1  ;;  %6621 = vmatmul.mubr.bf16.gmra.mrb[192].mxu0 %v17143_v13  ;;  %v17296_v13 = vld [vmem:[#allocation84_spill] sm:$0xff] }
 0x60b   :  { %6628 = vmatprep.mubr.bf16.mxu0 %v17144_v31  ;;  %v17298_v31 = vld [vmem:[#allocation28_spill] sm:$0xff] }
 0x60c   :  { %17290 = vst [vmem:[#allocation107_spill] sm:$0xff] %v14435_v32  ;;  %v14441_v30 = vadd.f32 %v6048_v47, %v17291_v5  ;;  %8867 = vmatmul.mubr.bf16.gmra.mrb[204].mxu1 %v17293_v39  ;;  %v17320_v32 = vld [vmem:[#allocation173_spill] sm:$0xff] }
 0x60d   :  { %v14447_v0 = vpop.f32.mrb[88].mxu0 }
 0x60e   :  { %17292 = vst [vmem:[#allocation130_spill] sm:$0xff] %v14441_v30  ;;  %v6416_v48 = vpop.f32.mrb[89].mxu0 }
 0x60f   :  { %v5699_v27 = vpop.f32.mrb[100].mxu1  ;;  %v14453_v10 = vpop.f32.mrb[90].mxu0 }
 0x610   :  { %v6053_v45 = vadd.f32 %v14208_v54, %v5699_v27  ;;  %v5701_v14 = vpop.f32.mrb[101].mxu1  ;;  %v6419_v5 = vpop.f32.mrb[91].mxu0 }
 0x611   :  { %v5702_v11 = vpop.f32.mrb[102].mxu1 }
 0x612   :  { %v14450_v8 = vadd.f32 %v6053_v45, %v17294_v56  ;;  %v6056_v47 = vadd.f32 %v14216_v19, %v5702_v11  ;;  %v5704_v25 = vpop.f32.mrb[103].mxu1  ;;  %6629 = vmatmul.mubr.bf16.gmra.mrb[196].mxu0 %v17149_v33  ;;  %v17299_v19 = vld [vmem:[#allocation160_spill] sm:$0xff]  ;;  %v17301_v33 = vld [vmem:[#allocation85_spill] sm:$0xff] }
 0x613   :  { %6636 = vmatprep.mubr.bf16.mxu0 %v17298_v31  ;;  %v17303_v31 = vld [vmem:[#allocation63_spill] sm:$0xff] }
 0x614   :  { %17295 = vst [vmem:[#allocation50_spill] sm:$0xff] %v14450_v8  ;;  %v14456_v39 = vadd.f32 %v6056_v47, %v17296_v13 }
 0x615   :  { %v14461_v48 = vpop.f32.mrb[92].mxu0 }
 0x616   :  { %17297 = vst [vmem:[#allocation23_spill] sm:$0xff] %v14456_v39  ;;  %v6424_v56 = vpop.f32.mrb[93].mxu0 }
 0x617   :  { %v5707_v54 = vpop.f32.mrb[104].mxu1  ;;  %v14467_v47 = vpop.f32.mrb[94].mxu0 }
 0x618   :  { %v6061_v27 = vadd.f32 %v14230_v28, %v5707_v54  ;;  %v5709_v14 = vpop.f32.mrb[105].mxu1  ;;  %v6427_v13 = vpop.f32.mrb[95].mxu0  ;;  %v17304_v28 = vld [vmem:[#allocation177_spill] sm:$0xff] }
 0x619   :  { %v5710_v45 = vpop.f32.mrb[106].mxu1 }
 0x61a   :  { %v14464_v11 = vadd.f32 %v6061_v27, %v17299_v19  ;;  %v6064_v25 = vadd.f32 %v14238_v3, %v5710_v45  ;;  %v5712_v5 = vpop.f32.mrb[107].mxu1  ;;  %6637 = vmatmul.mubr.bf16.gmra.mrb[200].mxu0 %v17303_v31  ;;  %v17305_v3 = vld [vmem:[#allocation115_spill] sm:$0xff] }
 0x61b   :  { %6644 = vmatprep.mubr.bf16.mxu0 %v17304_v28  ;;  %v17307_v31 = vld [vmem:[#allocation11_spill] sm:$0xff]  ;;  %v17309_v28 = vld [vmem:[#allocation89_spill] sm:$0xff] }
 0x61c   :  { %17300 = vst [vmem:[#allocation171_spill] sm:$0xff] %v14464_v11  ;;  %v14470_v39 = vadd.f32 %v6064_v25, %v17301_v33 }
 0x61d   :  { %v14475_v8 = vpop.f32.mrb[96].mxu0 }
 0x61e   :  { %17302 = vst [vmem:[#allocation56_spill] sm:$0xff] %v14470_v39  ;;  %v6432_v19 = vpop.f32.mrb[97].mxu0 }
 0x61f   :  { %v5715_v54 = vpop.f32.mrb[108].mxu1  ;;  %v14481_v25 = vpop.f32.mrb[98].mxu0 }
 0x620   :  { %v6069_v14 = vadd.f32 %v14228_v53, %v5715_v54  ;;  %v5717_v56 = vpop.f32.mrb[109].mxu1  ;;  %v6435_v33 = vpop.f32.mrb[99].mxu0 }
 0x621   :  { %v5718_v27 = vpop.f32.mrb[110].mxu1  ;;  %v17312_v33 = vld [vmem:[#allocation169_spill] sm:$0xff] }
 0x622   :  { %v14478_v45 = vadd.f32 %v6069_v14, %v17305_v3  ;;  %v6072_v5 = vadd.f32 %v14236_v41, %v5718_v27  ;;  %v5720_v13 = vpop.f32.mrb[111].mxu1  ;;  %6645 = vmatmul.mubr.bf16.gmra.mrb[204].mxu0 %v17309_v28  ;;  %v17310_v3 = vld [vmem:[#allocation15_spill] sm:$0xff] }
 0x624   :  { %17306 = vst [vmem:[#allocation136_spill] sm:$0xff] %v14478_v45  ;;  %v14484_v39 = vadd.f32 %v6072_v5, %v17307_v31 }
 0x625   :  { %v14488_v11 = vpop.f32.mrb[100].mxu0 }
 0x626   :  { %17308 = vst [vmem:[#allocation99_spill] sm:$0xff] %v14484_v39  ;;  %v6440_v14 = vpop.f32.mrb[101].mxu0  ;;  %v17314_v39 = vld [vmem:[#allocation20_spill] sm:$0xff] }
 0x627   :  { %v5723_v53 = vpop.f32.mrb[112].mxu1  ;;  %v14494_v13 = vpop.f32.mrb[102].mxu0 }
 0x628   :  { %v6077_v54 = vadd.f32 %v14250_v23, %v5723_v53  ;;  %v5725_v56 = vpop.f32.mrb[113].mxu1  ;;  %v6443_v5 = vpop.f32.mrb[103].mxu0 }
 0x629   :  { %v5726_v19 = vpop.f32.mrb[114].mxu1 }
 0x62a   :  { %v14491_v45 = vadd.f32 %v6077_v54, %v17310_v3  ;;  %v6080_v41 = vadd.f32 %v14258_v57, %v5726_v19  ;;  %v5728_v27 = vpop.f32.mrb[115].mxu1  ;;  %v17317_v3 = vld [vmem:[#allocation94_spill] sm:$0xff] }
 0x62c   :  { %17311 = vst [vmem:[#allocation117_spill] sm:$0xff] %v14491_v45  ;;  %v14497_v31 = vadd.f32 %v6080_v41, %v17312_v33  ;;  %v17318_v45 = vld [vmem:[#allocation19_spill] sm:$0xff] }
 0x62d   :  { %v14500_v56 = vpop.f32.mrb[104].mxu0 }
 0x62e   :  { %17313 = vst [vmem:[#allocation21_spill] sm:$0xff] %v14497_v31  ;;  %v6448_v14 = vpop.f32.mrb[105].mxu0 }
 0x62f   :  { %v5731_v28 = vpop.f32.mrb[116].mxu1  ;;  %v14506_v27 = vpop.f32.mrb[106].mxu0 }
 0x630   :  { %v6085_v23 = vadd.f32 %v17314_v39, %v5731_v28  ;;  %v5733_v53 = vpop.f32.mrb[117].mxu1  ;;  %v6451_v5 = vpop.f32.mrb[107].mxu0 }
 0x631   :  { %v5734_v30 = vpop.f32.mrb[118].mxu1  ;;  %v17322_v5 = vld [vmem:[#allocation100_spill] sm:$0xff] }
 0x632   :  { %v14503_v54 = vadd.f32 %v6085_v23, %v17315_v9  ;;  %v6088_v57 = vadd.f32 %v17317_v3, %v5734_v30  ;;  %v5736_v19 = vpop.f32.mrb[119].mxu1 }
 0x634   :  { %17316 = vst [vmem:[#allocation45_spill] sm:$0xff] %v14503_v54  ;;  %v14509_v41 = vadd.f32 %v6088_v57, %v17318_v45  ;;  %v17324_v54 = vld [vmem:[#allocation38_spill] sm:$0xff] }
 0x635   :  { %v14512_v53 = vpop.f32.mrb[108].mxu0 }
 0x636   :  { %17319 = vst [vmem:[#allocation118_spill] sm:$0xff] %v14509_v41  ;;  %v6456_v14 = vpop.f32.mrb[109].mxu0 }
 0x637   :  { %v5739_v33 = vpop.f32.mrb[120].mxu1  ;;  %v14518_v3 = vpop.f32.mrb[110].mxu0 }
 0x638   :  { %v6093_v39 = vadd.f32 %v14270_v26, %v5739_v33  ;;  %v5741_v28 = vpop.f32.mrb[121].mxu1  ;;  %v6459_v19 = vpop.f32.mrb[111].mxu0 }
 0x639   :  { %v5742_v31 = vpop.f32.mrb[122].mxu1  ;;  %v17326_v19 = vld [vmem:[#allocation40_spill] sm:$0xff] }
 0x63a   :  { %v14515_v9 = vadd.f32 %v6093_v39, %v17320_v32  ;;  %v6096_v30 = vadd.f32 %v14278_v36, %v5742_v31  ;;  %v5744_v23 = vpop.f32.mrb[123].mxu1  ;;  %v17325_v39 = vld [vmem:[#allocation181_spill] sm:$0xff] }
 0x63c   :  { %17321 = vst [vmem:[#allocation27_spill] sm:$0xff] %v14515_v9  ;;  %v14521_v45 = vadd.f32 %v6096_v30, %v17322_v5 }
 0x63d   :  { %v14524_v28 = vpop.f32.mrb[112].mxu0 }
 0x63e   :  { %17323 = vst [vmem:[#allocation25_spill] sm:$0xff] %v14521_v45  ;;  %v6464_v14 = vpop.f32.mrb[113].mxu0 }
 0x63f   :  { %v5747_v57 = vpop.f32.mrb[124].mxu1  ;;  %v14528_v31 = vpop.f32.mrb[114].mxu0 }
 0x640   :  { %v6101_v26 = vadd.f32 %v14268_v40, %v5747_v57  ;;  %v5749_v33 = vpop.f32.mrb[125].mxu1  ;;  %v6467_v23 = vpop.f32.mrb[115].mxu0  ;;  %v14537_v57 = vld [vmem:[%s15478_s5] ss:$0 sm:$0xff] }
 0x641   :  { %v5750_v41 = vpop.f32.mrb[126].mxu1  ;;  %v17327_v33 = vld [vmem:[#allocation184_spill] sm:$0xff] }
 0x642   :  { %v7084_v32 = vadd.f32 %v6101_v26, %v17324_v54  ;;  %v6104_v9 = vadd.f32 %v17325_v39, %v5750_v41  ;;  %v5752_v36 = vpop.f32.mrb[127].mxu1 }
 0x644   :  { %v7085_v20 = vadd.f32 %v6104_v9, %v17326_v19 }
 0x645   :  { %v14532_v40 = vpop.f32.mrb[116].mxu0 }
 0x646   :  { %v6472_v26 = vpop.f32.mrb[117].mxu0 }
 0x647   :  { %v8792_v30 = vpop.f32.mrb[128].mxu1  ;;  %v14542_v36 = vpop.f32.mrb[118].mxu0 }
 0x648   :  { %v6696_v5 = vadd.f32 %v8792_v30, %v14304_v58  ;;  %v6687_v45 = vpop.f32.mrb[129].mxu1  ;;  %v14547_v58 = vld [vmem:[%s15479_s6] ss:$0 sm:$0xff]  ;;  %v6475_v30 = vpop.f32.mrb[119].mxu0 }
 0x649   :  { %v6688_v54 = vadd.f32 %v6687_v45, %v14288_v34  ;;  %v8793_v41 = vpop.f32.mrb[130].mxu1  ;;  %v17328_v45 = vld [vmem:[#allocation146_spill] sm:$0xff] }
 0x64a   :  { %v7086_v14 = vadd.f32 %v17327_v33, %v6696_v5  ;;  %v6699_v39 = vadd.f32 %v8793_v41, %v14310_v62  ;;  %v6690_v9 = vpop.f32.mrb[131].mxu1 }
 0x64b   :  { %v7164_v23 = vadd.f32 %v7084_v32, %v6688_v54  ;;  %v6691_v19 = vadd.f32 %v6690_v9, %v14294_v2  ;;  %v9021_v2 = vld [vmem:[%s15474_s0] sm:$0xff]  ;;  %v9022_v9 = vld [vmem:[%s15474_s0 + $0x270] sm:$0xff] }
 0x64c   :  { %v7173_v34 = vmul.f32 %v14537_v57, %v7086_v14  ;;  %v7087_v26 = vadd.f32 %v17328_v45, %v6699_v39 }
 0x64d   :  { %v7251_v5 = vmul.f32 %v14537_v57, %v7164_v23  ;;  %v7165_v33 = vadd.f32 %v7085_v20, %v6691_v19  ;;  %v14562_v20 = vpop.f32.mrb[120].mxu0 }
 0x64e   :  { %v7260_v62 = vadd.f32 %v14547_v58, %v7173_v34  ;;  %v7174_v41 = vmul.f32 %v14537_v57, %v7087_v26  ;;  %v6480_v45 = vpop.f32.mrb[121].mxu0 }
 0x64f   :  { %v7338_v18 = vadd.f32 %v14547_v58, %v7251_v5  ;;  %v7252_v22 = vmul.f32 %v14537_v57, %v7165_v33  ;;  %v8796_v7 = vpop.f32.mrb[132].mxu1  ;;  %v9023_v5 = vld [vmem:[%s15474_s0 + $0x8] sm:$0xff] }
 0x650   :  { %v7340_v32 = vadd.f32 %v9021_v2, %v7260_v62  ;;  %v7261_v54 = vadd.f32 %v14547_v58, %v7174_v41  ;;  %v6712_v14 = vadd.f32 %v8796_v7, %v14336_v37  ;;  %v6703_v39 = vpop.f32.mrb[133].mxu1  ;;  %v17329_v7 = vld [vmem:[#allocation104_spill] sm:$0xff]  ;;  %v14574_v2 = vpop.f32.mrb[122].mxu0 }
 0x651   :  { %v7418_v23 = vadd.f32 %v9022_v9, %v7338_v18  ;;  %v7339_v19 = vadd.f32 %v14547_v58, %v7252_v22  ;;  %v6704_v30 = vadd.f32 %v6703_v39, %v14320_v61  ;;  %v8797_v34 = vpop.f32.mrb[134].mxu1  ;;  %v9024_v61 = vld [vmem:[%s15474_s0 + $0x278] sm:$0xff]  ;;  %v17330_v39 = vld [vmem:[#allocation138_spill] sm:$0xff]  ;;  %v6483_v45 = vpop.f32.mrb[123].mxu0 }
 0x652   :  { %v7420_v26 = vmax.f32 %v7340_v32, 0.0  ;;  %v7341_v37 = vadd.f32 %v9023_v5, %v7261_v54  ;;  %v7090_v33 = vadd.f32 %v17329_v7, %v6712_v14  ;;  %v6715_v62 = vadd.f32 %v8797_v34, %v14342_v21  ;;  %v6706_v41 = vpop.f32.mrb[135].mxu1  ;;  %v17332_v21 = vld [vmem:[#allocation64_spill] sm:$0xff]  ;;  %v17333_v7 = vld [vmem:[#allocation149_spill] sm:$0xff] }
 0x653   :  { %v7498_v18 = vmax.f32 %v7418_v23, 0.0  ;;  %v7419_v22 = vadd.f32 %v9024_v61, %v7339_v19  ;;  %v7088_v32 = vadd.f32 %v17330_v39, %v6704_v30  ;;  %v6707_v9 = vadd.f32 %v6706_v41, %v14326_v63  ;;  %v17335_v63 = vld [vmem:[#allocation150_spill] sm:$0xff] }
 0x654   :  { %v7500_v54 = vmul.f32 %v7420_v26, %v17331_v17  ;;  %v7421_v5 = vmax.f32 %v7341_v37, 0.0  ;;  %v7177_v14 = vmul.f32 %v14537_v57, %v7090_v33  ;;  %v7091_v34 = vadd.f32 %v17332_v21, %v6715_v62  ;;  %v17336_v37 = vld [vmem:[#allocation24_spill] sm:$0xff] }
 0x655   :  { %v7578_v38 = vmul.f32 %v7498_v18, %v17333_v7  ;;  %v7499_v23 = vmax.f32 %v7419_v22, 0.0  ;;  %v7175_v49 = vmul.f32 %v14537_v57, %v7088_v32  ;;  %v7089_v59 = vadd.f32 %v17334_v29, %v6707_v9  ;;  %v9025_v18 = vld [vmem:[%s15474_s0 + $0x20] sm:$0xff]  ;;  %v14607_v32 = vpop.f32.mrb[124].mxu0 }
 0x656   :  { %7580 = vst [vmem:[%s15480_s7] sm:$0xff] %v7500_v54  ;;  %v7501_v19 = vmul.f32 %v7421_v5, %v17335_v63  ;;  %v7264_v30 = vadd.f32 %v14547_v58, %v7177_v14  ;;  %v7178_v26 = vmul.f32 %v14537_v57, %v7091_v34  ;;  %v6488_v5 = vpop.f32.mrb[125].mxu0  ;;  %v17337_v34 = vld [vmem:[#allocation127_spill] sm:$0xff] }
 0x657   :  { %7658 = vst [vmem:[%s15480_s7 + $0x270] sm:$0xff] %v7578_v38  ;;  %v7579_v33 = vmul.f32 %v7499_v23, %v17336_v37  ;;  %v7262_v62 = vadd.f32 %v14547_v58, %v7175_v49  ;;  %v7176_v29 = vmul.f32 %v14537_v57, %v7089_v59  ;;  %v8800_v41 = vpop.f32.mrb[136].mxu1  ;;  %v9026_v59 = vld [vmem:[%s15474_s0 + $0x10] sm:$0xff]  ;;  %v17341_v5 = vld [vmem:[#allocation74_spill] sm:$0xff] }
 0x658   :  { %7581 = vst [vmem:[%s15480_s7 + $0x8] sm:$0xff] %v7501_v19  ;;  %v7344_v61 = vadd.f32 %v9025_v18, %v7264_v30  ;;  %v7265_v22 = vadd.f32 %v14547_v58, %v7178_v26  ;;  %v6728_v38 = vadd.f32 %v8800_v41, %v14368_v51  ;;  %v6719_v39 = vpop.f32.mrb[137].mxu1  ;;  %v9027_v51 = vld [vmem:[%s15474_s0 + $0x28] sm:$0xff]  ;;  %v14622_v26 = vpop.f32.mrb[126].mxu0 }
 0x659   :  { %7659 = vst [vmem:[%s15480_s7 + $0x278] sm:$0xff] %v7579_v33  ;;  %v7342_v49 = vadd.f32 %v9026_v59, %v7262_v62  ;;  %v7263_v9 = vadd.f32 %v14547_v58, %v7176_v29  ;;  %v6720_v45 = vadd.f32 %v6719_v39, %v14352_v43  ;;  %v8801_v54 = vpop.f32.mrb[138].mxu1  ;;  %v9028_v43 = vld [vmem:[%s15474_s0 + $0x18] sm:$0xff]  ;;  %v17339_v39 = vld [vmem:[#allocation132_spill] sm:$0xff] }
 0x65a   :  { %v7424_v14 = vmax.f32 %v7344_v61, 0.0  ;;  %v7345_v21 = vadd.f32 %v9027_v51, %v7265_v22  ;;  %v7094_v23 = vadd.f32 %v17337_v34, %v6728_v38  ;;  %v6731_v19 = vadd.f32 %v8801_v54, %v14374_v44  ;;  %v6722_v30 = vpop.f32.mrb[139].mxu1  ;;  %v17338_v29 = vld [vmem:[#allocation121_spill] sm:$0xff]  ;;  %v6491_v61 = vpop.f32.mrb[127].mxu0 }
 0x65b   :  { %v7422_v33 = vmax.f32 %v7342_v49, 0.0  ;;  %v7343_v62 = vadd.f32 %v9028_v43, %v7263_v9  ;;  %v7092_v41 = vadd.f32 %v17338_v29, %v6720_v45  ;;  %v6723_v18 = vadd.f32 %v6722_v30, %v14358_v46  ;;  %v17340_v44 = vld [vmem:[#allocation41_spill] sm:$0xff] }
 0x65c   :  { %v7504_v22 = vmul.f32 %v7424_v14, %v17339_v39  ;;  %v7425_v59 = vmax.f32 %v7345_v21, 0.0  ;;  %v7181_v38 = vmul.f32 %v14537_v57, %v7094_v23  ;;  %v7095_v54 = vadd.f32 %v17340_v44, %v6731_v19  ;;  %v17343_v46 = vld [vmem:[#allocation69_spill] sm:$0xff]  ;;  %v17344_v21 = vld [vmem:[#allocation68_spill] sm:$0xff] }
 0x65d   :  { %v7502_v51 = vmul.f32 %v7422_v33, %v17341_v5  ;;  %v7423_v49 = vmax.f32 %v7343_v62, 0.0  ;;  %v7179_v34 = vmul.f32 %v14537_v57, %v7092_v41  ;;  %v7093_v24 = vadd.f32 %v17342_v50, %v6723_v18  ;;  %v9029_v33 = vld [vmem:[%s15474_s0 + $0x40] sm:$0xff]  ;;  %v14655_v18 = vpop.f32.mrb[128].mxu0 }
 0x65e   :  { %7584 = vst [vmem:[%s15480_s7 + $0x20] sm:$0xff] %v7504_v22  ;;  %v7505_v9 = vmul.f32 %v7425_v59, %v17343_v46  ;;  %v7268_v45 = vadd.f32 %v14547_v58, %v7181_v38  ;;  %v7182_v14 = vmul.f32 %v14537_v57, %v7095_v54  ;;  %v6496_v44 = vpop.f32.mrb[129].mxu0 }
 0x65f   :  { %7582 = vst [vmem:[%s15480_s7 + $0x10] sm:$0xff] %v7502_v51  ;;  %v7503_v23 = vmul.f32 %v7423_v49, %v17344_v21  ;;  %v7266_v19 = vadd.f32 %v14547_v58, %v7179_v34  ;;  %v7180_v50 = vmul.f32 %v14537_v57, %v7093_v24  ;;  %v8804_v30 = vpop.f32.mrb[140].mxu1  ;;  %v9030_v24 = vld [vmem:[%s15474_s0 + $0x30] sm:$0xff]  ;;  %v17345_v49 = vld [vmem:[#allocation7_spill] sm:$0xff] }
 0x660   :  { %7585 = vst [vmem:[%s15480_s7 + $0x28] sm:$0xff] %v7505_v9  ;;  %v7348_v43 = vadd.f32 %v9029_v33, %v7268_v45  ;;  %v7269_v62 = vadd.f32 %v14547_v58, %v7182_v14  ;;  %v6744_v29 = vadd.f32 %v8804_v30, %v14400_v16  ;;  %v6735_v41 = vpop.f32.mrb[141].mxu1  ;;  %v9031_v16 = vld [vmem:[%s15474_s0 + $0x48] sm:$0xff]  ;;  %v14670_v14 = vpop.f32.mrb[130].mxu0 }
 0x661   :  { %7583 = vst [vmem:[%s15480_s7 + $0x18] sm:$0xff] %v7503_v23  ;;  %v7346_v61 = vadd.f32 %v9030_v24, %v7266_v19  ;;  %v7267_v22 = vadd.f32 %v14547_v58, %v7180_v50  ;;  %v6736_v59 = vadd.f32 %v6735_v41, %v14384_v4  ;;  %v8805_v38 = vpop.f32.mrb[142].mxu1  ;;  %17346 = vst [vmem:[#allocation102_spill] sm:$0xff] %v14670_v14  ;;  %v9032_v4 = vld [vmem:[%s15474_s0 + $0x38] sm:$0xff]  ;;  %v17347_v50 = vld [vmem:[#allocation30_spill] sm:$0xff] }
 0x662   :  { %v7428_v54 = vmax.f32 %v7348_v43, 0.0  ;;  %v7349_v51 = vadd.f32 %v9031_v16, %v7269_v62  ;;  %v7098_v34 = vadd.f32 %v17345_v49, %v6744_v29  ;;  %v6747_v9 = vadd.f32 %v8805_v38, %v14406_v6  ;;  %v6738_v45 = vpop.f32.mrb[143].mxu1  ;;  %v6499_v43 = vpop.f32.mrb[131].mxu0  ;;  %v17348_v41 = vld [vmem:[#allocation134_spill] sm:$0xff]  ;;  %v17349_v6 = vld [vmem:[#allocation155_spill] sm:$0xff] }
 0x663   :  { %v7426_v23 = vmax.f32 %v7346_v61, 0.0  ;;  %v7347_v19 = vadd.f32 %v9032_v4, %v7267_v22  ;;  %v7096_v30 = vadd.f32 %v17347_v50, %v6736_v59  ;;  %v6739_v33 = vadd.f32 %v6738_v45, %v14390_v55  ;;  %v17350_v44 = vld [vmem:[#allocation79_spill] sm:$0xff]  ;;  %v17352_v55 = vld [vmem:[#allocation76_spill] sm:$0xff] }
 0x664   :  { %v7508_v62 = vmul.f32 %v7428_v54, %v17348_v41  ;;  %v7429_v24 = vmax.f32 %v7349_v51, 0.0  ;;  %v7185_v29 = vmul.f32 %v14537_v57, %v7098_v34  ;;  %v7099_v38 = vadd.f32 %v17349_v6, %v6747_v9  ;;  %v17353_v51 = vld [vmem:[#allocation5_spill] sm:$0xff] }
 0x665   :  { %v7506_v16 = vmul.f32 %v7426_v23, %v17350_v44  ;;  %v7427_v61 = vmax.f32 %v7347_v19, 0.0  ;;  %v7183_v49 = vmul.f32 %v14537_v57, %v7096_v30  ;;  %v7097_v15 = vadd.f32 %v17351_v52, %v6739_v33  ;;  %v9033_v23 = vld [vmem:[%s15474_s0 + $0x60] sm:$0xff]  ;;  %v14703_v33 = vpop.f32.mrb[132].mxu0 }
 0x666   :  { %7588 = vst [vmem:[%s15480_s7 + $0x40] sm:$0xff] %v7508_v62  ;;  %v7509_v22 = vmul.f32 %v7429_v24, %v17352_v55  ;;  %v7272_v59 = vadd.f32 %v14547_v58, %v7185_v29  ;;  %v7186_v54 = vmul.f32 %v14537_v57, %v7099_v38  ;;  %v6504_v6 = vpop.f32.mrb[133].mxu0 }
 0x667   :  { %7586 = vst [vmem:[%s15480_s7 + $0x30] sm:$0xff] %v7506_v16  ;;  %v7507_v34 = vmul.f32 %v7427_v61, %v17353_v51  ;;  %v7270_v9 = vadd.f32 %v14547_v58, %v7183_v49  ;;  %v7184_v52 = vmul.f32 %v14537_v57, %v7097_v15  ;;  %v8808_v45 = vpop.f32.mrb[144].mxu1  ;;  %v9034_v15 = vld [vmem:[%s15474_s0 + $0x50] sm:$0xff]  ;;  %v17354_v61 = vld [vmem:[#allocation157_spill] sm:$0xff]  ;;  %v17358_v6 = vld [vmem:[#allocation106_spill] sm:$0xff] }
 0x668   :  { %7589 = vst [vmem:[%s15480_s7 + $0x48] sm:$0xff] %v7509_v22  ;;  %v7352_v4 = vadd.f32 %v9033_v23, %v7272_v59  ;;  %v7273_v19 = vadd.f32 %v14547_v58, %v7186_v54  ;;  %v6760_v50 = vadd.f32 %v8808_v45, %v14432_v1  ;;  %v6751_v30 = vpop.f32.mrb[145].mxu1  ;;  %v9035_v1 = vld [vmem:[%s15474_s0 + $0x68] sm:$0xff]  ;;  %v14718_v54 = vpop.f32.mrb[134].mxu0 }
 0x669   :  { %7587 = vst [vmem:[%s15480_s7 + $0x38] sm:$0xff] %v7507_v34  ;;  %v7350_v43 = vadd.f32 %v9034_v15, %v7270_v9  ;;  %v7271_v62 = vadd.f32 %v14547_v58, %v7184_v52  ;;  %v6752_v24 = vadd.f32 %v6751_v30, %v14416_v35  ;;  %v8809_v29 = vpop.f32.mrb[146].mxu1  ;;  %v9036_v35 = vld [vmem:[%s15474_s0 + $0x58] sm:$0xff]  ;;  %v17355_v52 = vld [vmem:[#allocation75_spill] sm:$0xff]  ;;  %v17356_v30 = vld [vmem:[#allocation60_spill] sm:$0xff] }
 0x66a   :  { %v7432_v38 = vmax.f32 %v7352_v4, 0.0  ;;  %v7353_v16 = vadd.f32 %v9035_v1, %v7273_v19  ;;  %v7102_v49 = vadd.f32 %v17354_v61, %v6760_v50  ;;  %v6763_v22 = vadd.f32 %v8809_v29, %v14438_v12  ;;  %v6754_v59 = vpop.f32.mrb[147].mxu1  ;;  %v6507_v4 = vpop.f32.mrb[135].mxu0  ;;  %v17357_v12 = vld [vmem:[#allocation133_spill] sm:$0xff] }
 0x66b   :  { %v7430_v34 = vmax.f32 %v7350_v43, 0.0  ;;  %v7351_v9 = vadd.f32 %v9036_v35, %v7271_v62  ;;  %v7100_v45 = vadd.f32 %v17355_v52, %v6752_v24  ;;  %v6755_v23 = vadd.f32 %v6754_v59, %v14422_v60  ;;  %v17360_v60 = vld [vmem:[#allocation165_spill] sm:$0xff] }
 0x66c   :  { %v7512_v19 = vmul.f32 %v7432_v38, %v17356_v30  ;;  %v7433_v15 = vmax.f32 %v7353_v16, 0.0  ;;  %v7189_v50 = vmul.f32 %v14537_v57, %v7102_v49  ;;  %v7103_v29 = vadd.f32 %v17357_v12, %v6763_v22  ;;  %v17361_v16 = vld [vmem:[#allocation113_spill] sm:$0xff] }
 0x66d   :  { %v7510_v1 = vmul.f32 %v7430_v34, %v17358_v6  ;;  %v7431_v43 = vmax.f32 %v7351_v9, 0.0  ;;  %v7187_v61 = vmul.f32 %v14537_v57, %v7100_v45  ;;  %v7101_v14 = vadd.f32 %v17359_v42, %v6755_v23  ;;  %v9037_v34 = vld [vmem:[%s15474_s0 + $0x80] sm:$0xff]  ;;  %v14751_v23 = vpop.f32.mrb[136].mxu0 }
 0x66e   :  { %7592 = vst [vmem:[%s15480_s7 + $0x60] sm:$0xff] %v7512_v19  ;;  %v7513_v62 = vmul.f32 %v7433_v15, %v17360_v60  ;;  %v7276_v24 = vadd.f32 %v14547_v58, %v7189_v50  ;;  %v7190_v38 = vmul.f32 %v14537_v57, %v7103_v29  ;;  %17362 = vst [vmem:[#allocation37_spill] sm:$0xff] %v14751_v23  ;;  %v6512_v12 = vpop.f32.mrb[137].mxu0 }
 0x66f   :  { %7590 = vst [vmem:[%s15480_s7 + $0x50] sm:$0xff] %v7510_v1  ;;  %v7511_v49 = vmul.f32 %v7431_v43, %v17361_v16  ;;  %v7274_v22 = vadd.f32 %v14547_v58, %v7187_v61  ;;  %v7188_v42 = vmul.f32 %v14537_v57, %v7101_v14  ;;  %v8812_v59 = vpop.f32.mrb[148].mxu1  ;;  %v9038_v14 = vld [vmem:[%s15474_s0 + $0x70] sm:$0xff]  ;;  %v17368_v12 = vld [vmem:[#allocation185_spill] sm:$0xff] }
 0x670   :  { %7593 = vst [vmem:[%s15480_s7 + $0x68] sm:$0xff] %v7513_v62  ;;  %v7356_v35 = vadd.f32 %v9037_v34, %v7276_v24  ;;  %v7277_v9 = vadd.f32 %v14547_v58, %v7190_v38  ;;  %v6776_v52 = vadd.f32 %v8812_v59, %v14461_v48  ;;  %v6767_v45 = vpop.f32.mrb[149].mxu1  ;;  %v9039_v48 = vld [vmem:[%s15474_s0 + $0x88] sm:$0xff]  ;;  %v17363_v43 = vld [vmem:[#allocation88_spill] sm:$0xff]  ;;  %v14766_v38 = vpop.f32.mrb[138].mxu0 }
 0x671   :  { %7591 = vst [vmem:[%s15480_s7 + $0x58] sm:$0xff] %v7511_v49  ;;  %v7354_v4 = vadd.f32 %v9038_v14, %v7274_v22  ;;  %v7275_v19 = vadd.f32 %v14547_v58, %v7188_v42  ;;  %v6768_v15 = vadd.f32 %v6767_v45, %v14447_v0  ;;  %v8813_v50 = vpop.f32.mrb[150].mxu1  ;;  %17364 = vst [vmem:[#allocation120_spill] sm:$0xff] %v14766_v38  ;;  %v9040_v0 = vld [vmem:[%s15474_s0 + $0x78] sm:$0xff]  ;;  %v17365_v42 = vld [vmem:[#allocation46_spill] sm:$0xff] }
 0x672   :  { %v7436_v29 = vmax.f32 %v7356_v35, 0.0  ;;  %v7357_v1 = vadd.f32 %v9039_v48, %v7277_v9  ;;  %v7106_v61 = vadd.f32 %v17363_v43, %v6776_v52  ;;  %v6779_v62 = vadd.f32 %v8813_v50, %v14467_v47  ;;  %v6770_v24 = vpop.f32.mrb[151].mxu1  ;;  %v6515_v35 = vpop.f32.mrb[139].mxu0  ;;  %v17366_v45 = vld [vmem:[#allocation152_spill] sm:$0xff]  ;;  %v17367_v47 = vld [vmem:[#allocation9_spill] sm:$0xff]  ;;  %v17369_v38 = vld [vmem:[#allocation158_spill] sm:$0xff] }
 0x673   :  { %v7434_v49 = vmax.f32 %v7354_v4, 0.0  ;;  %v7355_v22 = vadd.f32 %v9040_v0, %v7275_v19  ;;  %v7104_v59 = vadd.f32 %v17365_v42, %v6768_v15  ;;  %v6771_v34 = vadd.f32 %v6770_v24, %v14453_v10  ;;  %v17370_v10 = vld [vmem:[#allocation93_spill] sm:$0xff] }
 0x674   :  { %v7516_v9 = vmul.f32 %v7436_v29, %v17366_v45  ;;  %v7437_v14 = vmax.f32 %v7357_v1, 0.0  ;;  %v7193_v52 = vmul.f32 %v14537_v57, %v7106_v61  ;;  %v7107_v50 = vadd.f32 %v17367_v47, %v6779_v62  ;;  %v17371_v1 = vld [vmem:[#allocation114_spill] sm:$0xff] }
 0x675   :  { %v7514_v48 = vmul.f32 %v7434_v49, %v17368_v12  ;;  %v7435_v4 = vmax.f32 %v7355_v22, 0.0  ;;  %v7191_v43 = vmul.f32 %v14537_v57, %v7104_v59  ;;  %v7105_v23 = vadd.f32 %v17369_v38, %v6771_v34  ;;  %v9041_v49 = vld [vmem:[%s15474_s0 + $0xa0] sm:$0xff]  ;;  %v14799_v34 = vpop.f32.mrb[140].mxu0 }
 0x676   :  { %7596 = vst [vmem:[%s15480_s7 + $0x80] sm:$0xff] %v7516_v9  ;;  %v7517_v19 = vmul.f32 %v7437_v14, %v17370_v10  ;;  %v7280_v15 = vadd.f32 %v14547_v58, %v7193_v52  ;;  %v7194_v29 = vmul.f32 %v14537_v57, %v7107_v50  ;;  %v6520_v47 = vpop.f32.mrb[141].mxu0 }
 0x677   :  { %7594 = vst [vmem:[%s15480_s7 + $0x70] sm:$0xff] %v7514_v48  ;;  %v7515_v61 = vmul.f32 %v7435_v4, %v17371_v1  ;;  %v7278_v62 = vadd.f32 %v14547_v58, %v7191_v43  ;;  %v7192_v24 = vmul.f32 %v14537_v57, %v7105_v23  ;;  %v8816_v38 = vpop.f32.mrb[152].mxu1  ;;  %v9042_v23 = vld [vmem:[%s15474_s0 + $0x90] sm:$0xff] }
 0x678   :  { %7597 = vst [vmem:[%s15480_s7 + $0x88] sm:$0xff] %v7517_v19  ;;  %v7360_v0 = vadd.f32 %v9041_v49, %v7280_v15  ;;  %v7281_v22 = vadd.f32 %v14547_v58, %v7194_v29  ;;  %v6792_v42 = vadd.f32 %v8816_v38, %v14488_v11  ;;  %v6783_v59 = vpop.f32.mrb[153].mxu1  ;;  %v9043_v11 = vld [vmem:[%s15474_s0 + $0xa8] sm:$0xff]  ;;  %v17372_v4 = vld [vmem:[#allocation148_spill] sm:$0xff]  ;;  %v14814_v29 = vpop.f32.mrb[142].mxu0 }
 0x679   :  { %7595 = vst [vmem:[%s15480_s7 + $0x78] sm:$0xff] %v7515_v61  ;;  %v7358_v35 = vadd.f32 %v9042_v23, %v7278_v62  ;;  %v7279_v9 = vadd.f32 %v14547_v58, %v7192_v24  ;;  %v6784_v14 = vadd.f32 %v6783_v59, %v14475_v8  ;;  %v8817_v52 = vpop.f32.mrb[154].mxu1  ;;  %v9044_v8 = vld [vmem:[%s15474_s0 + $0x98] sm:$0xff]  ;;  %v17373_v24 = vld [vmem:[#allocation91_spill] sm:$0xff] }
 0x67a   :  { %v7440_v50 = vmax.f32 %v7360_v0, 0.0  ;;  %v7361_v48 = vadd.f32 %v9043_v11, %v7281_v22  ;;  %v7110_v43 = vadd.f32 %v17372_v4, %v6792_v42  ;;  %v6795_v19 = vadd.f32 %v8817_v52, %v14494_v13  ;;  %v6786_v15 = vpop.f32.mrb[155].mxu1  ;;  %v6523_v0 = vpop.f32.mrb[143].mxu0  ;;  %v17374_v13 = vld [vmem:[#allocation62_spill] sm:$0xff] }
 0x67b   :  { %v7438_v61 = vmax.f32 %v7358_v35, 0.0  ;;  %v7359_v62 = vadd.f32 %v9044_v8, %v7279_v9  ;;  %v7108_v38 = vadd.f32 %v17373_v24, %v6784_v14  ;;  %v6787_v49 = vadd.f32 %v6786_v15, %v14481_v25  ;;  %v17375_v11 = vld [vmem:[#allocation54_spill] sm:$0xff] }
 0x67c   :  { %v7520_v22 = vmul.f32 %v7440_v50, %v17331_v17  ;;  %v7441_v59 = vmax.f32 %v7361_v48, 0.0  ;;  %v7197_v42 = vmul.f32 %v14537_v57, %v7110_v43  ;;  %v7111_v23 = vadd.f32 %v17374_v13, %v6795_v19  ;;  %v9045_v15 = vld [vmem:[%s15474_s0 + $0xc0] sm:$0xff] }
 0x67d   :  { %v7518_v52 = vmul.f32 %v7438_v61, %v17333_v7  ;;  %v7439_v35 = vmax.f32 %v7359_v62, 0.0  ;;  %v7195_v47 = vmul.f32 %v14537_v57, %v7108_v38  ;;  %v7109_v4 = vadd.f32 %v17375_v11, %v6787_v49  ;;  %v14847_v38 = vpop.f32.mrb[144].mxu0  ;;  %v9046_v49 = vld [vmem:[%s15474_s0 + $0xb0] sm:$0xff] }
 0x67e   :  { %7600 = vst [vmem:[%s15480_s7 + $0xa0] sm:$0xff] %v7520_v22  ;;  %v7521_v25 = vmul.f32 %v7441_v59, %v17335_v63  ;;  %v7284_v9 = vadd.f32 %v14547_v58, %v7197_v42  ;;  %v7198_v14 = vmul.f32 %v14537_v57, %v7111_v23  ;;  %v6528_v13 = vpop.f32.mrb[145].mxu0 }
 0x67f   :  { %7598 = vst [vmem:[%s15480_s7 + $0x90] sm:$0xff] %v7518_v52  ;;  %v7519_v50 = vmul.f32 %v7439_v35, %v17336_v37  ;;  %v7282_v48 = vadd.f32 %v14547_v58, %v7195_v47  ;;  %v7196_v43 = vmul.f32 %v14537_v57, %v7109_v4  ;;  %v8820_v19 = vpop.f32.mrb[156].mxu1  ;;  %v17376_v35 = vld [vmem:[#allocation12_spill] sm:$0xff] }
 0x680   :  { %7601 = vst [vmem:[%s15480_s7 + $0xa8] sm:$0xff] %v7521_v25  ;;  %v7364_v61 = vadd.f32 %v9045_v15, %v7284_v9  ;;  %v7285_v8 = vadd.f32 %v14547_v58, %v7198_v14  ;;  %v6808_v62 = vadd.f32 %v8820_v19, %v14512_v53  ;;  %v6799_v24 = vpop.f32.mrb[157].mxu1  ;;  %v9047_v53 = vld [vmem:[%s15474_s0 + $0xc8] sm:$0xff]  ;;  %v14862_v25 = vpop.f32.mrb[146].mxu0 }
 0x681   :  { %7599 = vst [vmem:[%s15480_s7 + $0x98] sm:$0xff] %v7519_v50  ;;  %v7362_v0 = vadd.f32 %v9046_v49, %v7282_v48  ;;  %v7283_v22 = vadd.f32 %v14547_v58, %v7196_v43  ;;  %v6800_v59 = vadd.f32 %v6799_v24, %v14500_v56  ;;  %v8821_v42 = vpop.f32.mrb[158].mxu1  ;;  %v9048_v56 = vld [vmem:[%s15474_s0 + $0xb8] sm:$0xff]  ;;  %v17377_v50 = vld [vmem:[#allocation159_spill] sm:$0xff]  ;;  %v6531_v19 = vpop.f32.mrb[147].mxu0 }
 0x682   :  { %v7444_v23 = vmax.f32 %v7364_v61, 0.0  ;;  %v7365_v52 = vadd.f32 %v9047_v53, %v7285_v8  ;;  %v7114_v47 = vadd.f32 %v17376_v35, %v6808_v62  ;;  %v6811_v11 = vadd.f32 %v8821_v42, %v14518_v3  ;;  %v6802_v4 = vpop.f32.mrb[159].mxu1  ;;  %v17378_v3 = vld [vmem:[#allocation73_spill] sm:$0xff]  ;;  %v17379_v42 = vld [vmem:[#allocation70_spill] sm:$0xff] }
 0x683   :  { %v7442_v9 = vmax.f32 %v7362_v0, 0.0  ;;  %v7363_v14 = vadd.f32 %v9048_v56, %v7283_v22  ;;  %v7112_v48 = vadd.f32 %v17377_v50, %v6800_v59  ;;  %v6803_v43 = vadd.f32 %v6802_v4, %v14506_v27  ;;  %v9050_v50 = vld [vmem:[%s15474_s0 + $0xd0] sm:$0xff] }
 0x684   :  { %v7524_v15 = vmul.f32 %v7444_v23, %v17339_v39  ;;  %v7445_v61 = vmax.f32 %v7365_v52, 0.0  ;;  %v7201_v8 = vmul.f32 %v14537_v57, %v7114_v47  ;;  %v7115_v62 = vadd.f32 %v17378_v3, %v6811_v11  ;;  %v9049_v47 = vld [vmem:[%s15474_s0 + $0xe0] sm:$0xff] }
 0x685   :  { %v7522_v24 = vmul.f32 %v7442_v9, %v17341_v5  ;;  %v7443_v49 = vmax.f32 %v7363_v14, 0.0  ;;  %v7199_v0 = vmul.f32 %v14537_v57, %v7112_v48  ;;  %v7113_v13 = vadd.f32 %v17379_v42, %v6803_v43  ;;  %v14895_v14 = vpop.f32.mrb[148].mxu0 }
 0x686   :  { %7604 = vst [vmem:[%s15480_s7 + $0xc0] sm:$0xff] %v7524_v15  ;;  %v7525_v27 = vmul.f32 %v7445_v61, %v17343_v46  ;;  %v7288_v22 = vadd.f32 %v14547_v58, %v7201_v8  ;;  %v7202_v59 = vmul.f32 %v14537_v57, %v7115_v62  ;;  %v6536_v61 = vpop.f32.mrb[149].mxu0  ;;  %v17380_v62 = vld [vmem:[#allocation119_spill] sm:$0xff] }
 0x687   :  { %7602 = vst [vmem:[%s15480_s7 + $0xb0] sm:$0xff] %v7522_v24  ;;  %v7523_v23 = vmul.f32 %v7443_v49, %v17344_v21  ;;  %v7286_v53 = vadd.f32 %v14547_v58, %v7199_v0  ;;  %v7200_v52 = vmul.f32 %v14537_v57, %v7113_v13  ;;  %v8824_v35 = vpop.f32.mrb[160].mxu1  ;;  %v14910_v42 = vpop.f32.mrb[150].mxu0 }
 0x688   :  { %7605 = vst [vmem:[%s15480_s7 + $0xc8] sm:$0xff] %v7525_v27  ;;  %v7368_v11 = vadd.f32 %v9049_v47, %v7288_v22  ;;  %v7289_v4 = vadd.f32 %v14547_v58, %v7202_v59  ;;  %v6824_v9 = vadd.f32 %v8824_v35, %v14532_v40  ;;  %v6815_v56 = vpop.f32.mrb[161].mxu1  ;;  %v9051_v40 = vld [vmem:[%s15474_s0 + $0xe8] sm:$0xff]  ;;  %v17381_v22 = vld [vmem:[#allocation32_spill] sm:$0xff] }
 0x689   :  { %7603 = vst [vmem:[%s15480_s7 + $0xb8] sm:$0xff] %v7523_v23  ;;  %v7366_v48 = vadd.f32 %v9050_v50, %v7286_v53  ;;  %v7287_v43 = vadd.f32 %v14547_v58, %v7200_v52  ;;  %v6816_v19 = vadd.f32 %v6815_v56, %v14524_v28  ;;  %v8825_v15 = vpop.f32.mrb[162].mxu1  ;;  %v9052_v28 = vld [vmem:[%s15474_s0 + $0xd8] sm:$0xff]  ;;  %v6539_v53 = vpop.f32.mrb[151].mxu0  ;;  %v17383_v50 = vld [vmem:[#allocation176_spill] sm:$0xff] }
 0x68a   :  { %v7448_v8 = vmax.f32 %v7368_v11, 0.0  ;;  %v7369_v3 = vadd.f32 %v9051_v40, %v7289_v4  ;;  %v7118_v24 = vadd.f32 %v17380_v62, %v6824_v9  ;;  %v6827_v49 = vadd.f32 %v8825_v15, %v14542_v36  ;;  %v6818_v0 = vpop.f32.mrb[163].mxu1  ;;  %v17382_v36 = vld [vmem:[#allocation128_spill] sm:$0xff] }
 0x68b   :  { %v7446_v13 = vmax.f32 %v7366_v48, 0.0  ;;  %v7367_v27 = vadd.f32 %v9052_v28, %v7287_v43  ;;  %v7116_v59 = vadd.f32 %v17381_v22, %v6816_v19  ;;  %v6819_v23 = vadd.f32 %v6818_v0, %v14528_v31  ;;  %v9054_v28 = vld [vmem:[%s15474_s0 + $0xf0] sm:$0xff] }
 0x68c   :  { %v7528_v52 = vmul.f32 %v7448_v8, %v17348_v41  ;;  %v7449_v35 = vmax.f32 %v7369_v3, 0.0  ;;  %v7205_v47 = vmul.f32 %v14537_v57, %v7118_v24  ;;  %v7119_v11 = vadd.f32 %v17382_v36, %v6827_v49  ;;  %v9053_v3 = vld [vmem:[%s15474_s0 + $0x100] sm:$0xff] }
 0x68d   :  { %v7526_v4 = vmul.f32 %v7446_v13, %v17350_v44  ;;  %v7447_v9 = vmax.f32 %v7367_v27, 0.0  ;;  %v7203_v56 = vmul.f32 %v14537_v57, %v7116_v59  ;;  %v7117_v48 = vadd.f32 %v17383_v50, %v6819_v23  ;;  %v14943_v13 = vpop.f32.mrb[152].mxu0 }
 0x68e   :  { %7608 = vst [vmem:[%s15480_s7 + $0xe0] sm:$0xff] %v7528_v52  ;;  %v7529_v31 = vmul.f32 %v7449_v35, %v17352_v55  ;;  %v7292_v43 = vadd.f32 %v14547_v58, %v7205_v47  ;;  %v7206_v19 = vmul.f32 %v14537_v57, %v7119_v11  ;;  %v6544_v53 = vpop.f32.mrb[153].mxu0  ;;  %v17384_v47 = vld [vmem:[#allocation179_spill] sm:$0xff] }
 0x68f   :  { %7606 = vst [vmem:[%s15480_s7 + $0xd0] sm:$0xff] %v7526_v4  ;;  %v7527_v15 = vmul.f32 %v7447_v9, %v17353_v51  ;;  %v7290_v61 = vadd.f32 %v14547_v58, %v7203_v56  ;;  %v7204_v8 = vmul.f32 %v14537_v57, %v7117_v48  ;;  %v8828_v40 = vpop.f32.mrb[164].mxu1  ;;  %v14958_v9 = vpop.f32.mrb[154].mxu0  ;;  %v17385_v48 = vld [vmem:[#allocation164_spill] sm:$0xff] }
 0x690   :  { %7609 = vst [vmem:[%s15480_s7 + $0xe8] sm:$0xff] %v7529_v31  ;;  %v7372_v62 = vadd.f32 %v9053_v3, %v7292_v43  ;;  %v7293_v24 = vadd.f32 %v14547_v58, %v7206_v19  ;;  %v6840_v49 = vadd.f32 %v8828_v40, %v14607_v32  ;;  %v6831_v0 = vpop.f32.mrb[165].mxu1  ;;  %v9055_v32 = vld [vmem:[%s15474_s0 + $0x108] sm:$0xff]  ;;  %v6547_v19 = vpop.f32.mrb[155].mxu0 }
 0x691   :  { %7607 = vst [vmem:[%s15480_s7 + $0xd8] sm:$0xff] %v7527_v15  ;;  %v7370_v27 = vadd.f32 %v9054_v28, %v7290_v61  ;;  %v7291_v22 = vadd.f32 %v14547_v58, %v7204_v8  ;;  %v6832_v59 = vadd.f32 %v6831_v0, %v14562_v20  ;;  %v8829_v23 = vpop.f32.mrb[166].mxu1  ;;  %v9056_v20 = vld [vmem:[%s15474_s0 + $0xf8] sm:$0xff] }
 0x692   :  { %v7452_v52 = vmax.f32 %v7372_v62, 0.0  ;;  %v7373_v35 = vadd.f32 %v9055_v32, %v7293_v24  ;;  %v7122_v36 = vadd.f32 %v17384_v47, %v6840_v49  ;;  %v6843_v11 = vadd.f32 %v8829_v23, %v14622_v26  ;;  %v6834_v4 = vpop.f32.mrb[167].mxu1  ;;  %v17386_v26 = vld [vmem:[#allocation186_spill] sm:$0xff] }
 0x693   :  { %v7450_v56 = vmax.f32 %v7370_v27, 0.0  ;;  %v7371_v50 = vadd.f32 %v9056_v20, %v7291_v22  ;;  %v7120_v31 = vadd.f32 %v17385_v48, %v6832_v59  ;;  %v6835_v43 = vadd.f32 %v6834_v4, %v14574_v2  ;;  %v17387_v49 = vld [vmem:[#allocation78_spill] sm:$0xff]  ;;  %v9058_v4 = vld [vmem:[%s15474_s0 + $0x110] sm:$0xff] }
 0x694   :  { %v7532_v15 = vmul.f32 %v7452_v52, %v17356_v30  ;;  %v7453_v61 = vmax.f32 %v7373_v35, 0.0  ;;  %v7209_v8 = vmul.f32 %v14537_v57, %v7122_v36  ;;  %v7123_v40 = vadd.f32 %v17386_v26, %v6843_v11  ;;  %v9057_v52 = vld [vmem:[%s15474_s0 + $0x120] sm:$0xff] }
 0x695   :  { %v7530_v3 = vmul.f32 %v7450_v56, %v17358_v6  ;;  %v7451_v62 = vmax.f32 %v7371_v50, 0.0  ;;  %v7207_v24 = vmul.f32 %v14537_v57, %v7120_v31  ;;  %v7121_v0 = vadd.f32 %v17387_v49, %v6835_v43  ;;  %v14991_v11 = vpop.f32.mrb[156].mxu0 }
 0x696   :  { %7612 = vst [vmem:[%s15480_s7 + $0x100] sm:$0xff] %v7532_v15  ;;  %v7533_v2 = vmul.f32 %v7453_v61, %v17360_v60  ;;  %v7296_v28 = vadd.f32 %v14547_v58, %v7209_v8  ;;  %v7210_v27 = vmul.f32 %v14537_v57, %v7123_v40  ;;  %v6552_v31 = vpop.f32.mrb[157].mxu0  ;;  %v17388_v15 = vld [vmem:[#allocation141_spill] sm:$0xff] }
 0x697   :  { %7610 = vst [vmem:[%s15480_s7 + $0xf0] sm:$0xff] %v7530_v3  ;;  %v7531_v22 = vmul.f32 %v7451_v62, %v17361_v16  ;;  %v7294_v59 = vadd.f32 %v14547_v58, %v7207_v24  ;;  %v7208_v23 = vmul.f32 %v14537_v57, %v7121_v0  ;;  %v8832_v53 = vpop.f32.mrb[168].mxu1  ;;  %v15006_v40 = vpop.f32.mrb[158].mxu0  ;;  %v17389_v24 = vld [vmem:[#allocation180_spill] sm:$0xff]  ;;  %v17390_v0 = vld [vmem:[#allocation102_spill] sm:$0xff] }
 0x698   :  { %7613 = vst [vmem:[%s15480_s7 + $0x108] sm:$0xff] %v7533_v2  ;;  %v7376_v32 = vadd.f32 %v9057_v52, %v7296_v28  ;;  %v7297_v35 = vadd.f32 %v14547_v58, %v7210_v27  ;;  %v6856_v47 = vadd.f32 %v8832_v53, %v14703_v33  ;;  %v6847_v36 = vpop.f32.mrb[169].mxu1  ;;  %v9059_v33 = vld [vmem:[%s15474_s0 + $0x128] sm:$0xff]  ;;  %v6555_v28 = vpop.f32.mrb[159].mxu0 }
 0x699   :  { %7611 = vst [vmem:[%s15480_s7 + $0xf8] sm:$0xff] %v7531_v22  ;;  %v7374_v56 = vadd.f32 %v9058_v4, %v7294_v59  ;;  %v7295_v20 = vadd.f32 %v14547_v58, %v7208_v23  ;;  %v6848_v50 = vadd.f32 %v6847_v36, %v14655_v18  ;;  %v8833_v48 = vpop.f32.mrb[170].mxu1  ;;  %v9060_v18 = vld [vmem:[%s15474_s0 + $0x118] sm:$0xff] }
 0x69a   :  { %v7456_v43 = vmax.f32 %v7376_v32, 0.0  ;;  %v7377_v19 = vadd.f32 %v9059_v33, %v7297_v35  ;;  %v7126_v61 = vadd.f32 %v17388_v15, %v6856_v47  ;;  %v6859_v8 = vadd.f32 %v8833_v48, %v14718_v54  ;;  %v6850_v26 = vpop.f32.mrb[171].mxu1  ;;  %v17391_v54 = vld [vmem:[#allocation168_spill] sm:$0xff]  ;;  %v17392_v35 = vld [vmem:[#allocation43_spill] sm:$0xff] }
 0x69b   :  { %v7454_v3 = vmax.f32 %v7374_v56, 0.0  ;;  %v7375_v62 = vadd.f32 %v9060_v18, %v7295_v20  ;;  %v7124_v49 = vadd.f32 %v17389_v24, %v6848_v50  ;;  %v6851_v2 = vadd.f32 %v6850_v26, %v17390_v0  ;;  %v9062_v26 = vld [vmem:[%s15474_s0 + $0x130] sm:$0xff] }
 0x69c   :  { %v7536_v27 = vmul.f32 %v7456_v43, %v17366_v45  ;;  %v7457_v22 = vmax.f32 %v7377_v19, 0.0  ;;  %v7213_v59 = vmul.f32 %v14537_v57, %v7126_v61  ;;  %v7127_v23 = vadd.f32 %v17391_v54, %v6859_v8  ;;  %v9061_v43 = vld [vmem:[%s15474_s0 + $0x140] sm:$0xff] }
 0x69d   :  { %v7534_v53 = vmul.f32 %v7454_v3, %v17368_v12  ;;  %v7455_v52 = vmax.f32 %v7375_v62, 0.0  ;;  %v7211_v32 = vmul.f32 %v14537_v57, %v7124_v49  ;;  %v7125_v47 = vadd.f32 %v17392_v35, %v6851_v2  ;;  %v15039_v8 = vpop.f32.mrb[160].mxu0  ;;  %v17393_v62 = vld [vmem:[#allocation37_spill] sm:$0xff]  ;;  %v17395_v35 = vld [vmem:[#allocation126_spill] sm:$0xff] }
 0x69e   :  { %7616 = vst [vmem:[%s15480_s7 + $0x120] sm:$0xff] %v7536_v27  ;;  %v7537_v36 = vmul.f32 %v7457_v22, %v17370_v10  ;;  %v7300_v4 = vadd.f32 %v14547_v58, %v7213_v59  ;;  %v7214_v56 = vmul.f32 %v14537_v57, %v7127_v23  ;;  %v6560_v0 = vpop.f32.mrb[161].mxu0  ;;  %v17394_v27 = vld [vmem:[#allocation16_spill] sm:$0xff] }
 0x69f   :  { %7614 = vst [vmem:[%s15480_s7 + $0x110] sm:$0xff] %v7534_v53  ;;  %v7535_v20 = vmul.f32 %v7455_v52, %v17371_v1  ;;  %v7298_v50 = vadd.f32 %v14547_v58, %v7211_v32  ;;  %v7212_v48 = vmul.f32 %v14537_v57, %v7125_v47  ;;  %v8836_v31 = vpop.f32.mrb[172].mxu1  ;;  %v15054_v23 = vpop.f32.mrb[162].mxu0  ;;  %v9064_v52 = vld [vmem:[%s15474_s0 + $0x138] sm:$0xff] }
 0x6a0   :  { %7617 = vst [vmem:[%s15480_s7 + $0x128] sm:$0xff] %v7537_v36  ;;  %v7380_v33 = vadd.f32 %v9061_v43, %v7300_v4  ;;  %v7301_v19 = vadd.f32 %v14547_v58, %v7214_v56  ;;  %v6872_v15 = vadd.f32 %v8836_v31, %v14799_v34  ;;  %v6863_v61 = vpop.f32.mrb[173].mxu1  ;;  %v9063_v34 = vld [vmem:[%s15474_s0 + $0x148] sm:$0xff]  ;;  %v17396_v36 = vld [vmem:[#allocation120_spill] sm:$0xff]  ;;  %v6563_v56 = vpop.f32.mrb[163].mxu0 }
 0x6a1   :  { %7615 = vst [vmem:[%s15480_s7 + $0x118] sm:$0xff] %v7535_v20  ;;  %v7378_v3 = vadd.f32 %v9062_v26, %v7298_v50  ;;  %v7299_v18 = vadd.f32 %v14547_v58, %v7212_v48  ;;  %v6864_v24 = vadd.f32 %v6863_v61, %v17393_v62  ;;  %v8837_v49 = vpop.f32.mrb[174].mxu1  ;;  %v17399_v56 = vld [vmem:[#allocation122_spill] sm:$0xff] }
 0x6a2   :  { %v7460_v2 = vmax.f32 %v7380_v33, 0.0  ;;  %v7381_v28 = vadd.f32 %v9063_v34, %v7301_v19  ;;  %v7130_v22 = vadd.f32 %v17394_v27, %v6872_v15  ;;  %v6875_v59 = vadd.f32 %v8837_v49, %v14814_v29  ;;  %v6866_v54 = vpop.f32.mrb[175].mxu1  ;;  %v17397_v29 = vld [vmem:[#allocation182_spill] sm:$0xff]  ;;  %v17398_v15 = vld [vmem:[#allocation124_spill] sm:$0xff] }
 0x6a3   :  { %v7458_v53 = vmax.f32 %v7378_v3, 0.0  ;;  %v7379_v32 = vadd.f32 %v9064_v52, %v7299_v18  ;;  %v7128_v47 = vadd.f32 %v17395_v35, %v6864_v24  ;;  %v6867_v4 = vadd.f32 %v6866_v54, %v17396_v36  ;;  %v9066_v54 = vld [vmem:[%s15474_s0 + $0x150] sm:$0xff] }
 0x6a4   :  { %v7540_v20 = vmul.f32 %v7460_v2, %v17331_v17  ;;  %v7461_v50 = vmax.f32 %v7381_v28, 0.0  ;;  %v7217_v48 = vmul.f32 %v14537_v57, %v7130_v22  ;;  %v7131_v31 = vadd.f32 %v17397_v29, %v6875_v59  ;;  %v9065_v2 = vld [vmem:[%s15474_s0 + $0x160] sm:$0xff] }
 0x6a5   :  { %v7538_v43 = vmul.f32 %v7458_v53, %v17333_v7  ;;  %v7459_v33 = vmax.f32 %v7379_v32, 0.0  ;;  %v7215_v19 = vmul.f32 %v14537_v57, %v7128_v47  ;;  %v7129_v61 = vadd.f32 %v17398_v15, %v6867_v4  ;;  %v15087_v59 = vpop.f32.mrb[164].mxu0 }
 0x6a6   :  { %7620 = vst [vmem:[%s15480_s7 + $0x140] sm:$0xff] %v7540_v20  ;;  %v7541_v26 = vmul.f32 %v7461_v50, %v17335_v63  ;;  %v7304_v3 = vadd.f32 %v14547_v58, %v7217_v48  ;;  %v7218_v18 = vmul.f32 %v14537_v57, %v7131_v31  ;;  %v6568_v47 = vpop.f32.mrb[165].mxu0 }
 0x6a7   :  { %7618 = vst [vmem:[%s15480_s7 + $0x130] sm:$0xff] %v7538_v43  ;;  %v7539_v62 = vmul.f32 %v7459_v33, %v17336_v37  ;;  %v7302_v24 = vadd.f32 %v14547_v58, %v7215_v19  ;;  %v7216_v49 = vmul.f32 %v14537_v57, %v7129_v61  ;;  %v8840_v0 = vpop.f32.mrb[176].mxu1  ;;  %v15102_v29 = vpop.f32.mrb[166].mxu0  ;;  %v17400_v33 = vld [vmem:[#allocation71_spill] sm:$0xff] }
 0x6a8   :  { %7621 = vst [vmem:[%s15480_s7 + $0x148] sm:$0xff] %v7541_v26  ;;  %v7384_v34 = vadd.f32 %v9065_v2, %v7304_v3  ;;  %v7305_v28 = vadd.f32 %v14547_v58, %v7218_v18  ;;  %v6888_v27 = vadd.f32 %v8840_v0, %v14895_v14  ;;  %v6879_v22 = vpop.f32.mrb[177].mxu1  ;;  %v9067_v14 = vld [vmem:[%s15474_s0 + $0x168] sm:$0xff]  ;;  %v6571_v61 = vpop.f32.mrb[167].mxu0  ;;  %v17402_v2 = vld [vmem:[#allocation48_spill] sm:$0xff] }
 0x6a9   :  { %7619 = vst [vmem:[%s15480_s7 + $0x138] sm:$0xff] %v7539_v62  ;;  %v7382_v53 = vadd.f32 %v9066_v54, %v7302_v24  ;;  %v7303_v52 = vadd.f32 %v14547_v58, %v7216_v49  ;;  %v6880_v32 = vadd.f32 %v6879_v22, %v14847_v38  ;;  %v8841_v35 = vpop.f32.mrb[178].mxu1  ;;  %v9068_v38 = vld [vmem:[%s15474_s0 + $0x158] sm:$0xff] }
 0x6aa   :  { %v7464_v36 = vmax.f32 %v7384_v34, 0.0  ;;  %v7385_v4 = vadd.f32 %v9067_v14, %v7305_v28  ;;  %v7134_v20 = vadd.f32 %v17399_v56, %v6888_v27  ;;  %v6891_v50 = vadd.f32 %v8841_v35, %v14910_v42  ;;  %v6882_v48 = vpop.f32.mrb[179].mxu1  ;;  %v17401_v42 = vld [vmem:[#allocation172_spill] sm:$0xff] }
 0x6ab   :  { %v7462_v31 = vmax.f32 %v7382_v53, 0.0  ;;  %v7383_v43 = vadd.f32 %v9068_v38, %v7303_v52  ;;  %v7132_v19 = vadd.f32 %v17400_v33, %v6880_v32  ;;  %v6883_v15 = vadd.f32 %v6882_v48, %v14862_v25  ;;  %v9069_v32 = vld [vmem:[%s15474_s0 + $0x180] sm:$0xff] }
 0x6ac   :  { %v7544_v26 = vmul.f32 %v7464_v36, %v17339_v39  ;;  %v7465_v3 = vmax.f32 %v7385_v4, 0.0  ;;  %v7221_v18 = vmul.f32 %v14537_v57, %v7134_v20  ;;  %v7135_v62 = vadd.f32 %v17401_v42, %v6891_v50  ;;  %v17403_v33 = vld [vmem:[#allocation170_spill] sm:$0xff] }
 0x6ad   :  { %v7542_v24 = vmul.f32 %v7462_v31, %v17341_v5  ;;  %v7463_v49 = vmax.f32 %v7383_v43, 0.0  ;;  %v7219_v0 = vmul.f32 %v14537_v57, %v7132_v19  ;;  %v7133_v34 = vadd.f32 %v17402_v2, %v6883_v15  ;;  %v15135_v4 = vpop.f32.mrb[168].mxu0 }
 0x6ae   :  { %7624 = vst [vmem:[%s15480_s7 + $0x160] sm:$0xff] %v7544_v26  ;;  %v7545_v25 = vmul.f32 %v7465_v3, %v17343_v46  ;;  %v7308_v28 = vadd.f32 %v14547_v58, %v7221_v18  ;;  %v7222_v27 = vmul.f32 %v14537_v57, %v7135_v62  ;;  %v6576_v31 = vpop.f32.mrb[169].mxu0  ;;  %v17404_v18 = vld [vmem:[#allocation33_spill] sm:$0xff] }
 0x6af   :  { %7622 = vst [vmem:[%s15480_s7 + $0x150] sm:$0xff] %v7542_v24  ;;  %v7543_v22 = vmul.f32 %v7463_v49, %v17344_v21  ;;  %v7306_v54 = vadd.f32 %v14547_v58, %v7219_v0  ;;  %v7220_v53 = vmul.f32 %v14537_v57, %v7133_v34  ;;  %v8844_v52 = vpop.f32.mrb[180].mxu1  ;;  %v9070_v57 = vld [vmem:[%s15474_s0 + $0x170] sm:$0xff]  ;;  %v15150_v26 = vpop.f32.mrb[170].mxu0  ;;  %v17405_v34 = vld [vmem:[#allocation3_spill] sm:$0xff] }
 0x6b0   :  { %7625 = vst [vmem:[%s15480_s7 + $0x168] sm:$0xff] %v7545_v25  ;;  %v7388_v35 = vadd.f32 %v9069_v32, %v7308_v28  ;;  %v7309_v47 = vadd.f32 %v14547_v58, %v7222_v27  ;;  %v6904_v36 = vadd.f32 %v8844_v52, %v14991_v11  ;;  %v6895_v14 = vpop.f32.mrb[181].mxu1  ;;  %v9071_v11 = vld [vmem:[%s15474_s0 + $0x188] sm:$0xff]  ;;  %v6579_v24 = vpop.f32.mrb[171].mxu0  ;;  %v15175_v52 = vld [vmem:[%s15479_s6] ss:$0 sm:$0xff] }
 0x6b1   :  { %7623 = vst [vmem:[%s15480_s7 + $0x158] sm:$0xff] %v7543_v22  ;;  %v7386_v56 = vadd.f32 %v9070_v57, %v7306_v54  ;;  %v7307_v20 = vadd.f32 %v14547_v58, %v7220_v53  ;;  %v6896_v50 = vadd.f32 %v6895_v14, %v14943_v13  ;;  %v8845_v48 = vpop.f32.mrb[182].mxu1  ;;  %v9072_v58 = vld [vmem:[%s15474_s0 + $0x178] sm:$0xff]  ;;  %v17406_v54 = vld [vmem:[#allocation96_spill] sm:$0xff] }
 0x6b2   :  { %v7468_v38 = vmax.f32 %v7388_v35, 0.0  ;;  %v7389_v43 = vadd.f32 %v9071_v11, %v7309_v47  ;;  %v7138_v19 = vadd.f32 %v17403_v33, %v6904_v36  ;;  %v6907_v15 = vadd.f32 %v8845_v48, %v15006_v40  ;;  %v6898_v61 = vpop.f32.mrb[183].mxu1  ;;  %v15161_v40 = vld [vmem:[%s15478_s5] ss:$0 sm:$0xff]  ;;  %v9076_v11 = vld [vmem:[%s15474_s0 + $0x190] sm:$0xff] }
 0x6b3   :  { %v7466_v3 = vmax.f32 %v7386_v56, 0.0  ;;  %v7387_v13 = vadd.f32 %v9072_v58, %v7307_v20  ;;  %v7136_v42 = vadd.f32 %v17404_v18, %v6896_v50  ;;  %v6899_v62 = vadd.f32 %v6898_v61, %v14958_v9  ;;  %v9075_v56 = vld [vmem:[%s15474_s0 + $0x1a0] sm:$0xff] }
 0x6b4   :  { %v7548_v49 = vmul.f32 %v7468_v38, %v17348_v41  ;;  %v7469_v0 = vmax.f32 %v7389_v43, 0.0  ;;  %v7225_v2 = vmul.f32 %v15161_v40, %v7138_v19  ;;  %v7139_v25 = vadd.f32 %v17405_v34, %v6907_v15 }
 0x6b5   :  { %v7546_v28 = vmul.f32 %v7466_v3, %v17350_v44  ;;  %v7467_v27 = vmax.f32 %v7387_v13, 0.0  ;;  %v7223_v22 = vmul.f32 %v15161_v40, %v7136_v42  ;;  %v7137_v9 = vadd.f32 %v17406_v54, %v6899_v62  ;;  %v6582_v38 = vpop.f32.mrb[172].mxu0  ;;  %v17407_v13 = vld [vmem:[#allocation178_spill] sm:$0xff] }
 0x6b6   :  { %7628 = vst [vmem:[%s15480_s7 + $0x180] sm:$0xff] %v7548_v49  ;;  %v7549_v53 = vmul.f32 %v7469_v0, %v17352_v55  ;;  %v7312_v32 = vadd.f32 %v15175_v52, %v7225_v2  ;;  %v7226_v35 = vmul.f32 %v15161_v40, %v7139_v25  ;;  %v6584_v61 = vpop.f32.mrb[173].mxu0  ;;  %v9078_v0 = vld [vmem:[%s15474_s0 + $0x198] sm:$0xff]  ;;  %v17408_v2 = vld [vmem:[#allocation14_spill] sm:$0xff] }
 0x6b7   :  { %7626 = vst [vmem:[%s15480_s7 + $0x170] sm:$0xff] %v7546_v28  ;;  %v7547_v47 = vmul.f32 %v7467_v27, %v17353_v51  ;;  %v7310_v36 = vadd.f32 %v15175_v52, %v7223_v22  ;;  %v7224_v14 = vmul.f32 %v15161_v40, %v7137_v9  ;;  %v8848_v57 = vpop.f32.mrb[184].mxu1  ;;  %v6585_v24 = vpop.f32.mrb[174].mxu0  ;;  %v17409_v9 = vld [vmem:[#allocation44_spill] sm:$0xff] }
 0x6b8   :  { %7629 = vst [vmem:[%s15480_s7 + $0x188] sm:$0xff] %v7549_v53  ;;  %v7392_v20 = vadd.f32 %v9075_v56, %v7312_v32  ;;  %v7313_v50 = vadd.f32 %v15175_v52, %v7226_v35  ;;  %v6920_v48 = vadd.f32 %v8848_v57, %v15087_v59  ;;  %v6911_v31 = vpop.f32.mrb[185].mxu1  ;;  %v9077_v59 = vld [vmem:[%s15474_s0 + $0x1a8] sm:$0xff]  ;;  %v6587_v28 = vpop.f32.mrb[175].mxu0  ;;  %v9080_v61 = vld [vmem:[%s15474_s0 + $0x1b0] sm:$0xff] }
 0x6b9   :  { %7627 = vst [vmem:[%s15480_s7 + $0x178] sm:$0xff] %v7547_v47  ;;  %v7390_v43 = vadd.f32 %v9076_v11, %v7310_v36  ;;  %v7311_v33 = vadd.f32 %v15175_v52, %v7224_v14  ;;  %v6912_v19 = vadd.f32 %v6911_v31, %v15039_v8  ;;  %v8849_v15 = vpop.f32.mrb[186].mxu1  ;;  %v17410_v47 = vld [vmem:[#allocation51_spill] sm:$0xff]  ;;  %v9079_v31 = vld [vmem:[%s15474_s0 + $0x1c0] sm:$0xff]  ;;  %v9082_v28 = vld [vmem:[%s15474_s0 + $0x1b8] sm:$0xff] }
 0x6ba   :  { %v7472_v3 = vmax.f32 %v7392_v20, 0.0  ;;  %v7393_v58 = vadd.f32 %v9077_v59, %v7313_v50  ;;  %v7142_v18 = vadd.f32 %v17407_v13, %v6920_v48  ;;  %v6923_v42 = vadd.f32 %v8849_v15, %v15102_v29  ;;  %v6914_v62 = vpop.f32.mrb[187].mxu1 }
 0x6bb   :  { %v7470_v49 = vmax.f32 %v7390_v43, 0.0  ;;  %v7391_v8 = vadd.f32 %v9078_v0, %v7311_v33  ;;  %v7140_v34 = vadd.f32 %v17408_v2, %v6912_v19  ;;  %v6915_v25 = vadd.f32 %v6914_v62, %v15054_v23 }
 0x6bc   :  { %v7552_v27 = vmul.f32 %v7472_v3, %v17356_v30  ;;  %v7473_v22 = vmax.f32 %v7393_v58, 0.0  ;;  %v7229_v54 = vmul.f32 %v15161_v40, %v7142_v18  ;;  %v7143_v29 = vadd.f32 %v17409_v9, %v6923_v42 }
 0x6bd   :  { %v7550_v53 = vmul.f32 %v7470_v49, %v17358_v6  ;;  %v7471_v32 = vmax.f32 %v7391_v8, 0.0  ;;  %v7227_v35 = vmul.f32 %v15161_v40, %v7140_v34  ;;  %v7141_v36 = vadd.f32 %v17410_v47, %v6915_v25  ;;  %v6590_v15 = vpop.f32.mrb[176].mxu0  ;;  %v17411_v49 = vld [vmem:[#allocation82_spill] sm:$0xff] }
 0x6be   :  { %7632 = vst [vmem:[%s15480_s7 + $0x1a0] sm:$0xff] %v7552_v27  ;;  %v7553_v23 = vmul.f32 %v7473_v22, %v17360_v60  ;;  %v7316_v14 = vadd.f32 %v15175_v52, %v7229_v54  ;;  %v7230_v57 = vmul.f32 %v15161_v40, %v7143_v29  ;;  %v6592_v18 = vpop.f32.mrb[177].mxu0 }
 0x6bf   :  { %7630 = vst [vmem:[%s15480_s7 + $0x190] sm:$0xff] %v7550_v53  ;;  %v7551_v56 = vmul.f32 %v7471_v32, %v17361_v16  ;;  %v7314_v20 = vadd.f32 %v15175_v52, %v7227_v35  ;;  %v7228_v50 = vmul.f32 %v15161_v40, %v7141_v36  ;;  %v8852_v48 = vpop.f32.mrb[188].mxu1  ;;  %v6593_v34 = vpop.f32.mrb[178].mxu0  ;;  %v17413_v35 = vld [vmem:[#allocation101_spill] sm:$0xff] }
 0x6c0   :  { %7633 = vst [vmem:[%s15480_s7 + $0x1a8] sm:$0xff] %v7553_v23  ;;  %v7396_v11 = vadd.f32 %v9079_v31, %v7316_v14  ;;  %v7317_v43 = vadd.f32 %v15175_v52, %v7230_v57  ;;  %v6936_v33 = vadd.f32 %v8852_v48, %v6582_v38  ;;  %v6927_v19 = vpop.f32.mrb[189].mxu1  ;;  %v9081_v38 = vld [vmem:[%s15474_s0 + $0x1c8] sm:$0xff]  ;;  %v6595_v9 = vpop.f32.mrb[179].mxu0 }
 0x6c1   :  { %7631 = vst [vmem:[%s15480_s7 + $0x198] sm:$0xff] %v7551_v56  ;;  %v7394_v3 = vadd.f32 %v9080_v61, %v7314_v20  ;;  %v7315_v59 = vadd.f32 %v15175_v52, %v7228_v50  ;;  %v6928_v58 = vadd.f32 %v6927_v19, %v15135_v4  ;;  %v8853_v13 = vpop.f32.mrb[190].mxu1  ;;  %v17412_v4 = vld [vmem:[#allocation92_spill] sm:$0xff]  ;;  %v17414_v14 = vld [vmem:[#allocation123_spill] sm:$0xff] }
 0x6c2   :  { %v7476_v42 = vmax.f32 %v7396_v11, 0.0  ;;  %v7397_v62 = vadd.f32 %v9081_v38, %v7317_v43  ;;  %v7146_v0 = vadd.f32 %v17411_v49, %v6936_v33  ;;  %v6939_v8 = vadd.f32 %v8853_v13, %v6585_v24  ;;  %v6930_v2 = vpop.f32.mrb[191].mxu1  ;;  %v9083_v43 = vld [vmem:[%s15474_s0 + $0x1e0] sm:$0xff] }
 0x6c3   :  { %v7474_v25 = vmax.f32 %v7394_v3, 0.0  ;;  %v7395_v27 = vadd.f32 %v9082_v28, %v7315_v59  ;;  %v7144_v22 = vadd.f32 %v17412_v4, %v6928_v58  ;;  %v6931_v54 = vadd.f32 %v6930_v2, %v15150_v26  ;;  %v9084_v59 = vld [vmem:[%s15474_s0 + $0x1d0] sm:$0xff] }
 0x6c4   :  { %v7556_v29 = vmul.f32 %v7476_v42, %v17366_v45  ;;  %v7477_v53 = vmax.f32 %v7397_v62, 0.0  ;;  %v7233_v32 = vmul.f32 %v15161_v40, %v7146_v0  ;;  %v7147_v24 = vadd.f32 %v17413_v35, %v6939_v8  ;;  %v9085_v0 = vld [vmem:[%s15474_s0 + $0x1e8] sm:$0xff] }
 0x6c5   :  { %v7554_v47 = vmul.f32 %v7474_v25, %v17368_v12  ;;  %v7475_v36 = vmax.f32 %v7395_v27, 0.0  ;;  %v7231_v23 = vmul.f32 %v15161_v40, %v7144_v22  ;;  %v7145_v57 = vadd.f32 %v17414_v14, %v6931_v54  ;;  %v6598_v3 = vpop.f32.mrb[180].mxu0  ;;  %v9086_v27 = vld [vmem:[%s15474_s0 + $0x1d8] sm:$0xff]  ;;  %v17415_v22 = vld [vmem:[#allocation167_spill] sm:$0xff] }
 0x6c6   :  { %7636 = vst [vmem:[%s15480_s7 + $0x1c0] sm:$0xff] %v7556_v29  ;;  %v7557_v26 = vmul.f32 %v7477_v53, %v17370_v10  ;;  %v7320_v56 = vadd.f32 %v15175_v52, %v7233_v32  ;;  %v7234_v20 = vmul.f32 %v15161_v40, %v7147_v24  ;;  %v6600_v62 = vpop.f32.mrb[181].mxu0 }
 0x6c7   :  { %7634 = vst [vmem:[%s15480_s7 + $0x1b0] sm:$0xff] %v7554_v47  ;;  %v7555_v50 = vmul.f32 %v7475_v36, %v17371_v1  ;;  %v7318_v48 = vadd.f32 %v15175_v52, %v7231_v23  ;;  %v7232_v31 = vmul.f32 %v15161_v40, %v7145_v57  ;;  %v8856_v11 = vpop.f32.mrb[192].mxu1  ;;  %v6601_v25 = vpop.f32.mrb[182].mxu0 }
 0x6c8   :  { %7637 = vst [vmem:[%s15480_s7 + $0x1c8] sm:$0xff] %v7557_v26  ;;  %v7400_v33 = vadd.f32 %v9083_v43, %v7320_v56  ;;  %v7321_v19 = vadd.f32 %v15175_v52, %v7234_v20  ;;  %v6943_v61 = vpop.f32.mrb[193].mxu1  ;;  %v6952_v42 = vadd.f32 %v8856_v11, %v6598_v3  ;;  %v6603_v29 = vpop.f32.mrb[183].mxu0  ;;  %v17417_v26 = vld [vmem:[#allocation31_spill] sm:$0xff]  ;;  %v17418_v20 = vld [vmem:[#allocation130_spill] sm:$0xff] }
 0x6c9   :  { %7635 = vst [vmem:[%s15480_s7 + $0x1b8] sm:$0xff] %v7555_v50  ;;  %v7398_v58 = vadd.f32 %v9084_v59, %v7318_v48  ;;  %v7319_v13 = vadd.f32 %v15175_v52, %v7232_v31  ;;  %v6944_v18 = vadd.f32 %v6943_v61, %v6590_v15  ;;  %v8857_v38 = vpop.f32.mrb[194].mxu1  ;;  %v17416_v15 = vld [vmem:[#allocation107_spill] sm:$0xff] }
 0x6ca   :  { %v7480_v49 = vmax.f32 %v7400_v33, 0.0  ;;  %v7401_v8 = vadd.f32 %v9085_v0, %v7321_v19  ;;  %v6946_v2 = vpop.f32.mrb[195].mxu1  ;;  %v7150_v9 = vadd.f32 %v17416_v15, %v6952_v42  ;;  %v6955_v24 = vadd.f32 %v8857_v38, %v6601_v25  ;;  %v9088_v19 = vld [vmem:[%s15474_s0 + $0x200] sm:$0xff]  ;;  %v17420_v29 = vld [vmem:[#allocation23_spill] sm:$0xff] }
 0x6cb   :  { %v7478_v28 = vmax.f32 %v7398_v58, 0.0  ;;  %v7399_v4 = vadd.f32 %v9086_v27, %v7319_v13  ;;  %v7148_v54 = vadd.f32 %v17415_v22, %v6944_v18  ;;  %v6947_v35 = vadd.f32 %v6946_v2, %v6593_v34  ;;  %v17419_v0 = vld [vmem:[#allocation50_spill] sm:$0xff] }
 0x6cc   :  { %v7560_v53 = vmul.f32 %v7480_v49, %v17331_v17  ;;  %v7481_v32 = vmax.f32 %v7401_v8, 0.0  ;;  %v7237_v14 = vmul.f32 %v15161_v40, %v7150_v9  ;;  %v7151_v17 = vadd.f32 %v17418_v20, %v6955_v24 }
 0x6cd   :  { %v7558_v47 = vmul.f32 %v7478_v28, %v17333_v7  ;;  %v7479_v36 = vmax.f32 %v7399_v4, 0.0  ;;  %v7235_v23 = vmul.f32 %v15161_v40, %v7148_v54  ;;  %v7149_v56 = vadd.f32 %v17417_v26, %v6947_v35  ;;  %v6606_v43 = vpop.f32.mrb[184].mxu0  ;;  %v9089_v28 = vld [vmem:[%s15474_s0 + $0x1f8] sm:$0xff]  ;;  %v9090_v4 = vld [vmem:[%s15474_s0 + $0x208] sm:$0xff] }
 0x6ce   :  { %7640 = vst [vmem:[%s15480_s7 + $0x1e0] sm:$0xff] %v7560_v53  ;;  %v7561_v57 = vmul.f32 %v7481_v32, %v17335_v63  ;;  %v7324_v50 = vadd.f32 %v15175_v52, %v7237_v14  ;;  %v7238_v31 = vmul.f32 %v15161_v40, %v7151_v17  ;;  %v6608_v58 = vpop.f32.mrb[185].mxu0 }
 0x6cf   :  { %7638 = vst [vmem:[%s15480_s7 + $0x1d0] sm:$0xff] %v7558_v47  ;;  %v7559_v7 = vmul.f32 %v7479_v36, %v17336_v37  ;;  %v7322_v34 = vadd.f32 %v15175_v52, %v7235_v23  ;;  %v8860_v48 = vpop.f32.mrb[196].mxu1  ;;  %v7236_v63 = vmul.f32 %v15161_v40, %v7149_v56  ;;  %v9087_v37 = vld [vmem:[%s15474_s0 + $0x1f0] sm:$0xff]  ;;  %v6609_v38 = vpop.f32.mrb[186].mxu0 }
 0x6d0   :  { %7641 = vst [vmem:[%s15480_s7 + $0x1e8] sm:$0xff] %v7561_v57  ;;  %v6959_v11 = vpop.f32.mrb[197].mxu1  ;;  %v7404_v61 = vadd.f32 %v9088_v19, %v7324_v50  ;;  %v7325_v18 = vadd.f32 %v15175_v52, %v7238_v31  ;;  %v6611_v25 = vpop.f32.mrb[187].mxu0  ;;  %v9091_v57 = vld [vmem:[%s15474_s0 + $0x210] sm:$0xff]  ;;  %v9092_v50 = vld [vmem:[%s15474_s0 + $0x218] sm:$0xff]  ;;  %v17421_v31 = vld [vmem:[#allocation171_spill] sm:$0xff] }
 0x6d1   :  { %7639 = vst [vmem:[%s15480_s7 + $0x1d8] sm:$0xff] %v7559_v7  ;;  %v7402_v33 = vadd.f32 %v9087_v37, %v7322_v34  ;;  %v6960_v3 = vadd.f32 %v6959_v11, %v6606_v43  ;;  %v8861_v59 = vpop.f32.mrb[198].mxu1  ;;  %v7323_v13 = vadd.f32 %v15175_v52, %v7236_v63 }
 0x6d2   :  { %v6962_v42 = vpop.f32.mrb[199].mxu1  ;;  %v7484_v49 = vmax.f32 %v7404_v61, 0.0  ;;  %v7405_v22 = vadd.f32 %v9090_v4, %v7325_v18  ;;  %v17422_v61 = vld [vmem:[#allocation56_spill] sm:$0xff] }
 0x6d3   :  { %v7482_v62 = vmax.f32 %v7402_v33, 0.0  ;;  %v7152_v8 = vadd.f32 %v17419_v0, %v6960_v3  ;;  %v6963_v2 = vadd.f32 %v6962_v42, %v6609_v38  ;;  %v7403_v27 = vadd.f32 %v9089_v28, %v7323_v13 }
 0x6d4   :  { %v7564_v15 = vmul.f32 %v7484_v49, %v17339_v39  ;;  %v7485_v35 = vmax.f32 %v7405_v22, 0.0  ;;  %v17423_v22 = vld [vmem:[#allocation136_spill] sm:$0xff] }
 0x6d5   :  { %v7562_v54 = vmul.f32 %v7482_v62, %v17341_v5  ;;  %v7239_v9 = vmul.f32 %v15161_v40, %v7152_v8  ;;  %v7153_v53 = vadd.f32 %v17420_v29, %v6963_v2  ;;  %v7483_v32 = vmax.f32 %v7403_v27, 0.0  ;;  %v6614_v14 = vpop.f32.mrb[188].mxu0  ;;  %v9094_v27 = vld [vmem:[%s15474_s0 + $0x228] sm:$0xff] }
 0x6d6   :  { %7644 = vst [vmem:[%s15480_s7 + $0x200] sm:$0xff] %v7564_v15  ;;  %v7565_v36 = vmul.f32 %v7485_v35, %v17343_v46  ;;  %v6968_v20 = vadd.f32 %v8860_v48, %v6614_v14  ;;  %v6616_v7 = vpop.f32.mrb[189].mxu0  ;;  %v17424_v35 = vld [vmem:[#allocation99_spill] sm:$0xff] }
 0x6d7   :  { %7642 = vst [vmem:[%s15480_s7 + $0x1f0] sm:$0xff] %v7562_v54  ;;  %v7326_v24 = vadd.f32 %v15175_v52, %v7239_v9  ;;  %v7240_v5 = vmul.f32 %v15161_v40, %v7153_v53  ;;  %v8864_v47 = vpop.f32.mrb[200].mxu1  ;;  %v7563_v39 = vmul.f32 %v7483_v32, %v17344_v21  ;;  %v6617_v21 = vpop.f32.mrb[190].mxu0  ;;  %v9096_v7 = vld [vmem:[%s15474_s0 + $0x238] sm:$0xff] }
 0x6d8   :  { %v6975_v23 = vpop.f32.mrb[201].mxu1  ;;  %7645 = vst [vmem:[%s15480_s7 + $0x208] sm:$0xff] %v7565_v36  ;;  %v7154_v48 = vadd.f32 %v17421_v31, %v6968_v20  ;;  %v6971_v11 = vadd.f32 %v8861_v59, %v6617_v21  ;;  %v6619_v43 = vpop.f32.mrb[191].mxu0  ;;  %v17425_v21 = vld [vmem:[#allocation117_spill] sm:$0xff] }
 0x6d9   :  { %v7406_v26 = vadd.f32 %v9091_v57, %v7326_v24  ;;  %v7327_v56 = vadd.f32 %v15175_v52, %v7240_v5  ;;  %v8865_v17 = vpop.f32.mrb[202].mxu1  ;;  %7643 = vst [vmem:[%s15480_s7 + $0x1f8] sm:$0xff] %v7563_v39  ;;  %v17426_v43 = vld [vmem:[#allocation21_spill] sm:$0xff] }
 0x6da   :  { %v6978_v46 = vpop.f32.mrb[203].mxu1  ;;  %v7241_v19 = vmul.f32 %v15161_v40, %v7154_v48  ;;  %v7155_v3 = vadd.f32 %v17422_v61, %v6971_v11 }
 0x6db   :  { %v7486_v34 = vmax.f32 %v7406_v26, 0.0  ;;  %v7407_v63 = vadd.f32 %v9092_v50, %v7327_v56 }
 0x6dc   :  { %v7328_v13 = vadd.f32 %v15175_v52, %v7241_v19  ;;  %v7242_v18 = vmul.f32 %v15161_v40, %v7155_v3 }
 0x6dd   :  { %v7566_v37 = vmul.f32 %v7486_v34, %v17350_v44  ;;  %v7487_v33 = vmax.f32 %v7407_v63, 0.0  ;;  %v6622_v38 = vpop.f32.mrb[192].mxu0  ;;  %v9093_v44 = vld [vmem:[%s15474_s0 + $0x220] sm:$0xff] }
 0x6de   :  { %v7408_v62 = vadd.f32 %v9093_v44, %v7328_v13  ;;  %v7329_v49 = vadd.f32 %v15175_v52, %v7242_v18  ;;  %v6624_v8 = vpop.f32.mrb[193].mxu0 }
 0x6df   :  { %7646 = vst [vmem:[%s15480_s7 + $0x210] sm:$0xff] %v7566_v37  ;;  %v7567_v58 = vmul.f32 %v7487_v33, %v17353_v51  ;;  %v15369_v42 = vpop.f32.mrb[204].mxu1  ;;  %v6976_v51 = vadd.f32 %v6975_v23, %v6622_v38  ;;  %v6625_v25 = vpop.f32.mrb[194].mxu0  ;;  %v9098_v38 = vld [vmem:[%s15474_s0 + $0x248] sm:$0xff] }
 0x6e0   :  { %v6991_v59 = vpop.f32.mrb[205].mxu1  ;;  %v7488_v28 = vmax.f32 %v7408_v62, 0.0  ;;  %v7409_v4 = vadd.f32 %v9094_v27, %v7329_v49  ;;  %v6979_v15 = vadd.f32 %v6978_v46, %v6625_v25  ;;  %v6627_v9 = vpop.f32.mrb[195].mxu0  ;;  %v17427_v62 = vld [vmem:[#allocation45_spill] sm:$0xff] }
 0x6e1   :  { %7647 = vst [vmem:[%s15480_s7 + $0x218] sm:$0xff] %v7567_v58  ;;  %v15378_v0 = vpop.f32.mrb[206].mxu1  ;;  %v7156_v54 = vadd.f32 %v17423_v22, %v6976_v51 }
 0x6e2   :  { %v6994_v2 = vpop.f32.mrb[207].mxu1  ;;  %v7568_v29 = vmul.f32 %v7488_v28, %v17348_v41  ;;  %v7489_v53 = vmax.f32 %v7409_v4, 0.0  ;;  %v7157_v24 = vadd.f32 %v17424_v35, %v6979_v15  ;;  %v9095_v41 = vld [vmem:[%s15474_s0 + $0x230] sm:$0xff]  ;;  %v17428_v4 = vld [vmem:[#allocation118_spill] sm:$0xff] }
 0x6e3   :  { %v7243_v32 = vmul.f32 %v15161_v40, %v7156_v54 }
 0x6e4   :  { %7648 = vst [vmem:[%s15480_s7 + $0x220] sm:$0xff] %v7568_v29  ;;  %v7569_v5 = vmul.f32 %v7489_v53, %v17352_v55  ;;  %v7244_v36 = vmul.f32 %v15161_v40, %v7157_v24  ;;  %v9100_v24 = vld [vmem:[%s15474_s0 + $0x258] sm:$0xff] }
 0x6e5   :  { %v7330_v39 = vadd.f32 %v15175_v52, %v7243_v32  ;;  %v6630_v23 = vpop.f32.mrb[196].mxu0 }
 0x6e6   :  { %7649 = vst [vmem:[%s15480_s7 + $0x228] sm:$0xff] %v7569_v5  ;;  %v7331_v57 = vadd.f32 %v15175_v52, %v7244_v36  ;;  %v6984_v26 = vadd.f32 %v8864_v47, %v6630_v23  ;;  %v6632_v56 = vpop.f32.mrb[197].mxu0 }
 0x6e7   :  { %v7410_v14 = vadd.f32 %v9095_v41, %v7330_v39  ;;  %v6633_v20 = vpop.f32.mrb[198].mxu0  ;;  %v17429_v39 = vld [vmem:[#allocation27_spill] sm:$0xff]  ;;  %v17430_v56 = vld [vmem:[#allocation25_spill] sm:$0xff] }
 0x6e8   :  { %v7411_v46 = vadd.f32 %v9096_v7, %v7331_v57  ;;  %v7158_v34 = vadd.f32 %v17425_v21, %v6984_v26  ;;  %v6987_v50 = vadd.f32 %v8865_v17, %v6633_v20  ;;  %v6635_v63 = vpop.f32.mrb[199].mxu0 }
 0x6e9   :  { %v7490_v55 = vmax.f32 %v7410_v14, 0.0 }
 0x6ea   :  { %v7491_v48 = vmax.f32 %v7411_v46, 0.0  ;;  %v7245_v11 = vmul.f32 %v15161_v40, %v7158_v34  ;;  %v7159_v37 = vadd.f32 %v17426_v43, %v6987_v50 }
 0x6eb   :  { %v7570_v31 = vmul.f32 %v7490_v55, %v17358_v6  ;;  %v9097_v6 = vld [vmem:[%s15474_s0 + $0x240] sm:$0xff] }
 0x6ec   :  { %v7571_v47 = vmul.f32 %v7491_v48, %v17361_v16  ;;  %v7332_v33 = vadd.f32 %v15175_v52, %v7245_v11  ;;  %v7246_v19 = vmul.f32 %v15161_v40, %v7159_v37 }
 0x6ed   :  { %7650 = vst [vmem:[%s15480_s7 + $0x230] sm:$0xff] %v7570_v31  ;;  %v6638_v61 = vpop.f32.mrb[200].mxu0 }
 0x6ee   :  { %7651 = vst [vmem:[%s15480_s7 + $0x238] sm:$0xff] %v7571_v47  ;;  %v7412_v17 = vadd.f32 %v9097_v6, %v7332_v33  ;;  %v7333_v3 = vadd.f32 %v15175_v52, %v7246_v19  ;;  %v6992_v58 = vadd.f32 %v6991_v59, %v6638_v61  ;;  %v6640_v13 = vpop.f32.mrb[201].mxu0 }
 0x6ef   :  { %v6641_v18 = vpop.f32.mrb[202].mxu0 }
 0x6f0   :  { %v7492_v16 = vmax.f32 %v7412_v17, 0.0  ;;  %v7413_v44 = vadd.f32 %v9098_v38, %v7333_v3  ;;  %v7160_v49 = vadd.f32 %v17427_v62, %v6992_v58  ;;  %v6995_v51 = vadd.f32 %v6994_v2, %v6641_v18  ;;  %v6643_v8 = vpop.f32.mrb[203].mxu0 }
 0x6f2   :  { %v7572_v25 = vmul.f32 %v7492_v16, %v17356_v30  ;;  %v7493_v28 = vmax.f32 %v7413_v44, 0.0  ;;  %v7247_v27 = vmul.f32 %v15161_v40, %v7160_v49  ;;  %v7161_v22 = vadd.f32 %v17428_v4, %v6995_v51  ;;  %v9099_v30 = vld [vmem:[%s15474_s0 + $0x250] sm:$0xff] }
 0x6f4   :  { %7652 = vst [vmem:[%s15480_s7 + $0x240] sm:$0xff] %v7572_v25  ;;  %v7573_v59 = vmul.f32 %v7493_v28, %v17360_v60  ;;  %v7334_v54 = vadd.f32 %v15175_v52, %v7247_v27  ;;  %v7248_v15 = vmul.f32 %v15161_v40, %v7161_v22 }
 0x6f5   :  { %v6646_v9 = vpop.f32.mrb[204].mxu0 }
 0x6f6   :  { %7653 = vst [vmem:[%s15480_s7 + $0x248] sm:$0xff] %v7573_v59  ;;  %v7414_v2 = vadd.f32 %v9099_v30, %v7334_v54  ;;  %v7335_v29 = vadd.f32 %v15175_v52, %v7248_v15  ;;  %v7000_v53 = vadd.f32 %v15369_v42, %v6646_v9  ;;  %v6648_v32 = vpop.f32.mrb[205].mxu0 }
 0x6f7   :  { %v6649_v60 = vpop.f32.mrb[206].mxu0 }
 0x6f8   :  { %v7494_v35 = vmax.f32 %v7414_v2, 0.0  ;;  %v7415_v5 = vadd.f32 %v9100_v24, %v7335_v29  ;;  %v7162_v36 = vadd.f32 %v17429_v39, %v7000_v53  ;;  %v7003_v23 = vadd.f32 %v15378_v0, %v6649_v60  ;;  %v6651_v41 = vpop.f32.mrb[207].mxu0 }
 0x6fa   :  { %v7574_v14 = vmul.f32 %v7494_v35, %v17368_v12  ;;  %v7495_v57 = vmax.f32 %v7415_v5, 0.0  ;;  %v7249_v26 = vmul.f32 %v15161_v40, %v7162_v36  ;;  %v7163_v42 = vadd.f32 %v17430_v56, %v7003_v23  ;;  %v9101_v12 = vld [vmem:[%s15474_s0 + $0x260] sm:$0xff] }
 0x6fc   :  { %7654 = vst [vmem:[%s15480_s7 + $0x250] sm:$0xff] %v7574_v14  ;;  %v7575_v20 = vmul.f32 %v7495_v57, %v17371_v1  ;;  %v7336_v55 = vadd.f32 %v15175_v52, %v7249_v26  ;;  %v7250_v7 = vmul.f32 %v15161_v40, %v7163_v42  ;;  %v9102_v1 = vld [vmem:[%s15474_s0 + $0x268] sm:$0xff] }
 0x6fe   :  { %7655 = vst [vmem:[%s15480_s7 + $0x258] sm:$0xff] %v7575_v20  ;;  %v7416_v0 = vadd.f32 %v9101_v12, %v7336_v55  ;;  %v7337_v46 = vadd.f32 %v15175_v52, %v7250_v7 }
 0x700   :  { %v7496_v21 = vmax.f32 %v7416_v0, 0.0  ;;  %v7417_v34 = vadd.f32 %v9102_v1, %v7337_v46 }
 0x702   :  { %v7576_v50 = vmul.f32 %v7496_v21, %v17366_v45  ;;  %v7497_v40 = vmax.f32 %v7417_v34, 0.0 }
 0x704   :  { %7656 = vst [vmem:[%s15480_s7 + $0x260] sm:$0xff] %v7576_v50  ;;  %v7577_v63 = vmul.f32 %v7497_v40, %v17370_v10 }
 0x706   :  { %7657 = vst [vmem:[%s15480_s7 + $0x268] sm:$0xff] %v7577_v63 }

</bundles_post_ra>
